<compile_context>
chip_gen: v5e
topology: v5e:2x2
jax: 0.10.0
libtpu: 0.0.40
codegen_flags: <defaults>
</compile_context>

<pallas_src>
import jax
import jax.numpy as jnp
from jax.experimental import pallas as pl
from jax.experimental.pallas import tpu as pltpu

_LANE = 128


def _round_up(x, m):
    return (x + m - 1) // m * m


def _vmem_budget_bytes():
    """Physical VMEM per core and a usable budget (headroom for compiler internals)."""
    phys = 64 * 1024 * 1024            # conservative fallback (v7x-sized)
    try:
        phys = int(pltpu.get_tpu_info().vmem_capacity_bytes)
    except Exception:
        pass
    return phys, int(phys * 0.80)      # ~102 MiB on 128-MiB chips, ~51 MiB on v7x


def _estimate_vmem_bytes(H, W, C, d, TH, RB, Kp):
    """Rough (slightly conservative) VMEM footprint for a given (TH, RB)."""
    Cl = _round_up(C, _LANE)
    Wp, XS, YS = W + 2 * d, TH + 4 * d, TH + 2 * d

    def buf(major, sub, lane, itemsize):
        # lane dim pads to 128, sublane dim pads to the native tile (32 // itemsize).
        return major * _round_up(sub, 32 // itemsize) * _round_up(lane, _LANE) * itemsize

    total = 0
    total += 2 * buf(H, W, C, 2)          # resident bf16 input block (double-buffered)
    total += 2 * buf(TH, W, C, 4)         # f32 output block (double-buffered)
    total += 2 * 2 * buf(1, Kp, Cl, 2)    # two fused bf16 weights (double-buffered)
    total += buf(XS, Wp, Cl, 2)           # xs halo scratch
    total += buf(YS, Wp, Cl, 2)           # ys halo scratch
    total += buf(RB, W, Kp, 2)            # im2col chunk scratch
    return int(total * 1.1) + (2 << 20)   # fudge + slack


def _choose_tiles(H, W, C, d, Kp, budget):
    """Largest row tile TH (dividing H, TH >= 2d when tiled) that fits the VMEM budget,
    plus the im2col row-chunk RB (aiming for M_chunk = RB*W >= ~512 MXU rows)."""
    rb_target = _round_up(max(8, -(-512 // W)), 8)
    cands = [t for t in range(H, 0, -1) if H % t == 0 and (t == H or t >= 2 * d)]
    for TH in cands:
        RB = min(TH + 2 * d, rb_target)
        est = _estimate_vmem_bytes(H, W, C, d, TH, RB, Kp)
        if est <= budget:
            return TH, RB, est
    # Nothing fits (huge image): fall back to the smallest legal tile; the resident
    # input block is what dominates in this regime (see TODO at top of file).
    TH = cands[-1]
    RB = min(TH + 2 * d, rb_target)
    return TH, RB, _estimate_vmem_bytes(H, W, C, d, TH, RB, Kp)


def _make_kernel(H, W, C, Cp, Kp, d, TH, NH, RB):
    Wp = W + 2 * d          # padded width
    XS = TH + 4 * d         # padded-input rows needed per tile (conv1 halo)
    YS = TH + 2 * d         # conv1 output rows needed per tile (conv2 halo)

    def kernel(x_ref, w1_ref, b1_ref, w2_ref, b2_ref, o_ref, xs_ref, ys_ref, col_ref):
        # x_ref  : (H, W, C)    bf16  full true-C image for this batch element (resident)
        # w*     : (Kp, Cp)     bf16  fused HWIO weights, taps channel-interleaved
        # b*     : (1, Cp)      f32
        # o_ref  : (TH, W, C)   f32   output row tile (true C)
        # xs_ref : (XS, Wp, Cp) bf16  zero-padded input rows for this tile
        # ys_ref : (YS, Wp, Cp) bf16  zero-padded (ReLU'd) conv1 rows for this tile
        # col_ref: (RB, W, Kp)  bf16  im2col chunk buffer (shared by both convs)
        h = pl.program_id(1)
        r0 = h * TH                                   # first output row of this tile

        def zbf(shape):
            return jnp.zeros(shape, jnp.bfloat16)

        # ---- one-time scratch init (h is "arbitrary", so every core starts at h==0) --
        # W borders of xs/ys stay zero forever (never overwritten); col pad lanes
        # [9C:Kp) must be zero so the zero-padded weight K-rows contribute exactly 0.
        @pl.when(h == 0)
        def _():
            xs_ref[:, 0:d, :] = zbf((XS, d, Cp))
            xs_ref[:, W + d:Wp, :] = zbf((XS, d, Cp))
            ys_ref[:, 0:d, :] = zbf((YS, d, Cp))
            ys_ref[:, W + d:Wp, :] = zbf((YS, d, Cp))
            col_ref[...] = zbf((RB, W, Kp))

        # ---- stage the zero-padded (true-C, bf16) input rows for this tile ----------
        if NH == 1:
            xs_ref[0:2 * d, d:W + d, 0:C] = zbf((2 * d, W, C))
            xs_ref[XS - 2 * d:XS, d:W + d, 0:C] = zbf((2 * d, W, C))
            xs_ref[2 * d:2 * d + H, d:W + d, 0:C] = x_ref[...]
        else:
            @pl.when(h == 0)
            def _():
                xs_ref[0:2 * d, d:W + d, 0:C] = zbf((2 * d, W, C))
                xs_ref[2 * d:XS, d:W + d, 0:C] = x_ref[0:TH + 2 * d, :, :]

            @pl.when(h == NH - 1)
            def _():
                xs_ref[XS - 2 * d:XS, d:W + d, 0:C] = zbf((2 * d, W, C))
                xs_ref[0:TH + 2 * d, d:W + d, 0:C] = x_ref[H - (TH + 2 * d):H, :, :]

            @pl.when(jnp.logical_and(h > 0, h < NH - 1))
            def _():
                xs_ref[:, d:W + d, 0:C] = x_ref[pl.ds(r0 - 2 * d, XS), :, :]

        # ---- one dilated 3x3 conv == chunked fused im2col matmuls -------------------
        # K layout: k = (ky*3 + kx)*C + c_in  (matches the wrapper's weight packing).
        def conv(src_ref, n_out, w_ref, b_ref, consume):
            for start in range(0, n_out, RB):
                rows = min(RB, n_out - start)
                for ky in range(3):
                    for kx in range(3):
                        t = ky * 3 + kx
                        col_ref[0:rows, :, t * C:(t + 1) * C] = (
                            src_ref[start + ky * d:start + ky * d + rows,
                                    kx * d:kx * d + W, 0:C])
                # W % 8 == 0 keeps this reshape a pure view (no VMEM copy).
                cols = col_ref[0:rows, :, :].reshape(rows * W, Kp)
                acc = jnp.dot(cols, w_ref[...],
                              preferred_element_type=jnp.float32) + b_ref[...]
                consume(start, rows, acc)                       # (rows*W, Cp) f32

        # conv1 + ReLU over the extended (halo) row range -> ys (true-C lanes, bf16)
        def consume1(start, rows, acc):
            y = jnp.maximum(acc, 0.0).reshape(rows, W, Cp)[..., 0:C]
            ys_ref[start:start + rows, d:W + d, 0:C] = y.astype(jnp.bfloat16)

        conv(xs_ref, YS, w1_ref, b1_ref, consume1)

        # conv1 rows that fall outside the image must be ZERO for conv2's padding
        # (not conv1 applied to zero-padded input).
        if NH == 1:
            ys_ref[0:d, d:W + d, 0:C] = zbf((d, W, C))
            ys_ref[YS - d:YS, d:W + d, 0:C] = zbf((d, W, C))
        else:
            @pl.when(h == 0)
            def _():
                ys_ref[0:d, d:W + d, 0:C] = zbf((d, W, C))

            @pl.when(h == NH - 1)
            def _():
                ys_ref[YS - d:YS, d:W + d, 0:C] = zbf((d, W, C))

        # conv2 over the TH output rows of this tile + residual + ReLU, per chunk
        def consume2(start, rows, acc):
            res = x_ref[pl.ds(r0 + start, rows), :, :].astype(jnp.float32)  # (rows,W,C)
            y = acc.reshape(rows, W, Cp)[..., 0:C] + res
            o_ref[start:start + rows, :, :] = jnp.maximum(y, 0.0)

        conv(ys_ref, TH, w2_ref, b2_ref, consume2)

    return kernel


def residual_unit(x_nchw, w1, b1, w2, b2, dilation):
    """Pallas implementation of ResidualUnit.forward (requires in_ch == out_ch)."""
    N, C, H, W = x_nchw.shape
    d = int(dilation)
    assert d >= 1
    assert w1.shape == (C, C, 3, 3) and w2.shape == (C, C, 3, 3), "in_ch must equal out_ch"

    Cp = _round_up(C, _LANE)          # lane-dense output-channel dim of the matmuls
    Kp = _round_up(9 * C, _LANE)      # fused, channel-interleaved contraction dim

    phys, budget = _vmem_budget_bytes()
    TH, RB, est = _choose_tiles(H, W, C, d, Kp, budget)
    NH = H // TH
    # Halo-slice safety: the h==0 / h==NH-1 staging slices rely on these.
    assert H % TH == 0
    assert NH == 1 or (TH >= 2 * d and TH + 2 * d <= H)

    Wp, XS, YS = W + 2 * d, TH + 4 * d, TH + 2 * d

    # NCHW -> NHWC bf16, true C at the HBM boundary (no channel-pad pass, no f32 image).
    # TODO(synk): keep the surrounding model NHWC end-to-end to drop this transpose too.
    x_nhwc = jnp.transpose(x_nchw, (0, 2, 3, 1)).astype(jnp.bfloat16)

    def fuse_weight(w):
        # torch OIHW -> HWIO, flatten taps channel-interleaved: k = (ky*3+kx)*C + c_in.
        # Padded K rows / output columns are zero (the kernel zeroes the matching col
        # lanes, so garbage never reaches the accumulation).
        w_hwio = jnp.transpose(w, (2, 3, 1, 0)).astype(jnp.float32)   # (3,3,Cin,Cout)
        w_flat = w_hwio.reshape(9 * C, C)
        w_flat = jnp.pad(w_flat, ((0, Kp - 9 * C), (0, Cp - C)))
        return w_flat.astype(jnp.bfloat16)

    def pad_bias(b):
        return jnp.pad(b.astype(jnp.float32), (0, Cp - C)).reshape(1, Cp)

    kernel = _make_kernel(H, W, C, Cp, Kp, d, TH, NH, RB)

    wspec = pl.BlockSpec((Kp, Cp), lambda n, h: (0, 0))
    bspec = pl.BlockSpec((1, Cp), lambda n, h: (0, 0))

    # Need-based VMEM limit: at least the proven-safe 48 MiB, at most the per-chip budget.
    vmem_limit = int(min(budget, max(est + (16 << 20), 48 << 20)))

    out_nhwc = pl.pallas_call(
        kernel,
        out_shape=jax.ShapeDtypeStruct((N, H, W, C), jnp.float32),
        grid_spec=pltpu.PrefetchScalarGridSpec(
            num_scalar_prefetch=0,
            grid=(N, NH),
            in_specs=[
                # Whole true-C bf16 image for batch n: same block index across the
                # row-tile axis -> stays resident, no re-DMA per h step.
                pl.BlockSpec((None, H, W, C), lambda n, h: (n, 0, 0, 0)),
                wspec, bspec, wspec, bspec,
            ],
            out_specs=pl.BlockSpec((None, TH, W, C), lambda n, h: (n, h, 0, 0)),
            scratch_shapes=[
                pltpu.VMEM((XS, Wp, Cp), jnp.bfloat16),   # padded input rows (tile)
                pltpu.VMEM((YS, Wp, Cp), jnp.bfloat16),   # padded conv1 rows (tile)
                pltpu.VMEM((RB, W, Kp), jnp.bfloat16),    # im2col chunk buffer
            ],
        ),
        compiler_params=pltpu.CompilerParams(
            # h must be "arbitrary": the h==0-gated scratch init relies on every core
            # starting each image at h == 0 (megacore only splits the parallel N axis).
            dimension_semantics=("parallel", "arbitrary"),
            vmem_limit_bytes=vmem_limit,
        ),
    )(x_nhwc, fuse_weight(w1), pad_bias(b1), fuse_weight(w2), pad_bias(b2))

    # Back to NCHW (PyTorch convention); no channel de-pad needed (true-C output).
    return jnp.transpose(out_nhwc, (0, 3, 1, 2))


def residual_unit_ref(x_nchw, w1, b1, w2, b2, dilation):
    """Pure-JAX reference mirroring the PyTorch forward."""
    d = int(dilation)
    dn = ("NCHW", "OIHW", "NCHW")

    def conv(x, w, b):
        y = jax.lax.conv_general_dilated(
            x, w, window_strides=(1, 1), padding=((d, d), (d, d)),
            rhs_dilation=(d, d), dimension_numbers=dn)
        return y + b.reshape(1, -1, 1, 1)

    return jax.nn.relu(x_nchw + conv(jax.nn.relu(conv(x_nchw, w1, b1)), w2, b2))


if __name__ == "__main__":
    key = jax.random.PRNGKey(0)
    k1, k2, k3, k4, k5 = jax.random.split(key, 5)

    # Residual add requires in_ch == out_ch.
    N, C, H, W = 2, 4, 16, 16
    dilation = 2

    x = jax.random.normal(k1, (N, C, H, W), jnp.float32)
    w1 = jax.random.normal(k2, (C, C, 3, 3), jnp.float32) * 0.2   # (out, in, kh, kw)
    b1 = jax.random.normal(k3, (C,), jnp.float32) * 0.1
    w2 = jax.random.normal(k4, (C, C, 3, 3), jnp.float32) * 0.2
    b2 = jax.random.normal(k5, (C,), jnp.float32) * 0.1

    out = jax.block_until_ready(residual_unit(x, w1, b1, w2, b2, dilation))
    ref = residual_unit_ref(x, w1, b1, w2, b2, dilation)
    assert out.shape == ref.shape == (N, C, H, W)

    # bf16 matmul operands + bf16 staged input/residual with f32 accumulation
    # -> looser tolerance than pure f32.
    if not bool(jnp.allclose(out, ref, atol=3e-2, rtol=3e-2)):
        max_err = float(jnp.max(jnp.abs(out - ref)))
        raise AssertionError(f"Pallas kernel output mismatch, max abs err = {max_err}")

    print("KERNEL_OK")
</pallas_src>

<mosaic_0001>
module attributes {stable_mosaic.version = 11 : i64} {
  func.func @kernel(%arg0: i32, %arg1: i32, %arg2: memref<1x16x16x4xbf16, #tpu.memory_space<vmem>>, %arg3: memref<128x128xbf16, #tpu.memory_space<vmem>>, %arg4: memref<1x128xf32, #tpu.memory_space<vmem>>, %arg5: memref<128x128xbf16, #tpu.memory_space<vmem>>, %arg6: memref<1x128xf32, #tpu.memory_space<vmem>>, %arg7: memref<1x16x16x4xf32, #tpu.memory_space<vmem>>, %arg8: memref<24x20x128xbf16, #tpu.memory_space<vmem>>, %arg9: memref<20x20x128xbf16, #tpu.memory_space<vmem>>, %arg10: memref<20x16x128xbf16, #tpu.memory_space<vmem>>) attributes {dimension_semantics = [#tpu.dimension_semantics<parallel>, #tpu.dimension_semantics<arbitrary>], iteration_bounds = array<i64: 2, 1>, scalar_prefetch = 0 : i64, scratch_operands = 3 : i64, tpu.core_type = #tpu.core_type<tc>, window_params = [{transform_indices = @transform_0, window_bounds = array<i64: 1, 16, 16, 4>}, {pipeline_mode = #tpu.pipeline_mode<synchronous>, transform_indices = @transform_1, window_bounds = array<i64: 128, 128>}, {pipeline_mode = #tpu.pipeline_mode<synchronous>, transform_indices = @transform_2, window_bounds = array<i64: 1, 128>}, {pipeline_mode = #tpu.pipeline_mode<synchronous>, transform_indices = @transform_3, window_bounds = array<i64: 128, 128>}, {pipeline_mode = #tpu.pipeline_mode<synchronous>, transform_indices = @transform_4, window_bounds = array<i64: 1, 128>}, {transform_indices = @transform_5, window_bounds = array<i64: 1, 16, 16, 4>}]} {
    %c16_i32 = arith.constant 16 : i32
    %0 = arith.muli %arg1, %c16_i32 : i32
    %c0_i32 = arith.constant 0 : i32
    %1 = arith.cmpi eq, %arg1, %c0_i32 : i32
    %2 = arith.extui %1 : i1 to i32
    %c0_i32_0 = arith.constant 0 : i32
    %3 = arith.cmpi ne, %2, %c0_i32_0 : i32
    scf.if %3 {
      %cst_149 = arith.constant 0.000000e+00 : bf16
      %84 = vector.broadcast %cst_149 : bf16 to vector<24x2x128xbf16>
      %c0_150 = arith.constant 0 : index
      %c0_151 = arith.constant 0 : index
      %c0_152 = arith.constant 0 : index
      %85 = vector.load %arg8[%c0_150, %c0_151, %c0_152] : memref<24x20x128xbf16, #tpu.memory_space<vmem>>, vector<24x2x128xbf16>
      tpu.vector_store %arg8[%c0_150, %c0_151, %c0_152], %84 {strides = array<i32>} : memref<24x20x128xbf16, #tpu.memory_space<vmem>>, vector<24x2x128xbf16>,
      %cst_153 = arith.constant 0.000000e+00 : bf16
      %86 = vector.broadcast %cst_153 : bf16 to vector<24x2x128xbf16>
      %c0_154 = arith.constant 0 : index
      %c18_155 = arith.constant 18 : index
      %c0_156 = arith.constant 0 : index
      %87 = vector.load %arg8[%c0_154, %c18_155, %c0_156] : memref<24x20x128xbf16, #tpu.memory_space<vmem>>, vector<24x2x128xbf16>
      tpu.vector_store %arg8[%c0_154, %c18_155, %c0_156], %86 {strides = array<i32>} : memref<24x20x128xbf16, #tpu.memory_space<vmem>>, vector<24x2x128xbf16>,
      %cst_157 = arith.constant 0.000000e+00 : bf16
      %88 = vector.broadcast %cst_157 : bf16 to vector<20x2x128xbf16>
      %c0_158 = arith.constant 0 : index
      %c0_159 = arith.constant 0 : index
      %c0_160 = arith.constant 0 : index
      %89 = vector.load %arg9[%c0_158, %c0_159, %c0_160] : memref<20x20x128xbf16, #tpu.memory_space<vmem>>, vector<20x2x128xbf16>
      tpu.vector_store %arg9[%c0_158, %c0_159, %c0_160], %88 {strides = array<i32>} : memref<20x20x128xbf16, #tpu.memory_space<vmem>>, vector<20x2x128xbf16>,
      %cst_161 = arith.constant 0.000000e+00 : bf16
      %90 = vector.broadcast %cst_161 : bf16 to vector<20x2x128xbf16>
      %c0_162 = arith.constant 0 : index
      %c18_163 = arith.constant 18 : index
      %c0_164 = arith.constant 0 : index
      %91 = vector.load %arg9[%c0_162, %c18_163, %c0_164] : memref<20x20x128xbf16, #tpu.memory_space<vmem>>, vector<20x2x128xbf16>
      tpu.vector_store %arg9[%c0_162, %c18_163, %c0_164], %90 {strides = array<i32>} : memref<20x20x128xbf16, #tpu.memory_space<vmem>>, vector<20x2x128xbf16>,
      %cst_165 = arith.constant 0.000000e+00 : bf16
      %92 = vector.broadcast %cst_165 : bf16 to vector<20x16x128xbf16>
      %c0_166 = arith.constant 0 : index
      %c0_167 = arith.constant 0 : index
      %c0_168 = arith.constant 0 : index
      %93 = vector.load %arg10[%c0_166, %c0_167, %c0_168] : memref<20x16x128xbf16, #tpu.memory_space<vmem>>, vector<20x16x128xbf16>
      tpu.vector_store %arg10[%c0_166, %c0_167, %c0_168], %92 {strides = array<i32>} : memref<20x16x128xbf16, #tpu.memory_space<vmem>>, vector<20x16x128xbf16>,
    } else {
    }
    %cst = arith.constant 0.000000e+00 : bf16
    %4 = vector.broadcast %cst : bf16 to vector<4x16x4xbf16>
    %c0 = arith.constant 0 : index
    %c2 = arith.constant 2 : index
    %c0_1 = arith.constant 0 : index
    %5 = vector.load %arg8[%c0, %c2, %c0_1] : memref<24x20x128xbf16, #tpu.memory_space<vmem>>, vector<4x16x4xbf16>
    tpu.vector_store %arg8[%c0, %c2, %c0_1], %4 {strides = array<i32>} : memref<24x20x128xbf16, #tpu.memory_space<vmem>>, vector<4x16x4xbf16>,
    %cst_2 = arith.constant 0.000000e+00 : bf16
    %6 = vector.broadcast %cst_2 : bf16 to vector<4x16x4xbf16>
    %c20 = arith.constant 20 : index
    %c2_3 = arith.constant 2 : index
    %c0_4 = arith.constant 0 : index
    %7 = vector.load %arg8[%c20, %c2_3, %c0_4] : memref<24x20x128xbf16, #tpu.memory_space<vmem>>, vector<4x16x4xbf16>
    tpu.vector_store %arg8[%c20, %c2_3, %c0_4], %6 {strides = array<i32>} : memref<24x20x128xbf16, #tpu.memory_space<vmem>>, vector<4x16x4xbf16>,
    %c0_5 = arith.constant 0 : index
    %c0_6 = arith.constant 0 : index
    %c0_7 = arith.constant 0 : index
    %c0_8 = arith.constant 0 : index
    %8 = vector.load %arg2[%c0_5, %c0_6, %c0_7, %c0_8] : memref<1x16x16x4xbf16, #tpu.memory_space<vmem>>, vector<1x16x16x4xbf16>
    %9 = vector.shape_cast %8 : vector<1x16x16x4xbf16> to vector<16x16x4xbf16>
    %c4 = arith.constant 4 : index
    %c2_9 = arith.constant 2 : index
    %c0_10 = arith.constant 0 : index
    %10 = vector.load %arg8[%c4, %c2_9, %c0_10] : memref<24x20x128xbf16, #tpu.memory_space<vmem>>, vector<16x16x4xbf16>
    tpu.vector_store %arg8[%c4, %c2_9, %c0_10], %9 {strides = array<i32>} : memref<24x20x128xbf16, #tpu.memory_space<vmem>>, vector<16x16x4xbf16>,
    %c0_11 = arith.constant 0 : index
    %c0_12 = arith.constant 0 : index
    %c0_13 = arith.constant 0 : index
    %11 = vector.load %arg8[%c0_11, %c0_12, %c0_13] : memref<24x20x128xbf16, #tpu.memory_space<vmem>>, vector<20x16x4xbf16>
    %c0_14 = arith.constant 0 : index
    %c0_15 = arith.constant 0 : index
    %c0_16 = arith.constant 0 : index
    %12 = vector.load %arg10[%c0_14, %c0_15, %c0_16] : memref<20x16x128xbf16, #tpu.memory_space<vmem>>, vector<20x16x4xbf16>
    tpu.vector_store %arg10[%c0_14, %c0_15, %c0_16], %11 {strides = array<i32>} : memref<20x16x128xbf16, #tpu.memory_space<vmem>>, vector<20x16x4xbf16>,
    %c0_17 = arith.constant 0 : index
    %c2_18 = arith.constant 2 : index
    %c0_19 = arith.constant 0 : index
    %13 = vector.load %arg8[%c0_17, %c2_18, %c0_19] : memref<24x20x128xbf16, #tpu.memory_space<vmem>>, vector<20x16x4xbf16>
    %c0_20 = arith.constant 0 : index
    %c0_21 = arith.constant 0 : index
    %c4_22 = arith.constant 4 : index
    %14 = vector.load %arg10[%c0_20, %c0_21, %c4_22] : memref<20x16x128xbf16, #tpu.memory_space<vmem>>, vector<20x16x4xbf16>
    tpu.vector_store %arg10[%c0_20, %c0_21, %c4_22], %13 {strides = array<i32>} : memref<20x16x128xbf16, #tpu.memory_space<vmem>>, vector<20x16x4xbf16>,
    %c0_23 = arith.constant 0 : index
    %c4_24 = arith.constant 4 : index
    %c0_25 = arith.constant 0 : index
    %15 = vector.load %arg8[%c0_23, %c4_24, %c0_25] : memref<24x20x128xbf16, #tpu.memory_space<vmem>>, vector<20x16x4xbf16>
    %c0_26 = arith.constant 0 : index
    %c0_27 = arith.constant 0 : index
    %c8 = arith.constant 8 : index
    %16 = vector.load %arg10[%c0_26, %c0_27, %c8] : memref<20x16x128xbf16, #tpu.memory_space<vmem>>, vector<20x16x4xbf16>
    tpu.vector_store %arg10[%c0_26, %c0_27, %c8], %15 {strides = array<i32>} : memref<20x16x128xbf16, #tpu.memory_space<vmem>>, vector<20x16x4xbf16>,
    %c2_28 = arith.constant 2 : index
    %c0_29 = arith.constant 0 : index
    %c0_30 = arith.constant 0 : index
    %17 = vector.load %arg8[%c2_28, %c0_29, %c0_30] : memref<24x20x128xbf16, #tpu.memory_space<vmem>>, vector<20x16x4xbf16>
    %c0_31 = arith.constant 0 : index
    %c0_32 = arith.constant 0 : index
    %c12 = arith.constant 12 : index
    %18 = vector.load %arg10[%c0_31, %c0_32, %c12] : memref<20x16x128xbf16, #tpu.memory_space<vmem>>, vector<20x16x4xbf16>
    tpu.vector_store %arg10[%c0_31, %c0_32, %c12], %17 {strides = array<i32>} : memref<20x16x128xbf16, #tpu.memory_space<vmem>>, vector<20x16x4xbf16>,
    %c2_33 = arith.constant 2 : index
    %c2_34 = arith.constant 2 : index
    %c0_35 = arith.constant 0 : index
    %19 = vector.load %arg8[%c2_33, %c2_34, %c0_35] : memref<24x20x128xbf16, #tpu.memory_space<vmem>>, vector<20x16x4xbf16>
    %c0_36 = arith.constant 0 : index
    %c0_37 = arith.constant 0 : index
    %c16 = arith.constant 16 : index
    %20 = vector.load %arg10[%c0_36, %c0_37, %c16] : memref<20x16x128xbf16, #tpu.memory_space<vmem>>, vector<20x16x4xbf16>
    tpu.vector_store %arg10[%c0_36, %c0_37, %c16], %19 {strides = array<i32>} : memref<20x16x128xbf16, #tpu.memory_space<vmem>>, vector<20x16x4xbf16>,
    %c2_38 = arith.constant 2 : index
    %c4_39 = arith.constant 4 : index
    %c0_40 = arith.constant 0 : index
    %21 = vector.load %arg8[%c2_38, %c4_39, %c0_40] : memref<24x20x128xbf16, #tpu.memory_space<vmem>>, vector<20x16x4xbf16>
    %c0_41 = arith.constant 0 : index
    %c0_42 = arith.constant 0 : index
    %c20_43 = arith.constant 20 : index
    %22 = vector.load %arg10[%c0_41, %c0_42, %c20_43] : memref<20x16x128xbf16, #tpu.memory_space<vmem>>, vector<20x16x4xbf16>
    tpu.vector_store %arg10[%c0_41, %c0_42, %c20_43], %21 {strides = array<i32>} : memref<20x16x128xbf16, #tpu.memory_space<vmem>>, vector<20x16x4xbf16>,
    %c4_44 = arith.constant 4 : index
    %c0_45 = arith.constant 0 : index
    %c0_46 = arith.constant 0 : index
    %23 = vector.load %arg8[%c4_44, %c0_45, %c0_46] : memref<24x20x128xbf16, #tpu.memory_space<vmem>>, vector<20x16x4xbf16>
    %c0_47 = arith.constant 0 : index
    %c0_48 = arith.constant 0 : index
    %c24 = arith.constant 24 : index
    %24 = vector.load %arg10[%c0_47, %c0_48, %c24] : memref<20x16x128xbf16, #tpu.memory_space<vmem>>, vector<20x16x4xbf16>
    tpu.vector_store %arg10[%c0_47, %c0_48, %c24], %23 {strides = array<i32>} : memref<20x16x128xbf16, #tpu.memory_space<vmem>>, vector<20x16x4xbf16>,
    %c4_49 = arith.constant 4 : index
    %c2_50 = arith.constant 2 : index
    %c0_51 = arith.constant 0 : index
    %25 = vector.load %arg8[%c4_49, %c2_50, %c0_51] : memref<24x20x128xbf16, #tpu.memory_space<vmem>>, vector<20x16x4xbf16>
    %c0_52 = arith.constant 0 : index
    %c0_53 = arith.constant 0 : index
    %c28 = arith.constant 28 : index
    %26 = vector.load %arg10[%c0_52, %c0_53, %c28] : memref<20x16x128xbf16, #tpu.memory_space<vmem>>, vector<20x16x4xbf16>
    tpu.vector_store %arg10[%c0_52, %c0_53, %c28], %25 {strides = array<i32>} : memref<20x16x128xbf16, #tpu.memory_space<vmem>>, vector<20x16x4xbf16>,
    %c4_54 = arith.constant 4 : index
    %c4_55 = arith.constant 4 : index
    %c0_56 = arith.constant 0 : index
    %27 = vector.load %arg8[%c4_54, %c4_55, %c0_56] : memref<24x20x128xbf16, #tpu.memory_space<vmem>>, vector<20x16x4xbf16>
    %c0_57 = arith.constant 0 : index
    %c0_58 = arith.constant 0 : index
    %c32 = arith.constant 32 : index
    %28 = vector.load %arg10[%c0_57, %c0_58, %c32] : memref<20x16x128xbf16, #tpu.memory_space<vmem>>, vector<20x16x4xbf16>
    tpu.vector_store %arg10[%c0_57, %c0_58, %c32], %27 {strides = array<i32>} : memref<20x16x128xbf16, #tpu.memory_space<vmem>>, vector<20x16x4xbf16>,
    %c0_59 = arith.constant 0 : index
    %c0_60 = arith.constant 0 : index
    %c0_61 = arith.constant 0 : index
    %29 = vector.load %arg10[%c0_59, %c0_60, %c0_61] : memref<20x16x128xbf16, #tpu.memory_space<vmem>>, vector<20x16x128xbf16>
    %30 = vector.shape_cast %29 : vector<20x16x128xbf16> to vector<320x128xbf16>
    %c0_62 = arith.constant 0 : index
    %c0_63 = arith.constant 0 : index
    %31 = vector.load %arg3[%c0_62, %c0_63] : memref<128x128xbf16, #tpu.memory_space<vmem>>, vector<128x128xbf16>
    %cst_64 = arith.constant dense<0.000000e+00> : vector<320x128xf32>
    %32 = tpu.matmul %30, %31, %cst_64 {dimension_numbers = #tpu.dot_dimension_numbers<[1], [0], [0], [1], [0, 0, 1, 1], [], []>} : vector<320x128xbf16>, vector<128x128xbf16>, vector<320x128xf32> -> vector<320x128xf32>
    %c0_65 = arith.constant 0 : index
    %c0_66 = arith.constant 0 : index
    %33 = vector.load %arg4[%c0_65, %c0_66] : memref<1x128xf32, #tpu.memory_space<vmem>>, vector<1x128xf32>
    %34 = vector.broadcast %33 : vector<1x128xf32> to vector<320x128xf32>
    %35 = arith.addf %32, %34 : vector<320x128xf32>
    %cst_67 = arith.constant 0.000000e+00 : f32
    %36 = vector.broadcast %cst_67 : f32 to vector<320x128xf32>
    %37 = arith.maximumf %35, %36 : vector<320x128xf32>
    %38 = vector.shape_cast %37 : vector<320x128xf32> to vector<20x16x128xf32>
    %39 = vector.extract_strided_slice %38 {offsets = [0, 0, 0], sizes = [20, 16, 4], strides = [1, 1, 1]} : vector<20x16x128xf32> to vector<20x16x4xf32>
    %40 = arith.truncf %39 : vector<20x16x4xf32> to vector<20x16x4xbf16>
    %c0_68 = arith.constant 0 : index
    %c2_69 = arith.constant 2 : index
    %c0_70 = arith.constant 0 : index
    %41 = vector.load %arg9[%c0_68, %c2_69, %c0_70] : memref<20x20x128xbf16, #tpu.memory_space<vmem>>, vector<20x16x4xbf16>
    tpu.vector_store %arg9[%c0_68, %c2_69, %c0_70], %40 {strides = array<i32>} : memref<20x20x128xbf16, #tpu.memory_space<vmem>>, vector<20x16x4xbf16>,
    %cst_71 = arith.constant 0.000000e+00 : bf16
    %42 = vector.broadcast %cst_71 : bf16 to vector<2x16x4xbf16>
    %c0_72 = arith.constant 0 : index
    %c2_73 = arith.constant 2 : index
    %c0_74 = arith.constant 0 : index
    %43 = vector.load %arg9[%c0_72, %c2_73, %c0_74] : memref<20x20x128xbf16, #tpu.memory_space<vmem>>, vector<2x16x4xbf16>
    tpu.vector_store %arg9[%c0_72, %c2_73, %c0_74], %42 {strides = array<i32>} : memref<20x20x128xbf16, #tpu.memory_space<vmem>>, vector<2x16x4xbf16>,
    %cst_75 = arith.constant 0.000000e+00 : bf16
    %44 = vector.broadcast %cst_75 : bf16 to vector<2x16x4xbf16>
    %c18 = arith.constant 18 : index
    %c2_76 = arith.constant 2 : index
    %c0_77 = arith.constant 0 : index
    %45 = vector.load %arg9[%c18, %c2_76, %c0_77] : memref<20x20x128xbf16, #tpu.memory_space<vmem>>, vector<2x16x4xbf16>
    tpu.vector_store %arg9[%c18, %c2_76, %c0_77], %44 {strides = array<i32>} : memref<20x20x128xbf16, #tpu.memory_space<vmem>>, vector<2x16x4xbf16>,
    %c0_78 = arith.constant 0 : index
    %c0_79 = arith.constant 0 : index
    %c0_80 = arith.constant 0 : index
    %46 = vector.load %arg9[%c0_78, %c0_79, %c0_80] : memref<20x20x128xbf16, #tpu.memory_space<vmem>>, vector<16x16x4xbf16>
    %c0_81 = arith.constant 0 : index
    %c0_82 = arith.constant 0 : index
    %c0_83 = arith.constant 0 : index
    %47 = vector.load %arg10[%c0_81, %c0_82, %c0_83] : memref<20x16x128xbf16, #tpu.memory_space<vmem>>, vector<16x16x4xbf16>
    tpu.vector_store %arg10[%c0_81, %c0_82, %c0_83], %46 {strides = array<i32>} : memref<20x16x128xbf16, #tpu.memory_space<vmem>>, vector<16x16x4xbf16>,
    %c0_84 = arith.constant 0 : index
    %c2_85 = arith.constant 2 : index
    %c0_86 = arith.constant 0 : index
    %48 = vector.load %arg9[%c0_84, %c2_85, %c0_86] : memref<20x20x128xbf16, #tpu.memory_space<vmem>>, vector<16x16x4xbf16>
    %c0_87 = arith.constant 0 : index
    %c0_88 = arith.constant 0 : index
    %c4_89 = arith.constant 4 : index
    %49 = vector.load %arg10[%c0_87, %c0_88, %c4_89] : memref<20x16x128xbf16, #tpu.memory_space<vmem>>, vector<16x16x4xbf16>
    tpu.vector_store %arg10[%c0_87, %c0_88, %c4_89], %48 {strides = array<i32>} : memref<20x16x128xbf16, #tpu.memory_space<vmem>>, vector<16x16x4xbf16>,
    %c0_90 = arith.constant 0 : index
    %c4_91 = arith.constant 4 : index
    %c0_92 = arith.constant 0 : index
    %50 = vector.load %arg9[%c0_90, %c4_91, %c0_92] : memref<20x20x128xbf16, #tpu.memory_space<vmem>>, vector<16x16x4xbf16>
    %c0_93 = arith.constant 0 : index
    %c0_94 = arith.constant 0 : index
    %c8_95 = arith.constant 8 : index
    %51 = vector.load %arg10[%c0_93, %c0_94, %c8_95] : memref<20x16x128xbf16, #tpu.memory_space<vmem>>, vector<16x16x4xbf16>
    tpu.vector_store %arg10[%c0_93, %c0_94, %c8_95], %50 {strides = array<i32>} : memref<20x16x128xbf16, #tpu.memory_space<vmem>>, vector<16x16x4xbf16>,
    %c2_96 = arith.constant 2 : index
    %c0_97 = arith.constant 0 : index
    %c0_98 = arith.constant 0 : index
    %52 = vector.load %arg9[%c2_96, %c0_97, %c0_98] : memref<20x20x128xbf16, #tpu.memory_space<vmem>>, vector<16x16x4xbf16>
    %c0_99 = arith.constant 0 : index
    %c0_100 = arith.constant 0 : index
    %c12_101 = arith.constant 12 : index
    %53 = vector.load %arg10[%c0_99, %c0_100, %c12_101] : memref<20x16x128xbf16, #tpu.memory_space<vmem>>, vector<16x16x4xbf16>
    tpu.vector_store %arg10[%c0_99, %c0_100, %c12_101], %52 {strides = array<i32>} : memref<20x16x128xbf16, #tpu.memory_space<vmem>>, vector<16x16x4xbf16>,
    %c2_102 = arith.constant 2 : index
    %c2_103 = arith.constant 2 : index
    %c0_104 = arith.constant 0 : index
    %54 = vector.load %arg9[%c2_102, %c2_103, %c0_104] : memref<20x20x128xbf16, #tpu.memory_space<vmem>>, vector<16x16x4xbf16>
    %c0_105 = arith.constant 0 : index
    %c0_106 = arith.constant 0 : index
    %c16_107 = arith.constant 16 : index
    %55 = vector.load %arg10[%c0_105, %c0_106, %c16_107] : memref<20x16x128xbf16, #tpu.memory_space<vmem>>, vector<16x16x4xbf16>
    tpu.vector_store %arg10[%c0_105, %c0_106, %c16_107], %54 {strides = array<i32>} : memref<20x16x128xbf16, #tpu.memory_space<vmem>>, vector<16x16x4xbf16>,
    %c2_108 = arith.constant 2 : index
    %c4_109 = arith.constant 4 : index
    %c0_110 = arith.constant 0 : index
    %56 = vector.load %arg9[%c2_108, %c4_109, %c0_110] : memref<20x20x128xbf16, #tpu.memory_space<vmem>>, vector<16x16x4xbf16>
    %c0_111 = arith.constant 0 : index
    %c0_112 = arith.constant 0 : index
    %c20_113 = arith.constant 20 : index
    %57 = vector.load %arg10[%c0_111, %c0_112, %c20_113] : memref<20x16x128xbf16, #tpu.memory_space<vmem>>, vector<16x16x4xbf16>
    tpu.vector_store %arg10[%c0_111, %c0_112, %c20_113], %56 {strides = array<i32>} : memref<20x16x128xbf16, #tpu.memory_space<vmem>>, vector<16x16x4xbf16>,
    %c4_114 = arith.constant 4 : index
    %c0_115 = arith.constant 0 : index
    %c0_116 = arith.constant 0 : index
    %58 = vector.load %arg9[%c4_114, %c0_115, %c0_116] : memref<20x20x128xbf16, #tpu.memory_space<vmem>>, vector<16x16x4xbf16>
    %c0_117 = arith.constant 0 : index
    %c0_118 = arith.constant 0 : index
    %c24_119 = arith.constant 24 : index
    %59 = vector.load %arg10[%c0_117, %c0_118, %c24_119] : memref<20x16x128xbf16, #tpu.memory_space<vmem>>, vector<16x16x4xbf16>
    tpu.vector_store %arg10[%c0_117, %c0_118, %c24_119], %58 {strides = array<i32>} : memref<20x16x128xbf16, #tpu.memory_space<vmem>>, vector<16x16x4xbf16>,
    %c4_120 = arith.constant 4 : index
    %c2_121 = arith.constant 2 : index
    %c0_122 = arith.constant 0 : index
    %60 = vector.load %arg9[%c4_120, %c2_121, %c0_122] : memref<20x20x128xbf16, #tpu.memory_space<vmem>>, vector<16x16x4xbf16>
    %c0_123 = arith.constant 0 : index
    %c0_124 = arith.constant 0 : index
    %c28_125 = arith.constant 28 : index
    %61 = vector.load %arg10[%c0_123, %c0_124, %c28_125] : memref<20x16x128xbf16, #tpu.memory_space<vmem>>, vector<16x16x4xbf16>
    tpu.vector_store %arg10[%c0_123, %c0_124, %c28_125], %60 {strides = array<i32>} : memref<20x16x128xbf16, #tpu.memory_space<vmem>>, vector<16x16x4xbf16>,
    %c4_126 = arith.constant 4 : index
    %c4_127 = arith.constant 4 : index
    %c0_128 = arith.constant 0 : index
    %62 = vector.load %arg9[%c4_126, %c4_127, %c0_128] : memref<20x20x128xbf16, #tpu.memory_space<vmem>>, vector<16x16x4xbf16>
    %c0_129 = arith.constant 0 : index
    %c0_130 = arith.constant 0 : index
    %c32_131 = arith.constant 32 : index
    %63 = vector.load %arg10[%c0_129, %c0_130, %c32_131] : memref<20x16x128xbf16, #tpu.memory_space<vmem>>, vector<16x16x4xbf16>
    tpu.vector_store %arg10[%c0_129, %c0_130, %c32_131], %62 {strides = array<i32>} : memref<20x16x128xbf16, #tpu.memory_space<vmem>>, vector<16x16x4xbf16>,
    %c0_132 = arith.constant 0 : index
    %c0_133 = arith.constant 0 : index
    %c0_134 = arith.constant 0 : index
    %64 = vector.load %arg10[%c0_132, %c0_133, %c0_134] : memref<20x16x128xbf16, #tpu.memory_space<vmem>>, vector<16x16x128xbf16>
    %65 = vector.shape_cast %64 : vector<16x16x128xbf16> to vector<256x128xbf16>
    %c0_135 = arith.constant 0 : index
    %c0_136 = arith.constant 0 : index
    %66 = vector.load %arg5[%c0_135, %c0_136] : memref<128x128xbf16, #tpu.memory_space<vmem>>, vector<128x128xbf16>
    %cst_137 = arith.constant dense<0.000000e+00> : vector<256x128xf32>
    %67 = tpu.matmul %65, %66, %cst_137 {dimension_numbers = #tpu.dot_dimension_numbers<[1], [0], [0], [1], [0, 0, 1, 1], [], []>} : vector<256x128xbf16>, vector<128x128xbf16>, vector<256x128xf32> -> vector<256x128xf32>
    %c0_138 = arith.constant 0 : index
    %c0_139 = arith.constant 0 : index
    %68 = vector.load %arg6[%c0_138, %c0_139] : memref<1x128xf32, #tpu.memory_space<vmem>>, vector<1x128xf32>
    %69 = vector.broadcast %68 : vector<1x128xf32> to vector<256x128xf32>
    %70 = arith.addf %67, %69 : vector<256x128xf32>
    %c0_i32_140 = arith.constant 0 : i32
    %71 = arith.addi %0, %c0_i32_140 : i32
    %c0_141 = arith.constant 0 : index
    %72 = arith.index_cast %71 : i32 to index
    %c0_142 = arith.constant 0 : index
    %c0_143 = arith.constant 0 : index
    %73 = vector.load %arg2[%c0_141, %72, %c0_142, %c0_143] : memref<1x16x16x4xbf16, #tpu.memory_space<vmem>>, vector<1x16x16x4xbf16>
    %74 = vector.shape_cast %73 : vector<1x16x16x4xbf16> to vector<16x16x4xbf16>
    %75 = arith.extf %74 : vector<16x16x4xbf16> to vector<16x16x4xf32>
    %76 = vector.shape_cast %70 : vector<256x128xf32> to vector<16x16x128xf32>
    %77 = vector.extract_strided_slice %76 {offsets = [0, 0, 0], sizes = [16, 16, 4], strides = [1, 1, 1]} : vector<16x16x128xf32> to vector<16x16x4xf32>
    %78 = arith.addf %77, %75 : vector<16x16x4xf32>
    %cst_144 = arith.constant 0.000000e+00 : f32
    %79 = vector.broadcast %cst_144 : f32 to vector<16x16x4xf32>
    %80 = arith.maximumf %78, %79 : vector<16x16x4xf32>
    %c0_145 = arith.constant 0 : index
    %c0_146 = arith.constant 0 : index
    %c0_147 = arith.constant 0 : index
    %c0_148 = arith.constant 0 : index
    %81 = vector.load %arg7[%c0_145, %c0_146, %c0_147, %c0_148] : memref<1x16x16x4xf32, #tpu.memory_space<vmem>>, vector<1x16x16x4xf32>
    %82 = vector.shape_cast %81 : vector<1x16x16x4xf32> to vector<16x16x4xf32>
    %83 = vector.shape_cast %80 : vector<16x16x4xf32> to vector<1x16x16x4xf32>
    tpu.vector_store %arg7[%c0_145, %c0_146, %c0_147, %c0_148], %83 {strides = array<i32>} : memref<1x16x16x4xf32, #tpu.memory_space<vmem>>, vector<1x16x16x4xf32>,
    return
  }
  func.func @transform_0(%arg0: i32, %arg1: i32) -> (i32, i32, i32, i32) {
    %c0_i32 = arith.constant 0 : i32
    %c0_i32_0 = arith.constant 0 : i32
    %c0_i32_1 = arith.constant 0 : i32
    %c0_i32_2 = arith.constant 0 : i32
    return %arg0, %c0_i32, %c0_i32_0, %c0_i32_1 : i32, i32, i32, i32
  }
  func.func @transform_1(%arg0: i32, %arg1: i32) -> (i32, i32) {
    %c0_i32 = arith.constant 0 : i32
    %c0_i32_0 = arith.constant 0 : i32
    %c0_i32_1 = arith.constant 0 : i32
    return %c0_i32, %c0_i32_0 : i32, i32
  }
  func.func @transform_2(%arg0: i32, %arg1: i32) -> (i32, i32) {
    %c0_i32 = arith.constant 0 : i32
    %c0_i32_0 = arith.constant 0 : i32
    %c0_i32_1 = arith.constant 0 : i32
    return %c0_i32, %c0_i32_0 : i32, i32
  }
  func.func @transform_3(%arg0: i32, %arg1: i32) -> (i32, i32) {
    %c0_i32 = arith.constant 0 : i32
    %c0_i32_0 = arith.constant 0 : i32
    %c0_i32_1 = arith.constant 0 : i32
    return %c0_i32, %c0_i32_0 : i32, i32
  }
  func.func @transform_4(%arg0: i32, %arg1: i32) -> (i32, i32) {
    %c0_i32 = arith.constant 0 : i32
    %c0_i32_0 = arith.constant 0 : i32
    %c0_i32_1 = arith.constant 0 : i32
    return %c0_i32, %c0_i32_0 : i32, i32
  }
  func.func @transform_5(%arg0: i32, %arg1: i32) -> (i32, i32, i32, i32) {
    %c0_i32 = arith.constant 0 : i32
    %c0_i32_0 = arith.constant 0 : i32
    %c0_i32_1 = arith.constant 0 : i32
    return %arg0, %arg1, %c0_i32, %c0_i32_0 : i32, i32, i32, i32
  }
}

</mosaic_0001>

<bundles_post_ra>
// kernel: tpu_custom_call.1
= control target key start
LH: loop header
LB: loop body
LE: loop exit
PB: predicated region body
PF: predicated region fallthrough
CT: control target
= control target key end

     0   :  { %s8136_s18 = smov 0   ;;  %s8138_s19 = smov 0   ;;  %s11040_s0 = inlined_call_operand.vmem [shape: bf16[2,16,16,4], index: 0, kind: input, shape index: {}]   ;;  %s11041_s1 = inlined_call_operand.vmem [shape: bf16[128,128], index: 1, kind: input, shape index: {}]   ;;  %s11042_s2 = inlined_call_operand.vmem [shape: f32[1,128], index: 2, kind: input, shape index: {}]   ;;  %s11043_s3 = inlined_call_operand.vmem [shape: bf16[128,128], index: 3, kind: input, shape index: {}]   ;;  %s11044_s4 = inlined_call_operand.vmem [shape: f32[1,128], index: 4, kind: input, shape index: {}]   ;;  %s11045_s5 = inlined_call_operand.vmem [shape: f32[2,16,16,4], index: 5, kind: output, shape index: {}]  }
   0x1   :  { %s8140_s20 = smov 0  }
   0x2 LB: > { %s27_s21 = sadd.s32 1, %s8091_s19  ;;  %p7449_p0 = scmp.ge.s32.totalorder %s8095_s20, 1  ;;  %s8095_s20 = sphi %s8140_s20, %s15_s20   ;;  %s8091_s19 = sphi %s8138_s19, %s11053_s19   ;;  %s8087_s18 = sphi %s8136_s18, %s11052_s18  }
   0x3   : > { %p29_p1 = scmp.ge.s32.totalorder %s27_s21, 2  ;;  %p201_p2 = scmp.lt.s32.totalorder %s8095_s20, 3 }
   0x5   : > { %s11055_s21 = smov (%p29_p1, %s27_s21), 0  ;;  %p202_p3 = pnand %p7449_p0, %p201_p2 }
   0x6   : > { %s8098_s22 = smov (!%p202_p3), 4   ;;  %p234_p4 = scmp.lt.s32.totalorder (!%p202_p3), %s8087_s18, 1 }
   0x7   : > { %205 = sbr.rel (%p202_p3) target bundleno = 2207 (0x89f), region = 40  ;;  %s8099_s27 = smov (!%p202_p3), 8  }
   0x8   : > { %s8100_s28 = smov (!%p202_p3), 12   ;;  %s8101_s29 = smov (!%p202_p3), 16  }
   0x9   : > { %s8102_s30 = smov (!%p202_p3), 20   ;;  %s8103_s6 = smov (!%p202_p3), 24  }
   0xa   : > { %s8104_s7 = smov (!%p202_p3), 28   ;;  %s8105_s8 = smov (!%p202_p3), 32  }
   0xc   : > { %vm384_vm0 = vcmask 27649   ;;  %vm386_vm1 = vcmask 27648   ;;  %v8097_v0 = vmov 0   ;;  %vm856_vm2 = vcmask 1042432   ;;  %s11057_s18 = smov (!%p234_p4, %s8087_s18), 1 }
   0xd   : > { %390 = vst.msk [vmem:[#allocation2 + $0xc] sm:$0xe] %vm384_vm0, %v8097_v0  ;;  %vm857_vm3 = vcmask 1046532   ;;  %s7880_s23 = sshll.u32 %s11057_s18, 7  ;;  %vm388_vm5 = vcmask 24576   ;;  %vm476_vm6 = vcmask 1040384  }
   0xe   : > { %391 = vst.msk [vmem:[#allocation2 + $0x10] sm:$0xf] %vm386_vm1, %v8097_v0  ;;  %vm8168_vm4 = vmor %vm856_vm2, %vm857_vm3  ;;  %s8318_s26 = scalar_lea.vmem %s11040_s0, %s7880_s23  ;;  %vm477_vm7 = vcmask 1044484   ;;  %vm1119_vm9 = vcmask 60448   ;;  %vm1280_vm10 = vcmask 1041408   ;;  %vm1281_vm11 = vcmask 1045508  }
   0xf   : > { %256 = vst [vmem:[#allocation2] sm:$0x1] %v8097_v0  ;;  %v8327_v8 = vld [vmem:[%s8318_s26 + $0x8] sm:$0xf]  ;;  %v8332_v11 = vld [vmem:[%s8318_s26 + $0x10] sm:$0xf]  ;;  %vm8378_vm8 = vmor %vm476_vm6, %vm477_vm7 }
  0x10   : > { %257 = vst [vmem:[#allocation2 + $0xc] sm:$0x1] %v8097_v0  ;;  %v417_v14 = vld [vmem:[%s8318_s26 + $0x14] sm:$0xf]  ;;  %v8338_v15 = vld [vmem:[%s8318_s26] sm:$0xf]  ;;  %vm8662_vm12 = vmor %vm1280_vm10, %vm1281_vm11 }
  0x11   : > { %258 = vst [vmem:[#allocation2 + $0x18] sm:$0x1] %v8097_v0  ;;  %v484_v20 = vrot.slane %v8327_v8, 7  ;;  %v413_v21 = vld [vmem:[%s8318_s26 + $0x4] sm:$0xf]  ;;  %v489_v24 = vrot.slane %v8332_v11, 7 }
  0x12   : > { %259 = vst [vmem:[#allocation2 + $0x24] sm:$0x1] %v8097_v0  ;;  %v8352_v22 = vld [vmem:[%s8318_s26 + $0xc] sm:$0xf]  ;;  %v491_v25 = vrot.slane %v417_v14, 7  ;;  %v479_v26 = vrot.slane %v8338_v15, 7 }
  0x13   : > { %260 = vst [vmem:[#allocation2 + $0x30] sm:$0x1] %v8097_v0  ;;  %v481_v27 = vrot.slane %v413_v21, 7  ;;  %v485_v28 = vrot.slane %v484_v20, 4  ;;  %v486_v29 = vrot.slane %v8352_v22, 7  ;;  %v490_v34 = vrot.slane %v489_v24, 4 }
  0x14   : > { %v739_v1 = vld [vmem:[#allocation2 + $0xc] sm:$0xe]  ;;  %261 = vst [vmem:[#allocation2 + $0x3c] sm:$0x1] %v8097_v0  ;;  %v8371_v31 = vld [vmem:[%s8318_s26 + $0x20] sm:$0xf] }
  0x15   : > { %v8166_v2 = vld [vmem:[#allocation2 + $0x10] sm:$0xf]  ;;  %v7455_v4 = vrot.slane %v739_v1, 9  ;;  %262 = vst [vmem:[#allocation2 + $0x48] sm:$0x1] %v8097_v0  ;;  %v493_v37 = vrot.slane %v491_v25, 4  ;;  %v487_v43 = vsel %vm8378_vm8, %v485_v28, %v486_v29  ;;  %v492_v48 = vsel %vm8378_vm8, %v490_v34, %v491_v25 }
  0x16   : > { %v868_v5 = vrot.slane %v8166_v2, 5  ;;  %263 = vst [vmem:[#allocation2 + $0x54] sm:$0x1] %v8097_v0  ;;  %v8383_v35 = vld [vmem:[%s8318_s26 + $0x28] sm:$0xf]  ;;  %v480_v38 = vrot.slane %v479_v26, 4 }
  0x17   : > { %264 = vst [vmem:[#allocation2 + $0x60] sm:$0x1] %v8097_v0  ;;  %v483_v39 = vrot.slane %v481_v27, 4  ;;  %v8393_v41 = vld [vmem:[%s8318_s26 + $0x24] sm:$0xf]  ;;  %v499_v42 = vrot.slane %v8371_v31, 7 }
  0x18   : > { %v869_v6 = vsel %vm8168_vm4, %v7455_v4, %v868_v5  ;;  %265 = vst [vmem:[#allocation2 + $0x6c] sm:$0x1] %v8097_v0  ;;  %v870_v32 = vrot.slane %v868_v5, 4  ;;  %v423_v45 = vld [vmem:[%s8318_s26 + $0x2c] sm:$0xf]  ;;  %v504_v46 = vrot.slane %v8383_v35, 7  ;;  %v482_v60 = vsel %vm8378_vm8, %v480_v38, %v481_v27 }
  0x19   : > { %1003 = vrot.lane.b32.xlu1 %v869_v6, %s8098_s22  ;;  %266 = vst [vmem:[#allocation2 + $0x78] sm:$0x1] %v8097_v0  ;;  %v8409_v49 = vld [vmem:[%s8318_s26 + $0x18] sm:$0xf]  ;;  %v501_v53 = vrot.slane %v8393_v41, 7  ;;  %v500_v56 = vrot.slane %v499_v42, 4 }
  0x1a   : > { %267 = vst [vmem:[#allocation2 + $0x84] sm:$0x1] %v8097_v0  ;;  %v494_v61 = vrot.slane %v8409_v49, 7  ;;  %v505_v63 = vrot.slane %v504_v46, 4  ;;  %v506_v1 = vrot.slane %v423_v45, 7  ;;  %vm1543_vm13 = vcmask 93248  }
  0x1b   : > { %268 = vst [vmem:[#allocation2 + $0x90] sm:$0x1] %v8097_v0  ;;  %v419_v2 = vld [vmem:[%s8318_s26 + $0x1c] sm:$0xf]  ;;  %vm1785_vm14 = vcmask 126048   ;;  %vm2206_vm15 = vcmask 158848  }
  0x1c   : > { %269 = vst [vmem:[#allocation2 + $0x9c] sm:$0x1] %v8097_v0  ;;  %v496_v11 = vrot.slane %v419_v2, 7  ;;  %v8445_v14 = vld [vmem:[%s8318_s26 + $0x3c] sm:$0xf]  ;;  %v503_v2 = vrot.slane %v501_v53, 4 }
  0x1d   : > { %270 = vst [vmem:[#allocation2 + $0xa8] sm:$0x1] %v8097_v0  ;;  %v516_v27 = vrot.slane %v8445_v14, 7  ;;  %vm2627_vm2 = vcmask 191648   ;;  %vm2868_vm3 = vcmask 224448   ;;  %vm3289_vm6 = vcmask 257248  }
  0x1e   : > { %271 = vst [vmem:[#allocation2 + $0xb4] sm:$0x1] %v8097_v0  ;;  %v498_v21 = vrot.slane %v496_v11, 4  ;;  %vm3710_vm7 = vcmask 290048  }
  0x1f   : > { %272 = vst [vmem:[#allocation2 + $0xc0] sm:$0x1] %v8097_v0 }
  0x20   : > { %273 = vst [vmem:[#allocation2 + $0xcc] sm:$0x1] %v8097_v0 }
  0x21   : > { %274 = vst [vmem:[#allocation2 + $0xd8] sm:$0x1] %v8097_v0 }
  0x22   : > { %275 = vst [vmem:[#allocation2 + $0xe4] sm:$0x1] %v8097_v0 }
  0x23   : > { %276 = vst [vmem:[#allocation2 + $0xf0] sm:$0x1] %v8097_v0 }
  0x24   : > { %277 = vst [vmem:[#allocation2 + $0xfc] sm:$0x1] %v8097_v0 }
  0x25   : > { %278 = vst [vmem:[#allocation2 + $0x108] sm:$0x1] %v8097_v0 }
  0x26   : > { %279 = vst [vmem:[#allocation2 + $0x114] sm:$0x1] %v8097_v0 }
  0x27   : > { %280 = vst [vmem:[#allocation2 + $0x8] sm:$0x2] %v8097_v0 }
  0x28   : > { %281 = vst [vmem:[#allocation2 + $0x14] sm:$0x2] %v8097_v0 }
  0x29   : > { %282 = vst [vmem:[#allocation2 + $0x20] sm:$0x2] %v8097_v0 }
  0x2a   : > { %283 = vst [vmem:[#allocation2 + $0x2c] sm:$0x2] %v8097_v0 }
  0x2b   : > { %284 = vst [vmem:[#allocation2 + $0x38] sm:$0x2] %v8097_v0 }
  0x2c   : > { %285 = vst [vmem:[#allocation2 + $0x44] sm:$0x2] %v8097_v0 }
  0x2d   : > { %286 = vst [vmem:[#allocation2 + $0x50] sm:$0x2] %v8097_v0 }
  0x2e   : > { %287 = vst [vmem:[#allocation2 + $0x5c] sm:$0x2] %v8097_v0 }
  0x2f   : > { %288 = vst [vmem:[#allocation2 + $0x68] sm:$0x2] %v8097_v0 }
  0x30   : > { %289 = vst [vmem:[#allocation2 + $0x74] sm:$0x2] %v8097_v0 }
  0x31   : > { %290 = vst [vmem:[#allocation2 + $0x80] sm:$0x2] %v8097_v0 }
  0x32   : > { %291 = vst [vmem:[#allocation2 + $0x8c] sm:$0x2] %v8097_v0 }
  0x33   : > { %292 = vst [vmem:[#allocation2 + $0x98] sm:$0x2] %v8097_v0 }
  0x34   : > { %293 = vst [vmem:[#allocation2 + $0xa4] sm:$0x2] %v8097_v0 }
  0x35   : > { %294 = vst [vmem:[#allocation2 + $0xb0] sm:$0x2] %v8097_v0 }
  0x36   : > { %295 = vst [vmem:[#allocation2 + $0xbc] sm:$0x2] %v8097_v0 }
  0x37   : > { %296 = vst [vmem:[#allocation2 + $0xc8] sm:$0x2] %v8097_v0 }
  0x38   : > { %297 = vst [vmem:[#allocation2 + $0xd4] sm:$0x2] %v8097_v0 }
  0x39   : > { %298 = vst [vmem:[#allocation2 + $0xe0] sm:$0x2] %v8097_v0 }
  0x3a   : > { %299 = vst [vmem:[#allocation2 + $0xec] sm:$0x2] %v8097_v0 }
  0x3b   : > { %300 = vst [vmem:[#allocation2 + $0xf8] sm:$0x2] %v8097_v0 }
  0x3c   : > { %301 = vst [vmem:[#allocation2 + $0x104] sm:$0x2] %v8097_v0 }
  0x3d   : > { %302 = vst [vmem:[#allocation2 + $0x110] sm:$0x2] %v8097_v0 }
  0x3e   : > { %303 = vst [vmem:[#allocation2 + $0x11c] sm:$0x2] %v8097_v0 }
  0x3f   : > { %304 = vst [vmem:[#allocation3] sm:$0x1] %v8097_v0 }
  0x40   : > { %305 = vst [vmem:[#allocation3 + $0xc] sm:$0x1] %v8097_v0 }
  0x41   : > { %306 = vst [vmem:[#allocation3 + $0x18] sm:$0x1] %v8097_v0 }
  0x42   : > { %307 = vst [vmem:[#allocation3 + $0x24] sm:$0x1] %v8097_v0 }
  0x43   : > { %308 = vst [vmem:[#allocation3 + $0x30] sm:$0x1] %v8097_v0 }
  0x44   : > { %309 = vst [vmem:[#allocation3 + $0x3c] sm:$0x1] %v8097_v0 }
  0x45   : > { %310 = vst [vmem:[#allocation3 + $0x48] sm:$0x1] %v8097_v0 }
  0x46   : > { %311 = vst [vmem:[#allocation3 + $0x54] sm:$0x1] %v8097_v0 }
  0x47   : > { %312 = vst [vmem:[#allocation3 + $0x60] sm:$0x1] %v8097_v0 }
  0x48   : > { %313 = vst [vmem:[#allocation3 + $0x6c] sm:$0x1] %v8097_v0 }
  0x49   : > { %314 = vst [vmem:[#allocation3 + $0x78] sm:$0x1] %v8097_v0 }
  0x4a   : > { %315 = vst [vmem:[#allocation3 + $0x84] sm:$0x1] %v8097_v0 }
  0x4b   : > { %316 = vst [vmem:[#allocation3 + $0x90] sm:$0x1] %v8097_v0 }
  0x4c   : > { %317 = vst [vmem:[#allocation3 + $0x9c] sm:$0x1] %v8097_v0 }
  0x4d   : > { %318 = vst [vmem:[#allocation3 + $0xa8] sm:$0x1] %v8097_v0 }
  0x4e   : > { %319 = vst [vmem:[#allocation3 + $0xb4] sm:$0x1] %v8097_v0 }
  0x4f   : > { %320 = vst [vmem:[#allocation3 + $0xc0] sm:$0x1] %v8097_v0 }
  0x50   : > { %321 = vst [vmem:[#allocation3 + $0xcc] sm:$0x1] %v8097_v0 }
  0x51   : > { %322 = vst [vmem:[#allocation3 + $0xd8] sm:$0x1] %v8097_v0 }
  0x52   : > { %323 = vst [vmem:[#allocation3 + $0xe4] sm:$0x1] %v8097_v0 }
  0x53   : > { %324 = vst [vmem:[#allocation3 + $0x8] sm:$0x2] %v8097_v0 }
  0x54   : > { %325 = vst [vmem:[#allocation3 + $0x14] sm:$0x2] %v8097_v0 }
  0x55   : > { %326 = vst [vmem:[#allocation3 + $0x20] sm:$0x2] %v8097_v0 }
  0x56   : > { %327 = vst [vmem:[#allocation3 + $0x2c] sm:$0x2] %v8097_v0 }
  0x57   : > { %328 = vst [vmem:[#allocation3 + $0x38] sm:$0x2] %v8097_v0 }
  0x58   : > { %329 = vst [vmem:[#allocation3 + $0x44] sm:$0x2] %v8097_v0 }
  0x59   : > { %330 = vst [vmem:[#allocation3 + $0x50] sm:$0x2] %v8097_v0 }
  0x5a   : > { %331 = vst [vmem:[#allocation3 + $0x5c] sm:$0x2] %v8097_v0 }
  0x5b   : > { %332 = vst [vmem:[#allocation3 + $0x68] sm:$0x2] %v8097_v0 }
  0x5c   : > { %333 = vst [vmem:[#allocation3 + $0x74] sm:$0x2] %v8097_v0 }
  0x5d   : > { %334 = vst [vmem:[#allocation3 + $0x80] sm:$0x2] %v8097_v0 }
  0x5e   : > { %335 = vst [vmem:[#allocation3 + $0x8c] sm:$0x2] %v8097_v0 }
  0x5f   : > { %336 = vst [vmem:[#allocation3 + $0x98] sm:$0x2] %v8097_v0 }
  0x60   : > { %337 = vst [vmem:[#allocation3 + $0xa4] sm:$0x2] %v8097_v0 }
  0x61   : > { %338 = vst [vmem:[#allocation3 + $0xb0] sm:$0x2] %v8097_v0 }
  0x62   : > { %339 = vst [vmem:[#allocation3 + $0xbc] sm:$0x2] %v8097_v0 }
  0x63   : > { %340 = vst [vmem:[#allocation3 + $0xc8] sm:$0x2] %v8097_v0 }
  0x64   : > { %341 = vst [vmem:[#allocation3 + $0xd4] sm:$0x2] %v8097_v0 }
  0x65   : > { %342 = vst [vmem:[#allocation3 + $0xe0] sm:$0x2] %v8097_v0 }
  0x66   : > { %343 = vst [vmem:[#allocation3 + $0xec] sm:$0x2] %v8097_v0 }
  0x67   : > { %344 = vst [vmem:[#allocation4] sm:$0xf] %v8097_v0 }
  0x68   : > { %345 = vst [vmem:[#allocation4 + $0x4] sm:$0xf] %v8097_v0 }
  0x69   : > { %346 = vst [vmem:[#allocation4 + $0x8] sm:$0xf] %v8097_v0 }
  0x6a   : > { %347 = vst [vmem:[#allocation4 + $0xc] sm:$0xf] %v8097_v0 }
  0x6b   : > { %348 = vst [vmem:[#allocation4 + $0x10] sm:$0xf] %v8097_v0 }
  0x6c   : > { %349 = vst [vmem:[#allocation4 + $0x14] sm:$0xf] %v8097_v0 }
  0x6d   : > { %350 = vst [vmem:[#allocation4 + $0x18] sm:$0xf] %v8097_v0 }
  0x6e   : > { %351 = vst [vmem:[#allocation4 + $0x1c] sm:$0xf] %v8097_v0 }
  0x6f   : > { %352 = vst [vmem:[#allocation4 + $0x20] sm:$0xf] %v8097_v0 }
  0x70   : > { %353 = vst [vmem:[#allocation4 + $0x24] sm:$0xf] %v8097_v0 }
  0x71   : > { %354 = vst [vmem:[#allocation4 + $0x28] sm:$0xf] %v8097_v0 }
  0x72   : > { %355 = vst [vmem:[#allocation4 + $0x2c] sm:$0xf] %v8097_v0 }
  0x73   : > { %356 = vst [vmem:[#allocation4 + $0x30] sm:$0xf] %v8097_v0 }
  0x74   : > { %357 = vst [vmem:[#allocation4 + $0x34] sm:$0xf] %v8097_v0 }
  0x75   : > { %358 = vst [vmem:[#allocation4 + $0x38] sm:$0xf] %v8097_v0 }
  0x76   : > { %359 = vst [vmem:[#allocation4 + $0x3c] sm:$0xf] %v8097_v0 }
  0x77   : > { %360 = vst [vmem:[#allocation4 + $0x40] sm:$0xf] %v8097_v0 }
  0x78   : > { %361 = vst [vmem:[#allocation4 + $0x44] sm:$0xf] %v8097_v0 }
  0x79   : > { %362 = vst [vmem:[#allocation4 + $0x48] sm:$0xf] %v8097_v0 }
  0x7a   : > { %363 = vst [vmem:[#allocation4 + $0x4c] sm:$0xf] %v8097_v0 }
  0x7b   : > { %364 = vst [vmem:[#allocation4 + $0x50] sm:$0xf] %v8097_v0 }
  0x7c   : > { %365 = vst [vmem:[#allocation4 + $0x54] sm:$0xf] %v8097_v0 }
  0x7d   : > { %366 = vst [vmem:[#allocation4 + $0x58] sm:$0xf] %v8097_v0 }
  0x7e   : > { %367 = vst [vmem:[#allocation4 + $0x5c] sm:$0xf] %v8097_v0 }
  0x7f   : > { %368 = vst [vmem:[#allocation4 + $0x60] sm:$0xf] %v8097_v0 }
  0x80   : > { %369 = vst [vmem:[#allocation4 + $0x64] sm:$0xf] %v8097_v0 }
  0x81   : > { %370 = vst [vmem:[#allocation4 + $0x68] sm:$0xf] %v8097_v0 }
  0x82   : > { %371 = vst [vmem:[#allocation4 + $0x6c] sm:$0xf] %v8097_v0 }
  0x83   : > { %372 = vst [vmem:[#allocation4 + $0x70] sm:$0xf] %v8097_v0 }
  0x84   : > { %373 = vst [vmem:[#allocation4 + $0x74] sm:$0xf] %v8097_v0 }
  0x85   : > { %374 = vst [vmem:[#allocation4 + $0x78] sm:$0xf] %v8097_v0 }
  0x86   : > { %375 = vst [vmem:[#allocation4 + $0x7c] sm:$0xf] %v8097_v0 }
  0x87   : > { %376 = vst [vmem:[#allocation4 + $0x80] sm:$0xf] %v8097_v0 }
  0x88   : > { %377 = vst [vmem:[#allocation4 + $0x84] sm:$0xf] %v8097_v0 }
  0x89   : > { %378 = vst [vmem:[#allocation4 + $0x88] sm:$0xf] %v8097_v0 }
  0x8a   : > { %379 = vst [vmem:[#allocation4 + $0x8c] sm:$0xf] %v8097_v0 }
  0x8b   : > { %380 = vst [vmem:[#allocation4 + $0x90] sm:$0xf] %v8097_v0 }
  0x8c   : > { %381 = vst [vmem:[#allocation4 + $0x94] sm:$0xf] %v8097_v0 }
  0x8d   : > { %382 = vst [vmem:[#allocation4 + $0x98] sm:$0xf] %v8097_v0 }
  0x8e   : > { %383 = vst [vmem:[#allocation4 + $0x9c] sm:$0xf] %v8097_v0 }
  0x8f   : > { %385 = vst.msk [vmem:[#allocation2] sm:$0xe] %vm384_vm0, %v8097_v0 }
  0x90   : > { %387 = vst.msk [vmem:[#allocation2 + $0x4] sm:$0xf] %vm386_vm1, %v8097_v0 }
  0x91   : > { %393 = vst.msk [vmem:[#allocation2 + $0x18] sm:$0xe] %vm384_vm0, %v8097_v0 }
  0x92   : > { %394 = vst.msk [vmem:[#allocation2 + $0x1c] sm:$0xf] %vm386_vm1, %v8097_v0 }
  0x93   : > { %396 = vst.msk [vmem:[#allocation2 + $0x24] sm:$0xe] %vm384_vm0, %v8097_v0 }
  0x94   : > { %397 = vst.msk [vmem:[#allocation2 + $0x28] sm:$0xf] %vm386_vm1, %v8097_v0 }
  0x95   : > { %400 = vst.msk [vmem:[#allocation2 + $0xf0] sm:$0xe] %vm384_vm0, %v8097_v0 }
  0x96   : > { %401 = vst.msk [vmem:[#allocation2 + $0xf4] sm:$0xf] %vm386_vm1, %v8097_v0  ;;  %v736_v7 = vld [vmem:[#allocation2] sm:$0xe] }
  0x97   : > { %403 = vst.msk [vmem:[#allocation2 + $0xfc] sm:$0xe] %vm384_vm0, %v8097_v0  ;;  %v737_v9 = vld [vmem:[#allocation2 + $0x4] sm:$0xf]  ;;  %v7454_v10 = vrot.slane %v736_v7, 9 }
  0x98   : > { %404 = vst.msk [vmem:[#allocation2 + $0x100] sm:$0xf] %vm386_vm1, %v8097_v0  ;;  %v861_v12 = vrot.slane %v737_v9, 5  ;;  %v742_v13 = vld [vmem:[#allocation2 + $0x18] sm:$0xe]  ;;  %v502_v9 = vsel %vm8378_vm8, %v500_v56, %v501_v53 }
  0x99   : > { %406 = vst.msk [vmem:[#allocation2 + $0x108] sm:$0xe] %vm384_vm0, %v8097_v0  ;;  %v743_v16 = vld [vmem:[#allocation2 + $0x1c] sm:$0xf]  ;;  %v7456_v17 = vrot.slane %v742_v13, 9  ;;  %v508_v13 = vrot.slane %v506_v1, 4 }
  0x9a   : > { %407 = vst.msk [vmem:[#allocation2 + $0x10c] sm:$0xf] %vm386_vm1, %v8097_v0  ;;  %v862_v18 = vsel %vm8168_vm4, %v7454_v10, %v861_v12  ;;  %v875_v19 = vrot.slane %v743_v16, 5  ;;  %v863_v36 = vrot.slane %v861_v12, 4  ;;  %v745_v52 = vld [vmem:[#allocation2 + $0x24] sm:$0xe]  ;;  %v507_v12 = vsel %vm8378_vm8, %v505_v63, %v506_v1 }
  0x9b   : > { %409 = vst.msk [vmem:[#allocation2 + $0x114] sm:$0xe] %vm384_vm0, %v8097_v0  ;;  %999 = vrot.lane.b32.xlu0 %v862_v18, %s8098_s22  ;;  %v8368_v30 = vld [vmem:[#allocation2 + $0x28] sm:$0xf]  ;;  %v426_v7 = vld [vmem:[%s8318_s26 + $0x38] sm:$0xf] }
  0x9c   : > { %410 = vst.msk [vmem:[#allocation2 + $0x118] sm:$0xf] %vm386_vm1, %v8097_v0  ;;  %v876_v23 = vsel %vm8168_vm4, %v7456_v17, %v875_v19  ;;  %v882_v40 = vrot.slane %v8368_v30, 5  ;;  %v877_v44 = vrot.slane %v875_v19, 4  ;;  %v7457_v8 = vrot.slane %v745_v52, 9 }
  0x9d   : > { %392 = vst.msk [vmem:[#allocation2 + $0x14] sm:$0x1] %vm388_vm5, %v8097_v0  ;;  %1007 = vrot.lane.b32.xlu2 %v876_v23, %s8098_s22  ;;  %v495_v10 = vrot.slane %v494_v61, 4  ;;  %v514_v16 = vrot.slane %v426_v7, 7  ;;  %v488_v23 = vrot.slane %v486_v29, 4 }
  0x9e   : > { %389 = vst.msk [vmem:[#allocation2 + $0x8] sm:$0x1] %vm388_vm5, %v8097_v0  ;;  %v884_v4 = vrot.slane %v882_v40, 4  ;;  %v425_v53 = vld [vmem:[%s8318_s26 + $0x34] sm:$0xf] }
  0x9f   : > { %395 = vst.msk [vmem:[#allocation2 + $0x20] sm:$0x1] %vm388_vm5, %v8097_v0  ;;  %v497_v15 = vsel %vm8378_vm8, %v495_v10, %v496_v11 }
  0xa0   : > { %398 = vst.msk [vmem:[#allocation2 + $0x2c] sm:$0x1] %vm388_vm5, %v8097_v0 }
  0xa1   : > { %402 = vst.msk [vmem:[#allocation2 + $0xf8] sm:$0x1] %vm388_vm5, %v8097_v0 }
  0xa2   : > { %405 = vst.msk [vmem:[#allocation2 + $0x104] sm:$0x1] %vm388_vm5, %v8097_v0 }
  0xa3   : > { %408 = vst.msk [vmem:[#allocation2 + $0x110] sm:$0x1] %vm388_vm5, %v8097_v0 }
  0xa4   : > { %v741_v47 = vld [vmem:[#allocation2 + $0x14] sm:$0x1]  ;;  %411 = vst.msk [vmem:[#allocation2 + $0x11c] sm:$0x1] %vm388_vm5, %v8097_v0 }
  0xa5   : > { %v871_v50 = vrot.slane %v741_v47, 5  ;;  %v738_v51 = vld [vmem:[#allocation2 + $0x8] sm:$0x1]  ;;  %611 = vst.msk [vmem:[#allocation2 + $0x3c] sm:$0xe] %vm384_vm0, %v484_v20  ;;  %v883_v20 = vsel %vm8168_vm4, %v7457_v8, %v882_v40 }
  0xa6   : > { %v864_v54 = vrot.slane %v738_v51, 5  ;;  %612 = vst.msk [vmem:[#allocation2 + $0x40] sm:$0xf] %vm386_vm1, %v487_v43  ;;  %v744_v55 = vld [vmem:[#allocation2 + $0x20] sm:$0x1] }
  0xa7   : > { %v872_v57 = vsel %vm8168_vm4, %v870_v32, %v871_v50  ;;  %v747_v58 = vld [vmem:[#allocation2 + $0x2c] sm:$0x1]  ;;  %v878_v59 = vrot.slane %v744_v55, 5  ;;  %615 = vst.msk [vmem:[#allocation2 + $0x4c] sm:$0xf] %vm386_vm1, %v492_v48 }
  0xa8   : > { %1005 = vrot.lane.b32.xlu1 %v872_v57, %s8098_s22  ;;  %v865_v62 = vsel %vm8168_vm4, %v863_v36, %v864_v54  ;;  %616 = vst.msk [vmem:[#allocation2 + $0x50] sm:$0x1] %vm388_vm5, %v493_v37  ;;  %v885_v5 = vrot.slane %v747_v58, 5  ;;  %v429_v48 = vld [vmem:[%s8318_s26 + $0x44] sm:$0xf] }
  0xa9   : > { %1001 = vrot.lane.b32.xlu0 %v865_v62, %s8098_s22  ;;  %v879_v6 = vsel %vm8168_vm4, %v877_v44, %v878_v59  ;;  %614 = vst.msk [vmem:[#allocation2 + $0x48] sm:$0xe] %vm384_vm0, %v489_v24  ;;  %v428_v44 = vld [vmem:[%s8318_s26 + $0x40] sm:$0xf]  ;;  %v521_v54 = vrot.slane %v429_v48, 7 }
  0xaa   : > { %1009 = vrot.lane.b32.xlu2 %v879_v6, %s8098_s22  ;;  %609 = vst.msk [vmem:[#allocation2 + $0x34] sm:$0xf] %vm386_vm1, %v482_v60  ;;  %v886_v17 = vsel %vm8168_vm4, %v884_v4, %v885_v5  ;;  %v519_v52 = vrot.slane %v428_v44, 7  ;;  %v424_v57 = vld [vmem:[%s8318_s26 + $0x30] sm:$0xf] }
  0xab   : > { %610 = vst.msk [vmem:[#allocation2 + $0x38] sm:$0x1] %vm388_vm5, %v483_v39  ;;  %v509_v1 = vrot.slane %v424_v57, 7  ;;  %v431_v48 = vld [vmem:[%s8318_s26 + $0x4c] sm:$0xf] }
  0xac   : > { %608 = vst.msk [vmem:[#allocation2 + $0x30] sm:$0xe] %vm384_vm0, %v479_v26  ;;  %v751_v18 = vld [vmem:[#allocation2 + $0x3c] sm:$0xe]  ;;  %v515_v26 = vrot.slane %v514_v16, 4  ;;  %v520_v60 = vrot.slane %v519_v52, 4 }
  0xad   : > { %v752_v19 = vld [vmem:[#allocation2 + $0x40] sm:$0xf]  ;;  %620 = vst.msk [vmem:[#allocation2 + $0x60] sm:$0xe] %vm384_vm0, %v499_v42  ;;  %v7459_v24 = vrot.slane %v751_v18, 9  ;;  %v510_v11 = vrot.slane %v509_v1, 4 }
  0xae   : > { %621 = vst.msk [vmem:[#allocation2 + $0x64] sm:$0xf] %vm386_vm1, %v502_v9  ;;  %v896_v25 = vrot.slane %v752_v19, 5  ;;  %v755_v28 = vld [vmem:[#allocation2 + $0x4c] sm:$0xf]  ;;  %v517_v35 = vsel %vm8378_vm8, %v515_v26, %v516_v27  ;;  %v522_v8 = vsel %vm8378_vm8, %v520_v60, %v521_v54 }
  0xaf   : > { %624 = vst.msk [vmem:[#allocation2 + $0x70] sm:$0xf] %vm386_vm1, %v507_v12  ;;  %v903_v38 = vrot.slane %v755_v28, 5  ;;  %v756_v39 = vld [vmem:[#allocation2 + $0x50] sm:$0x1] }
  0xb0   : > { %1013 = vrot.lane.b32.xlu1 %v886_v17, %s8098_s22  ;;  %625 = vst.msk [vmem:[#allocation2 + $0x74] sm:$0x1] %vm388_vm5, %v508_v13  ;;  %v897_v37 = vsel %vm8168_vm4, %v7459_v24, %v896_v25  ;;  %v754_v43 = vld [vmem:[#allocation2 + $0x48] sm:$0xe]  ;;  %v898_v51 = vrot.slane %v896_v25, 4  ;;  %v511_v13 = vrot.slane %v425_v53, 7 }
  0xb1   : > { %1011 = vrot.lane.b32.xlu0 %v883_v20, %s8098_s22  ;;  %v749_v30 = vld [vmem:[#allocation2 + $0x34] sm:$0xf]  ;;  %623 = vst.msk [vmem:[#allocation2 + $0x6c] sm:$0xe] %vm384_vm0, %v504_v46  ;;  %v905_v45 = vrot.slane %v903_v38, 4  ;;  %v906_v46 = vrot.slane %v756_v39, 5 }
  0xb2   : > { %v750_v31 = vld [vmem:[#allocation2 + $0x38] sm:$0x1]  ;;  %v889_v22 = vrot.slane %v749_v30, 5  ;;  %618 = vst.msk [vmem:[#allocation2 + $0x58] sm:$0xf] %vm386_vm1, %v497_v15  ;;  %v7460_v50 = vrot.slane %v754_v43, 9  ;;  %v512_v20 = vsel %vm8378_vm8, %v510_v11, %v511_v13 }
  0xb3   : > { %v892_v29 = vrot.slane %v750_v31, 5  ;;  %v748_v32 = vld [vmem:[#allocation2 + $0x30] sm:$0xe]  ;;  %619 = vst.msk [vmem:[#allocation2 + $0x5c] sm:$0x1] %vm388_vm5, %v498_v21  ;;  %v907_v62 = vsel %vm8168_vm4, %v905_v45, %v906_v46  ;;  %v513_v15 = vrot.slane %v511_v13, 4 }
  0xb4   : > { %v891_v34 = vrot.slane %v889_v22, 4  ;;  %v7458_v36 = vrot.slane %v748_v32, 9  ;;  %617 = vst.msk [vmem:[#allocation2 + $0x54] sm:$0xe] %vm384_vm0, %v494_v61  ;;  %v760_v49 = vld [vmem:[#allocation2 + $0x60] sm:$0xe]  ;;  %v904_v6 = vsel %vm8168_vm4, %v7460_v50, %v903_v38 }
  0xb5   : > { %613 = vst.msk [vmem:[#allocation2 + $0x44] sm:$0x1] %vm388_vm5, %v488_v23  ;;  %v8486_v55 = vld [vmem:[#allocation2 + $0x64] sm:$0xf]  ;;  %v523_v61 = vrot.slane %v521_v54, 4  ;;  %v7462_v4 = vrot.slane %v760_v49, 9 }
  0xb6   : > { %v893_v40 = vsel %vm8168_vm4, %v891_v34, %v892_v29  ;;  %v890_v42 = vsel %vm8168_vm4, %v7458_v36, %v889_v22  ;;  %629 = vst.msk [vmem:[#allocation2 + $0x84] sm:$0xe] %vm384_vm0, %v514_v16  ;;  %v917_v5 = vrot.slane %v8486_v55, 5  ;;  %v8500_v9 = vld [vmem:[#allocation2 + $0x70] sm:$0xf] }
  0xb7   : > { %1015 = vrot.lane.b32.xlu2 %v890_v42, %s8098_s22  ;;  %630 = vst.msk [vmem:[#allocation2 + $0x88] sm:$0xf] %vm386_vm1, %v517_v35  ;;  %v432_v16 = vld [vmem:[%s8318_s26 + $0x50] sm:$0xf]  ;;  %v8513_v18 = vld [vmem:[%s8318_s26 + $0x54] sm:$0xf] }
  0xb8   : > { %1019 = vrot.lane.b32.xlu1 %v897_v37, %s8098_s22  ;;  %632 = vst.msk [vmem:[#allocation2 + $0x90] sm:$0xe] %vm384_vm0, %v519_v52  ;;  %v529_v19 = vrot.slane %v432_v16, 7  ;;  %v531_v21 = vrot.slane %v8513_v18, 7  ;;  %v434_v23 = vld [vmem:[%s8318_s26 + $0x58] sm:$0xf]  ;;  %v918_v22 = vsel %vm8168_vm4, %v7462_v4, %v917_v5 }
  0xb9   : > { %1017 = vrot.lane.b32.xlu0 %v893_v40, %s8098_s22  ;;  %v758_v47 = vld [vmem:[#allocation2 + $0x58] sm:$0xf]  ;;  %634 = vst.msk [vmem:[#allocation2 + $0x98] sm:$0x1] %vm388_vm5, %v523_v61  ;;  %v435_v24 = vld [vmem:[%s8318_s26 + $0x5c] sm:$0xf] }
  0xba   : > { %v759_v56 = vld [vmem:[#allocation2 + $0x5c] sm:$0x1]  ;;  %v910_v58 = vrot.slane %v758_v47, 5  ;;  %633 = vst.msk [vmem:[#allocation2 + $0x94] sm:$0xf] %vm386_vm1, %v522_v8  ;;  %v530_v25 = vrot.slane %v529_v19, 4 }
  0xbb   : > { %v757_v7 = vld [vmem:[#allocation2 + $0x54] sm:$0xe]  ;;  %v913_v10 = vrot.slane %v759_v56, 5  ;;  %626 = vst.msk [vmem:[#allocation2 + $0x78] sm:$0xe] %vm384_vm0, %v509_v1  ;;  %v534_v26 = vrot.slane %v434_v23, 7 }
  0xbc   : > { %v753_v59 = vld [vmem:[#allocation2 + $0x44] sm:$0x1]  ;;  %v912_v12 = vrot.slane %v910_v58, 4  ;;  %v7461_v17 = vrot.slane %v757_v7, 9  ;;  %622 = vst.msk [vmem:[#allocation2 + $0x68] sm:$0x1] %vm388_vm5, %v503_v2  ;;  %v532_v34 = vsel %vm8378_vm8, %v530_v25, %v531_v21 }
  0xbd   : > { %v899_v63 = vrot.slane %v753_v59, 5  ;;  %627 = vst.msk [vmem:[#allocation2 + $0x7c] sm:$0xf] %vm386_vm1, %v512_v20  ;;  %v536_v28 = vrot.slane %v435_v24, 7  ;;  %v924_v30 = vrot.slane %v8500_v9, 5  ;;  %v535_v36 = vrot.slane %v534_v26, 4 }
  0xbe   : > { %628 = vst.msk [vmem:[#allocation2 + $0x80] sm:$0x1] %vm388_vm5, %v513_v15  ;;  %v430_v31 = vld [vmem:[%s8318_s26 + $0x48] sm:$0xf]  ;;  %v765_v29 = vld [vmem:[#allocation2 + $0x74] sm:$0x1]  ;;  %v911_v32 = vsel %vm8168_vm4, %v7461_v17, %v910_v58  ;;  %v914_v35 = vsel %vm8168_vm4, %v912_v12, %v913_v10 }
  0xbf   : > { %v900_v41 = vsel %vm8168_vm4, %v898_v51, %v899_v63  ;;  %638 = vst.msk [vmem:[#allocation2 + $0xa8] sm:$0xe] %vm384_vm0, %v529_v19  ;;  %v538_v37 = vrot.slane %v536_v28, 4  ;;  %v763_v38 = vld [vmem:[#allocation2 + $0x6c] sm:$0xe]  ;;  %v537_v39 = vsel %vm8378_vm8, %v535_v36, %v536_v28  ;;  %v524_v40 = vrot.slane %v430_v31, 7 }
  0xc0   : > { %1025 = vrot.lane.b32.xlu1 %v907_v62, %s8098_s22  ;;  %1021 = vrot.lane.b32.xlu2 %v900_v41, %s8098_s22  ;;  %639 = vst.msk [vmem:[#allocation2 + $0xac] sm:$0xf] %vm386_vm1, %v532_v34  ;;  %v518_v42 = vrot.slane %v516_v27, 4  ;;  %v926_v43 = vrot.slane %v924_v30, 4  ;;  %v927_v44 = vrot.slane %v765_v29, 5  ;;  %v919_v46 = vrot.slane %v917_v5, 4 }
  0xc1   : > { %1023 = vrot.lane.b32.xlu0 %v904_v6, %s8098_s22  ;;  %641 = vst.msk [vmem:[#allocation2 + $0xb4] sm:$0xe] %vm384_vm0, %v534_v26  ;;  %v7463_v49 = vrot.slane %v763_v38, 9  ;;  %v525_v14 = vrot.slane %v524_v40, 4  ;;  %v526_v27 = vrot.slane %v431_v48, 7 }
  0xc2   : > { %642 = vst.msk [vmem:[#allocation2 + $0xb8] sm:$0xf] %vm386_vm1, %v537_v39  ;;  %v769_v51 = vld [vmem:[#allocation2 + $0x84] sm:$0xe]  ;;  %v438_v55 = vld [vmem:[%s8318_s26 + $0x68] sm:$0xf]  ;;  %v928_v56 = vsel %vm8168_vm4, %v926_v43, %v927_v44 }
  0xc3   : > { %v762_v45 = vld [vmem:[#allocation2 + $0x68] sm:$0x1]  ;;  %643 = vst.msk [vmem:[#allocation2 + $0xbc] sm:$0x1] %vm388_vm5, %v538_v37  ;;  %v527_v52 = vsel %vm8378_vm8, %v525_v14, %v526_v27  ;;  %v528_v54 = vrot.slane %v526_v27, 4  ;;  %v925_v60 = vsel %vm8168_vm4, %v7463_v49, %v924_v30  ;;  %v544_v1 = vrot.slane %v438_v55, 7 }
  0xc4   : > { %v920_v47 = vrot.slane %v762_v45, 5  ;;  %635 = vst.msk [vmem:[#allocation2 + $0x9c] sm:$0xe] %vm384_vm0, %v524_v40  ;;  %v767_v50 = vld [vmem:[#allocation2 + $0x7c] sm:$0xf]  ;;  %v7465_v5 = vrot.slane %v769_v51, 9 }
  0xc5   : > { %631 = vst.msk [vmem:[#allocation2 + $0x8c] sm:$0x1] %vm388_vm5, %v518_v42  ;;  %v770_v57 = vld [vmem:[#allocation2 + $0x88] sm:$0xf]  ;;  %v766_v59 = vld [vmem:[#allocation2 + $0x78] sm:$0xe] }
  0xc6   : > { %v921_v58 = vsel %vm8168_vm4, %v919_v46, %v920_v47  ;;  %636 = vst.msk [vmem:[#allocation2 + $0xa0] sm:$0xf] %vm386_vm1, %v527_v52  ;;  %v931_v61 = vrot.slane %v767_v50, 5  ;;  %v8561_v62 = vld [vmem:[%s8318_s26 + $0x6c] sm:$0xf]  ;;  %v938_v9 = vrot.slane %v770_v57, 5 }
  0xc7   : > { %637 = vst.msk [vmem:[#allocation2 + $0xa4] sm:$0x1] %vm388_vm5, %v528_v54  ;;  %v768_v63 = vld [vmem:[#allocation2 + $0x80] sm:$0x1]  ;;  %v546_v2 = vrot.slane %v8561_v62, 7  ;;  %v7464_v10 = vrot.slane %v766_v59, 9 }
  0xc8   : > { %1031 = vrot.lane.b32.xlu1 %v918_v22, %s8098_s22  ;;  %1027 = vrot.lane.b32.xlu2 %v911_v32, %s8098_s22  ;;  %v440_v4 = vld [vmem:[%s8318_s26 + $0x70] sm:$0xf]  ;;  %v773_v6 = vld [vmem:[#allocation2 + $0x94] sm:$0xf]  ;;  %v545_v41 = vrot.slane %v544_v1, 4  ;;  %v933_v11 = vrot.slane %v931_v61, 4  ;;  %v939_v23 = vsel %vm8168_vm4, %v7465_v5, %v938_v9 }
  0xc9   : > { %1029 = vrot.lane.b32.xlu0 %v914_v35, %s8098_s22  ;;  %v441_v7 = vld [vmem:[%s8318_s26 + $0x74] sm:$0xf]  ;;  %v549_v8 = vrot.slane %v440_v4, 7  ;;  %647 = vst.msk [vmem:[#allocation2 + $0xcc] sm:$0xe] %vm384_vm0, %v544_v1  ;;  %v934_v12 = vrot.slane %v768_v63, 5  ;;  %v932_v26 = vsel %vm8168_vm4, %v7464_v10, %v931_v61 }
  0xca   : > { %v551_v53 = vrot.slane %v441_v7, 7  ;;  %v547_v16 = vsel %vm8378_vm8, %v545_v41, %v546_v2  ;;  %v436_v19 = vld [vmem:[%s8318_s26 + $0x60] sm:$0xf]  ;;  %v437_v20 = vld [vmem:[%s8318_s26 + $0x64] sm:$0xf]  ;;  %v945_v25 = vrot.slane %v773_v6, 5 }
  0xcb   : > { %v550_v13 = vrot.slane %v549_v8, 4  ;;  %650 = vst.msk [vmem:[#allocation2 + $0xd8] sm:$0xe] %vm384_vm0, %v549_v8  ;;  %v774_v24 = vld [vmem:[#allocation2 + $0x98] sm:$0x1]  ;;  %v935_v28 = vsel %vm8168_vm4, %v933_v11, %v934_v12  ;;  %v539_v31 = vrot.slane %v436_v19, 7 }
  0xcc   : > { %v553_v17 = vrot.slane %v551_v53, 4  ;;  %648 = vst.msk [vmem:[#allocation2 + $0xd0] sm:$0xf] %vm386_vm1, %v547_v16  ;;  %v771_v30 = vld [vmem:[#allocation2 + $0x8c] sm:$0x1]  ;;  %v541_v22 = vrot.slane %v437_v20, 7 }
  0xcd   : > { %v552_v15 = vsel %vm8378_vm8, %v550_v13, %v551_v53  ;;  %v772_v29 = vld [vmem:[#allocation2 + $0x90] sm:$0xe]  ;;  %v533_v32 = vrot.slane %v531_v21, 4  ;;  %v540_v34 = vrot.slane %v539_v31, 4  ;;  %644 = vst.msk [vmem:[#allocation2 + $0xc0] sm:$0xe] %vm384_vm0, %v539_v31 }
  0xce   : > { %651 = vst.msk [vmem:[#allocation2 + $0xdc] sm:$0xf] %vm386_vm1, %v552_v15  ;;  %v543_v36 = vrot.slane %v541_v22, 4  ;;  %v947_v35 = vrot.slane %v945_v25, 4  ;;  %v948_v37 = vrot.slane %v774_v24, 5  ;;  %v940_v38 = vrot.slane %v938_v9, 4 }
  0xcf   : > { %652 = vst.msk [vmem:[#allocation2 + $0xe0] sm:$0x1] %vm388_vm5, %v553_v17  ;;  %v941_v39 = vrot.slane %v771_v30, 5  ;;  %v7466_v40 = vrot.slane %v772_v29, 9  ;;  %v542_v18 = vsel %vm8378_vm8, %v540_v34, %v541_v22  ;;  %v776_v21 = vld [vmem:[#allocation2 + $0xa0] sm:$0xf] }
  0xd0   : > { %1037 = vrot.lane.b32.xlu1 %v928_v56, %s8098_s22  ;;  %1033 = vrot.lane.b32.xlu2 %v921_v58, %s8098_s22  ;;  %640 = vst.msk [vmem:[#allocation2 + $0xb0] sm:$0x1] %vm388_vm5, %v533_v32  ;;  %v949_v42 = vsel %vm8168_vm4, %v947_v35, %v948_v37  ;;  %v778_v43 = vld [vmem:[#allocation2 + $0xa8] sm:$0xe]  ;;  %v442_v45 = vld [vmem:[%s8318_s26 + $0x78] sm:$0xf] }
  0xd1   : > { %1035 = vrot.lane.b32.xlu0 %v925_v60, %s8098_s22  ;;  %646 = vst.msk [vmem:[#allocation2 + $0xc8] sm:$0x1] %vm388_vm5, %v543_v36  ;;  %v942_v44 = vsel %vm8168_vm4, %v940_v38, %v941_v39  ;;  %v779_v46 = vld [vmem:[#allocation2 + $0xac] sm:$0xf]  ;;  %v946_v47 = vsel %vm8168_vm4, %v7466_v40, %v945_v25  ;;  %v952_v48 = vrot.slane %v776_v21, 5  ;;  %v554_v27 = vrot.slane %v442_v45, 7 }
  0xd2   : > { %645 = vst.msk [vmem:[#allocation2 + $0xc4] sm:$0xf] %vm386_vm1, %v542_v18  ;;  %v775_v49 = vld [vmem:[#allocation2 + $0x9c] sm:$0xe]  ;;  %v777_v14 = vld [vmem:[#allocation2 + $0xa4] sm:$0x1] }
  0xd3   : > { %v443_v50 = vld [vmem:[%s8318_s26 + $0x7c] sm:$0xf]  ;;  %v7468_v51 = vrot.slane %v778_v43, 9  ;;  %v959_v52 = vrot.slane %v779_v46, 5  ;;  %v7467_v54 = vrot.slane %v775_v49, 9  ;;  %v954_v56 = vrot.slane %v952_v48, 4 }
  0xd4   : > { %v782_v55 = vld [vmem:[#allocation2 + $0xb8] sm:$0xf]  ;;  %v955_v57 = vrot.slane %v777_v14, 5  ;;  %v555_v58 = vrot.slane %v554_v27, 4  ;;  %v556_v59 = vrot.slane %v443_v50, 7  ;;  %v548_v60 = vrot.slane %v546_v2, 4 }
  0xd5   : > { %653 = vst.msk [vmem:[#allocation2 + $0xe4] sm:$0xe] %vm384_vm0, %v554_v27  ;;  %v960_v61 = vsel %vm8168_vm4, %v7468_v51, %v959_v52  ;;  %v783_v63 = vld [vmem:[#allocation2 + $0xbc] sm:$0x1]  ;;  %v966_v1 = vrot.slane %v782_v55, 5  ;;  %v953_v4 = vsel %vm8168_vm4, %v7467_v54, %v952_v48  ;;  %v961_v10 = vrot.slane %v959_v52, 4 }
  0xd6   : > { %v557_v5 = vsel %vm8378_vm8, %v555_v58, %v556_v59  ;;  %v956_v6 = vsel %vm8168_vm4, %v954_v56, %v955_v57  ;;  %v558_v8 = vrot.slane %v556_v59, 4  ;;  %v781_v62 = vld [vmem:[#allocation2 + $0xb4] sm:$0xe]  ;;  %649 = vst.msk [vmem:[#allocation2 + $0xd4] sm:$0x1] %vm388_vm5, %v548_v60  ;;  %v969_v9 = vrot.slane %v783_v63, 5 }
  0xd7   : > { %v780_v7 = vld [vmem:[#allocation2 + $0xb0] sm:$0x1]  ;;  %654 = vst.msk [vmem:[#allocation2 + $0xe8] sm:$0xf] %vm386_vm1, %v557_v5  ;;  %v968_v2 = vrot.slane %v966_v1, 4  ;;  %v7469_v53 = vrot.slane %v781_v62, 9 }
  0xd8   : > { %1043 = vrot.lane.b32.xlu1 %v939_v23, %s8098_s22  ;;  %1039 = vrot.lane.b32.xlu2 %v932_v26, %s8098_s22  ;;  %655 = vst.msk [vmem:[#allocation2 + $0xec] sm:$0x1] %vm388_vm5, %v558_v8  ;;  %v962_v41 = vrot.slane %v780_v7, 5  ;;  %v787_v13 = vld [vmem:[#allocation2 + $0xcc] sm:$0xe] }
  0xd9   : > { %1041 = vrot.lane.b32.xlu0 %v935_v28, %s8098_s22  ;;  %v785_v11 = vld [vmem:[#allocation2 + $0xc4] sm:$0xf]  ;;  %v970_v12 = vsel %vm8168_vm4, %v968_v2, %v969_v9  ;;  %v788_v17 = vld [vmem:[#allocation2 + $0xd0] sm:$0xf]  ;;  %v967_v19 = vsel %vm8168_vm4, %v7469_v53, %v966_v1  ;;  %v784_v15 = vld [vmem:[#allocation2 + $0xc0] sm:$0xe]  ;;  %v1004_v28 = vpop.permute.xlu1 %1003 }
  0xda   : > { %v963_v16 = vsel %vm8168_vm4, %v961_v10, %v962_v41  ;;  %v973_v20 = vrot.slane %v785_v11, 5  ;;  %v786_v23 = vld [vmem:[#allocation2 + $0xc8] sm:$0x1]  ;;  %v7471_v24 = vrot.slane %v787_v13, 9  ;;  %v791_v25 = vld [vmem:[#allocation2 + $0xdc] sm:$0xf] }
  0xdb   : > { %v660_v26 = vld [vmem:[#allocation2 + $0x18] sm:$0xf]  ;;  %v980_v30 = vrot.slane %v788_v17, 5  ;;  %v7470_v31 = vrot.slane %v784_v15, 9  ;;  %v658_v22 = vld [vmem:[#allocation2 + $0xc] sm:$0xf] }
  0xdc   : > { %700 = vst.msk [vmem:[#allocation4 + $0x10] sm:$0xf] %vm386_vm1, %v660_v26  ;;  %v975_v29 = vrot.slane %v973_v20, 4  ;;  %v976_v32 = vrot.slane %v786_v23, 5  ;;  %v987_v34 = vrot.slane %v791_v25, 5 }
  0xdd   : > { %698 = vst.msk [vmem:[#allocation4 + $0x8] sm:$0xf] %vm386_vm1, %v658_v22  ;;  %v792_v36 = vld [vmem:[#allocation2 + $0xe0] sm:$0x1]  ;;  %v981_v35 = vsel %vm8168_vm4, %v7471_v24, %v980_v30  ;;  %v974_v37 = vsel %vm8168_vm4, %v7470_v31, %v973_v20  ;;  %v789_v39 = vld [vmem:[#allocation2 + $0xd4] sm:$0x1] }
  0xde   : > { %1122 = vst.msk [vmem:[#allocation4 + $0x8] sm:$0xf] %vm1119_vm9, %v1004_v28  ;;  %v977_v38 = vsel %vm8168_vm4, %v975_v29, %v976_v32  ;;  %v989_v40 = vrot.slane %v987_v34, 4  ;;  %v990_v18 = vrot.slane %v792_v36, 5  ;;  %v790_v21 = vld [vmem:[#allocation2 + $0xd8] sm:$0xe] }
  0xdf   : > { %v661_v43 = vld [vmem:[#allocation2 + $0x1c] sm:$0xf]  ;;  %v982_v45 = vrot.slane %v980_v30, 4  ;;  %v983_v46 = vrot.slane %v789_v39, 5  ;;  %v7472_v48 = vrot.slane %v790_v21, 9 }
  0xe0   : > { %1049 = vrot.lane.b32.xlu1 %v949_v42, %s8098_s22  ;;  %1045 = vrot.lane.b32.xlu2 %v942_v44, %s8098_s22  ;;  %v659_v44 = vld [vmem:[#allocation2 + $0x10] sm:$0xf]  ;;  %701 = vst.msk [vmem:[#allocation4 + $0x14] sm:$0xf] %vm386_vm1, %v661_v43  ;;  %v794_v49 = vld [vmem:[#allocation2 + $0xe8] sm:$0xf]  ;;  %v991_v27 = vsel %vm8168_vm4, %v989_v40, %v990_v18 }
  0xe1   : > { %1047 = vrot.lane.b32.xlu0 %v946_v47, %s8098_s22  ;;  %v656_v47 = vld [vmem:[#allocation2] sm:$0xf]  ;;  %699 = vst.msk [vmem:[#allocation4 + $0xc] sm:$0xf] %vm386_vm1, %v659_v44  ;;  %v1161_v50 = vld [vmem:[#allocation2 + $0x4] sm:$0xf]  ;;  %v984_v51 = vsel %vm8168_vm4, %v982_v45, %v983_v46  ;;  %v988_v54 = vsel %vm8168_vm4, %v7472_v48, %v987_v34 }
  0xe2   : > { %696 = vst.msk [vmem:[#allocation4] sm:$0xf] %vm386_vm1, %v656_v47  ;;  %v1160_v14 = vld [vmem:[#allocation2] sm:$0xc]  ;;  %v793_v52 = vld [vmem:[#allocation2 + $0xe4] sm:$0xe] }
  0xe3   : > { %v994_v55 = vrot.slane %v794_v49, 5  ;;  %v7474_v56 = vrot.slane %v1160_v14, 10  ;;  %v795_v57 = vld [vmem:[#allocation2 + $0xec] sm:$0x1]  ;;  %v1285_v58 = vrot.slane %v1161_v50, 6  ;;  %v7473_v60 = vrot.slane %v793_v52, 9 }
  0xe4   : > { %v1164_v59 = vld [vmem:[#allocation2 + $0x10] sm:$0xf]  ;;  %v657_v63 = vld [vmem:[#allocation2 + $0x4] sm:$0xf]  ;;  %v1165_v2 = vld [vmem:[#allocation2 + $0x14] sm:$0x3] }
  0xe5   : > { %v664_v1 = vld [vmem:[#allocation2 + $0x30] sm:$0xf]  ;;  %v996_v5 = vrot.slane %v994_v55, 4  ;;  %697 = vst.msk [vmem:[#allocation4 + $0x4] sm:$0xf] %vm386_vm1, %v657_v63  ;;  %v1292_v7 = vrot.slane %v1164_v59, 6  ;;  %v1286_v62 = vsel %vm8662_vm12, %v7474_v56, %v1285_v58  ;;  %v995_v9 = vsel %vm8168_vm4, %v7473_v60, %v994_v55 }
  0xe6   : > { %704 = vst.msk [vmem:[#allocation4 + $0x20] sm:$0xf] %vm386_vm1, %v664_v1  ;;  %v1162_v41 = vld [vmem:[#allocation2 + $0x8] sm:$0x3]  ;;  %v1163_v53 = vld [vmem:[#allocation2 + $0xc] sm:$0xc] }
  0xe7   : > { %v1294_v11 = vrot.slane %v1292_v7, 4  ;;  %v662_v13 = vld [vmem:[#allocation2 + $0x24] sm:$0xf]  ;;  %v1287_v17 = vrot.slane %v1285_v58, 4  ;;  %v667_v20 = vld [vmem:[#allocation2 + $0x40] sm:$0xf] }
  0xe8   : > { %1055 = vrot.lane.b32.xlu1 %v960_v61, %s8098_s22  ;;  %1051 = vrot.lane.b32.xlu2 %v953_v4, %s8098_s22  ;;  %v663_v61 = vld [vmem:[#allocation2 + $0x28] sm:$0xf]  ;;  %702 = vst.msk [vmem:[#allocation4 + $0x18] sm:$0xf] %vm386_vm1, %v662_v13  ;;  %v7475_v15 = vrot.slane %v1163_v53, 10 }
  0xe9   : > { %1053 = vrot.lane.b32.xlu0 %v956_v6, %s8098_s22  ;;  %703 = vst.msk [vmem:[#allocation4 + $0x1c] sm:$0xf] %vm386_vm1, %v663_v61  ;;  %v997_v6 = vrot.slane %v795_v57, 5  ;;  %v1167_v23 = vld [vmem:[#allocation2 + $0x1c] sm:$0xf] }
  0xea   : > { %707 = vst.msk [vmem:[#allocation4 + $0x2c] sm:$0xf] %vm386_vm1, %v667_v20  ;;  %v1169_v24 = vld [vmem:[#allocation2 + $0x24] sm:$0xc]  ;;  %v1170_v26 = vld [vmem:[#allocation2 + $0x28] sm:$0xf]  ;;  %v1293_v22 = vsel %vm8662_vm12, %v7475_v15, %v1292_v7 }
  0xeb   : > { %v998_v10 = vsel %vm8168_vm4, %v996_v5, %v997_v6  ;;  %v1166_v31 = vld [vmem:[#allocation2 + $0x18] sm:$0xc]  ;;  %v1299_v29 = vrot.slane %v1167_v23, 6  ;;  %v7477_v32 = vrot.slane %v1169_v24, 10  ;;  %v1168_v34 = vld [vmem:[#allocation2 + $0x20] sm:$0x3] }
  0xec   : > { %v1306_v36 = vrot.slane %v1170_v26, 6  ;;  %v665_v40 = vld [vmem:[#allocation2 + $0x34] sm:$0xf]  ;;  %v1174_v45 = vld [vmem:[#allocation2 + $0x38] sm:$0x3] }
  0xed   : > { %v670_v18 = vld [vmem:[#allocation2 + $0x54] sm:$0xf]  ;;  %v1301_v21 = vrot.slane %v1299_v29, 4  ;;  %705 = vst.msk [vmem:[#allocation4 + $0x24] sm:$0xf] %vm386_vm1, %v665_v40 }
  0xee   : > { %710 = vst.msk [vmem:[#allocation4 + $0x38] sm:$0xf] %vm386_vm1, %v670_v18  ;;  %v1307_v44 = vsel %vm8662_vm12, %v7477_v32, %v1306_v36  ;;  %v1171_v48 = vld [vmem:[#allocation2 + $0x2c] sm:$0x3]  ;;  %v1172_v49 = vld [vmem:[#allocation2 + $0x30] sm:$0xc] }
  0xef   : > { %v672_v50 = vld [vmem:[#allocation2 + $0x60] sm:$0xf]  ;;  %v1309_v52 = vrot.slane %v1171_v48, 6  ;;  %v7478_v56 = vrot.slane %v1172_v49, 10  ;;  %v673_v60 = vld [vmem:[#allocation2 + $0x64] sm:$0xf] }
  0xf0   : > { %1061 = vrot.lane.b32.xlu1 %v970_v12, %s8098_s22  ;;  %1057 = vrot.lane.b32.xlu2 %v963_v16, %s8098_s22  ;;  %v1295_v12 = vrot.slane %v1165_v2, 6  ;;  %v666_v16 = vld [vmem:[#allocation2 + $0x3c] sm:$0xf]  ;;  %712 = vst.msk [vmem:[#allocation4 + $0x40] sm:$0xf] %vm386_vm1, %v672_v50 }
  0xf1   : > { %1059 = vrot.lane.b32.xlu0 %v967_v19, %s8098_s22  ;;  %v1288_v19 = vrot.slane %v1162_v41, 6  ;;  %706 = vst.msk [vmem:[#allocation4 + $0x28] sm:$0xf] %vm386_vm1, %v666_v16  ;;  %v1176_v59 = vld [vmem:[#allocation2 + $0x40] sm:$0xf] }
  0xf2   : > { %v1296_v25 = vsel %vm8662_vm12, %v1294_v11, %v1295_v12  ;;  %v1178_v63 = vld [vmem:[#allocation2 + $0x48] sm:$0xc]  ;;  %v1179_v1 = vld [vmem:[#allocation2 + $0x4c] sm:$0xf]  ;;  %v1320_v7 = vrot.slane %v1176_v59, 6 }
  0xf3   : > { %v1289_v30 = vsel %vm8662_vm12, %v1287_v17, %v1288_v19  ;;  %713 = vst.msk [vmem:[#allocation4 + $0x44] sm:$0xf] %vm386_vm1, %v673_v60  ;;  %v7480_v2 = vrot.slane %v1178_v63, 10  ;;  %v1327_v41 = vrot.slane %v1179_v1, 6  ;;  %v671_v11 = vld [vmem:[#allocation2 + $0x58] sm:$0xf] }
  0xf4   : > { %v1322_v13 = vrot.slane %v1320_v7, 4  ;;  %711 = vst.msk [vmem:[#allocation4 + $0x3c] sm:$0xf] %vm386_vm1, %v671_v11  ;;  %v676_v20 = vld [vmem:[#allocation2 + $0x78] sm:$0xf] }
  0xf5   : > { %v1328_v23 = vsel %vm8662_vm12, %v7480_v2, %v1327_v41  ;;  %v1183_v24 = vld [vmem:[#allocation2 + $0x5c] sm:$0x3]  ;;  %716 = vst.msk [vmem:[#allocation4 + $0x50] sm:$0xf] %vm386_vm1, %v676_v20  ;;  %v1329_v32 = vrot.slane %v1327_v41, 4 }
  0xf6   : > { %v1185_v40 = vld [vmem:[#allocation2 + $0x64] sm:$0xf]  ;;  %v679_v18 = vld [vmem:[#allocation2 + $0x88] sm:$0xf]  ;;  %v682_v59 = vld [vmem:[#allocation2 + $0x9c] sm:$0xf] }
  0xf7   : > { %v1008_v42 = vpop.permute.xlu2 %1007  ;;  %719 = vst.msk [vmem:[#allocation4 + $0x5c] sm:$0xf] %vm386_vm1, %v679_v18  ;;  %v1186_v48 = vld [vmem:[#allocation2 + $0x68] sm:$0x3]  ;;  %v1192_v63 = vld [vmem:[#allocation2 + $0x80] sm:$0x3] }
  0xf8   : > { %1067 = vrot.lane.b32.xlu1 %v981_v35, %s8098_s22  ;;  %1063 = vrot.lane.b32.xlu2 %v974_v37, %s8098_s22  ;;  %1124 = vst.msk [vmem:[#allocation4 + $0x10] sm:$0xf] %vm1119_vm9, %v1008_v42  ;;  %v1173_v35 = vld [vmem:[#allocation2 + $0x34] sm:$0xf]  ;;  %v7476_v37 = vrot.slane %v1166_v31, 10  ;;  %v1302_v42 = vrot.slane %v1168_v34, 6 }
  0xf9   : > { %1065 = vrot.lane.b32.xlu0 %v977_v38, %s8098_s22  ;;  %v669_v38 = vld [vmem:[#allocation2 + $0x4c] sm:$0xf]  ;;  %v1313_v43 = vrot.slane %v1173_v35, 6  ;;  %722 = vst.msk [vmem:[#allocation4 + $0x68] sm:$0xf] %vm386_vm1, %v682_v59 }
  0xfa   : > { %709 = vst.msk [vmem:[#allocation4 + $0x34] sm:$0xf] %vm386_vm1, %v669_v38  ;;  %v1300_v46 = vsel %vm8662_vm12, %v7476_v37, %v1299_v29  ;;  %v1303_v47 = vsel %vm8662_vm12, %v1301_v21, %v1302_v42  ;;  %v678_v29 = vld [vmem:[#allocation2 + $0x84] sm:$0xf]  ;;  %v1187_v42 = vld [vmem:[#allocation2 + $0x6c] sm:$0xc] }
  0xfb   : > { %v1315_v14 = vrot.slane %v1313_v43, 4  ;;  %v1314_v6 = vsel %vm8662_vm12, %v7478_v56, %v1313_v43  ;;  %718 = vst.msk [vmem:[#allocation4 + $0x58] sm:$0xf] %vm386_vm1, %v678_v29  ;;  %v1188_v43 = vld [vmem:[#allocation2 + $0x70] sm:$0xf]  ;;  %v7483_v49 = vrot.slane %v1187_v42, 10 }
  0xfc   : > { %v1348_v50 = vrot.slane %v1188_v43, 6  ;;  %v1344_v56 = vrot.slane %v1186_v48, 6  ;;  %v684_v2 = vld [vmem:[#allocation2 + $0xa8] sm:$0xf]  ;;  %v680_v41 = vld [vmem:[#allocation2 + $0x90] sm:$0xf] }
  0xfd   : > { %724 = vst.msk [vmem:[#allocation4 + $0x70] sm:$0xf] %vm386_vm1, %v684_v2  ;;  %v1196_v20 = vld [vmem:[#allocation2 + $0x90] sm:$0xc]  ;;  %v1201_v42 = vld [vmem:[#allocation2 + $0xa4] sm:$0x3] }
  0xfe   : > { %720 = vst.msk [vmem:[#allocation4 + $0x60] sm:$0xf] %vm386_vm1, %v680_v41  ;;  %v1379_v48 = vrot.slane %v1201_v42, 6  ;;  %v1205_v59 = vld [vmem:[#allocation2 + $0xb4] sm:$0xc] }
  0xff   : > { %v1209_v41 = vld [vmem:[#allocation2 + $0xc4] sm:$0xf]  ;;  %v1211_v42 = vld [vmem:[#allocation2 + $0xcc] sm:$0xc] }
 0x100   : > { %1073 = vrot.lane.b32.xlu1 %v991_v27, %s8098_s22  ;;  %1069 = vrot.lane.b32.xlu2 %v984_v51, %s8098_s22  ;;  %v1316_v27 = vrot.slane %v1174_v45, 6  ;;  %v1308_v51 = vrot.slane %v1306_v36, 4  ;;  %v674_v36 = vld [vmem:[#allocation2 + $0x6c] sm:$0xf] }
 0x101   : > { %1071 = vrot.lane.b32.xlu0 %v988_v54, %s8098_s22  ;;  %v668_v54 = vld [vmem:[#allocation2 + $0x48] sm:$0xf]  ;;  %714 = vst.msk [vmem:[#allocation4 + $0x48] sm:$0xf] %vm386_vm1, %v674_v36 }
 0x102   : > { %708 = vst.msk [vmem:[#allocation4 + $0x30] sm:$0xf] %vm386_vm1, %v668_v54  ;;  %v1317_v61 = vsel %vm8662_vm12, %v1315_v14, %v1316_v27  ;;  %v1310_v5 = vsel %vm8662_vm12, %v1308_v51, %v1309_v52  ;;  %v1191_v14 = vld [vmem:[#allocation2 + $0x7c] sm:$0xf]  ;;  %v681_v27 = vld [vmem:[#allocation2 + $0x94] sm:$0xf] }
 0x103   : > { %721 = vst.msk [vmem:[#allocation4 + $0x64] sm:$0xf] %vm386_vm1, %v681_v27  ;;  %v677_v52 = vld [vmem:[#allocation2 + $0x7c] sm:$0xf]  ;;  %v1355_v60 = vrot.slane %v1191_v14, 6 }
 0x104   : > { %v1010_v8 = vpop.permute.xlu2 %1009  ;;  %717 = vst.msk [vmem:[#allocation4 + $0x54] sm:$0xf] %vm386_vm1, %v677_v52 }
 0x105   : > { %1125 = vst.msk [vmem:[#allocation4 + $0x14] sm:$0xf] %vm1119_vm9, %v1010_v8  ;;  %v1175_v8 = vld [vmem:[#allocation2 + $0x3c] sm:$0xc] }
 0x106   : > { %v7479_v53 = vrot.slane %v1175_v8, 10  ;;  %v1357_v8 = vrot.slane %v1355_v60, 4 }
 0x108   : > { %1423 = vrot.lane.b32.xlu1 %v1286_v62, %s8099_s27  ;;  %1075 = vrot.lane.b32.xlu2 %v995_v9, %s8098_s22  ;;  %v1177_v62 = vld [vmem:[#allocation2 + $0x44] sm:$0x3]  ;;  %v1182_v9 = vld [vmem:[#allocation2 + $0x58] sm:$0xf] }
 0x109   : > { %1077 = vrot.lane.b32.xlu0 %v998_v10, %s8098_s22  ;;  %v675_v10 = vld [vmem:[#allocation2 + $0x70] sm:$0xf]  ;;  %v1323_v16 = vrot.slane %v1177_v62, 6  ;;  %v1334_v15 = vrot.slane %v1182_v9, 6  ;;  %v1358_v62 = vrot.slane %v1192_v63, 6  ;;  %v1350_v9 = vrot.slane %v1348_v50, 4 }
 0x10a   : > { %715 = vst.msk [vmem:[#allocation4 + $0x4c] sm:$0xf] %vm386_vm1, %v675_v10 }
 0x10b   : > { %v1324_v26 = vsel %vm8662_vm12, %v1322_v13, %v1323_v16  ;;  %v1336_v31 = vrot.slane %v1334_v15, 4  ;;  %v1194_v16 = vld [vmem:[#allocation2 + $0x88] sm:$0xf] }
 0x10d   : > { %v1000_v28 = vpop.permute.xlu0 %999 }
 0x10e   : > { %1120 = vst.msk [vmem:[#allocation4] sm:$0xf] %vm1119_vm9, %v1000_v28  ;;  %v1180_v28 = vld [vmem:[#allocation2 + $0x50] sm:$0x3] }
 0x10f   : > { %v1330_v34 = vrot.slane %v1180_v28, 6  ;;  %v1195_v28 = vld [vmem:[#allocation2 + $0x8c] sm:$0x3] }
 0x110   : > { %1429 = vrot.lane.b32.xlu1 %v1296_v25, %s8099_s27  ;;  %1425 = vrot.lane.b32.xlu2 %v1289_v30, %s8099_s27  ;;  %v1321_v25 = vsel %vm8662_vm12, %v7479_v53, %v1320_v7  ;;  %v1181_v30 = vld [vmem:[#allocation2 + $0x54] sm:$0xc]  ;;  %v1190_v7 = vld [vmem:[#allocation2 + $0x78] sm:$0xc] }
 0x111   : > { %1427 = vrot.lane.b32.xlu0 %v1293_v22, %s8099_s27  ;;  %v1016_v39 = vpop.permute.xlu2 %1015  ;;  %v1337_v22 = vrot.slane %v1183_v24, 6  ;;  %v7481_v37 = vrot.slane %v1181_v30, 10  ;;  %v7484_v11 = vrot.slane %v1190_v7, 10  ;;  %v7486_v30 = vrot.slane %v1196_v20, 10 }
 0x112   : > { %1128 = vst.msk [vmem:[#allocation4 + $0x20] sm:$0xf] %vm1119_vm9, %v1016_v39  ;;  %v7489_v7 = vrot.slane %v1205_v59, 10  ;;  %v1217_v59 = vld [vmem:[#allocation2 + $0xe4] sm:$0xc] }
 0x113   : > { %v1338_v21 = vsel %vm8662_vm12, %v1336_v31, %v1337_v22  ;;  %v1335_v45 = vsel %vm8662_vm12, %v7481_v37, %v1334_v15  ;;  %v1197_v15 = vld [vmem:[#allocation2 + $0x94] sm:$0xf]  ;;  %v1356_v24 = vsel %vm8662_vm12, %v7484_v11, %v1355_v60  ;;  %v1200_v31 = vld [vmem:[#allocation2 + $0xa0] sm:$0xf]  ;;  %v687_v22 = vld [vmem:[#allocation2 + $0xb8] sm:$0xf] }
 0x114   : > { %v1369_v29 = vrot.slane %v1197_v15, 6  ;;  %727 = vst.msk [vmem:[#allocation4 + $0x7c] sm:$0xf] %vm386_vm1, %v687_v22  ;;  %v1365_v37 = vrot.slane %v1195_v28, 6  ;;  %v1376_v18 = vrot.slane %v1200_v31, 6 }
 0x115   : > { %v1206_v60 = vld [vmem:[#allocation2 + $0xb8] sm:$0xf]  ;;  %v1210_v15 = vld [vmem:[#allocation2 + $0xc8] sm:$0x3] }
 0x116   : > { %v1371_v14 = vrot.slane %v1369_v29, 4  ;;  %v1400_v28 = vrot.slane %v1210_v15, 6  ;;  %v692_v22 = vld [vmem:[#allocation2 + $0xd8] sm:$0xf]  ;;  %v1588_v15 = vld [vmem:[#allocation2 + $0x28] sm:$0xf] }
 0x117   : > { %732 = vst.msk [vmem:[#allocation4 + $0x90] sm:$0xf] %vm386_vm1, %v692_v22 }
 0x118   : > { %1435 = vrot.lane.b32.xlu1 %v1307_v44, %s8099_s27  ;;  %1431 = vrot.lane.b32.xlu2 %v1300_v46, %s8099_s27  ;;  %v1331_v44 = vsel %vm8662_vm12, %v1329_v32, %v1330_v34  ;;  %v1341_v46 = vrot.slane %v1185_v40, 6  ;;  %v683_v34 = vld [vmem:[#allocation2 + $0xa0] sm:$0xf] }
 0x119   : > { %1433 = vrot.lane.b32.xlu0 %v1303_v47, %s8099_s27  ;;  %v1184_v47 = vld [vmem:[#allocation2 + $0x60] sm:$0xc]  ;;  %723 = vst.msk [vmem:[#allocation4 + $0x6c] sm:$0xf] %vm386_vm1, %v683_v34 }
 0x11a   : > { %v1006_v55 = vpop.permute.xlu1 %1005  ;;  %v1022_v57 = vpop.permute.xlu2 %1021  ;;  %v7482_v51 = vrot.slane %v1184_v47, 10  ;;  %v688_v40 = vld [vmem:[#allocation2 + $0xc0] sm:$0xf]  ;;  %v1378_v47 = vrot.slane %v1376_v18, 4 }
 0x11b   : > { %1123 = vst.msk [vmem:[#allocation4 + $0xc] sm:$0xf] %vm1119_vm9, %v1006_v55  ;;  %v1002_v58 = vpop.permute.xlu0 %1001  ;;  %v1343_v55 = vrot.slane %v1341_v46, 4 }
 0x11c   : > { %1121 = vst.msk [vmem:[#allocation4 + $0x4] sm:$0xf] %vm1119_vm9, %v1002_v58  ;;  %v1342_v1 = vsel %vm8662_vm12, %v7482_v51, %v1341_v46  ;;  %v1199_v46 = vld [vmem:[#allocation2 + $0x9c] sm:$0xc] }
 0x11d   : > { %1131 = vst.msk [vmem:[#allocation4 + $0x2c] sm:$0xf] %vm1119_vm9, %v1022_v57  ;;  %v7487_v52 = vrot.slane %v1199_v46, 10  ;;  %v7491_v46 = vrot.slane %v1211_v42, 10 }
 0x11e   : > { %728 = vst.msk [vmem:[#allocation4 + $0x80] sm:$0xf] %vm386_vm1, %v688_v40  ;;  %v1215_v40 = vld [vmem:[#allocation2 + $0xdc] sm:$0xf] }
 0x11f   : > { %v1377_v63 = vsel %vm8662_vm12, %v7487_v52, %v1376_v18 }
 0x120   : > { %1441 = vrot.lane.b32.xlu1 %v1317_v61, %s8099_s27  ;;  %1437 = vrot.lane.b32.xlu2 %v1310_v5, %s8099_s27  ;;  %v1349_v61 = vsel %vm8662_vm12, %v7483_v49, %v1348_v50  ;;  %v1345_v5 = vsel %vm8662_vm12, %v1343_v55, %v1344_v56  ;;  %v690_v49 = vld [vmem:[#allocation2 + $0xcc] sm:$0xf]  ;;  %v686_v50 = vld [vmem:[#allocation2 + $0xb4] sm:$0xf] }
 0x121   : > { %1439 = vrot.lane.b32.xlu0 %v1314_v6, %s8099_s27  ;;  %v1189_v6 = vld [vmem:[#allocation2 + $0x74] sm:$0x3]  ;;  %730 = vst.msk [vmem:[#allocation4 + $0x88] sm:$0xf] %vm386_vm1, %v690_v49  ;;  %v1203_v56 = vld [vmem:[#allocation2 + $0xac] sm:$0xf] }
 0x122   : > { %v1014_v12 = vpop.permute.xlu1 %1013  ;;  %v1028_v17 = vpop.permute.xlu2 %1027  ;;  %v1351_v10 = vrot.slane %v1189_v6, 6  ;;  %726 = vst.msk [vmem:[#allocation4 + $0x78] sm:$0xf] %vm386_vm1, %v686_v50  ;;  %v1204_v6 = vld [vmem:[#allocation2 + $0xb0] sm:$0x3] }
 0x123   : > { %1127 = vst.msk [vmem:[#allocation4 + $0x1c] sm:$0xf] %vm1119_vm9, %v1014_v12  ;;  %v1012_v19 = vpop.permute.xlu0 %1011  ;;  %v1386_v11 = vrot.slane %v1204_v6, 6  ;;  %v1218_v49 = vld [vmem:[#allocation2 + $0xe8] sm:$0xf]  ;;  %v7493_v6 = vrot.slane %v1217_v59, 10 }
 0x124   : > { %1126 = vst.msk [vmem:[#allocation4 + $0x18] sm:$0xf] %vm1119_vm9, %v1012_v19  ;;  %v1359_v19 = vsel %vm8662_vm12, %v1357_v8, %v1358_v62  ;;  %v693_v8 = vld [vmem:[#allocation2 + $0xdc] sm:$0xf]  ;;  %v1390_v62 = vrot.slane %v1206_v60, 6 }
 0x125   : > { %1134 = vst.msk [vmem:[#allocation4 + $0x38] sm:$0xf] %vm1119_vm9, %v1028_v17  ;;  %v685_v17 = vld [vmem:[#allocation2 + $0xac] sm:$0xf] }
 0x126   : > { %725 = vst.msk [vmem:[#allocation4 + $0x74] sm:$0xf] %vm386_vm1, %v685_v17  ;;  %v1391_v17 = vsel %vm8662_vm12, %v7489_v7, %v1390_v62 }
 0x127   : > { %733 = vst.msk [vmem:[#allocation4 + $0x94] sm:$0xf] %vm386_vm1, %v693_v8 }
 0x128   : > { %1447 = vrot.lane.b32.xlu1 %v1328_v23, %s8099_s27  ;;  %1443 = vrot.lane.b32.xlu2 %v1321_v25, %s8099_s27  ;;  %v1352_v23 = vsel %vm8662_vm12, %v1350_v9, %v1351_v10  ;;  %v1362_v25 = vrot.slane %v1194_v16, 6  ;;  %v689_v9 = vld [vmem:[#allocation2 + $0xc4] sm:$0xf] }
 0x129   : > { %1445 = vrot.lane.b32.xlu0 %v1324_v26, %s8099_s27  ;;  %v1193_v26 = vld [vmem:[#allocation2 + $0x84] sm:$0xc]  ;;  %729 = vst.msk [vmem:[#allocation4 + $0x84] sm:$0xf] %vm386_vm1, %v689_v9 }
 0x12a   : > { %v1020_v35 = vpop.permute.xlu1 %1019  ;;  %v1034_v38 = vpop.permute.xlu2 %1033  ;;  %v7485_v32 = vrot.slane %v1193_v26, 10  ;;  %v694_v16 = vld [vmem:[#allocation2 + $0xe4] sm:$0xf] }
 0x12b   : > { %1130 = vst.msk [vmem:[#allocation4 + $0x28] sm:$0xf] %vm1119_vm9, %v1020_v35  ;;  %v1018_v39 = vpop.permute.xlu0 %1017  ;;  %v1364_v35 = vrot.slane %v1362_v25, 4 }
 0x12c   : > { %1129 = vst.msk [vmem:[#allocation4 + $0x24] sm:$0xf] %vm1119_vm9, %v1018_v39  ;;  %v1363_v43 = vsel %vm8662_vm12, %v7485_v32, %v1362_v25  ;;  %v1208_v25 = vld [vmem:[#allocation2 + $0xc0] sm:$0xc] }
 0x12d   : > { %1137 = vst.msk [vmem:[#allocation4 + $0x44] sm:$0xf] %vm1119_vm9, %v1034_v38  ;;  %v7490_v32 = vrot.slane %v1208_v25, 10 }
 0x12e   : > { %734 = vst.msk [vmem:[#allocation4 + $0x98] sm:$0xf] %vm386_vm1, %v694_v16 }
 0x130   : > { %1453 = vrot.lane.b32.xlu1 %v1338_v21, %s8099_s27  ;;  %1449 = vrot.lane.b32.xlu2 %v1331_v44, %s8099_s27  ;;  %v1370_v21 = vsel %vm8662_vm12, %v7486_v30, %v1369_v29  ;;  %v1366_v44 = vsel %vm8662_vm12, %v1364_v35, %v1365_v37  ;;  %v1392_v30 = vrot.slane %v1390_v62, 4  ;;  %v1212_v35 = vld [vmem:[#allocation2 + $0xd0] sm:$0xf] }
 0x131   : > { %1451 = vrot.lane.b32.xlu0 %v1335_v45, %s8099_s27  ;;  %v1198_v45 = vld [vmem:[#allocation2 + $0x98] sm:$0x3] }
 0x132   : > { %v1026_v54 = vpop.permute.xlu1 %1025  ;;  %v1040_v57 = vpop.permute.xlu2 %1039  ;;  %v1372_v27 = vrot.slane %v1198_v45, 6  ;;  %v1411_v45 = vrot.slane %v1215_v40, 6  ;;  %v1599_v40 = vld [vmem:[#allocation2 + $0x6c] sm:$0xf] }
 0x133   : > { %1133 = vst.msk [vmem:[#allocation4 + $0x34] sm:$0xf] %vm1119_vm9, %v1026_v54  ;;  %v1024_v58 = vpop.permute.xlu0 %1023 }
 0x134   : > { %1132 = vst.msk [vmem:[#allocation4 + $0x30] sm:$0xf] %vm1119_vm9, %v1024_v58  ;;  %v1380_v58 = vsel %vm8662_vm12, %v1378_v47, %v1379_v48  ;;  %v695_v47 = vld [vmem:[#allocation2 + $0xe8] sm:$0xf] }
 0x135   : > { %1140 = vst.msk [vmem:[#allocation4 + $0x50] sm:$0xf] %vm1119_vm9, %v1040_v57  ;;  %v691_v57 = vld [vmem:[#allocation2 + $0xd0] sm:$0xf] }
 0x136   : > { %731 = vst.msk [vmem:[#allocation4 + $0x8c] sm:$0xf] %vm386_vm1, %v691_v57 }
 0x137   : > { %735 = vst.msk [vmem:[#allocation4 + $0x9c] sm:$0xf] %vm386_vm1, %v695_v47  ;;  %v1601_v47 = vld [vmem:[#allocation2 + $0x78] sm:$0xf] }
 0x138   : > { %1459 = vrot.lane.b32.xlu1 %v1349_v61, %s8099_s27  ;;  %1455 = vrot.lane.b32.xlu2 %v1342_v1, %s8099_s27  ;;  %v1373_v61 = vsel %vm8662_vm12, %v1371_v14, %v1372_v27  ;;  %v1383_v1 = vrot.slane %v1203_v56, 6  ;;  %v1219_v56 = vld [vmem:[#allocation2 + $0xec] sm:$0x3] }
 0x139   : > { %1457 = vrot.lane.b32.xlu0 %v1345_v5, %s8099_s27  ;;  %v1202_v5 = vld [vmem:[#allocation2 + $0xa8] sm:$0xc] }
 0x13a   : > { %v1032_v53 = vpop.permute.xlu1 %1031  ;;  %v1046_v12 = vpop.permute.xlu2 %1045  ;;  %v7488_v2 = vrot.slane %v1202_v5, 10 }
 0x13b   : > { %1136 = vst.msk [vmem:[#allocation4 + $0x40] sm:$0xf] %vm1119_vm9, %v1032_v53  ;;  %v1030_v13 = vpop.permute.xlu0 %1029  ;;  %v1385_v53 = vrot.slane %v1383_v1, 4 }
 0x13c   : > { %1135 = vst.msk [vmem:[#allocation4 + $0x3c] sm:$0xf] %vm1119_vm9, %v1030_v13  ;;  %v1384_v20 = vsel %vm8662_vm12, %v7488_v2, %v1383_v1 }
 0x13d   : > { %1143 = vst.msk [vmem:[#allocation4 + $0x5c] sm:$0xf] %vm1119_vm9, %v1046_v12 }
 0x140   : > { %1465 = vrot.lane.b32.xlu1 %v1359_v19, %s8099_s27  ;;  %1461 = vrot.lane.b32.xlu2 %v1352_v23, %s8099_s27  ;;  %v1397_v19 = vrot.slane %v1209_v41, 6  ;;  %v1387_v23 = vsel %vm8662_vm12, %v1385_v53, %v1386_v11  ;;  %v1587_v11 = vld [vmem:[#allocation2 + $0x24] sm:$0xf] }
 0x141   : > { %1463 = vrot.lane.b32.xlu0 %v1356_v24, %s8099_s27  ;;  %v1207_v24 = vld [vmem:[#allocation2 + $0xbc] sm:$0x3] }
 0x142   : > { %v1038_v36 = vpop.permute.xlu1 %1037  ;;  %v1052_v38 = vpop.permute.xlu2 %1051  ;;  %v1399_v26 = vrot.slane %v1397_v19, 4  ;;  %v1393_v31 = vrot.slane %v1207_v24, 6  ;;  %v1398_v18 = vsel %vm8662_vm12, %v7490_v32, %v1397_v19 }
 0x143   : > { %1139 = vst.msk [vmem:[#allocation4 + $0x4c] sm:$0xf] %vm1119_vm9, %v1038_v36  ;;  %v1036_v39 = vpop.permute.xlu0 %1035 }
 0x144   : > { %1138 = vst.msk [vmem:[#allocation4 + $0x48] sm:$0xf] %vm1119_vm9, %v1036_v39  ;;  %v1401_v37 = vsel %vm8662_vm12, %v1399_v26, %v1400_v28  ;;  %v1394_v39 = vsel %vm8662_vm12, %v1392_v30, %v1393_v31  ;;  %v1593_v28 = vld [vmem:[#allocation2 + $0x48] sm:$0xf]  ;;  %v1591_v30 = vld [vmem:[#allocation2 + $0x3c] sm:$0xf] }
 0x145   : > { %1146 = vst.msk [vmem:[#allocation4 + $0x68] sm:$0xf] %vm1119_vm9, %v1052_v38  ;;  %v1214_v38 = vld [vmem:[#allocation2 + $0xd8] sm:$0xc]  ;;  %v1592_v31 = vld [vmem:[#allocation2 + $0x40] sm:$0xf] }
 0x148   : > { %1471 = vrot.lane.b32.xlu1 %v1370_v21, %s8099_s27  ;;  %1467 = vrot.lane.b32.xlu2 %v1363_v43, %s8099_s27  ;;  %v1404_v21 = vrot.slane %v1212_v35, 6  ;;  %v1213_v43 = vld [vmem:[#allocation2 + $0xd4] sm:$0x3] }
 0x149   : > { %1469 = vrot.lane.b32.xlu0 %v1366_v44, %s8099_s27  ;;  %v7492_v44 = vrot.slane %v1214_v38, 10  ;;  %v1407_v27 = vrot.slane %v1213_v43, 6  ;;  %v1595_v35 = vld [vmem:[#allocation2 + $0x54] sm:$0xf] }
 0x14a   : > { %v1044_v51 = vpop.permute.xlu1 %1043  ;;  %v1058_v54 = vpop.permute.xlu2 %1057  ;;  %v1406_v14 = vrot.slane %v1404_v21, 4 }
 0x14b   : > { %1142 = vst.msk [vmem:[#allocation4 + $0x58] sm:$0xf] %vm1119_vm9, %v1044_v51  ;;  %v1042_v55 = vpop.permute.xlu0 %1041  ;;  %v1412_v52 = vsel %vm8662_vm12, %v7492_v44, %v1411_v45 }
 0x14c   : > { %1141 = vst.msk [vmem:[#allocation4 + $0x54] sm:$0xf] %vm1119_vm9, %v1042_v55  ;;  %v1405_v55 = vsel %vm8662_vm12, %v7491_v46, %v1404_v21  ;;  %v1408_v57 = vsel %vm8662_vm12, %v1406_v14, %v1407_v27  ;;  %v1598_v21 = vld [vmem:[#allocation2 + $0x64] sm:$0xf]  ;;  %v1600_v46 = vld [vmem:[#allocation2 + $0x70] sm:$0xf] }
 0x14d   : > { %1149 = vst.msk [vmem:[#allocation4 + $0x74] sm:$0xf] %vm1119_vm9, %v1058_v54  ;;  %v1418_v54 = vrot.slane %v1218_v49, 6  ;;  %v1605_v27 = vld [vmem:[#allocation2 + $0x90] sm:$0xf] }
 0x14f   : > { %v1420_v60 = vrot.slane %v1418_v54, 4  ;;  %v1419_v9 = vsel %vm8662_vm12, %v7493_v6, %v1418_v54 }
 0x150   : > { %1477 = vrot.lane.b32.xlu1 %v1380_v58, %s8099_s27  ;;  %1473 = vrot.lane.b32.xlu2 %v1373_v61, %s8099_s27  ;;  %v1216_v58 = vld [vmem:[#allocation2 + $0xe0] sm:$0x3]  ;;  %v1421_v61 = vrot.slane %v1219_v56, 6 }
 0x151   : > { %1475 = vrot.lane.b32.xlu0 %v1377_v63, %s8099_s27  ;;  %v1413_v63 = vrot.slane %v1411_v45, 4  ;;  %v1414_v1 = vrot.slane %v1216_v58, 6  ;;  %v1602_v45 = vld [vmem:[#allocation2 + $0x7c] sm:$0xf]  ;;  %v1608_v56 = vld [vmem:[#allocation2 + $0xa0] sm:$0xf] }
 0x152   : > { %v1050_v10 = vpop.permute.xlu1 %1049  ;;  %v1064_v12 = vpop.permute.xlu2 %1063  ;;  %v1422_v62 = vsel %vm8662_vm12, %v1420_v60, %v1421_v61  ;;  %v1607_v58 = vld [vmem:[#allocation2 + $0x9c] sm:$0xf] }
 0x153   : > { %1145 = vst.msk [vmem:[#allocation4 + $0x64] sm:$0xf] %vm1119_vm9, %v1050_v10  ;;  %v1048_v13 = vpop.permute.xlu0 %1047  ;;  %v1415_v2 = vsel %vm8662_vm12, %v1413_v63, %v1414_v1  ;;  %v1611_v63 = vld [vmem:[#allocation2 + $0xb4] sm:$0xf]  ;;  %v1609_v1 = vld [vmem:[#allocation2 + $0xa8] sm:$0xf] }
 0x154   : > { %1144 = vst.msk [vmem:[#allocation4 + $0x60] sm:$0xf] %vm1119_vm9, %v1048_v13  ;;  %v1586_v13 = vld [vmem:[#allocation2 + $0x1c] sm:$0xf] }
 0x155   : > { %1152 = vst.msk [vmem:[#allocation4 + $0x80] sm:$0xf] %vm1119_vm9, %v1064_v12  ;;  %v1585_v12 = vld [vmem:[#allocation2 + $0x18] sm:$0xf] }
 0x158   : > { %1483 = vrot.lane.b32.xlu1 %v1391_v17, %s8099_s27  ;;  %1479 = vrot.lane.b32.xlu2 %v1384_v20, %s8099_s27  ;;  %v1590_v20 = vld [vmem:[#allocation2 + $0x34] sm:$0xf] }
 0x159   : > { %1481 = vrot.lane.b32.xlu0 %v1387_v23, %s8099_s27  ;;  %v1589_v23 = vld [vmem:[#allocation2 + $0x30] sm:$0xf] }
 0x15a   : > { %v1056_v29 = vpop.permute.xlu1 %1055  ;;  %v1070_v34 = vpop.permute.xlu2 %1069 }
 0x15b   : > { %1148 = vst.msk [vmem:[#allocation4 + $0x70] sm:$0xf] %vm1119_vm9, %v1056_v29  ;;  %v1054_v36 = vpop.permute.xlu0 %1053 }
 0x15c   : > { %1147 = vst.msk [vmem:[#allocation4 + $0x6c] sm:$0xf] %vm1119_vm9, %v1054_v36  ;;  %v1594_v36 = vld [vmem:[#allocation2 + $0x4c] sm:$0xf] }
 0x15d   : > { %1155 = vst.msk [vmem:[#allocation4 + $0x8c] sm:$0xf] %vm1119_vm9, %v1070_v34  ;;  %v1596_v34 = vld [vmem:[#allocation2 + $0x58] sm:$0xf] }
 0x160   : > { %1489 = vrot.lane.b32.xlu1 %v1401_v37, %s8099_s27  ;;  %1485 = vrot.lane.b32.xlu2 %v1394_v39, %s8099_s27 }
 0x161   : > { %1487 = vrot.lane.b32.xlu0 %v1398_v18, %s8099_s27  ;;  %v1597_v18 = vld [vmem:[#allocation2 + $0x60] sm:$0xf] }
 0x162   : > { %v1062_v48 = vpop.permute.xlu1 %1061  ;;  %v1076_v50 = vpop.permute.xlu2 %1075 }
 0x163   : > { %1151 = vst.msk [vmem:[#allocation4 + $0x7c] sm:$0xf] %vm1119_vm9, %v1062_v48  ;;  %v1060_v51 = vpop.permute.xlu0 %1059 }
 0x164   : > { %1150 = vst.msk [vmem:[#allocation4 + $0x78] sm:$0xf] %vm1119_vm9, %v1060_v51  ;;  %v1604_v51 = vld [vmem:[#allocation2 + $0x88] sm:$0xf] }
 0x165   : > { %1158 = vst.msk [vmem:[#allocation4 + $0x98] sm:$0xf] %vm1119_vm9, %v1076_v50  ;;  %v1603_v50 = vld [vmem:[#allocation2 + $0x84] sm:$0xf] }
 0x168   : > { %1495 = vrot.lane.b32.xlu1 %v1412_v52, %s8099_s27  ;;  %1491 = vrot.lane.b32.xlu2 %v1405_v55, %s8099_s27 }
 0x169   : > { %1493 = vrot.lane.b32.xlu0 %v1408_v57, %s8099_s27  ;;  %v1606_v57 = vld [vmem:[#allocation2 + $0x94] sm:$0xf] }
 0x16a   : > { %v1068_v5 = vpop.permute.xlu1 %1067  ;;  %v1426_v7 = vpop.permute.xlu2 %1425 }
 0x16b   : > { %1154 = vst.msk [vmem:[#allocation4 + $0x88] sm:$0xf] %vm1119_vm9, %v1068_v5  ;;  %v1066_v8 = vpop.permute.xlu0 %1065  ;;  %v1610_v5 = vld [vmem:[#allocation2 + $0xac] sm:$0xf] }
 0x16c   : > { %1153 = vst.msk [vmem:[#allocation4 + $0x84] sm:$0xf] %vm1119_vm9, %v1066_v8 }
 0x16d   : > { %1545 = vst.msk [vmem:[#allocation4 + $0x4] sm:$0xf] %vm1543_vm13, %v1426_v7 }
 0x170   : > { %1501 = vrot.lane.b32.xlu1 %v1422_v62, %s8099_s27  ;;  %1497 = vrot.lane.b32.xlu2 %v1415_v2, %s8099_s27  ;;  %v1614_v62 = vld [vmem:[#allocation2 + $0xc4] sm:$0xf]  ;;  %v1612_v2 = vld [vmem:[#allocation2 + $0xb8] sm:$0xf] }
 0x171   : > { %1499 = vrot.lane.b32.xlu0 %v1419_v9, %s8099_s27  ;;  %v1613_v9 = vld [vmem:[#allocation2 + $0xc0] sm:$0xf] }
 0x172   : > { %v1074_v10 = vpop.permute.xlu1 %1073  ;;  %v1432_v41 = vpop.permute.xlu2 %1431 }
 0x173   : > { %1157 = vst.msk [vmem:[#allocation4 + $0x94] sm:$0xf] %vm1119_vm9, %v1074_v10  ;;  %v1072_v53 = vpop.permute.xlu0 %1071 }
 0x174   : > { %1156 = vst.msk [vmem:[#allocation4 + $0x90] sm:$0xf] %vm1119_vm9, %v1072_v53 }
 0x175   : > { %1548 = vst.msk [vmem:[#allocation4 + $0x10] sm:$0xf] %vm1543_vm13, %v1432_v41 }
 0x178   : > { %1669 = vrot.lane.b32.xlu1 %v1587_v11, %s8100_s28  ;;  %1665 = vrot.lane.b32.xlu2 %v1585_v12, %s8100_s28  ;;  %v1617_v11 = vld [vmem:[#allocation2 + $0xd8] sm:$0xf]  ;;  %v1615_v12 = vld [vmem:[#allocation2 + $0xcc] sm:$0xf] }
 0x179   : > { %1667 = vrot.lane.b32.xlu0 %v1586_v13, %s8100_s28  ;;  %v1616_v13 = vld [vmem:[#allocation2 + $0xd0] sm:$0xf] }
 0x17a   : > { %v1424_v16 = vpop.permute.xlu1 %1423  ;;  %v1438_v17 = vpop.permute.xlu2 %1437 }
 0x17b   : > { %1544 = vst.msk [vmem:[#allocation4] sm:$0xf] %vm1543_vm13, %v1424_v16  ;;  %v1078_v19 = vpop.permute.xlu0 %1077 }
 0x17c   : > { %1159 = vst.msk [vmem:[#allocation4 + $0x9c] sm:$0xf] %vm1119_vm9, %v1078_v19 }
 0x17d   : > { %1551 = vst.msk [vmem:[#allocation4 + $0x1c] sm:$0xf] %vm1543_vm13, %v1438_v17 }
 0x180   : > { %1675 = vrot.lane.b32.xlu1 %v1590_v20, %s8100_s28  ;;  %1671 = vrot.lane.b32.xlu2 %v1588_v15, %s8100_s28  ;;  %v1620_v20 = vld [vmem:[#allocation2 + $0xe8] sm:$0xf]  ;;  %v1618_v15 = vld [vmem:[#allocation2 + $0xdc] sm:$0xf] }
 0x181   : > { %1673 = vrot.lane.b32.xlu0 %v1589_v23, %s8100_s28  ;;  %v1619_v23 = vld [vmem:[#allocation2 + $0xe4] sm:$0xf] }
 0x182   : > { %v1430_v24 = vpop.permute.xlu1 %1429  ;;  %v1444_v25 = vpop.permute.xlu2 %1443 }
 0x183   : > { %1547 = vst.msk [vmem:[#allocation4 + $0xc] sm:$0xf] %vm1543_vm13, %v1430_v24  ;;  %v1428_v26 = vpop.permute.xlu0 %1427 }
 0x184   : > { %1546 = vst.msk [vmem:[#allocation4 + $0x8] sm:$0xf] %vm1543_vm13, %v1428_v26 }
 0x185   : > { %1554 = vst.msk [vmem:[#allocation4 + $0x28] sm:$0xf] %vm1543_vm13, %v1444_v25  ;;  %v1827_v25 = vld [vmem:[#allocation2 + $0x1c] sm:$0xf] }
 0x188   : > { %1681 = vrot.lane.b32.xlu1 %v1593_v28, %s8100_s28  ;;  %1677 = vrot.lane.b32.xlu2 %v1591_v30, %s8100_s28  ;;  %v1623_v30 = vld [vmem:[#allocation2 + $0xfc] sm:$0xf] }
 0x189   : > { %1679 = vrot.lane.b32.xlu0 %v1592_v31, %s8100_s28  ;;  %v1948_v31 = vrot.slane %v1827_v25, 5 }
 0x18a   : > { %v1436_v22 = vpop.permute.xlu1 %1435  ;;  %v1450_v29 = vpop.permute.xlu2 %1449 }
 0x18b   : > { %1550 = vst.msk [vmem:[#allocation4 + $0x18] sm:$0xf] %vm1543_vm13, %v1436_v22  ;;  %v1434_v32 = vpop.permute.xlu0 %1433  ;;  %v1621_v22 = vld [vmem:[#allocation2 + $0xf0] sm:$0xf] }
 0x18c   : > { %1549 = vst.msk [vmem:[#allocation4 + $0x14] sm:$0xf] %vm1543_vm13, %v1434_v32  ;;  %v1622_v32 = vld [vmem:[#allocation2 + $0xf4] sm:$0xf] }
 0x18d   : > { %1557 = vst.msk [vmem:[#allocation4 + $0x34] sm:$0xf] %vm1543_vm13, %v1450_v29  ;;  %v1828_v29 = vld [vmem:[#allocation2 + $0x20] sm:$0x1] }
 0x190   : > { %1687 = vrot.lane.b32.xlu1 %v1596_v34, %s8100_s28  ;;  %1683 = vrot.lane.b32.xlu2 %v1594_v36, %s8100_s28  ;;  %v1826_v34 = vld [vmem:[#allocation2 + $0x18] sm:$0xe]  ;;  %v1950_v36 = vrot.slane %v1948_v31, 4 }
 0x191   : > { %1685 = vrot.lane.b32.xlu0 %v1595_v35, %s8100_s28  ;;  %v1951_v35 = vrot.slane %v1828_v29, 5 }
 0x192   : > { %v1442_v37 = vpop.permute.xlu1 %1441  ;;  %v1456_v38 = vpop.permute.xlu2 %1455 }
 0x193   : > { %1553 = vst.msk [vmem:[#allocation4 + $0x24] sm:$0xf] %vm1543_vm13, %v1442_v37  ;;  %v1440_v39 = vpop.permute.xlu0 %1439 }
 0x194   : > { %1552 = vst.msk [vmem:[#allocation4 + $0x20] sm:$0xf] %vm1543_vm13, %v1440_v39 }
 0x195   : > { %1560 = vst.msk [vmem:[#allocation4 + $0x40] sm:$0xf] %vm1543_vm13, %v1456_v38  ;;  %v7494_v38 = vrot.slane %v1826_v34, 9 }
 0x198   : > { %1693 = vrot.lane.b32.xlu1 %v1599_v40, %s8100_s28  ;;  %1689 = vrot.lane.b32.xlu2 %v1597_v18, %s8100_s28  ;;  %v1830_v18 = vld [vmem:[#allocation2 + $0x28] sm:$0xf] }
 0x199   : > { %1691 = vrot.lane.b32.xlu0 %v1598_v21, %s8100_s28  ;;  %v1952_v21 = vsel %vm8168_vm4, %v1950_v36, %v1951_v35  ;;  %v1846_v36 = vld [vmem:[#allocation2 + $0x68] sm:$0x1] }
 0x19a   : > { %v1448_v42 = vpop.permute.xlu1 %1447  ;;  %v1462_v43 = vpop.permute.xlu2 %1461 }
 0x19b   : > { %1556 = vst.msk [vmem:[#allocation4 + $0x30] sm:$0xf] %vm1543_vm13, %v1448_v42  ;;  %v1446_v44 = vpop.permute.xlu0 %1445  ;;  %v1832_v42 = vld [vmem:[#allocation2 + $0x30] sm:$0xe] }
 0x19c   : > { %1555 = vst.msk [vmem:[#allocation4 + $0x2c] sm:$0xf] %vm1543_vm13, %v1446_v44  ;;  %v1833_v44 = vld [vmem:[#allocation2 + $0x34] sm:$0xf] }
 0x19d   : > { %1563 = vst.msk [vmem:[#allocation4 + $0x4c] sm:$0xf] %vm1543_vm13, %v1462_v43  ;;  %v1624_v43 = vld [vmem:[#allocation2 + $0x100] sm:$0xf] }
 0x1a0   : > { %1699 = vrot.lane.b32.xlu1 %v1602_v45, %s8100_s28  ;;  %1695 = vrot.lane.b32.xlu2 %v1600_v46, %s8100_s28  ;;  %v1949_v45 = vsel %vm8168_vm4, %v7494_v38, %v1948_v31  ;;  %v1955_v46 = vrot.slane %v1830_v18, 5  ;;  %v1844_v38 = vld [vmem:[#allocation2 + $0x60] sm:$0xe] }
 0x1a1   : > { %1697 = vrot.lane.b32.xlu0 %v1601_v47, %s8100_s28  ;;  %v1829_v47 = vld [vmem:[#allocation2 + $0x24] sm:$0xe] }
 0x1a2   : > { %v1454_v48 = vpop.permute.xlu1 %1453  ;;  %v1468_v49 = vpop.permute.xlu2 %1467 }
 0x1a3   : > { %1559 = vst.msk [vmem:[#allocation4 + $0x3c] sm:$0xf] %vm1543_vm13, %v1454_v48  ;;  %v1452_v14 = vpop.permute.xlu0 %1451  ;;  %v1831_v48 = vld [vmem:[#allocation2 + $0x2c] sm:$0x1] }
 0x1a4   : > { %1558 = vst.msk [vmem:[#allocation4 + $0x38] sm:$0xf] %vm1543_vm13, %v1452_v14  ;;  %v1962_v14 = vrot.slane %v1833_v44, 5 }
 0x1a5   : > { %1566 = vst.msk [vmem:[#allocation4 + $0x58] sm:$0xf] %vm1543_vm13, %v1468_v49  ;;  %v7496_v49 = vrot.slane %v1832_v42, 9 }
 0x1a8   : > { %1705 = vrot.lane.b32.xlu1 %v1605_v27, %s8100_s28  ;;  %1701 = vrot.lane.b32.xlu2 %v1603_v50, %s8100_s28  ;;  %v7495_v27 = vrot.slane %v1829_v47, 9 }
 0x1a9   : > { %1703 = vrot.lane.b32.xlu0 %v1604_v51, %s8100_s28  ;;  %v1836_v51 = vld [vmem:[#allocation2 + $0x40] sm:$0xf] }
 0x1aa   : > { %v1460_v52 = vpop.permute.xlu1 %1459  ;;  %v1474_v54 = vpop.permute.xlu2 %1473 }
 0x1ab   : > { %1562 = vst.msk [vmem:[#allocation4 + $0x48] sm:$0xf] %vm1543_vm13, %v1460_v52  ;;  %v1458_v55 = vpop.permute.xlu0 %1457  ;;  %v1957_v52 = vrot.slane %v1955_v46, 4 }
 0x1ac   : > { %1561 = vst.msk [vmem:[#allocation4 + $0x44] sm:$0xf] %vm1543_vm13, %v1458_v55 }
 0x1ad   : > { %1569 = vst.msk [vmem:[#allocation4 + $0x64] sm:$0xf] %vm1543_vm13, %v1474_v54  ;;  %v1958_v54 = vrot.slane %v1831_v48, 5  ;;  %v1850_v48 = vld [vmem:[#allocation2 + $0x78] sm:$0xe] }
 0x1b0   : > { %1711 = vrot.lane.b32.xlu1 %v1608_v56, %s8100_s28  ;;  %1707 = vrot.lane.b32.xlu2 %v1606_v57, %s8100_s28  ;;  %v1963_v57 = vsel %vm8168_vm4, %v7496_v49, %v1962_v14 }
 0x1b1   : > { %1709 = vrot.lane.b32.xlu0 %v1607_v58, %s8100_s28  ;;  %v1969_v58 = vrot.slane %v1836_v51, 5  ;;  %v1847_v51 = vld [vmem:[#allocation2 + $0x6c] sm:$0xe] }
 0x1b2   : > { %v1466_v59 = vpop.permute.xlu1 %1465  ;;  %v1480_v60 = vpop.permute.xlu2 %1479 }
 0x1b3   : > { %1565 = vst.msk [vmem:[#allocation4 + $0x54] sm:$0xf] %vm1543_vm13, %v1466_v59  ;;  %v1464_v61 = vpop.permute.xlu0 %1463  ;;  %v1956_v59 = vsel %vm8168_vm4, %v7495_v27, %v1955_v46  ;;  %v1848_v46 = vld [vmem:[#allocation2 + $0x70] sm:$0xf] }
 0x1b4   : > { %1564 = vst.msk [vmem:[#allocation4 + $0x50] sm:$0xf] %vm1543_vm13, %v1464_v61  ;;  %v1959_v61 = vsel %vm8168_vm4, %v1957_v52, %v1958_v54  ;;  %v1849_v52 = vld [vmem:[#allocation2 + $0x74] sm:$0x1]  ;;  %v7502_v54 = vrot.slane %v1850_v48, 9 }
 0x1b5   : > { %1572 = vst.msk [vmem:[#allocation4 + $0x70] sm:$0xf] %vm1543_vm13, %v1480_v60  ;;  %v1837_v60 = vld [vmem:[#allocation2 + $0x44] sm:$0x1] }
 0x1b8   : > { %1717 = vrot.lane.b32.xlu1 %v1611_v63, %s8100_s28  ;;  %1713 = vrot.lane.b32.xlu2 %v1609_v1, %s8100_s28  ;;  %v1834_v63 = vld [vmem:[#allocation2 + $0x38] sm:$0x1]  ;;  %v1835_v1 = vld [vmem:[#allocation2 + $0x3c] sm:$0xe] }
 0x1b9   : > { %1715 = vrot.lane.b32.xlu0 %v1610_v5, %s8100_s28  ;;  %v1971_v5 = vrot.slane %v1969_v58, 4 }
 0x1ba   : > { %v1472_v6 = vpop.permute.xlu1 %1471  ;;  %v1486_v7 = vpop.permute.xlu2 %1485 }
 0x1bb   : > { %1568 = vst.msk [vmem:[#allocation4 + $0x60] sm:$0xf] %vm1543_vm13, %v1472_v6  ;;  %v1470_v8 = vpop.permute.xlu0 %1469  ;;  %v1972_v6 = vrot.slane %v1837_v60, 5  ;;  %v2000_v60 = vrot.slane %v1849_v52, 5  ;;  %v1868_v52 = vld [vmem:[#allocation2 + $0xc0] sm:$0xe] }
 0x1bc   : > { %1567 = vst.msk [vmem:[#allocation4 + $0x5c] sm:$0xf] %vm1543_vm13, %v1470_v8  ;;  %v1965_v8 = vrot.slane %v1834_v63, 5 }
 0x1bd   : > { %1575 = vst.msk [vmem:[#allocation4 + $0x7c] sm:$0xf] %vm1543_vm13, %v1486_v7  ;;  %v1964_v7 = vrot.slane %v1962_v14, 4  ;;  %v1851_v14 = vld [vmem:[#allocation2 + $0x7c] sm:$0xf] }
 0x1c0   : > { %1723 = vrot.lane.b32.xlu1 %v1614_v62, %s8100_s28  ;;  %1719 = vrot.lane.b32.xlu2 %v1612_v2, %s8100_s28  ;;  %v7497_v2 = vrot.slane %v1835_v1, 9 }
 0x1c1   : > { %1721 = vrot.lane.b32.xlu0 %v1613_v9, %s8100_s28 }
 0x1c2   : > { %v1478_v10 = vpop.permute.xlu1 %1477  ;;  %v1492_v41 = vpop.permute.xlu2 %1491 }
 0x1c3   : > { %1571 = vst.msk [vmem:[#allocation4 + $0x6c] sm:$0xf] %vm1543_vm13, %v1478_v10  ;;  %v1476_v53 = vpop.permute.xlu0 %1475 }
 0x1c4   : > { %1570 = vst.msk [vmem:[#allocation4 + $0x68] sm:$0xf] %vm1543_vm13, %v1476_v53  ;;  %v1973_v53 = vsel %vm8168_vm4, %v1971_v5, %v1972_v6 }
 0x1c5   : > { %1578 = vst.msk [vmem:[#allocation4 + $0x88] sm:$0xf] %vm1543_vm13, %v1492_v41  ;;  %v1839_v41 = vld [vmem:[#allocation2 + $0x4c] sm:$0xf] }
 0x1c8   : > { %1729 = vrot.lane.b32.xlu1 %v1617_v11, %s8100_s28  ;;  %1725 = vrot.lane.b32.xlu2 %v1615_v12, %s8100_s28  ;;  %v1841_v11 = vld [vmem:[#allocation2 + $0x54] sm:$0xe]  ;;  %v1966_v12 = vsel %vm8168_vm4, %v1964_v7, %v1965_v8  ;;  %v1855_v7 = vld [vmem:[#allocation2 + $0x8c] sm:$0x1] }
 0x1c9   : > { %1727 = vrot.lane.b32.xlu0 %v1616_v13, %s8100_s28  ;;  %v1842_v13 = vld [vmem:[#allocation2 + $0x58] sm:$0xf] }
 0x1ca   : > { %v1484_v16 = vpop.permute.xlu1 %1483  ;;  %v1498_v17 = vpop.permute.xlu2 %1497 }
 0x1cb   : > { %1574 = vst.msk [vmem:[#allocation4 + $0x78] sm:$0xf] %vm1543_vm13, %v1484_v16  ;;  %v1482_v19 = vpop.permute.xlu0 %1481  ;;  %v1970_v16 = vsel %vm8168_vm4, %v7497_v2, %v1969_v58  ;;  %v1854_v58 = vld [vmem:[#allocation2 + $0x88] sm:$0xf]  ;;  %v1853_v2 = vld [vmem:[#allocation2 + $0x84] sm:$0xe] }
 0x1cc   : > { %1573 = vst.msk [vmem:[#allocation4 + $0x74] sm:$0xf] %vm1543_vm13, %v1482_v19  ;;  %v1838_v19 = vld [vmem:[#allocation2 + $0x48] sm:$0xe]  ;;  %v2011_v5 = vrot.slane %v1854_v58, 5 }
 0x1cd   : > { %1581 = vst.msk [vmem:[#allocation4 + $0x94] sm:$0xf] %vm1543_vm13, %v1498_v17  ;;  %v1976_v17 = vrot.slane %v1839_v41, 5  ;;  %v1865_v58 = vld [vmem:[#allocation2 + $0xb4] sm:$0xe] }
 0x1d0   : > { %1735 = vrot.lane.b32.xlu1 %v1620_v20, %s8100_s28  ;;  %1731 = vrot.lane.b32.xlu2 %v1618_v15, %s8100_s28  ;;  %v1840_v20 = vld [vmem:[#allocation2 + $0x50] sm:$0x1]  ;;  %v7499_v15 = vrot.slane %v1841_v11, 9 }
 0x1d1   : > { %1733 = vrot.lane.b32.xlu0 %v1619_v23, %s8100_s28  ;;  %v1983_v23 = vrot.slane %v1842_v13, 5 }
 0x1d2   : > { %v1490_v24 = vpop.permute.xlu1 %1489  ;;  %v1666_v26 = vpop.permute.xlu2 %1665 }
 0x1d3   : > { %1577 = vst.msk [vmem:[#allocation4 + $0x84] sm:$0xf] %vm1543_vm13, %v1490_v24  ;;  %v1488_v28 = vpop.permute.xlu0 %1487  ;;  %v7498_v24 = vrot.slane %v1838_v19, 9  ;;  %v1984_v29 = vsel %vm8168_vm4, %v7499_v15, %v1983_v23  ;;  %v1985_v18 = vrot.slane %v1983_v23, 4  ;;  %v1860_v23 = vld [vmem:[#allocation2 + $0xa0] sm:$0xf] }
 0x1d4   : > { %1576 = vst.msk [vmem:[#allocation4 + $0x80] sm:$0xf] %vm1543_vm13, %v1488_v28  ;;  %v1978_v28 = vrot.slane %v1976_v17, 4 }
 0x1d5   : > { %1786 = vst.msk [vmem:[#allocation4] sm:$0xf] %vm1785_vm14, %v1666_v26  ;;  %v1845_v26 = vld [vmem:[#allocation2 + $0x64] sm:$0xf]  ;;  %v1977_v34 = vsel %vm8168_vm4, %v7498_v24, %v1976_v17  ;;  %v1857_v17 = vld [vmem:[#allocation2 + $0x94] sm:$0xf] }
 0x1d8   : > { %1741 = vrot.lane.b32.xlu1 %v1623_v30, %s8100_s28  ;;  %1737 = vrot.lane.b32.xlu2 %v1621_v22, %s8100_s28  ;;  %v1979_v30 = vrot.slane %v1840_v20, 5  ;;  %v1859_v20 = vld [vmem:[#allocation2 + $0x9c] sm:$0xe] }
 0x1d9   : > { %1739 = vrot.lane.b32.xlu0 %v1622_v32, %s8100_s28  ;;  %v1990_v32 = vrot.slane %v1845_v26, 5  ;;  %v1856_v26 = vld [vmem:[#allocation2 + $0x90] sm:$0xe] }
 0x1da   : > { %v1496_v37 = vpop.permute.xlu1 %1495  ;;  %v1672_v39 = vpop.permute.xlu2 %1671  ;;  %v1980_v35 = vsel %vm8168_vm4, %v1978_v28, %v1979_v30  ;;  %v1858_v28 = vld [vmem:[#allocation2 + $0x98] sm:$0x1]  ;;  %v7505_v30 = vrot.slane %v1859_v20, 9 }
 0x1db   : > { %1580 = vst.msk [vmem:[#allocation4 + $0x90] sm:$0xf] %vm1543_vm13, %v1496_v37  ;;  %v1494_v40 = vpop.permute.xlu0 %1493  ;;  %v1843_v37 = vld [vmem:[#allocation2 + $0x5c] sm:$0x1] }
 0x1dc   : > { %1579 = vst.msk [vmem:[#allocation4 + $0x8c] sm:$0xf] %vm1543_vm13, %v1494_v40  ;;  %v1993_v40 = vrot.slane %v1846_v36, 5  ;;  %v2021_v36 = vrot.slane %v1858_v28, 5  ;;  %v1877_v28 = vld [vmem:[#allocation2 + $0xe4] sm:$0xe] }
 0x1dd   : > { %1789 = vst.msk [vmem:[#allocation4 + $0xc] sm:$0xf] %vm1785_vm14, %v1672_v39  ;;  %v1992_v39 = vrot.slane %v1990_v32, 4 }
 0x1df   : > { %v1994_v47 = vsel %vm8168_vm4, %v1992_v39, %v1993_v40 }
 0x1e0   : > { %2088 = vrot.lane.b32.xlu1 %v1952_v21, %s8101_s29  ;;  %1743 = vrot.lane.b32.xlu2 %v1624_v43, %s8100_s28  ;;  %v1986_v21 = vrot.slane %v1843_v37, 5  ;;  %v7500_v43 = vrot.slane %v1844_v38, 9 }
 0x1e1   : > { %2086 = vrot.lane.b32.xlu0 %v1949_v45, %s8101_s29 }
 0x1e2   : > { %v1502_v50 = vpop.permute.xlu1 %1501  ;;  %v1678_v55 = vpop.permute.xlu2 %1677  ;;  %v1987_v49 = vsel %vm8168_vm4, %v1985_v18, %v1986_v21  ;;  %v1991_v27 = vsel %vm8168_vm4, %v7500_v43, %v1990_v32  ;;  %v1863_v32 = vld [vmem:[#allocation2 + $0xac] sm:$0xf]  ;;  %v1864_v18 = vld [vmem:[#allocation2 + $0xb0] sm:$0x1]  ;;  %v1862_v43 = vld [vmem:[#allocation2 + $0xa8] sm:$0xe] }
 0x1e3   : > { %1583 = vst.msk [vmem:[#allocation4 + $0x9c] sm:$0xf] %vm1543_vm13, %v1502_v50  ;;  %v1500_v56 = vpop.permute.xlu0 %1499  ;;  %v1997_v50 = vrot.slane %v1848_v46, 5  ;;  %v2032_v39 = vrot.slane %v1863_v32, 5  ;;  %v1874_v32 = vld [vmem:[#allocation2 + $0xd8] sm:$0xe] }
 0x1e4   : > { %1582 = vst.msk [vmem:[#allocation4 + $0x98] sm:$0xf] %vm1543_vm13, %v1500_v56  ;;  %v7501_v56 = vrot.slane %v1847_v51, 9 }
 0x1e5   : > { %1792 = vst.msk [vmem:[#allocation4 + $0x18] sm:$0xf] %vm1785_vm14, %v1678_v55  ;;  %v2004_v55 = vrot.slane %v1851_v14, 5 }
 0x1e6   : > { %v1998_v6 = vsel %vm8168_vm4, %v7501_v56, %v1997_v50 }
 0x1e7   : > { %v2005_v1 = vsel %vm8168_vm4, %v7502_v54, %v2004_v55  ;;  %v2006_v41 = vrot.slane %v2004_v55, 4  ;;  %v1869_v55 = vld [vmem:[#allocation2 + $0xc4] sm:$0xf] }
 0x1e8   : > { %2094 = vrot.lane.b32.xlu1 %v1963_v57, %s8101_s29  ;;  %2090 = vrot.lane.b32.xlu2 %v1956_v59, %s8101_s29  ;;  %v1999_v59 = vrot.slane %v1997_v50, 4  ;;  %v1866_v50 = vld [vmem:[#allocation2 + $0xb8] sm:$0xf] }
 0x1e9   : > { %2092 = vrot.lane.b32.xlu0 %v1959_v61, %s8101_s29 }
 0x1ea   : > { %v1670_v62 = vpop.permute.xlu1 %1669  ;;  %v1684_v9 = vpop.permute.xlu2 %1683  ;;  %v2001_v8 = vsel %vm8168_vm4, %v1999_v59, %v2000_v60  ;;  %v1867_v59 = vld [vmem:[#allocation2 + $0xbc] sm:$0x1]  ;;  %v7508_v60 = vrot.slane %v1868_v52, 9 }
 0x1eb   : > { %1788 = vst.msk [vmem:[#allocation4 + $0x8] sm:$0xf] %vm1785_vm14, %v1670_v62  ;;  %v1668_v10 = vpop.permute.xlu0 %1667  ;;  %v1852_v62 = vld [vmem:[#allocation2 + $0x80] sm:$0x1] }
 0x1ec   : > { %1787 = vst.msk [vmem:[#allocation4 + $0x4] sm:$0xf] %vm1785_vm14, %v1668_v10  ;;  %v2014_v10 = vrot.slane %v1855_v7, 5  ;;  %v2042_v7 = vrot.slane %v1867_v59, 5  ;;  %v2247_v59 = vld [vmem:[#allocation2 + $0x18] sm:$0xc] }
 0x1ed   : > { %1795 = vst.msk [vmem:[#allocation4 + $0x24] sm:$0xf] %vm1785_vm14, %v1684_v9  ;;  %v2013_v9 = vrot.slane %v2011_v5, 4 }
 0x1ef   : > { %v2015_v19 = vsel %vm8168_vm4, %v2013_v9, %v2014_v10 }
 0x1f0   : > { %2100 = vrot.lane.b32.xlu1 %v1973_v53, %s8101_s29  ;;  %2096 = vrot.lane.b32.xlu2 %v1966_v12, %s8101_s29  ;;  %v2007_v53 = vrot.slane %v1852_v62, 5  ;;  %v7503_v12 = vrot.slane %v1853_v2, 9 }
 0x1f1   : > { %2098 = vrot.lane.b32.xlu0 %v1970_v16, %s8101_s29 }
 0x1f2   : > { %v1676_v25 = vpop.permute.xlu1 %1675  ;;  %v1690_v31 = vpop.permute.xlu2 %1689  ;;  %v2008_v15 = vsel %vm8168_vm4, %v2006_v41, %v2007_v53  ;;  %v2012_v24 = vsel %vm8168_vm4, %v7503_v12, %v2011_v5  ;;  %v1872_v5 = vld [vmem:[#allocation2 + $0xd0] sm:$0xf]  ;;  %v1873_v41 = vld [vmem:[#allocation2 + $0xd4] sm:$0x1]  ;;  %v1871_v12 = vld [vmem:[#allocation2 + $0xcc] sm:$0xe] }
 0x1f3   : > { %1791 = vst.msk [vmem:[#allocation4 + $0x14] sm:$0xf] %vm1785_vm14, %v1676_v25  ;;  %v1674_v22 = vpop.permute.xlu0 %1673  ;;  %v2018_v25 = vrot.slane %v1857_v17, 5  ;;  %v2053_v9 = vrot.slane %v1872_v5, 5  ;;  %v1883_v5 = vld [vmem:[#allocation2 + $0xfc] sm:$0xe] }
 0x1f4   : > { %1790 = vst.msk [vmem:[#allocation4 + $0x10] sm:$0xf] %vm1785_vm14, %v1674_v22  ;;  %v7504_v22 = vrot.slane %v1856_v26, 9 }
 0x1f5   : > { %1798 = vst.msk [vmem:[#allocation4 + $0x30] sm:$0xf] %vm1785_vm14, %v1690_v31  ;;  %v2025_v31 = vrot.slane %v1860_v23, 5 }
 0x1f6   : > { %v2019_v40 = vsel %vm8168_vm4, %v7504_v22, %v2018_v25 }
 0x1f7   : > { %v2026_v38 = vsel %vm8168_vm4, %v7505_v30, %v2025_v31  ;;  %v2027_v46 = vrot.slane %v2025_v31, 4  ;;  %v1878_v31 = vld [vmem:[#allocation2 + $0xe8] sm:$0xf] }
 0x1f8   : > { %2106 = vrot.lane.b32.xlu1 %v1984_v29, %s8101_s29  ;;  %2102 = vrot.lane.b32.xlu2 %v1977_v34, %s8101_s29  ;;  %v2020_v34 = vrot.slane %v2018_v25, 4  ;;  %v1875_v25 = vld [vmem:[#allocation2 + $0xdc] sm:$0xf] }
 0x1f9   : > { %2104 = vrot.lane.b32.xlu0 %v1980_v35, %s8101_s29 }
 0x1fa   : > { %v1682_v42 = vpop.permute.xlu1 %1681  ;;  %v1696_v44 = vpop.permute.xlu2 %1695  ;;  %v2022_v21 = vsel %vm8168_vm4, %v2020_v34, %v2021_v36  ;;  %v1876_v34 = vld [vmem:[#allocation2 + $0xe0] sm:$0x1]  ;;  %v7511_v36 = vrot.slane %v1877_v28, 9 }
 0x1fb   : > { %1794 = vst.msk [vmem:[#allocation4 + $0x20] sm:$0xf] %vm1785_vm14, %v1682_v42  ;;  %v1680_v45 = vpop.permute.xlu0 %1679  ;;  %v1861_v42 = vld [vmem:[#allocation2 + $0xa4] sm:$0x1] }
 0x1fc   : > { %1793 = vst.msk [vmem:[#allocation4 + $0x1c] sm:$0xf] %vm1785_vm14, %v1680_v45  ;;  %v2035_v45 = vrot.slane %v1864_v18, 5  ;;  %v2063_v18 = vrot.slane %v1876_v34, 5  ;;  %v2256_v34 = vld [vmem:[#allocation2 + $0x3c] sm:$0xc] }
 0x1fd   : > { %1801 = vst.msk [vmem:[#allocation4 + $0x3c] sm:$0xf] %vm1785_vm14, %v1696_v44  ;;  %v2034_v44 = vrot.slane %v2032_v39, 4 }
 0x1ff   : > { %v2036_v51 = vsel %vm8168_vm4, %v2034_v44, %v2035_v45 }
 0x200   : > { %2112 = vrot.lane.b32.xlu1 %v1994_v47, %s8101_s29  ;;  %2108 = vrot.lane.b32.xlu2 %v1987_v49, %s8101_s29  ;;  %v2028_v47 = vrot.slane %v1861_v42, 5  ;;  %v7506_v49 = vrot.slane %v1862_v43, 9 }
 0x201   : > { %2110 = vrot.lane.b32.xlu0 %v1991_v27, %s8101_s29 }
 0x202   : > { %v1688_v57 = vpop.permute.xlu1 %1687  ;;  %v1702_v61 = vpop.permute.xlu2 %1701  ;;  %v2029_v54 = vsel %vm8168_vm4, %v2027_v46, %v2028_v47  ;;  %v2033_v56 = vsel %vm8168_vm4, %v7506_v49, %v2032_v39  ;;  %v1881_v39 = vld [vmem:[#allocation2 + $0xf4] sm:$0xf]  ;;  %v1882_v46 = vld [vmem:[#allocation2 + $0xf8] sm:$0x1]  ;;  %v1880_v49 = vld [vmem:[#allocation2 + $0xf0] sm:$0xe] }
 0x203   : > { %1797 = vst.msk [vmem:[#allocation4 + $0x2c] sm:$0xf] %vm1785_vm14, %v1688_v57  ;;  %v1686_v63 = vpop.permute.xlu0 %1685  ;;  %v2039_v57 = vrot.slane %v1866_v50, 5  ;;  %v2074_v44 = vrot.slane %v1881_v39, 5  ;;  %v2253_v39 = vld [vmem:[#allocation2 + $0x30] sm:$0xc] }
 0x204   : > { %1796 = vst.msk [vmem:[#allocation4 + $0x28] sm:$0xf] %vm1785_vm14, %v1686_v63  ;;  %v7507_v63 = vrot.slane %v1865_v58, 9 }
 0x205   : > { %1804 = vst.msk [vmem:[#allocation4 + $0x48] sm:$0xf] %vm1785_vm14, %v1702_v61  ;;  %v2046_v61 = vrot.slane %v1869_v55, 5 }
 0x206   : > { %v2040_v10 = vsel %vm8168_vm4, %v7507_v63, %v2039_v57 }
 0x207   : > { %v2047_v2 = vsel %vm8168_vm4, %v7508_v60, %v2046_v61  ;;  %v2048_v17 = vrot.slane %v2046_v61, 4  ;;  %v2248_v61 = vld [vmem:[#allocation2 + $0x1c] sm:$0xf] }
 0x208   : > { %2118 = vrot.lane.b32.xlu1 %v2005_v1, %s8101_s29  ;;  %2114 = vrot.lane.b32.xlu2 %v1998_v6, %s8101_s29  ;;  %v2041_v6 = vrot.slane %v2039_v57, 4  ;;  %v1884_v57 = vld [vmem:[#allocation2 + $0x100] sm:$0xf] }
 0x209   : > { %2116 = vrot.lane.b32.xlu0 %v2001_v8, %s8101_s29 }
 0x20a   : > { %v1694_v11 = vpop.permute.xlu1 %1693  ;;  %v1708_v13 = vpop.permute.xlu2 %1707  ;;  %v2043_v53 = vsel %vm8168_vm4, %v2041_v6, %v2042_v7  ;;  %v1885_v6 = vld [vmem:[#allocation2 + $0x104] sm:$0x1]  ;;  %v7514_v7 = vrot.slane %v2247_v59, 10 }
 0x20b   : > { %1800 = vst.msk [vmem:[#allocation4 + $0x38] sm:$0xf] %vm1785_vm14, %v1694_v11  ;;  %v1692_v16 = vpop.permute.xlu0 %1691  ;;  %v1870_v11 = vld [vmem:[#allocation2 + $0xc8] sm:$0x1] }
 0x20c   : > { %1799 = vst.msk [vmem:[#allocation4 + $0x34] sm:$0xf] %vm1785_vm14, %v1692_v16  ;;  %v2056_v16 = vrot.slane %v1873_v41, 5  ;;  %v2084_v41 = vrot.slane %v1885_v6, 5  ;;  %v2265_v6 = vld [vmem:[#allocation2 + $0x60] sm:$0xc] }
 0x20d   : > { %1807 = vst.msk [vmem:[#allocation4 + $0x54] sm:$0xf] %vm1785_vm14, %v1708_v13  ;;  %v2055_v13 = vrot.slane %v2053_v9, 4 }
 0x20f   : > { %v2057_v26 = vsel %vm8168_vm4, %v2055_v13, %v2056_v16 }
 0x210   : > { %2124 = vrot.lane.b32.xlu1 %v2015_v19, %s8101_s29  ;;  %2120 = vrot.lane.b32.xlu2 %v2008_v15, %s8101_s29  ;;  %v2049_v19 = vrot.slane %v1870_v11, 5  ;;  %v7509_v15 = vrot.slane %v1871_v12, 9 }
 0x211   : > { %2122 = vrot.lane.b32.xlu0 %v2012_v24, %s8101_s29 }
 0x212   : > { %v1700_v29 = vpop.permute.xlu1 %1699  ;;  %v1714_v35 = vpop.permute.xlu2 %1713  ;;  %v2050_v30 = vsel %vm8168_vm4, %v2048_v17, %v2049_v19  ;;  %v2054_v22 = vsel %vm8168_vm4, %v7509_v15, %v2053_v9  ;;  %v2251_v9 = vld [vmem:[#allocation2 + $0x28] sm:$0xf]  ;;  %v2252_v17 = vld [vmem:[#allocation2 + $0x2c] sm:$0x3]  ;;  %v2250_v15 = vld [vmem:[#allocation2 + $0x24] sm:$0xc] }
 0x213   : > { %1803 = vst.msk [vmem:[#allocation4 + $0x44] sm:$0xf] %vm1785_vm14, %v1700_v29  ;;  %v1698_v37 = vpop.permute.xlu0 %1697  ;;  %v2060_v29 = vrot.slane %v1875_v25, 5  ;;  %v2376_v13 = vrot.slane %v2251_v9, 6  ;;  %v2262_v9 = vld [vmem:[#allocation2 + $0x54] sm:$0xc] }
 0x214   : > { %1802 = vst.msk [vmem:[#allocation4 + $0x40] sm:$0xf] %vm1785_vm14, %v1698_v37  ;;  %v7510_v37 = vrot.slane %v1874_v32, 9 }
 0x215   : > { %1810 = vst.msk [vmem:[#allocation4 + $0x60] sm:$0xf] %vm1785_vm14, %v1714_v35  ;;  %v2067_v35 = vrot.slane %v1878_v31, 5 }
 0x216   : > { %v2061_v45 = vsel %vm8168_vm4, %v7510_v37, %v2060_v29 }
 0x217   : > { %v2068_v43 = vsel %vm8168_vm4, %v7511_v36, %v2067_v35  ;;  %v2069_v50 = vrot.slane %v2067_v35, 4  ;;  %v2257_v35 = vld [vmem:[#allocation2 + $0x40] sm:$0xf] }
 0x218   : > { %2130 = vrot.lane.b32.xlu1 %v2026_v38, %s8101_s29  ;;  %2126 = vrot.lane.b32.xlu2 %v2019_v40, %s8101_s29  ;;  %v2062_v40 = vrot.slane %v2060_v29, 4  ;;  %v2254_v29 = vld [vmem:[#allocation2 + $0x34] sm:$0xf] }
 0x219   : > { %2128 = vrot.lane.b32.xlu0 %v2022_v21, %s8101_s29 }
 0x21a   : > { %v1706_v48 = vpop.permute.xlu1 %1705  ;;  %v1720_v14 = vpop.permute.xlu2 %1719  ;;  %v2064_v47 = vsel %vm8168_vm4, %v2062_v40, %v2063_v18  ;;  %v2255_v40 = vld [vmem:[#allocation2 + $0x38] sm:$0x3]  ;;  %v7517_v18 = vrot.slane %v2256_v34, 10 }
 0x21b   : > { %1806 = vst.msk [vmem:[#allocation4 + $0x50] sm:$0xf] %vm1785_vm14, %v1706_v48  ;;  %v1704_v27 = vpop.permute.xlu0 %1703  ;;  %v1879_v48 = vld [vmem:[#allocation2 + $0xec] sm:$0x1] }
 0x21c   : > { %1805 = vst.msk [vmem:[#allocation4 + $0x4c] sm:$0xf] %vm1785_vm14, %v1704_v27  ;;  %v2077_v27 = vrot.slane %v1882_v46, 5  ;;  %v2386_v46 = vrot.slane %v2255_v40, 6  ;;  %v2274_v40 = vld [vmem:[#allocation2 + $0x84] sm:$0xc] }
 0x21d   : > { %1813 = vst.msk [vmem:[#allocation4 + $0x6c] sm:$0xf] %vm1785_vm14, %v1720_v14  ;;  %v2076_v14 = vrot.slane %v2074_v44, 4 }
 0x21f   : > { %v2078_v58 = vsel %vm8168_vm4, %v2076_v14, %v2077_v27 }
 0x220   : > { %2136 = vrot.lane.b32.xlu1 %v2036_v51, %s8101_s29  ;;  %2132 = vrot.lane.b32.xlu2 %v2029_v54, %s8101_s29  ;;  %v2070_v51 = vrot.slane %v1879_v48, 5  ;;  %v7512_v54 = vrot.slane %v1880_v49, 9 }
 0x221   : > { %2134 = vrot.lane.b32.xlu0 %v2033_v56, %s8101_s29 }
 0x222   : > { %v1712_v1 = vpop.permute.xlu1 %1711  ;;  %v1726_v8 = vpop.permute.xlu2 %1725  ;;  %v2071_v60 = vsel %vm8168_vm4, %v2069_v50, %v2070_v51  ;;  %v2075_v63 = vsel %vm8168_vm4, %v7512_v54, %v2074_v44  ;;  %v2260_v44 = vld [vmem:[#allocation2 + $0x4c] sm:$0xf]  ;;  %v2261_v50 = vld [vmem:[#allocation2 + $0x50] sm:$0x3]  ;;  %v2259_v54 = vld [vmem:[#allocation2 + $0x48] sm:$0xc] }
 0x223   : > { %1809 = vst.msk [vmem:[#allocation4 + $0x5c] sm:$0xf] %vm1785_vm14, %v1712_v1  ;;  %v1710_v62 = vpop.permute.xlu0 %1709  ;;  %v2081_v1 = vrot.slane %v1884_v57, 5  ;;  %v2397_v14 = vrot.slane %v2260_v44, 6  ;;  %v2271_v44 = vld [vmem:[#allocation2 + $0x78] sm:$0xc] }
 0x224   : > { %1808 = vst.msk [vmem:[#allocation4 + $0x58] sm:$0xf] %vm1785_vm14, %v1710_v62  ;;  %v7513_v62 = vrot.slane %v1883_v5, 9 }
 0x225   : > { %1816 = vst.msk [vmem:[#allocation4 + $0x78] sm:$0xf] %vm1785_vm14, %v1726_v8  ;;  %v2369_v8 = vrot.slane %v2248_v61, 6 }
 0x226   : > { %v2082_v16 = vsel %vm8168_vm4, %v7513_v62, %v2081_v1 }
 0x227   : > { %v2370_v12 = vsel %vm8662_vm12, %v7514_v7, %v2369_v8  ;;  %v2371_v25 = vrot.slane %v2369_v8, 4  ;;  %v2266_v8 = vld [vmem:[#allocation2 + $0x64] sm:$0xf] }
 0x228   : > { %2142 = vrot.lane.b32.xlu1 %v2047_v2, %s8101_s29  ;;  %2138 = vrot.lane.b32.xlu2 %v2040_v10, %s8101_s29  ;;  %v2083_v10 = vrot.slane %v2081_v1, 4  ;;  %v2263_v1 = vld [vmem:[#allocation2 + $0x58] sm:$0xf] }
 0x229   : > { %2140 = vrot.lane.b32.xlu0 %v2043_v53, %s8101_s29 }
 0x22a   : > { %v1718_v20 = vpop.permute.xlu1 %1717  ;;  %v1732_v23 = vpop.permute.xlu2 %1731  ;;  %v2085_v19 = vsel %vm8168_vm4, %v2083_v10, %v2084_v41  ;;  %v2264_v10 = vld [vmem:[#allocation2 + $0x5c] sm:$0x3]  ;;  %v7520_v41 = vrot.slane %v2265_v6, 10 }
 0x22b   : > { %1812 = vst.msk [vmem:[#allocation4 + $0x68] sm:$0xf] %vm1785_vm14, %v1718_v20  ;;  %v1716_v24 = vpop.permute.xlu0 %1715  ;;  %v2249_v20 = vld [vmem:[#allocation2 + $0x20] sm:$0x3] }
 0x22c   : > { %1811 = vst.msk [vmem:[#allocation4 + $0x64] sm:$0xf] %vm1785_vm14, %v1716_v24  ;;  %v2379_v24 = vrot.slane %v2252_v17, 6  ;;  %v2407_v17 = vrot.slane %v2264_v10, 6  ;;  %v2283_v10 = vld [vmem:[#allocation2 + $0xa8] sm:$0xc] }
 0x22d   : > { %1819 = vst.msk [vmem:[#allocation4 + $0x84] sm:$0xf] %vm1785_vm14, %v1732_v23  ;;  %v2378_v23 = vrot.slane %v2376_v13, 4 }
 0x22f   : > { %v2380_v32 = vsel %vm8662_vm12, %v2378_v23, %v2379_v24 }
 0x230   : > { %2148 = vrot.lane.b32.xlu1 %v2057_v26, %s8101_s29  ;;  %2144 = vrot.lane.b32.xlu2 %v2050_v30, %s8101_s29  ;;  %v2372_v26 = vrot.slane %v2249_v20, 6  ;;  %v7515_v30 = vrot.slane %v2250_v15, 10 }
 0x231   : > { %2146 = vrot.lane.b32.xlu0 %v2054_v22, %s8101_s29 }
 0x232   : > { %v1724_v38 = vpop.permute.xlu1 %1723  ;;  %v1738_v21 = vpop.permute.xlu2 %1737  ;;  %v2373_v36 = vsel %vm8662_vm12, %v2371_v25, %v2372_v26  ;;  %v2377_v37 = vsel %vm8662_vm12, %v7515_v30, %v2376_v13  ;;  %v2269_v13 = vld [vmem:[#allocation2 + $0x70] sm:$0xf]  ;;  %v2270_v25 = vld [vmem:[#allocation2 + $0x74] sm:$0x3]  ;;  %v2268_v30 = vld [vmem:[#allocation2 + $0x6c] sm:$0xc] }
 0x233   : > { %1815 = vst.msk [vmem:[#allocation4 + $0x74] sm:$0xf] %vm1785_vm14, %v1724_v38  ;;  %v1722_v42 = vpop.permute.xlu0 %1721  ;;  %v2383_v38 = vrot.slane %v2254_v29, 6  ;;  %v2418_v23 = vrot.slane %v2269_v13, 6  ;;  %v2280_v13 = vld [vmem:[#allocation2 + $0x9c] sm:$0xc] }
 0x234   : > { %1814 = vst.msk [vmem:[#allocation4 + $0x70] sm:$0xf] %vm1785_vm14, %v1722_v42  ;;  %v7516_v42 = vrot.slane %v2253_v39, 10 }
 0x235   : > { %1822 = vst.msk [vmem:[#allocation4 + $0x90] sm:$0xf] %vm1785_vm14, %v1738_v21  ;;  %v2390_v21 = vrot.slane %v2257_v35, 6 }
 0x236   : > { %v2384_v27 = vsel %vm8662_vm12, %v7516_v42, %v2383_v38 }
 0x237   : > { %v2391_v49 = vsel %vm8662_vm12, %v7517_v18, %v2390_v21  ;;  %v2392_v57 = vrot.slane %v2390_v21, 4  ;;  %v2275_v21 = vld [vmem:[#allocation2 + $0x88] sm:$0xf] }
 0x238   : > { %2154 = vrot.lane.b32.xlu1 %v2068_v43, %s8101_s29  ;;  %2150 = vrot.lane.b32.xlu2 %v2061_v45, %s8101_s29  ;;  %v2385_v45 = vrot.slane %v2383_v38, 4  ;;  %v2272_v38 = vld [vmem:[#allocation2 + $0x7c] sm:$0xf] }
 0x239   : > { %2152 = vrot.lane.b32.xlu0 %v2064_v47, %s8101_s29 }
 0x23a   : > { %v1730_v52 = vpop.permute.xlu1 %1729  ;;  %v1744_v55 = vpop.permute.xlu2 %1743  ;;  %v2387_v51 = vsel %vm8662_vm12, %v2385_v45, %v2386_v46  ;;  %v2273_v45 = vld [vmem:[#allocation2 + $0x80] sm:$0x3]  ;;  %v7523_v46 = vrot.slane %v2274_v40, 10 }
 0x23b   : > { %1818 = vst.msk [vmem:[#allocation4 + $0x80] sm:$0xf] %vm1785_vm14, %v1730_v52  ;;  %v1728_v56 = vpop.permute.xlu0 %1727  ;;  %v2258_v52 = vld [vmem:[#allocation2 + $0x44] sm:$0x3] }
 0x23c   : > { %1817 = vst.msk [vmem:[#allocation4 + $0x7c] sm:$0xf] %vm1785_vm14, %v1728_v56  ;;  %v2400_v56 = vrot.slane %v2261_v50, 6  ;;  %v2428_v50 = vrot.slane %v2273_v45, 6  ;;  %v2292_v45 = vld [vmem:[#allocation2 + $0xcc] sm:$0xc] }
 0x23d   : > { %1825 = vst.msk [vmem:[#allocation4 + $0x9c] sm:$0xf] %vm1785_vm14, %v1744_v55  ;;  %v2399_v55 = vrot.slane %v2397_v14, 4 }
 0x23f   : > { %v2401_v5 = vsel %vm8662_vm12, %v2399_v55, %v2400_v56 }
 0x240   : > { %2160 = vrot.lane.b32.xlu1 %v2078_v58, %s8101_s29  ;;  %2156 = vrot.lane.b32.xlu2 %v2071_v60, %s8101_s29  ;;  %v2393_v58 = vrot.slane %v2258_v52, 6  ;;  %v7518_v60 = vrot.slane %v2259_v54, 10 }
 0x241   : > { %2158 = vrot.lane.b32.xlu0 %v2075_v63, %s8101_s29 }
 0x242   : > { %v1736_v2 = vpop.permute.xlu1 %1735  ;;  %v2091_v53 = vpop.permute.xlu2 %2090  ;;  %v2394_v7 = vsel %vm8662_vm12, %v2392_v57, %v2393_v58  ;;  %v2398_v62 = vsel %vm8662_vm12, %v7518_v60, %v2397_v14  ;;  %v2278_v14 = vld [vmem:[#allocation2 + $0x94] sm:$0xf]  ;;  %v2279_v57 = vld [vmem:[#allocation2 + $0x98] sm:$0x3]  ;;  %v2277_v60 = vld [vmem:[#allocation2 + $0x90] sm:$0xc] }
 0x243   : > { %1821 = vst.msk [vmem:[#allocation4 + $0x8c] sm:$0xf] %vm1785_vm14, %v1736_v2  ;;  %v1734_v11 = vpop.permute.xlu0 %1733  ;;  %v2404_v2 = vrot.slane %v2263_v1, 6  ;;  %v2439_v55 = vrot.slane %v2278_v14, 6  ;;  %v2289_v14 = vld [vmem:[#allocation2 + $0xc0] sm:$0xc] }
 0x244   : > { %1820 = vst.msk [vmem:[#allocation4 + $0x88] sm:$0xf] %vm1785_vm14, %v1734_v11  ;;  %v7519_v11 = vrot.slane %v2262_v9, 10 }
 0x245   : > { %2209 = vst.msk [vmem:[#allocation4 + $0x8] sm:$0xf] %vm2206_vm15, %v2091_v53  ;;  %v2411_v53 = vrot.slane %v2266_v8, 6 }
 0x246   : > { %v2405_v24 = vsel %vm8662_vm12, %v7519_v11, %v2404_v2 }
 0x247   : > { %v2412_v15 = vsel %vm8662_vm12, %v7520_v41, %v2411_v53  ;;  %v2413_v29 = vrot.slane %v2411_v53, 4  ;;  %v2284_v53 = vld [vmem:[#allocation2 + $0xac] sm:$0xf] }
 0x248   : > { %2507 = vrot.lane.b32.xlu1 %v2370_v12, %s8102_s30  ;;  %2162 = vrot.lane.b32.xlu2 %v2082_v16, %s8101_s29  ;;  %v2406_v16 = vrot.slane %v2404_v2, 4  ;;  %v2281_v2 = vld [vmem:[#allocation2 + $0xa0] sm:$0xf] }
 0x249   : > { %2164 = vrot.lane.b32.xlu0 %v2085_v19, %s8101_s29 }
 0x24a   : > { %v1742_v28 = vpop.permute.xlu1 %1741  ;;  %v2097_v31 = vpop.permute.xlu2 %2096  ;;  %v2408_v26 = vsel %vm8662_vm12, %v2406_v16, %v2407_v17  ;;  %v2282_v16 = vld [vmem:[#allocation2 + $0xa4] sm:$0x3]  ;;  %v7526_v17 = vrot.slane %v2283_v10, 10 }
 0x24b   : > { %1824 = vst.msk [vmem:[#allocation4 + $0x98] sm:$0xf] %vm1785_vm14, %v1742_v28  ;;  %v1740_v22 = vpop.permute.xlu0 %1739  ;;  %v2267_v28 = vld [vmem:[#allocation2 + $0x68] sm:$0x3] }
 0x24c   : > { %1823 = vst.msk [vmem:[#allocation4 + $0x94] sm:$0xf] %vm1785_vm14, %v1740_v22  ;;  %v2421_v22 = vrot.slane %v2270_v25, 6  ;;  %v2449_v25 = vrot.slane %v2282_v16, 6  ;;  %v2301_v16 = vld [vmem:[#allocation2 + $0xf0] sm:$0xc] }
 0x24d   : > { %2212 = vst.msk [vmem:[#allocation4 + $0x14] sm:$0xf] %vm2206_vm15, %v2097_v31  ;;  %v2420_v31 = vrot.slane %v2418_v23, 4 }
 0x24f   : > { %v2422_v39 = vsel %vm8662_vm12, %v2420_v31, %v2421_v22 }
 0x250   : > { %2513 = vrot.lane.b32.xlu1 %v2380_v32, %s8102_s30  ;;  %2509 = vrot.lane.b32.xlu2 %v2373_v36, %s8102_s30  ;;  %v2414_v32 = vrot.slane %v2267_v28, 6  ;;  %v7521_v36 = vrot.slane %v2268_v30, 10 }
 0x251   : > { %2511 = vrot.lane.b32.xlu0 %v2377_v37, %s8102_s30 }
 0x252   : > { %v2089_v43 = vpop.permute.xlu1 %2088  ;;  %v2103_v47 = vpop.permute.xlu2 %2102  ;;  %v2415_v18 = vsel %vm8662_vm12, %v2413_v29, %v2414_v32  ;;  %v2419_v42 = vsel %vm8662_vm12, %v7521_v36, %v2418_v23  ;;  %v2287_v23 = vld [vmem:[#allocation2 + $0xb8] sm:$0xf]  ;;  %v2288_v29 = vld [vmem:[#allocation2 + $0xbc] sm:$0x3]  ;;  %v2286_v36 = vld [vmem:[#allocation2 + $0xb4] sm:$0xc] }
 0x253   : > { %2208 = vst.msk [vmem:[#allocation4 + $0x4] sm:$0xf] %vm2206_vm15, %v2089_v43  ;;  %v2087_v48 = vpop.permute.xlu0 %2086  ;;  %v2425_v43 = vrot.slane %v2272_v38, 6  ;;  %v2460_v31 = vrot.slane %v2287_v23, 6  ;;  %v2298_v23 = vld [vmem:[#allocation2 + $0xe4] sm:$0xc] }
 0x254   : > { %2207 = vst.msk [vmem:[#allocation4] sm:$0xf] %vm2206_vm15, %v2087_v48  ;;  %v7522_v48 = vrot.slane %v2271_v44, 10 }
 0x255   : > { %2215 = vst.msk [vmem:[#allocation4 + $0x20] sm:$0xf] %vm2206_vm15, %v2103_v47  ;;  %v2432_v47 = vrot.slane %v2275_v21, 6 }
 0x256   : > { %v2426_v56 = vsel %vm8662_vm12, %v7522_v48, %v2425_v43 }
 0x257   : > { %v2433_v54 = vsel %vm8662_vm12, %v7523_v46, %v2432_v47  ;;  %v2434_v1 = vrot.slane %v2432_v47, 4  ;;  %v2293_v47 = vld [vmem:[#allocation2 + $0xd0] sm:$0xf] }
 0x258   : > { %2519 = vrot.lane.b32.xlu1 %v2391_v49, %s8102_s30  ;;  %2515 = vrot.lane.b32.xlu2 %v2384_v27, %s8102_s30  ;;  %v2427_v27 = vrot.slane %v2425_v43, 4  ;;  %v2290_v43 = vld [vmem:[#allocation2 + $0xc4] sm:$0xf] }
 0x259   : > { %2517 = vrot.lane.b32.xlu0 %v2387_v51, %s8102_s30 }
 0x25a   : > { %v2095_v59 = vpop.permute.xlu1 %2094  ;;  %v2109_v61 = vpop.permute.xlu2 %2108  ;;  %v2429_v58 = vsel %vm8662_vm12, %v2427_v27, %v2428_v50  ;;  %v2291_v27 = vld [vmem:[#allocation2 + $0xc8] sm:$0x3]  ;;  %v7529_v50 = vrot.slane %v2292_v45, 10 }
 0x25b   : > { %2211 = vst.msk [vmem:[#allocation4 + $0x10] sm:$0xf] %vm2206_vm15, %v2095_v59  ;;  %v2093_v63 = vpop.permute.xlu0 %2092  ;;  %v2276_v59 = vld [vmem:[#allocation2 + $0x8c] sm:$0x3] }
 0x25c   : > { %2210 = vst.msk [vmem:[#allocation4 + $0xc] sm:$0xf] %vm2206_vm15, %v2093_v63  ;;  %v2442_v63 = vrot.slane %v2279_v57, 6  ;;  %v2470_v57 = vrot.slane %v2291_v27, 6 }
 0x25d   : > { %2218 = vst.msk [vmem:[#allocation4 + $0x2c] sm:$0xf] %vm2206_vm15, %v2109_v61  ;;  %v2441_v61 = vrot.slane %v2439_v55, 4 }
 0x25f   : > { %v2443_v9 = vsel %vm8662_vm12, %v2441_v61, %v2442_v63 }
 0x260   : > { %2525 = vrot.lane.b32.xlu1 %v2401_v5, %s8102_s30  ;;  %2521 = vrot.lane.b32.xlu2 %v2394_v7, %s8102_s30  ;;  %v2435_v5 = vrot.slane %v2276_v59, 6  ;;  %v7524_v7 = vrot.slane %v2277_v60, 10 }
 0x261   : > { %2523 = vrot.lane.b32.xlu0 %v2398_v62, %s8102_s30 }
 0x262   : > { %v2101_v12 = vpop.permute.xlu1 %2100  ;;  %v2115_v19 = vpop.permute.xlu2 %2114  ;;  %v2436_v41 = vsel %vm8662_vm12, %v2434_v1, %v2435_v5  ;;  %v2440_v11 = vsel %vm8662_vm12, %v7524_v7, %v2439_v55  ;;  %v2296_v55 = vld [vmem:[#allocation2 + $0xdc] sm:$0xf]  ;;  %v2297_v1 = vld [vmem:[#allocation2 + $0xe0] sm:$0x3]  ;;  %v2295_v7 = vld [vmem:[#allocation2 + $0xd8] sm:$0xc] }
 0x263   : > { %2214 = vst.msk [vmem:[#allocation4 + $0x1c] sm:$0xf] %vm2206_vm15, %v2101_v12  ;;  %v2099_v20 = vpop.permute.xlu0 %2098  ;;  %v2446_v12 = vrot.slane %v2281_v2, 6  ;;  %v2481_v61 = vrot.slane %v2296_v55, 6  ;;  %v2668_v55 = vld [vmem:[#allocation2 + $0x30] sm:$0xf] }
 0x264   : > { %2213 = vst.msk [vmem:[#allocation4 + $0x18] sm:$0xf] %vm2206_vm15, %v2099_v20  ;;  %v7525_v20 = vrot.slane %v2280_v13, 10 }
 0x265   : > { %2221 = vst.msk [vmem:[#allocation4 + $0x38] sm:$0xf] %vm2206_vm15, %v2115_v19  ;;  %v2453_v19 = vrot.slane %v2284_v53, 6 }
 0x266   : > { %v2447_v22 = vsel %vm8662_vm12, %v7525_v20, %v2446_v12 }
 0x267   : > { %v2454_v30 = vsel %vm8662_vm12, %v7526_v17, %v2453_v19  ;;  %v2455_v38 = vrot.slane %v2453_v19, 4  ;;  %v2302_v19 = vld [vmem:[#allocation2 + $0xf4] sm:$0xf] }
 0x268   : > { %2531 = vrot.lane.b32.xlu1 %v2412_v15, %s8102_s30  ;;  %2527 = vrot.lane.b32.xlu2 %v2405_v24, %s8102_s30  ;;  %v2448_v24 = vrot.slane %v2446_v12, 4  ;;  %v2299_v12 = vld [vmem:[#allocation2 + $0xe8] sm:$0xf] }
 0x269   : > { %2529 = vrot.lane.b32.xlu0 %v2408_v26, %s8102_s30 }
 0x26a   : > { %v2107_v34 = vpop.permute.xlu1 %2106  ;;  %v2121_v35 = vpop.permute.xlu2 %2120  ;;  %v2450_v32 = vsel %vm8662_vm12, %v2448_v24, %v2449_v25  ;;  %v2300_v24 = vld [vmem:[#allocation2 + $0xec] sm:$0x3]  ;;  %v7532_v25 = vrot.slane %v2301_v16, 10 }
 0x26b   : > { %2217 = vst.msk [vmem:[#allocation4 + $0x28] sm:$0xf] %vm2206_vm15, %v2107_v34  ;;  %v2105_v37 = vpop.permute.xlu0 %2104  ;;  %v2285_v34 = vld [vmem:[#allocation2 + $0xb0] sm:$0x3] }
 0x26c   : > { %2216 = vst.msk [vmem:[#allocation4 + $0x24] sm:$0xf] %vm2206_vm15, %v2105_v37  ;;  %v2463_v37 = vrot.slane %v2288_v29, 6  ;;  %v2491_v29 = vrot.slane %v2300_v24, 6 }
 0x26d   : > { %2224 = vst.msk [vmem:[#allocation4 + $0x44] sm:$0xf] %vm2206_vm15, %v2121_v35  ;;  %v2462_v35 = vrot.slane %v2460_v31, 4 }
 0x26f   : > { %v2464_v44 = vsel %vm8662_vm12, %v2462_v35, %v2463_v37 }
 0x270   : > { %2537 = vrot.lane.b32.xlu1 %v2422_v39, %s8102_s30  ;;  %2533 = vrot.lane.b32.xlu2 %v2415_v18, %s8102_s30  ;;  %v2456_v39 = vrot.slane %v2285_v34, 6  ;;  %v7527_v18 = vrot.slane %v2286_v36, 10 }
 0x271   : > { %2535 = vrot.lane.b32.xlu0 %v2419_v42, %s8102_s30 }
 0x272   : > { %v2113_v49 = vpop.permute.xlu1 %2112  ;;  %v2127_v51 = vpop.permute.xlu2 %2126  ;;  %v2457_v46 = vsel %vm8662_vm12, %v2455_v38, %v2456_v39  ;;  %v2461_v48 = vsel %vm8662_vm12, %v7527_v18, %v2460_v31  ;;  %v2305_v31 = vld [vmem:[#allocation2 + $0x100] sm:$0xf]  ;;  %v2306_v38 = vld [vmem:[#allocation2 + $0x104] sm:$0x3]  ;;  %v2304_v18 = vld [vmem:[#allocation2 + $0xfc] sm:$0xc] }
 0x273   : > { %2220 = vst.msk [vmem:[#allocation4 + $0x34] sm:$0xf] %vm2206_vm15, %v2113_v49  ;;  %v2111_v52 = vpop.permute.xlu0 %2110  ;;  %v2467_v49 = vrot.slane %v2290_v43, 6  ;;  %v2502_v35 = vrot.slane %v2305_v31, 6 }
 0x274   : > { %2219 = vst.msk [vmem:[#allocation4 + $0x30] sm:$0xf] %vm2206_vm15, %v2111_v52  ;;  %v7528_v52 = vrot.slane %v2289_v14, 10 }
 0x275   : > { %2227 = vst.msk [vmem:[#allocation4 + $0x50] sm:$0xf] %vm2206_vm15, %v2127_v51  ;;  %v2474_v51 = vrot.slane %v2293_v47, 6 }
 0x276   : > { %v2468_v63 = vsel %vm8662_vm12, %v7528_v52, %v2467_v49 }
 0x277   : > { %v2475_v60 = vsel %vm8662_vm12, %v7529_v50, %v2474_v51  ;;  %v2476_v2 = vrot.slane %v2474_v51, 4 }
 0x278   : > { %2543 = vrot.lane.b32.xlu1 %v2433_v54, %s8102_s30  ;;  %2539 = vrot.lane.b32.xlu2 %v2426_v56, %s8102_s30  ;;  %v2469_v56 = vrot.slane %v2467_v49, 4 }
 0x279   : > { %2541 = vrot.lane.b32.xlu0 %v2429_v58, %s8102_s30 }
 0x27a   : > { %v2119_v6 = vpop.permute.xlu1 %2118  ;;  %v2133_v8 = vpop.permute.xlu2 %2132  ;;  %v2471_v5 = vsel %vm8662_vm12, %v2469_v56, %v2470_v57  ;;  %v2669_v56 = vld [vmem:[#allocation2 + $0x34] sm:$0xf] }
 0x27b   : > { %2223 = vst.msk [vmem:[#allocation4 + $0x40] sm:$0xf] %vm2206_vm15, %v2119_v6  ;;  %v2117_v62 = vpop.permute.xlu0 %2116  ;;  %v2294_v6 = vld [vmem:[#allocation2 + $0xd4] sm:$0x3] }
 0x27c   : > { %2222 = vst.msk [vmem:[#allocation4 + $0x3c] sm:$0xf] %vm2206_vm15, %v2117_v62  ;;  %v2484_v62 = vrot.slane %v2297_v1, 6 }
 0x27d   : > { %2230 = vst.msk [vmem:[#allocation4 + $0x5c] sm:$0xf] %vm2206_vm15, %v2133_v8  ;;  %v2483_v8 = vrot.slane %v2481_v61, 4 }
 0x27f   : > { %v2485_v13 = vsel %vm8662_vm12, %v2483_v8, %v2484_v62  ;;  %v2674_v8 = vld [vmem:[#allocation2 + $0x54] sm:$0xf]  ;;  %v2675_v62 = vld [vmem:[#allocation2 + $0x58] sm:$0xf] }
 0x280   : > { %2549 = vrot.lane.b32.xlu1 %v2443_v9, %s8102_s30  ;;  %2545 = vrot.lane.b32.xlu2 %v2436_v41, %s8102_s30  ;;  %v2477_v9 = vrot.slane %v2294_v6, 6  ;;  %v7530_v41 = vrot.slane %v2295_v7, 10  ;;  %v2676_v7 = vld [vmem:[#allocation2 + $0x60] sm:$0xf] }
 0x281   : > { %2547 = vrot.lane.b32.xlu0 %v2440_v11, %s8102_s30 }
 0x282   : > { %v2125_v15 = vpop.permute.xlu1 %2124  ;;  %v2139_v26 = vpop.permute.xlu2 %2138  ;;  %v2478_v17 = vsel %vm8662_vm12, %v2476_v2, %v2477_v9  ;;  %v2482_v20 = vsel %vm8662_vm12, %v7530_v41, %v2481_v61  ;;  %v2671_v61 = vld [vmem:[#allocation2 + $0x40] sm:$0xf]  ;;  %v2679_v41 = vld [vmem:[#allocation2 + $0x70] sm:$0xf] }
 0x283   : > { %2226 = vst.msk [vmem:[#allocation4 + $0x4c] sm:$0xf] %vm2206_vm15, %v2125_v15  ;;  %v2123_v28 = vpop.permute.xlu0 %2122  ;;  %v2488_v15 = vrot.slane %v2299_v12, 6 }
 0x284   : > { %2225 = vst.msk [vmem:[#allocation4 + $0x48] sm:$0xf] %vm2206_vm15, %v2123_v28  ;;  %v7531_v28 = vrot.slane %v2298_v23, 10 }
 0x285   : > { %2233 = vst.msk [vmem:[#allocation4 + $0x68] sm:$0xf] %vm2206_vm15, %v2139_v26  ;;  %v2495_v26 = vrot.slane %v2302_v19, 6  ;;  %v2680_v19 = vld [vmem:[#allocation2 + $0x78] sm:$0xf] }
 0x286   : > { %v2489_v37 = vsel %vm8662_vm12, %v7531_v28, %v2488_v15  ;;  %v2684_v28 = vld [vmem:[#allocation2 + $0x90] sm:$0xf] }
 0x287   : > { %v2496_v36 = vsel %vm8662_vm12, %v7532_v25, %v2495_v26  ;;  %v2497_v43 = vrot.slane %v2495_v26, 4  ;;  %v2685_v25 = vld [vmem:[#allocation2 + $0x94] sm:$0xf]  ;;  %v2683_v26 = vld [vmem:[#allocation2 + $0x88] sm:$0xf] }
 0x288   : > { %2555 = vrot.lane.b32.xlu1 %v2454_v30, %s8102_s30  ;;  %2551 = vrot.lane.b32.xlu2 %v2447_v22, %s8102_s30  ;;  %v2490_v22 = vrot.slane %v2488_v15, 4 }
 0x289   : > { %2553 = vrot.lane.b32.xlu0 %v2450_v32, %s8102_s30 }
 0x28a   : > { %v2131_v40 = vpop.permute.xlu1 %2130  ;;  %v2145_v21 = vpop.permute.xlu2 %2144  ;;  %v2492_v39 = vsel %vm8662_vm12, %v2490_v22, %v2491_v29  ;;  %v2688_v29 = vld [vmem:[#allocation2 + $0xa8] sm:$0xf] }
 0x28b   : > { %2229 = vst.msk [vmem:[#allocation4 + $0x58] sm:$0xf] %vm2206_vm15, %v2131_v40  ;;  %v2129_v42 = vpop.permute.xlu0 %2128  ;;  %v2303_v40 = vld [vmem:[#allocation2 + $0xf8] sm:$0x3] }
 0x28c   : > { %2228 = vst.msk [vmem:[#allocation4 + $0x54] sm:$0xf] %vm2206_vm15, %v2129_v42  ;;  %v2505_v42 = vrot.slane %v2306_v38, 6  ;;  %v2691_v38 = vld [vmem:[#allocation2 + $0xb8] sm:$0xf] }
 0x28d   : > { %2236 = vst.msk [vmem:[#allocation4 + $0x74] sm:$0xf] %vm2206_vm15, %v2145_v21  ;;  %v2504_v21 = vrot.slane %v2502_v35, 4 }
 0x28f   : > { %v2506_v49 = vsel %vm8662_vm12, %v2504_v21, %v2505_v42 }
 0x290   : > { %2561 = vrot.lane.b32.xlu1 %v2464_v44, %s8102_s30  ;;  %2557 = vrot.lane.b32.xlu2 %v2457_v46, %s8102_s30  ;;  %v2498_v44 = vrot.slane %v2303_v40, 6  ;;  %v7533_v46 = vrot.slane %v2304_v18, 10  ;;  %v2690_v40 = vld [vmem:[#allocation2 + $0xb4] sm:$0xf] }
 0x291   : > { %2559 = vrot.lane.b32.xlu0 %v2461_v48, %s8102_s30 }
 0x292   : > { %v2137_v54 = vpop.permute.xlu1 %2136  ;;  %v2151_v58 = vpop.permute.xlu2 %2150  ;;  %v2499_v14 = vsel %vm8662_vm12, %v2497_v43, %v2498_v44  ;;  %v2503_v27 = vsel %vm8662_vm12, %v7533_v46, %v2502_v35  ;;  %v2694_v43 = vld [vmem:[#allocation2 + $0xcc] sm:$0xf]  ;;  %v2692_v44 = vld [vmem:[#allocation2 + $0xc0] sm:$0xf] }
 0x293   : > { %2232 = vst.msk [vmem:[#allocation4 + $0x64] sm:$0xf] %vm2206_vm15, %v2137_v54  ;;  %v2135_v59 = vpop.permute.xlu0 %2134  ;;  %v2670_v54 = vld [vmem:[#allocation2 + $0x3c] sm:$0xf] }
 0x294   : > { %2231 = vst.msk [vmem:[#allocation4 + $0x60] sm:$0xf] %vm2206_vm15, %v2135_v59 }
 0x295   : > { %2239 = vst.msk [vmem:[#allocation4 + $0x80] sm:$0xf] %vm2206_vm15, %v2151_v58 }
 0x298   : > { %2567 = vrot.lane.b32.xlu1 %v2475_v60, %s8102_s30  ;;  %2563 = vrot.lane.b32.xlu2 %v2468_v63, %s8102_s30  ;;  %v2673_v60 = vld [vmem:[#allocation2 + $0x4c] sm:$0xf]  ;;  %v2672_v63 = vld [vmem:[#allocation2 + $0x48] sm:$0xf] }
 0x299   : > { %2565 = vrot.lane.b32.xlu0 %v2471_v5, %s8102_s30 }
 0x29a   : > { %v2143_v10 = vpop.permute.xlu1 %2142  ;;  %v2157_v53 = vpop.permute.xlu2 %2156 }
 0x29b   : > { %2235 = vst.msk [vmem:[#allocation4 + $0x70] sm:$0xf] %vm2206_vm15, %v2143_v10  ;;  %v2141_v11 = vpop.permute.xlu0 %2140 }
 0x29c   : > { %2234 = vst.msk [vmem:[#allocation4 + $0x6c] sm:$0xf] %vm2206_vm15, %v2141_v11  ;;  %v2678_v11 = vld [vmem:[#allocation2 + $0x6c] sm:$0xf] }
 0x29d   : > { %2242 = vst.msk [vmem:[#allocation4 + $0x8c] sm:$0xf] %vm2206_vm15, %v2157_v53  ;;  %v2677_v53 = vld [vmem:[#allocation2 + $0x64] sm:$0xf] }
 0x2a0   : > { %2573 = vrot.lane.b32.xlu1 %v2485_v13, %s8102_s30  ;;  %2569 = vrot.lane.b32.xlu2 %v2478_v17, %s8102_s30  ;;  %v2682_v17 = vld [vmem:[#allocation2 + $0x84] sm:$0xf] }
 0x2a1   : > { %2571 = vrot.lane.b32.xlu0 %v2482_v20, %s8102_s30  ;;  %v2681_v20 = vld [vmem:[#allocation2 + $0x7c] sm:$0xf] }
 0x2a2   : > { %v2149_v30 = vpop.permute.xlu1 %2148  ;;  %v2163_v32 = vpop.permute.xlu2 %2162 }
 0x2a3   : > { %2238 = vst.msk [vmem:[#allocation4 + $0x7c] sm:$0xf] %vm2206_vm15, %v2149_v30  ;;  %v2147_v34 = vpop.permute.xlu0 %2146 }
 0x2a4   : > { %2237 = vst.msk [vmem:[#allocation4 + $0x78] sm:$0xf] %vm2206_vm15, %v2147_v34  ;;  %v2687_v34 = vld [vmem:[#allocation2 + $0xa0] sm:$0xf] }
 0x2a5   : > { %2245 = vst.msk [vmem:[#allocation4 + $0x98] sm:$0xf] %vm2206_vm15, %v2163_v32  ;;  %v2686_v32 = vld [vmem:[#allocation2 + $0x9c] sm:$0xf] }
 0x2a8   : > { %2579 = vrot.lane.b32.xlu1 %v2496_v36, %s8102_s30  ;;  %2575 = vrot.lane.b32.xlu2 %v2489_v37, %s8102_s30 }
 0x2a9   : > { %2577 = vrot.lane.b32.xlu0 %v2492_v39, %s8102_s30  ;;  %v2689_v39 = vld [vmem:[#allocation2 + $0xac] sm:$0xf] }
 0x2aa   : > { %v2155_v45 = vpop.permute.xlu1 %2154  ;;  %v2510_v47 = vpop.permute.xlu2 %2509 }
 0x2ab   : > { %2241 = vst.msk [vmem:[#allocation4 + $0x88] sm:$0xf] %vm2206_vm15, %v2155_v45  ;;  %v2153_v48 = vpop.permute.xlu0 %2152  ;;  %v2693_v45 = vld [vmem:[#allocation2 + $0xc4] sm:$0xf] }
 0x2ac   : > { %2240 = vst.msk [vmem:[#allocation4 + $0x84] sm:$0xf] %vm2206_vm15, %v2153_v48 }
 0x2ad   : > { %2629 = vst.msk [vmem:[#allocation4 + $0x4] sm:$0xf] %vm2627_vm2, %v2510_v47 }
 0x2b0   : > { %2585 = vrot.lane.b32.xlu1 %v2506_v49, %s8102_s30  ;;  %2581 = vrot.lane.b32.xlu2 %v2499_v14, %s8102_s30  ;;  %v2697_v49 = vld [vmem:[#allocation2 + $0xdc] sm:$0xf]  ;;  %v2695_v14 = vld [vmem:[#allocation2 + $0xd0] sm:$0xf] }
 0x2b1   : > { %2583 = vrot.lane.b32.xlu0 %v2503_v27, %s8102_s30  ;;  %v2696_v27 = vld [vmem:[#allocation2 + $0xd8] sm:$0xf] }
 0x2b2   : > { %v2161_v50 = vpop.permute.xlu1 %2160  ;;  %v2516_v51 = vpop.permute.xlu2 %2515 }
 0x2b3   : > { %2244 = vst.msk [vmem:[#allocation4 + $0x94] sm:$0xf] %vm2206_vm15, %v2161_v50  ;;  %v2159_v52 = vpop.permute.xlu0 %2158 }
 0x2b4   : > { %2243 = vst.msk [vmem:[#allocation4 + $0x90] sm:$0xf] %vm2206_vm15, %v2159_v52 }
 0x2b5   : > { %2632 = vst.msk [vmem:[#allocation4 + $0x10] sm:$0xf] %vm2627_vm2, %v2516_v51 }
 0x2b8   : > { %2752 = vrot.lane.b32.xlu1 %v2670_v54, %s8103_s6  ;;  %2748 = vrot.lane.b32.xlu2 %v2668_v55, %s8103_s6  ;;  %v2700_v54 = vld [vmem:[#allocation2 + $0xf0] sm:$0xf]  ;;  %v2698_v55 = vld [vmem:[#allocation2 + $0xe4] sm:$0xf] }
 0x2b9   : > { %2750 = vrot.lane.b32.xlu0 %v2669_v56, %s8103_s6  ;;  %v2699_v56 = vld [vmem:[#allocation2 + $0xe8] sm:$0xf] }
 0x2ba   : > { %v2508_v57 = vpop.permute.xlu1 %2507  ;;  %v2522_v58 = vpop.permute.xlu2 %2521 }
 0x2bb   : > { %2628 = vst.msk [vmem:[#allocation4] sm:$0xf] %vm2627_vm2, %v2508_v57  ;;  %v2165_v59 = vpop.permute.xlu0 %2164 }
 0x2bc   : > { %2246 = vst.msk [vmem:[#allocation4 + $0x9c] sm:$0xf] %vm2206_vm15, %v2165_v59 }
 0x2bd   : > { %2635 = vst.msk [vmem:[#allocation4 + $0x1c] sm:$0xf] %vm2627_vm2, %v2522_v58 }
 0x2c0   : > { %2758 = vrot.lane.b32.xlu1 %v2673_v60, %s8103_s6  ;;  %2754 = vrot.lane.b32.xlu2 %v2671_v61, %s8103_s6  ;;  %v2703_v60 = vld [vmem:[#allocation2 + $0x100] sm:$0xf]  ;;  %v2701_v61 = vld [vmem:[#allocation2 + $0xf4] sm:$0xf] }
 0x2c1   : > { %2756 = vrot.lane.b32.xlu0 %v2672_v63, %s8103_s6  ;;  %v2702_v63 = vld [vmem:[#allocation2 + $0xfc] sm:$0xf] }
 0x2c2   : > { %v2514_v1 = vpop.permute.xlu1 %2513  ;;  %v2528_v5 = vpop.permute.xlu2 %2527 }
 0x2c3   : > { %2631 = vst.msk [vmem:[#allocation4 + $0xc] sm:$0xf] %vm2627_vm2, %v2514_v1  ;;  %v2512_v6 = vpop.permute.xlu0 %2511 }
 0x2c4   : > { %2630 = vst.msk [vmem:[#allocation4 + $0x8] sm:$0xf] %vm2627_vm2, %v2512_v6 }
 0x2c5   : > { %2638 = vst.msk [vmem:[#allocation4 + $0x28] sm:$0xf] %vm2627_vm2, %v2528_v5  ;;  %v2910_v5 = vld [vmem:[#allocation2 + $0x34] sm:$0xf] }
 0x2c8   : > { %2764 = vrot.lane.b32.xlu1 %v2676_v7, %s8103_s6  ;;  %2760 = vrot.lane.b32.xlu2 %v2674_v8, %s8103_s6  ;;  %v2706_v8 = vld [vmem:[#allocation2 + $0x114] sm:$0xf] }
 0x2c9   : > { %2762 = vrot.lane.b32.xlu0 %v2675_v62, %s8103_s6  ;;  %v3031_v62 = vrot.slane %v2910_v5, 5 }
 0x2ca   : > { %v2520_v2 = vpop.permute.xlu1 %2519  ;;  %v2534_v9 = vpop.permute.xlu2 %2533 }
 0x2cb   : > { %2634 = vst.msk [vmem:[#allocation4 + $0x18] sm:$0xf] %vm2627_vm2, %v2520_v2  ;;  %v2518_v10 = vpop.permute.xlu0 %2517  ;;  %v2704_v2 = vld [vmem:[#allocation2 + $0x108] sm:$0xf] }
 0x2cc   : > { %2633 = vst.msk [vmem:[#allocation4 + $0x14] sm:$0xf] %vm2627_vm2, %v2518_v10  ;;  %v2705_v10 = vld [vmem:[#allocation2 + $0x10c] sm:$0xf] }
 0x2cd   : > { %2641 = vst.msk [vmem:[#allocation4 + $0x34] sm:$0xf] %vm2627_vm2, %v2534_v9  ;;  %v2911_v9 = vld [vmem:[#allocation2 + $0x38] sm:$0x1] }
 0x2d0   : > { %2770 = vrot.lane.b32.xlu1 %v2679_v41, %s8103_s6  ;;  %2766 = vrot.lane.b32.xlu2 %v2677_v53, %s8103_s6  ;;  %v2909_v41 = vld [vmem:[#allocation2 + $0x30] sm:$0xe]  ;;  %v3033_v53 = vrot.slane %v3031_v62, 4 }
 0x2d1   : > { %2768 = vrot.lane.b32.xlu0 %v2678_v11, %s8103_s6  ;;  %v3034_v11 = vrot.slane %v2911_v9, 5 }
 0x2d2   : > { %v2526_v12 = vpop.permute.xlu1 %2525  ;;  %v2540_v13 = vpop.permute.xlu2 %2539 }
 0x2d3   : > { %2637 = vst.msk [vmem:[#allocation4 + $0x24] sm:$0xf] %vm2627_vm2, %v2526_v12  ;;  %v2524_v16 = vpop.permute.xlu0 %2523 }
 0x2d4   : > { %2636 = vst.msk [vmem:[#allocation4 + $0x20] sm:$0xf] %vm2627_vm2, %v2524_v16 }
 0x2d5   : > { %2644 = vst.msk [vmem:[#allocation4 + $0x40] sm:$0xf] %vm2627_vm2, %v2540_v13  ;;  %v7534_v13 = vrot.slane %v2909_v41, 9 }
 0x2d8   : > { %2776 = vrot.lane.b32.xlu1 %v2682_v17, %s8103_s6  ;;  %2772 = vrot.lane.b32.xlu2 %v2680_v19, %s8103_s6  ;;  %v2913_v19 = vld [vmem:[#allocation2 + $0x40] sm:$0xf] }
 0x2d9   : > { %2774 = vrot.lane.b32.xlu0 %v2681_v20, %s8103_s6  ;;  %v3035_v20 = vsel %vm8168_vm4, %v3033_v53, %v3034_v11  ;;  %v2929_v53 = vld [vmem:[#allocation2 + $0x80] sm:$0x1] }
 0x2da   : > { %v2532_v15 = vpop.permute.xlu1 %2531  ;;  %v2546_v23 = vpop.permute.xlu2 %2545 }
 0x2db   : > { %2640 = vst.msk [vmem:[#allocation4 + $0x30] sm:$0xf] %vm2627_vm2, %v2532_v15  ;;  %v2530_v24 = vpop.permute.xlu0 %2529  ;;  %v2915_v15 = vld [vmem:[#allocation2 + $0x48] sm:$0xe] }
 0x2dc   : > { %2639 = vst.msk [vmem:[#allocation4 + $0x2c] sm:$0xf] %vm2627_vm2, %v2530_v24  ;;  %v2916_v24 = vld [vmem:[#allocation2 + $0x4c] sm:$0xf] }
 0x2dd   : > { %2647 = vst.msk [vmem:[#allocation4 + $0x4c] sm:$0xf] %vm2627_vm2, %v2546_v23  ;;  %v2707_v23 = vld [vmem:[#allocation2 + $0x118] sm:$0xf] }
 0x2e0   : > { %2782 = vrot.lane.b32.xlu1 %v2685_v25, %s8103_s6  ;;  %2778 = vrot.lane.b32.xlu2 %v2683_v26, %s8103_s6  ;;  %v3032_v25 = vsel %vm8168_vm4, %v7534_v13, %v3031_v62  ;;  %v3038_v26 = vrot.slane %v2913_v19, 5  ;;  %v2927_v13 = vld [vmem:[#allocation2 + $0x78] sm:$0xe] }
 0x2e1   : > { %2780 = vrot.lane.b32.xlu0 %v2684_v28, %s8103_s6  ;;  %v2912_v28 = vld [vmem:[#allocation2 + $0x3c] sm:$0xe] }
 0x2e2   : > { %v2538_v30 = vpop.permute.xlu1 %2537  ;;  %v2552_v31 = vpop.permute.xlu2 %2551 }
 0x2e3   : > { %2643 = vst.msk [vmem:[#allocation4 + $0x3c] sm:$0xf] %vm2627_vm2, %v2538_v30  ;;  %v2536_v22 = vpop.permute.xlu0 %2535  ;;  %v2914_v30 = vld [vmem:[#allocation2 + $0x44] sm:$0x1] }
 0x2e4   : > { %2642 = vst.msk [vmem:[#allocation4 + $0x38] sm:$0xf] %vm2627_vm2, %v2536_v22  ;;  %v3045_v22 = vrot.slane %v2916_v24, 5 }
 0x2e5   : > { %2650 = vst.msk [vmem:[#allocation4 + $0x58] sm:$0xf] %vm2627_vm2, %v2552_v31  ;;  %v7536_v31 = vrot.slane %v2915_v15, 9 }
 0x2e8   : > { %2788 = vrot.lane.b32.xlu1 %v2688_v29, %s8103_s6  ;;  %2784 = vrot.lane.b32.xlu2 %v2686_v32, %s8103_s6  ;;  %v7535_v29 = vrot.slane %v2912_v28, 9 }
 0x2e9   : > { %2786 = vrot.lane.b32.xlu0 %v2687_v34, %s8103_s6  ;;  %v2919_v34 = vld [vmem:[#allocation2 + $0x58] sm:$0xf] }
 0x2ea   : > { %v2544_v36 = vpop.permute.xlu1 %2543  ;;  %v2558_v35 = vpop.permute.xlu2 %2557 }
 0x2eb   : > { %2646 = vst.msk [vmem:[#allocation4 + $0x48] sm:$0xf] %vm2627_vm2, %v2544_v36  ;;  %v2542_v37 = vpop.permute.xlu0 %2541  ;;  %v3040_v36 = vrot.slane %v3038_v26, 4 }
 0x2ec   : > { %2645 = vst.msk [vmem:[#allocation4 + $0x44] sm:$0xf] %vm2627_vm2, %v2542_v37 }
 0x2ed   : > { %2653 = vst.msk [vmem:[#allocation4 + $0x64] sm:$0xf] %vm2627_vm2, %v2558_v35  ;;  %v3041_v35 = vrot.slane %v2914_v30, 5  ;;  %v2933_v30 = vld [vmem:[#allocation2 + $0x90] sm:$0xe] }
 0x2f0   : > { %2794 = vrot.lane.b32.xlu1 %v2691_v38, %s8103_s6  ;;  %2790 = vrot.lane.b32.xlu2 %v2689_v39, %s8103_s6  ;;  %v3046_v39 = vsel %vm8168_vm4, %v7536_v31, %v3045_v22 }
 0x2f1   : > { %2792 = vrot.lane.b32.xlu0 %v2690_v40, %s8103_s6  ;;  %v3052_v40 = vrot.slane %v2919_v34, 5  ;;  %v2930_v34 = vld [vmem:[#allocation2 + $0x84] sm:$0xe] }
 0x2f2   : > { %v2550_v18 = vpop.permute.xlu1 %2549  ;;  %v2564_v21 = vpop.permute.xlu2 %2563 }
 0x2f3   : > { %2649 = vst.msk [vmem:[#allocation4 + $0x54] sm:$0xf] %vm2627_vm2, %v2550_v18  ;;  %v2548_v42 = vpop.permute.xlu0 %2547  ;;  %v3039_v18 = vsel %vm8168_vm4, %v7535_v29, %v3038_v26  ;;  %v2931_v26 = vld [vmem:[#allocation2 + $0x88] sm:$0xf] }
 0x2f4   : > { %2648 = vst.msk [vmem:[#allocation4 + $0x50] sm:$0xf] %vm2627_vm2, %v2548_v42  ;;  %v3042_v42 = vsel %vm8168_vm4, %v3040_v36, %v3041_v35  ;;  %v2932_v36 = vld [vmem:[#allocation2 + $0x8c] sm:$0x1]  ;;  %v7542_v35 = vrot.slane %v2933_v30, 9 }
 0x2f5   : > { %2656 = vst.msk [vmem:[#allocation4 + $0x70] sm:$0xf] %vm2627_vm2, %v2564_v21  ;;  %v2920_v21 = vld [vmem:[#allocation2 + $0x5c] sm:$0x1] }
 0x2f8   : > { %2800 = vrot.lane.b32.xlu1 %v2694_v43, %s8103_s6  ;;  %2796 = vrot.lane.b32.xlu2 %v2692_v44, %s8103_s6  ;;  %v2917_v43 = vld [vmem:[#allocation2 + $0x50] sm:$0x1]  ;;  %v2918_v44 = vld [vmem:[#allocation2 + $0x54] sm:$0xe] }
 0x2f9   : > { %2798 = vrot.lane.b32.xlu0 %v2693_v45, %s8103_s6  ;;  %v3054_v45 = vrot.slane %v3052_v40, 4 }
 0x2fa   : > { %v2556_v46 = vpop.permute.xlu1 %2555  ;;  %v2570_v47 = vpop.permute.xlu2 %2569 }
 0x2fb   : > { %2652 = vst.msk [vmem:[#allocation4 + $0x60] sm:$0xf] %vm2627_vm2, %v2556_v46  ;;  %v2554_v48 = vpop.permute.xlu0 %2553  ;;  %v3055_v46 = vrot.slane %v2920_v21, 5  ;;  %v3083_v21 = vrot.slane %v2932_v36, 5  ;;  %v2951_v36 = vld [vmem:[#allocation2 + $0xd8] sm:$0xe] }
 0x2fc   : > { %2651 = vst.msk [vmem:[#allocation4 + $0x5c] sm:$0xf] %vm2627_vm2, %v2554_v48  ;;  %v3048_v48 = vrot.slane %v2917_v43, 5 }
 0x2fd   : > { %2659 = vst.msk [vmem:[#allocation4 + $0x7c] sm:$0xf] %vm2627_vm2, %v2570_v47  ;;  %v3047_v47 = vrot.slane %v3045_v22, 4  ;;  %v2934_v22 = vld [vmem:[#allocation2 + $0x94] sm:$0xf] }
 0x300   : > { %2806 = vrot.lane.b32.xlu1 %v2697_v49, %s8103_s6  ;;  %2802 = vrot.lane.b32.xlu2 %v2695_v14, %s8103_s6  ;;  %v7537_v14 = vrot.slane %v2918_v44, 9 }
 0x301   : > { %2804 = vrot.lane.b32.xlu0 %v2696_v27, %s8103_s6 }
 0x302   : > { %v2562_v50 = vpop.permute.xlu1 %2561  ;;  %v2576_v51 = vpop.permute.xlu2 %2575 }
 0x303   : > { %2655 = vst.msk [vmem:[#allocation4 + $0x6c] sm:$0xf] %vm2627_vm2, %v2562_v50  ;;  %v2560_v52 = vpop.permute.xlu0 %2559 }
 0x304   : > { %2654 = vst.msk [vmem:[#allocation4 + $0x68] sm:$0xf] %vm2627_vm2, %v2560_v52  ;;  %v3056_v52 = vsel %vm8168_vm4, %v3054_v45, %v3055_v46 }
 0x305   : > { %2662 = vst.msk [vmem:[#allocation4 + $0x88] sm:$0xf] %vm2627_vm2, %v2576_v51  ;;  %v2922_v51 = vld [vmem:[#allocation2 + $0x64] sm:$0xf] }
 0x308   : > { %2812 = vrot.lane.b32.xlu1 %v2700_v54, %s8103_s6  ;;  %2808 = vrot.lane.b32.xlu2 %v2698_v55, %s8103_s6  ;;  %v2924_v54 = vld [vmem:[#allocation2 + $0x6c] sm:$0xe]  ;;  %v3049_v55 = vsel %vm8168_vm4, %v3047_v47, %v3048_v48  ;;  %v2938_v47 = vld [vmem:[#allocation2 + $0xa4] sm:$0x1] }
 0x309   : > { %2810 = vrot.lane.b32.xlu0 %v2699_v56, %s8103_s6  ;;  %v2925_v56 = vld [vmem:[#allocation2 + $0x70] sm:$0xf] }
 0x30a   : > { %v2568_v57 = vpop.permute.xlu1 %2567  ;;  %v2582_v58 = vpop.permute.xlu2 %2581 }
 0x30b   : > { %2658 = vst.msk [vmem:[#allocation4 + $0x78] sm:$0xf] %vm2627_vm2, %v2568_v57  ;;  %v2566_v59 = vpop.permute.xlu0 %2565  ;;  %v3053_v57 = vsel %vm8168_vm4, %v7537_v14, %v3052_v40  ;;  %v2937_v40 = vld [vmem:[#allocation2 + $0xa0] sm:$0xf]  ;;  %v2936_v14 = vld [vmem:[#allocation2 + $0x9c] sm:$0xe] }
 0x30c   : > { %2657 = vst.msk [vmem:[#allocation4 + $0x74] sm:$0xf] %vm2627_vm2, %v2566_v59  ;;  %v2921_v59 = vld [vmem:[#allocation2 + $0x60] sm:$0xe]  ;;  %v3094_v45 = vrot.slane %v2937_v40, 5 }
 0x30d   : > { %2665 = vst.msk [vmem:[#allocation4 + $0x94] sm:$0xf] %vm2627_vm2, %v2582_v58  ;;  %v3059_v58 = vrot.slane %v2922_v51, 5  ;;  %v2948_v40 = vld [vmem:[#allocation2 + $0xcc] sm:$0xe] }
 0x310   : > { %2818 = vrot.lane.b32.xlu1 %v2703_v60, %s8103_s6  ;;  %2814 = vrot.lane.b32.xlu2 %v2701_v61, %s8103_s6  ;;  %v2923_v60 = vld [vmem:[#allocation2 + $0x68] sm:$0x1]  ;;  %v7539_v61 = vrot.slane %v2924_v54, 9 }
 0x311   : > { %2816 = vrot.lane.b32.xlu0 %v2702_v63, %s8103_s6  ;;  %v3066_v63 = vrot.slane %v2925_v56, 5 }
 0x312   : > { %v2574_v1 = vpop.permute.xlu1 %2573  ;;  %v2749_v6 = vpop.permute.xlu2 %2748 }
 0x313   : > { %2661 = vst.msk [vmem:[#allocation4 + $0x84] sm:$0xf] %vm2627_vm2, %v2574_v1  ;;  %v2572_v7 = vpop.permute.xlu0 %2571  ;;  %v7538_v1 = vrot.slane %v2921_v59, 9  ;;  %v3067_v9 = vsel %vm8168_vm4, %v7539_v61, %v3066_v63  ;;  %v3068_v19 = vrot.slane %v3066_v63, 4  ;;  %v2943_v63 = vld [vmem:[#allocation2 + $0xb8] sm:$0xf] }
 0x314   : > { %2660 = vst.msk [vmem:[#allocation4 + $0x80] sm:$0xf] %vm2627_vm2, %v2572_v7  ;;  %v3061_v7 = vrot.slane %v3059_v58, 4 }
 0x315   : > { %2869 = vst.msk [vmem:[#allocation4] sm:$0xf] %vm2868_vm3, %v2749_v6  ;;  %v2928_v6 = vld [vmem:[#allocation2 + $0x7c] sm:$0xf]  ;;  %v3060_v41 = vsel %vm8168_vm4, %v7538_v1, %v3059_v58  ;;  %v2940_v58 = vld [vmem:[#allocation2 + $0xac] sm:$0xf] }
 0x318   : > { %2824 = vrot.lane.b32.xlu1 %v2706_v8, %s8103_s6  ;;  %2820 = vrot.lane.b32.xlu2 %v2704_v2, %s8103_s6  ;;  %v3062_v8 = vrot.slane %v2923_v60, 5  ;;  %v2942_v60 = vld [vmem:[#allocation2 + $0xb4] sm:$0xe] }
 0x319   : > { %2822 = vrot.lane.b32.xlu0 %v2705_v10, %s8103_s6  ;;  %v3073_v10 = vrot.slane %v2928_v6, 5  ;;  %v2939_v6 = vld [vmem:[#allocation2 + $0xa8] sm:$0xe] }
 0x31a   : > { %v2580_v12 = vpop.permute.xlu1 %2579  ;;  %v2755_v16 = vpop.permute.xlu2 %2754  ;;  %v3063_v11 = vsel %vm8168_vm4, %v3061_v7, %v3062_v8  ;;  %v2941_v7 = vld [vmem:[#allocation2 + $0xb0] sm:$0x1]  ;;  %v7545_v8 = vrot.slane %v2942_v60, 9 }
 0x31b   : > { %2664 = vst.msk [vmem:[#allocation4 + $0x90] sm:$0xf] %vm2627_vm2, %v2580_v12  ;;  %v2578_v17 = vpop.permute.xlu0 %2577  ;;  %v2926_v12 = vld [vmem:[#allocation2 + $0x74] sm:$0x1] }
 0x31c   : > { %2663 = vst.msk [vmem:[#allocation4 + $0x8c] sm:$0xf] %vm2627_vm2, %v2578_v17  ;;  %v3076_v17 = vrot.slane %v2929_v53, 5  ;;  %v3104_v53 = vrot.slane %v2941_v7, 5  ;;  %v2960_v7 = vld [vmem:[#allocation2 + $0xfc] sm:$0xe] }
 0x31d   : > { %2872 = vst.msk [vmem:[#allocation4 + $0xc] sm:$0xf] %vm2868_vm3, %v2755_v16  ;;  %v3075_v16 = vrot.slane %v3073_v10, 4 }
 0x31f   : > { %v3077_v28 = vsel %vm8168_vm4, %v3075_v16, %v3076_v17 }
 0x320   : > { %3171 = vrot.lane.b32.xlu1 %v3035_v20, %s8104_s7  ;;  %2826 = vrot.lane.b32.xlu2 %v2707_v23, %s8103_s6  ;;  %v3069_v20 = vrot.slane %v2926_v12, 5  ;;  %v7540_v23 = vrot.slane %v2927_v13, 9 }
 0x321   : > { %3169 = vrot.lane.b32.xlu0 %v3032_v25, %s8104_s7 }
 0x322   : > { %v2586_v32 = vpop.permute.xlu1 %2585  ;;  %v2761_v37 = vpop.permute.xlu2 %2760  ;;  %v3070_v31 = vsel %vm8168_vm4, %v3068_v19, %v3069_v20  ;;  %v3074_v29 = vsel %vm8168_vm4, %v7540_v23, %v3073_v10  ;;  %v2946_v10 = vld [vmem:[#allocation2 + $0xc4] sm:$0xf]  ;;  %v2947_v19 = vld [vmem:[#allocation2 + $0xc8] sm:$0x1]  ;;  %v2945_v23 = vld [vmem:[#allocation2 + $0xc0] sm:$0xe] }
 0x323   : > { %2667 = vst.msk [vmem:[#allocation4 + $0x9c] sm:$0xf] %vm2627_vm2, %v2586_v32  ;;  %v2584_v38 = vpop.permute.xlu0 %2583  ;;  %v3080_v32 = vrot.slane %v2931_v26, 5  ;;  %v3115_v16 = vrot.slane %v2946_v10, 5  ;;  %v2957_v10 = vld [vmem:[#allocation2 + $0xf0] sm:$0xe] }
 0x324   : > { %2666 = vst.msk [vmem:[#allocation4 + $0x98] sm:$0xf] %vm2627_vm2, %v2584_v38  ;;  %v7541_v38 = vrot.slane %v2930_v34, 9 }
 0x325   : > { %2875 = vst.msk [vmem:[#allocation4 + $0x18] sm:$0xf] %vm2868_vm3, %v2761_v37  ;;  %v3087_v37 = vrot.slane %v2934_v22, 5 }
 0x326   : > { %v3081_v46 = vsel %vm8168_vm4, %v7541_v38, %v3080_v32 }
 0x327   : > { %v3088_v44 = vsel %vm8168_vm4, %v7542_v35, %v3087_v37  ;;  %v3089_v51 = vrot.slane %v3087_v37, 4  ;;  %v2952_v37 = vld [vmem:[#allocation2 + $0xdc] sm:$0xf] }
 0x328   : > { %3177 = vrot.lane.b32.xlu1 %v3046_v39, %s8104_s7  ;;  %3173 = vrot.lane.b32.xlu2 %v3039_v18, %s8104_s7  ;;  %v3082_v18 = vrot.slane %v3080_v32, 4  ;;  %v2949_v32 = vld [vmem:[#allocation2 + $0xd0] sm:$0xf] }
 0x329   : > { %3175 = vrot.lane.b32.xlu0 %v3042_v42, %s8104_s7 }
 0x32a   : > { %v2753_v49 = vpop.permute.xlu1 %2752  ;;  %v2767_v27 = vpop.permute.xlu2 %2766  ;;  %v3084_v48 = vsel %vm8168_vm4, %v3082_v18, %v3083_v21  ;;  %v2950_v18 = vld [vmem:[#allocation2 + $0xd4] sm:$0x1]  ;;  %v7548_v21 = vrot.slane %v2951_v36, 9 }
 0x32b   : > { %2871 = vst.msk [vmem:[#allocation4 + $0x8] sm:$0xf] %vm2868_vm3, %v2753_v49  ;;  %v2751_v50 = vpop.permute.xlu0 %2750  ;;  %v2935_v49 = vld [vmem:[#allocation2 + $0x98] sm:$0x1] }
 0x32c   : > { %2870 = vst.msk [vmem:[#allocation4 + $0x4] sm:$0xf] %vm2868_vm3, %v2751_v50  ;;  %v3097_v50 = vrot.slane %v2938_v47, 5  ;;  %v3125_v47 = vrot.slane %v2950_v18, 5  ;;  %v3330_v18 = vld [vmem:[#allocation2 + $0x30] sm:$0xc] }
 0x32d   : > { %2878 = vst.msk [vmem:[#allocation4 + $0x24] sm:$0xf] %vm2868_vm3, %v2767_v27  ;;  %v3096_v27 = vrot.slane %v3094_v45, 4 }
 0x32f   : > { %v3098_v59 = vsel %vm8168_vm4, %v3096_v27, %v3097_v50 }
 0x330   : > { %3183 = vrot.lane.b32.xlu1 %v3056_v52, %s8104_s7  ;;  %3179 = vrot.lane.b32.xlu2 %v3049_v55, %s8104_s7  ;;  %v3090_v52 = vrot.slane %v2935_v49, 5  ;;  %v7543_v55 = vrot.slane %v2936_v14, 9 }
 0x331   : > { %3181 = vrot.lane.b32.xlu0 %v3053_v57, %s8104_s7 }
 0x332   : > { %v2759_v5 = vpop.permute.xlu1 %2758  ;;  %v2773_v62 = vpop.permute.xlu2 %2772  ;;  %v3091_v61 = vsel %vm8168_vm4, %v3089_v51, %v3090_v52  ;;  %v3095_v1 = vsel %vm8168_vm4, %v7543_v55, %v3094_v45  ;;  %v2955_v45 = vld [vmem:[#allocation2 + $0xe8] sm:$0xf]  ;;  %v2956_v51 = vld [vmem:[#allocation2 + $0xec] sm:$0x1]  ;;  %v2954_v55 = vld [vmem:[#allocation2 + $0xe4] sm:$0xe] }
 0x333   : > { %2874 = vst.msk [vmem:[#allocation4 + $0x14] sm:$0xf] %vm2868_vm3, %v2759_v5  ;;  %v2757_v2 = vpop.permute.xlu0 %2756  ;;  %v3101_v5 = vrot.slane %v2940_v58, 5  ;;  %v3136_v27 = vrot.slane %v2955_v45, 5  ;;  %v2966_v45 = vld [vmem:[#allocation2 + $0x114] sm:$0xe] }
 0x334   : > { %2873 = vst.msk [vmem:[#allocation4 + $0x10] sm:$0xf] %vm2868_vm3, %v2757_v2  ;;  %v7544_v2 = vrot.slane %v2939_v6, 9 }
 0x335   : > { %2881 = vst.msk [vmem:[#allocation4 + $0x30] sm:$0xf] %vm2868_vm3, %v2773_v62  ;;  %v3108_v62 = vrot.slane %v2943_v63, 5 }
 0x336   : > { %v3102_v17 = vsel %vm8168_vm4, %v7544_v2, %v3101_v5 }
 0x337   : > { %v3109_v13 = vsel %vm8168_vm4, %v7545_v8, %v3108_v62  ;;  %v3110_v26 = vrot.slane %v3108_v62, 4  ;;  %v2961_v62 = vld [vmem:[#allocation2 + $0x100] sm:$0xf] }
 0x338   : > { %3189 = vrot.lane.b32.xlu1 %v3067_v9, %s8104_s7  ;;  %3185 = vrot.lane.b32.xlu2 %v3060_v41, %s8104_s7  ;;  %v3103_v41 = vrot.slane %v3101_v5, 4  ;;  %v2958_v5 = vld [vmem:[#allocation2 + $0xf4] sm:$0xf] }
 0x339   : > { %3187 = vrot.lane.b32.xlu0 %v3063_v11, %s8104_s7 }
 0x33a   : > { %v2765_v15 = vpop.permute.xlu1 %2764  ;;  %v2779_v24 = vpop.permute.xlu2 %2778  ;;  %v3105_v20 = vsel %vm8168_vm4, %v3103_v41, %v3104_v53  ;;  %v2959_v41 = vld [vmem:[#allocation2 + $0xf8] sm:$0x1]  ;;  %v7551_v53 = vrot.slane %v2960_v7, 9 }
 0x33b   : > { %2877 = vst.msk [vmem:[#allocation4 + $0x20] sm:$0xf] %vm2868_vm3, %v2765_v15  ;;  %v2763_v25 = vpop.permute.xlu0 %2762  ;;  %v2944_v15 = vld [vmem:[#allocation2 + $0xbc] sm:$0x1] }
 0x33c   : > { %2876 = vst.msk [vmem:[#allocation4 + $0x1c] sm:$0xf] %vm2868_vm3, %v2763_v25  ;;  %v3118_v25 = vrot.slane %v2947_v19, 5  ;;  %v3146_v19 = vrot.slane %v2959_v41, 5  ;;  %v3339_v41 = vld [vmem:[#allocation2 + $0x54] sm:$0xc] }
 0x33d   : > { %2884 = vst.msk [vmem:[#allocation4 + $0x3c] sm:$0xf] %vm2868_vm3, %v2779_v24  ;;  %v3117_v24 = vrot.slane %v3115_v16, 4 }
 0x33f   : > { %v3119_v34 = vsel %vm8168_vm4, %v3117_v24, %v3118_v25 }
 0x340   : > { %3195 = vrot.lane.b32.xlu1 %v3077_v28, %s8104_s7  ;;  %3191 = vrot.lane.b32.xlu2 %v3070_v31, %s8104_s7  ;;  %v3111_v28 = vrot.slane %v2944_v15, 5  ;;  %v7546_v31 = vrot.slane %v2945_v23, 9 }
 0x341   : > { %3193 = vrot.lane.b32.xlu0 %v3074_v29, %s8104_s7 }
 0x342   : > { %v2771_v39 = vpop.permute.xlu1 %2770  ;;  %v2785_v42 = vpop.permute.xlu2 %2784  ;;  %v3112_v35 = vsel %vm8168_vm4, %v3110_v26, %v3111_v28  ;;  %v3116_v38 = vsel %vm8168_vm4, %v7546_v31, %v3115_v16  ;;  %v2964_v16 = vld [vmem:[#allocation2 + $0x10c] sm:$0xf]  ;;  %v2965_v26 = vld [vmem:[#allocation2 + $0x110] sm:$0x1]  ;;  %v2963_v31 = vld [vmem:[#allocation2 + $0x108] sm:$0xe] }
 0x343   : > { %2880 = vst.msk [vmem:[#allocation4 + $0x2c] sm:$0xf] %vm2868_vm3, %v2771_v39  ;;  %v2769_v43 = vpop.permute.xlu0 %2768  ;;  %v3122_v39 = vrot.slane %v2949_v32, 5  ;;  %v3157_v24 = vrot.slane %v2964_v16, 5  ;;  %v3336_v16 = vld [vmem:[#allocation2 + $0x48] sm:$0xc] }
 0x344   : > { %2879 = vst.msk [vmem:[#allocation4 + $0x28] sm:$0xf] %vm2868_vm3, %v2769_v43  ;;  %v7547_v43 = vrot.slane %v2948_v40, 9 }
 0x345   : > { %2887 = vst.msk [vmem:[#allocation4 + $0x48] sm:$0xf] %vm2868_vm3, %v2785_v42  ;;  %v3129_v42 = vrot.slane %v2952_v37, 5 }
 0x346   : > { %v3123_v50 = vsel %vm8168_vm4, %v7547_v43, %v3122_v39 }
 0x347   : > { %v3130_v14 = vsel %vm8168_vm4, %v7548_v21, %v3129_v42  ;;  %v3131_v58 = vrot.slane %v3129_v42, 4  ;;  %v3331_v42 = vld [vmem:[#allocation2 + $0x34] sm:$0xf] }
 0x348   : > { %3201 = vrot.lane.b32.xlu1 %v3088_v44, %s8104_s7  ;;  %3197 = vrot.lane.b32.xlu2 %v3081_v46, %s8104_s7  ;;  %v3124_v46 = vrot.slane %v3122_v39, 4  ;;  %v2967_v39 = vld [vmem:[#allocation2 + $0x118] sm:$0xf] }
 0x349   : > { %3199 = vrot.lane.b32.xlu0 %v3084_v48, %s8104_s7 }
 0x34a   : > { %v2777_v54 = vpop.permute.xlu1 %2776  ;;  %v2791_v56 = vpop.permute.xlu2 %2790  ;;  %v3126_v52 = vsel %vm8168_vm4, %v3124_v46, %v3125_v47  ;;  %v2968_v46 = vld [vmem:[#allocation2 + $0x11c] sm:$0x1]  ;;  %v7554_v47 = vrot.slane %v3330_v18, 10 }
 0x34b   : > { %2883 = vst.msk [vmem:[#allocation4 + $0x38] sm:$0xf] %vm2868_vm3, %v2777_v54  ;;  %v2775_v57 = vpop.permute.xlu0 %2774  ;;  %v2953_v54 = vld [vmem:[#allocation2 + $0xe0] sm:$0x1] }
 0x34c   : > { %2882 = vst.msk [vmem:[#allocation4 + $0x34] sm:$0xf] %vm2868_vm3, %v2775_v57  ;;  %v3139_v57 = vrot.slane %v2956_v51, 5 }
 0x34d   : > { %2890 = vst.msk [vmem:[#allocation4 + $0x54] sm:$0xf] %vm2868_vm3, %v2791_v56  ;;  %v3138_v56 = vrot.slane %v3136_v27, 4 }
 0x34f   : > { %v3140_v6 = vsel %vm8168_vm4, %v3138_v56, %v3139_v57 }
 0x350   : > { %3207 = vrot.lane.b32.xlu1 %v3098_v59, %s8104_s7  ;;  %3203 = vrot.lane.b32.xlu2 %v3091_v61, %s8104_s7  ;;  %v3132_v59 = vrot.slane %v2953_v54, 5  ;;  %v7549_v61 = vrot.slane %v2954_v55, 9 }
 0x351   : > { %3205 = vrot.lane.b32.xlu0 %v3095_v1, %s8104_s7 }
 0x352   : > { %v2783_v9 = vpop.permute.xlu1 %2782  ;;  %v2797_v11 = vpop.permute.xlu2 %2796  ;;  %v3133_v8 = vsel %vm8168_vm4, %v3131_v58, %v3132_v59  ;;  %v3137_v2 = vsel %vm8168_vm4, %v7549_v61, %v3136_v27  ;;  %v3335_v59 = vld [vmem:[#allocation2 + $0x44] sm:$0x3]  ;;  %v3333_v61 = vld [vmem:[#allocation2 + $0x3c] sm:$0xc] }
 0x353   : > { %2886 = vst.msk [vmem:[#allocation4 + $0x44] sm:$0xf] %vm2868_vm3, %v2783_v9  ;;  %v2781_v12 = vpop.permute.xlu0 %2780  ;;  %v3143_v9 = vrot.slane %v2958_v5, 5 }
 0x354   : > { %2885 = vst.msk [vmem:[#allocation4 + $0x40] sm:$0xf] %vm2868_vm3, %v2781_v12  ;;  %v7550_v12 = vrot.slane %v2957_v10, 9 }
 0x355   : > { %2893 = vst.msk [vmem:[#allocation4 + $0x60] sm:$0xf] %vm2868_vm3, %v2797_v11  ;;  %v3150_v11 = vrot.slane %v2961_v62, 5 }
 0x356   : > { %v3144_v25 = vsel %vm8168_vm4, %v7550_v12, %v3143_v9  ;;  %v3340_v12 = vld [vmem:[#allocation2 + $0x58] sm:$0xf] }
 0x357   : > { %v3151_v23 = vsel %vm8168_vm4, %v7551_v53, %v3150_v11  ;;  %v3152_v32 = vrot.slane %v3150_v11, 4 }
 0x358   : > { %3213 = vrot.lane.b32.xlu1 %v3109_v13, %s8104_s7  ;;  %3209 = vrot.lane.b32.xlu2 %v3102_v17, %s8104_s7  ;;  %v3145_v17 = vrot.slane %v3143_v9, 4  ;;  %v3337_v9 = vld [vmem:[#allocation2 + $0x4c] sm:$0xf] }
 0x359   : > { %3211 = vrot.lane.b32.xlu0 %v3105_v20, %s8104_s7 }
 0x35a   : > { %v2789_v30 = vpop.permute.xlu1 %2788  ;;  %v2803_v22 = vpop.permute.xlu2 %2802  ;;  %v3147_v28 = vsel %vm8168_vm4, %v3145_v17, %v3146_v19  ;;  %v3338_v17 = vld [vmem:[#allocation2 + $0x50] sm:$0x3]  ;;  %v7557_v19 = vrot.slane %v3339_v41, 10 }
 0x35b   : > { %2889 = vst.msk [vmem:[#allocation4 + $0x50] sm:$0xf] %vm2868_vm3, %v2789_v30  ;;  %v2787_v29 = vpop.permute.xlu0 %2786  ;;  %v2962_v30 = vld [vmem:[#allocation2 + $0x104] sm:$0x1] }
 0x35c   : > { %2888 = vst.msk [vmem:[#allocation4 + $0x4c] sm:$0xf] %vm2868_vm3, %v2787_v29  ;;  %v3160_v29 = vrot.slane %v2965_v26, 5 }
 0x35d   : > { %2896 = vst.msk [vmem:[#allocation4 + $0x6c] sm:$0xf] %vm2868_vm3, %v2803_v22  ;;  %v3159_v22 = vrot.slane %v3157_v24, 4 }
 0x35f   : > { %v3161_v40 = vsel %vm8168_vm4, %v3159_v22, %v3160_v29 }
 0x360   : > { %3219 = vrot.lane.b32.xlu1 %v3119_v34, %s8104_s7  ;;  %3215 = vrot.lane.b32.xlu2 %v3112_v35, %s8104_s7  ;;  %v3153_v34 = vrot.slane %v2962_v30, 5  ;;  %v7552_v35 = vrot.slane %v2963_v31, 9 }
 0x361   : > { %3217 = vrot.lane.b32.xlu0 %v3116_v38, %s8104_s7 }
 0x362   : > { %v2795_v44 = vpop.permute.xlu1 %2794  ;;  %v2809_v48 = vpop.permute.xlu2 %2808  ;;  %v3154_v21 = vsel %vm8168_vm4, %v3152_v32, %v3153_v34  ;;  %v3158_v43 = vsel %vm8168_vm4, %v7552_v35, %v3157_v24  ;;  %v3344_v34 = vld [vmem:[#allocation2 + $0x68] sm:$0x3]  ;;  %v3342_v35 = vld [vmem:[#allocation2 + $0x60] sm:$0xc] }
 0x363   : > { %2892 = vst.msk [vmem:[#allocation4 + $0x5c] sm:$0xf] %vm2868_vm3, %v2795_v44  ;;  %v2793_v49 = vpop.permute.xlu0 %2792  ;;  %v3164_v44 = vrot.slane %v2967_v39, 5 }
 0x364   : > { %2891 = vst.msk [vmem:[#allocation4 + $0x58] sm:$0xf] %vm2868_vm3, %v2793_v49  ;;  %v7553_v49 = vrot.slane %v2966_v45, 9 }
 0x365   : > { %2899 = vst.msk [vmem:[#allocation4 + $0x78] sm:$0xf] %vm2868_vm3, %v2809_v48  ;;  %v3452_v48 = vrot.slane %v3331_v42, 6  ;;  %v3166_v27 = vrot.slane %v3164_v44, 4 }
 0x366   : > { %v3165_v57 = vsel %vm8168_vm4, %v7553_v49, %v3164_v44  ;;  %v3346_v44 = vld [vmem:[#allocation2 + $0x70] sm:$0xf]  ;;  %v3349_v49 = vld [vmem:[#allocation2 + $0x7c] sm:$0xf] }
 0x367   : > { %v3453_v55 = vsel %vm8662_vm12, %v7554_v47, %v3452_v48  ;;  %v3454_v5 = vrot.slane %v3452_v48, 4 }
 0x368   : > { %3225 = vrot.lane.b32.xlu1 %v3130_v14, %s8104_s7  ;;  %3221 = vrot.lane.b32.xlu2 %v3123_v50, %s8104_s7  ;;  %v3167_v50 = vrot.slane %v2968_v46, 5  ;;  %v3348_v46 = vld [vmem:[#allocation2 + $0x78] sm:$0xc] }
 0x369   : > { %3223 = vrot.lane.b32.xlu0 %v3126_v52, %s8104_s7  ;;  %v3334_v52 = vld [vmem:[#allocation2 + $0x40] sm:$0xf] }
 0x36a   : > { %v2801_v60 = vpop.permute.xlu1 %2800  ;;  %v2815_v63 = vpop.permute.xlu2 %2814  ;;  %v3459_v56 = vrot.slane %v3334_v52, 6  ;;  %v3168_v58 = vsel %vm8168_vm4, %v3166_v27, %v3167_v50  ;;  %v3345_v27 = vld [vmem:[#allocation2 + $0x6c] sm:$0xc]  ;;  %v3347_v50 = vld [vmem:[#allocation2 + $0x74] sm:$0x3]  ;;  %v3494_v52 = vrot.slane %v3349_v49, 6 }
 0x36b   : > { %2895 = vst.msk [vmem:[#allocation4 + $0x68] sm:$0xf] %vm2868_vm3, %v2801_v60  ;;  %v2799_v1 = vpop.permute.xlu0 %2798  ;;  %v3332_v60 = vld [vmem:[#allocation2 + $0x38] sm:$0x3] }
 0x36c   : > { %2894 = vst.msk [vmem:[#allocation4 + $0x64] sm:$0xf] %vm2868_vm3, %v2799_v1  ;;  %v3462_v1 = vrot.slane %v3335_v59, 6  ;;  %v3352_v59 = vld [vmem:[#allocation2 + $0x88] sm:$0xf] }
 0x36d   : > { %2902 = vst.msk [vmem:[#allocation4 + $0x84] sm:$0xf] %vm2868_vm3, %v2815_v63  ;;  %v3461_v63 = vrot.slane %v3459_v56, 4 }
 0x36f   : > { %v3463_v10 = vsel %vm8662_vm12, %v3461_v63, %v3462_v1  ;;  %v3501_v63 = vrot.slane %v3352_v59, 6 }
 0x370   : > { %3231 = vrot.lane.b32.xlu1 %v3140_v6, %s8104_s7  ;;  %3227 = vrot.lane.b32.xlu2 %v3133_v8, %s8104_s7  ;;  %v3455_v6 = vrot.slane %v3332_v60, 6  ;;  %v7555_v8 = vrot.slane %v3333_v61, 10 }
 0x371   : > { %3229 = vrot.lane.b32.xlu0 %v3137_v2, %s8104_s7 }
 0x372   : > { %v2807_v13 = vpop.permute.xlu1 %2806  ;;  %v2821_v20 = vpop.permute.xlu2 %2820  ;;  %v3456_v53 = vsel %vm8662_vm12, %v3454_v5, %v3455_v6  ;;  %v3460_v11 = vsel %vm8662_vm12, %v7555_v8, %v3459_v56  ;;  %v3353_v6 = vld [vmem:[#allocation2 + $0x8c] sm:$0x3]  ;;  %v3351_v8 = vld [vmem:[#allocation2 + $0x84] sm:$0xc] }
 0x373   : > { %2898 = vst.msk [vmem:[#allocation4 + $0x74] sm:$0xf] %vm2868_vm3, %v2807_v13  ;;  %v2805_v15 = vpop.permute.xlu0 %2804  ;;  %v3466_v13 = vrot.slane %v3337_v9, 6  ;;  %v3496_v9 = vrot.slane %v3494_v52, 4 }
 0x374   : > { %2897 = vst.msk [vmem:[#allocation4 + $0x70] sm:$0xf] %vm2868_vm3, %v2805_v15  ;;  %v7556_v15 = vrot.slane %v3336_v16, 10 }
 0x375   : > { %2905 = vst.msk [vmem:[#allocation4 + $0x90] sm:$0xf] %vm2868_vm3, %v2821_v20  ;;  %v3473_v20 = vrot.slane %v3340_v12, 6  ;;  %v3468_v24 = vrot.slane %v3466_v13, 4 }
 0x376   : > { %v3467_v29 = vsel %vm8662_vm12, %v7556_v15, %v3466_v13  ;;  %v3355_v13 = vld [vmem:[#allocation2 + $0x94] sm:$0xf]  ;;  %v3358_v15 = vld [vmem:[#allocation2 + $0xa0] sm:$0xf] }
 0x377   : > { %v3474_v31 = vsel %vm8662_vm12, %v7557_v19, %v3473_v20  ;;  %v3475_v39 = vrot.slane %v3473_v20, 4 }
 0x378   : > { %3237 = vrot.lane.b32.xlu1 %v3151_v23, %s8104_s7  ;;  %3233 = vrot.lane.b32.xlu2 %v3144_v25, %s8104_s7  ;;  %v3469_v25 = vrot.slane %v3338_v17, 6  ;;  %v3357_v17 = vld [vmem:[#allocation2 + $0x9c] sm:$0xc] }
 0x379   : > { %3235 = vrot.lane.b32.xlu0 %v3147_v28, %s8104_s7  ;;  %v3343_v28 = vld [vmem:[#allocation2 + $0x64] sm:$0xf] }
 0x37a   : > { %v2813_v36 = vpop.permute.xlu1 %2812  ;;  %v2827_v37 = vpop.permute.xlu2 %2826  ;;  %v3480_v22 = vrot.slane %v3343_v28, 6  ;;  %v3470_v32 = vsel %vm8662_vm12, %v3468_v24, %v3469_v25  ;;  %v3354_v24 = vld [vmem:[#allocation2 + $0x90] sm:$0xc]  ;;  %v3356_v25 = vld [vmem:[#allocation2 + $0x98] sm:$0x3]  ;;  %v3515_v28 = vrot.slane %v3358_v15, 6 }
 0x37b   : > { %2901 = vst.msk [vmem:[#allocation4 + $0x80] sm:$0xf] %vm2868_vm3, %v2813_v36  ;;  %v2811_v38 = vpop.permute.xlu0 %2810  ;;  %v3341_v36 = vld [vmem:[#allocation2 + $0x5c] sm:$0x3]  ;;  %v3370_v15 = vld [vmem:[#allocation2 + $0xd0] sm:$0xf] }
 0x37c   : > { %2900 = vst.msk [vmem:[#allocation4 + $0x7c] sm:$0xf] %vm2868_vm3, %v2811_v38  ;;  %v3483_v38 = vrot.slane %v3344_v34, 6  ;;  %v3361_v34 = vld [vmem:[#allocation2 + $0xac] sm:$0xf] }
 0x37d   : > { %2908 = vst.msk [vmem:[#allocation4 + $0x9c] sm:$0xf] %vm2868_vm3, %v2827_v37  ;;  %v3482_v37 = vrot.slane %v3480_v22, 4 }
 0x37f   : > { %v3484_v45 = vsel %vm8662_vm12, %v3482_v37, %v3483_v38  ;;  %v3522_v37 = vrot.slane %v3361_v34, 6 }
 0x380   : > { %3243 = vrot.lane.b32.xlu1 %v3161_v40, %s8104_s7  ;;  %3239 = vrot.lane.b32.xlu2 %v3154_v21, %s8104_s7  ;;  %v3476_v40 = vrot.slane %v3341_v36, 6  ;;  %v7558_v21 = vrot.slane %v3342_v35, 10 }
 0x381   : > { %3241 = vrot.lane.b32.xlu0 %v3158_v43, %s8104_s7 }
 0x382   : > { %v2819_v14 = vpop.permute.xlu1 %2818  ;;  %v3174_v51 = vpop.permute.xlu2 %3173  ;;  %v3477_v47 = vsel %vm8662_vm12, %v3475_v39, %v3476_v40  ;;  %v3481_v48 = vsel %vm8662_vm12, %v7558_v21, %v3480_v22  ;;  %v3362_v40 = vld [vmem:[#allocation2 + $0xb0] sm:$0x3]  ;;  %v3360_v21 = vld [vmem:[#allocation2 + $0xa8] sm:$0xc] }
 0x383   : > { %2904 = vst.msk [vmem:[#allocation4 + $0x8c] sm:$0xf] %vm2868_vm3, %v2819_v14  ;;  %v2817_v54 = vpop.permute.xlu0 %2816  ;;  %v3487_v14 = vrot.slane %v3346_v44, 6  ;;  %v3517_v44 = vrot.slane %v3515_v28, 4 }
 0x384   : > { %2903 = vst.msk [vmem:[#allocation4 + $0x88] sm:$0xf] %vm2868_vm3, %v2817_v54  ;;  %v7559_v54 = vrot.slane %v3345_v27, 10 }
 0x385   : > { %3292 = vst.msk [vmem:[#allocation4 + $0x8] sm:$0xf] %vm3289_vm6, %v3174_v51  ;;  %v7560_v51 = vrot.slane %v3348_v46, 10  ;;  %v3489_v56 = vrot.slane %v3487_v14, 4 }
 0x386   : > { %v3488_v1 = vsel %vm8662_vm12, %v7559_v54, %v3487_v14  ;;  %v3364_v14 = vld [vmem:[#allocation2 + $0xb8] sm:$0xf]  ;;  %v3365_v54 = vld [vmem:[#allocation2 + $0xbc] sm:$0x3] }
 0x387   : > { %v3495_v61 = vsel %vm8662_vm12, %v7560_v51, %v3494_v52  ;;  %v3529_v52 = vrot.slane %v3364_v14, 6 }
 0x388   : > { %3590 = vrot.lane.b32.xlu1 %v3453_v55, %s8105_s8  ;;  %3245 = vrot.lane.b32.xlu2 %v3165_v57, %s8104_s7  ;;  %v3490_v57 = vrot.slane %v3347_v50, 6 }
 0x389   : > { %3247 = vrot.lane.b32.xlu0 %v3168_v58, %s8104_s7 }
 0x38a   : > { %v2825_v7 = vpop.permute.xlu1 %2824  ;;  %v3180_v62 = vpop.permute.xlu2 %3179  ;;  %v3491_v5 = vsel %vm8662_vm12, %v3489_v56, %v3490_v57  ;;  %v3531_v57 = vrot.slane %v3529_v52, 4 }
 0x38b   : > { %2907 = vst.msk [vmem:[#allocation4 + $0x98] sm:$0xf] %vm2868_vm3, %v2825_v7  ;;  %v2823_v2 = vpop.permute.xlu0 %2822  ;;  %v3350_v7 = vld [vmem:[#allocation2 + $0x80] sm:$0x3] }
 0x38c   : > { %2906 = vst.msk [vmem:[#allocation4 + $0x94] sm:$0xf] %vm2868_vm3, %v2823_v2  ;;  %v3504_v2 = vrot.slane %v3353_v6, 6 }
 0x38d   : > { %3295 = vst.msk [vmem:[#allocation4 + $0x14] sm:$0xf] %vm3289_vm6, %v3180_v62  ;;  %v3503_v62 = vrot.slane %v3501_v63, 4 }
 0x38f   : > { %v3505_v16 = vsel %vm8662_vm12, %v3503_v62, %v3504_v2 }
 0x390   : > { %3596 = vrot.lane.b32.xlu1 %v3463_v10, %s8105_s8  ;;  %3592 = vrot.lane.b32.xlu2 %v3456_v53, %s8105_s8  ;;  %v3497_v10 = vrot.slane %v3350_v7, 6  ;;  %v7561_v53 = vrot.slane %v3351_v8, 10 }
 0x391   : > { %3594 = vrot.lane.b32.xlu0 %v3460_v11, %s8105_s8 }
 0x392   : > { %v3172_v23 = vpop.permute.xlu1 %3171  ;;  %v3186_v26 = vpop.permute.xlu2 %3185  ;;  %v3498_v19 = vsel %vm8662_vm12, %v3496_v9, %v3497_v10  ;;  %v3502_v20 = vsel %vm8662_vm12, %v7561_v53, %v3501_v63  ;;  %v7907_v10 = vld [vmem:[%s11041_s1 + $0x28] sm:$0xff]  ;;  %v3363_v53 = vld [vmem:[#allocation2 + $0xb4] sm:$0xc] }
 0x393   : > { %3291 = vst.msk [vmem:[#allocation4 + $0x4] sm:$0xf] %vm3289_vm6, %v3172_v23  ;;  %v3170_v30 = vpop.permute.xlu0 %3169  ;;  %v3508_v23 = vrot.slane %v3355_v13, 6 }
 0x394   : > { %3290 = vst.msk [vmem:[#allocation4] sm:$0xf] %vm3289_vm6, %v3170_v30  ;;  %v7562_v30 = vrot.slane %v3354_v24, 10  ;;  %v3371_v24 = vld [vmem:[#allocation2 + $0xd4] sm:$0x3] }
 0x395   : > { %3298 = vst.msk [vmem:[#allocation4 + $0x20] sm:$0xf] %vm3289_vm6, %v3186_v26  ;;  %v7563_v26 = vrot.slane %v3357_v17, 10  ;;  %v3510_v22 = vrot.slane %v3508_v23, 4 }
 0x396   : > { %v3509_v38 = vsel %vm8662_vm12, %v7562_v30, %v3508_v23  ;;  %v3543_v23 = vrot.slane %v3370_v15, 6 }
 0x397   : > { %v3516_v35 = vsel %vm8662_vm12, %v7563_v26, %v3515_v28  ;;  %v3546_v28 = vrot.slane %v3371_v24, 6 }
 0x398   : > { %3602 = vrot.lane.b32.xlu1 %v3474_v31, %s8105_s8  ;;  %3598 = vrot.lane.b32.xlu2 %v3467_v29, %s8105_s8  ;;  %v3511_v29 = vrot.slane %v3356_v25, 6  ;;  %v3369_v25 = vld [vmem:[#allocation2 + $0xcc] sm:$0xc]  ;;  %v3545_v26 = vrot.slane %v3543_v23, 4 }
 0x399   : > { %3600 = vrot.lane.b32.xlu0 %v3470_v32, %s8105_s8  ;;  %v7567_v30 = vrot.slane %v3369_v25, 10 }
 0x39a   : > { %v3178_v18 = vpop.permute.xlu1 %3177  ;;  %v3192_v42 = vpop.permute.xlu2 %3191  ;;  %v3512_v39 = vsel %vm8662_vm12, %v3510_v22, %v3511_v29 }
 0x39b   : > { %3294 = vst.msk [vmem:[#allocation4 + $0x10] sm:$0xf] %vm3289_vm6, %v3178_v18  ;;  %v3176_v43 = vpop.permute.xlu0 %3175  ;;  %v3359_v18 = vld [vmem:[#allocation2 + $0xa4] sm:$0x3]  ;;  %v3544_v34 = vsel %vm8662_vm12, %v7567_v30, %v3543_v23 }
 0x39c   : > { %3293 = vst.msk [vmem:[#allocation4 + $0xc] sm:$0xf] %vm3289_vm6, %v3176_v43  ;;  %v3525_v43 = vrot.slane %v3362_v40, 6 }
 0x39d   : > { %3301 = vst.msk [vmem:[#allocation4 + $0x2c] sm:$0xf] %vm3289_vm6, %v3192_v42  ;;  %v3524_v42 = vrot.slane %v3522_v37, 4 }
 0x39f   : > { %v3526_v27 = vsel %vm8662_vm12, %v3524_v42, %v3525_v43  ;;  %v3373_v43 = vld [vmem:[#allocation2 + $0xdc] sm:$0xf] }
 0x3a0   : > { %3608 = vrot.lane.b32.xlu1 %v3484_v45, %s8105_s8  ;;  %3604 = vrot.lane.b32.xlu2 %v3477_v47, %s8105_s8  ;;  %v3518_v45 = vrot.slane %v3359_v18, 6 }
 0x3a1   : > { %3606 = vrot.lane.b32.xlu0 %v3481_v48, %s8105_s8  ;;  %v7564_v48 = vrot.slane %v3360_v21, 10 }
 0x3a2   : > { %v3184_v55 = vpop.permute.xlu1 %3183  ;;  %v3198_v58 = vpop.permute.xlu2 %3197  ;;  %v3519_v50 = vsel %vm8662_vm12, %v3517_v44, %v3518_v45  ;;  %v3374_v44 = vld [vmem:[#allocation2 + $0xe0] sm:$0x3]  ;;  %v3550_v45 = vrot.slane %v3373_v43, 6 }
 0x3a3   : > { %3297 = vst.msk [vmem:[#allocation4 + $0x1c] sm:$0xf] %vm3289_vm6, %v3184_v55  ;;  %v3182_v60 = vpop.permute.xlu0 %3181  ;;  %v3523_v51 = vsel %vm8662_vm12, %v7564_v48, %v3522_v37 }
 0x3a4   : > { %3296 = vst.msk [vmem:[#allocation4 + $0x18] sm:$0xf] %vm3289_vm6, %v3182_v60  ;;  %v7909_v60 = vld [vmem:[%s11041_s1 + $0x38] sm:$0xff] }
 0x3a5   : > { %3304 = vst.msk [vmem:[#allocation4 + $0x38] sm:$0xf] %vm3289_vm6, %v3198_v58  ;;  %v3532_v58 = vrot.slane %v3365_v54, 6  ;;  %3979 = vmatpush.bf16.msra.mxu0 %v7909_v60  ;;  %8013 = vmatpush.bf16.msra.mxu2 %v7909_v60  ;;  %v3375_v54 = vld [vmem:[#allocation2 + $0xe4] sm:$0xc] }
 0x3a6   : > { %8014 = vmatpush.bf16.msra.mxu3 %v7909_v60 }
 0x3a7   : > { %v3533_v63 = vsel %vm8662_vm12, %v3531_v57, %v3532_v58 }
 0x3a8   : > { %3614 = vrot.lane.b32.xlu1 %v3495_v61, %s8105_s8  ;;  %3610 = vrot.lane.b32.xlu2 %v3488_v1, %s8105_s8  ;;  %v7908_v61 = vld [vmem:[%s11041_s1 + $0x30] sm:$0xff]  ;;  %v3366_v1 = vld [vmem:[#allocation2 + $0xc0] sm:$0xc] }
 0x3a9   : > { %3612 = vrot.lane.b32.xlu0 %v3491_v5, %s8105_s8  ;;  %v3367_v5 = vld [vmem:[#allocation2 + $0xc4] sm:$0xf]  ;;  %3980 = vmatpush.bf16.msra.mxu0 %v7908_v61  ;;  %v7566_v6 = vrot.slane %v3366_v1, 10 }
 0x3aa   : > { %v3190_v41 = vpop.permute.xlu1 %3189  ;;  %v3204_v11 = vpop.permute.xlu2 %3203  ;;  %v3536_v7 = vrot.slane %v3367_v5, 6  ;;  %8015 = vmatpush.bf16.msra.mxu2 %v7908_v61  ;;  %8016 = vmatpush.bf16.msra.mxu3 %v7908_v61 }
 0x3ab   : > { %3300 = vst.msk [vmem:[#allocation4 + $0x28] sm:$0xf] %vm3289_vm6, %v3190_v41  ;;  %v3188_v12 = vpop.permute.xlu0 %3187  ;;  %v7906_v41 = vld [vmem:[%s11041_s1 + $0x20] sm:$0xff] }
 0x3ac   : > { %3299 = vst.msk [vmem:[#allocation4 + $0x24] sm:$0xf] %vm3289_vm6, %v3188_v12  ;;  %v3537_v9 = vsel %vm8662_vm12, %v7566_v6, %v3536_v7  ;;  %v3538_v37 = vrot.slane %v3536_v7, 4 }
 0x3ad   : > { %3307 = vst.msk [vmem:[#allocation4 + $0x44] sm:$0xf] %vm3289_vm6, %v3204_v11  ;;  %3981 = vmatpush.bf16.msra.mxu0 %v7907_v10  ;;  %v7565_v11 = vrot.slane %v3363_v53, 10 }
 0x3ae   : > { %8017 = vmatpush.bf16.msra.mxu2 %v7907_v10  ;;  %8018 = vmatpush.bf16.msra.mxu3 %v7907_v10 }
 0x3af   : > { %v3530_v17 = vsel %vm8662_vm12, %v7565_v11, %v3529_v52 }
 0x3b0   : > { %3620 = vrot.lane.b32.xlu1 %v3505_v16, %s8105_s8  ;;  %3616 = vrot.lane.b32.xlu2 %v3498_v19, %s8105_s8  ;;  %v7905_v19 = vld [vmem:[%s11041_s1 + $0x18] sm:$0xff] }
 0x3b1   : > { %3618 = vrot.lane.b32.xlu0 %v3502_v20, %s8105_s8  ;;  %3982 = vmatpush.bf16.msra.mxu0 %v7906_v41  ;;  %v7904_v20 = vld [vmem:[%s11041_s1 + $0x10] sm:$0xff] }
 0x3b2   : > { %v3196_v31 = vpop.permute.xlu1 %3195  ;;  %v3210_v32 = vpop.permute.xlu2 %3209  ;;  %8019 = vmatpush.bf16.msra.mxu2 %v7906_v41  ;;  %8020 = vmatpush.bf16.msra.mxu3 %v7906_v41  ;;  %v3377_v41 = vld [vmem:[#allocation2 + $0xec] sm:$0x3] }
 0x3b3   : > { %3303 = vst.msk [vmem:[#allocation4 + $0x34] sm:$0xf] %vm3289_vm6, %v3196_v31  ;;  %v3194_v36 = vpop.permute.xlu0 %3193  ;;  %v3560_v11 = vrot.slane %v3377_v41, 6 }
 0x3b4   : > { %3302 = vst.msk [vmem:[#allocation4 + $0x30] sm:$0xf] %vm3289_vm6, %v3194_v36  ;;  %v7903_v36 = vld [vmem:[%s11041_s1 + $0x8] sm:$0xff] }
 0x3b5   : > { %3310 = vst.msk [vmem:[#allocation4 + $0x50] sm:$0xf] %vm3289_vm6, %v3210_v32  ;;  %3983 = vmatpush.bf16.msra.mxu0 %v7905_v19  ;;  %v3547_v32 = vsel %vm8662_vm12, %v3545_v26, %v3546_v28 }
 0x3b6   : > { %8021 = vmatpush.bf16.msra.mxu2 %v7905_v19  ;;  %8022 = vmatpush.bf16.msra.mxu3 %v7905_v19 }
 0x3b8   : > { %3626 = vrot.lane.b32.xlu1 %v3516_v35, %s8105_s8  ;;  %3622 = vrot.lane.b32.xlu2 %v3509_v38, %s8105_s8  ;;  %v3368_v35 = vld [vmem:[#allocation2 + $0xc8] sm:$0x3]  ;;  %v7902_v38 = vld [vmem:[%s11041_s1] sm:$0xff] }
 0x3b9   : > { %3624 = vrot.lane.b32.xlu0 %v3512_v39, %s8105_s8  ;;  %3984 = vmatpush.bf16.msra.mxu0 %v7904_v20  ;;  %v3539_v39 = vrot.slane %v3368_v35, 6 }
 0x3ba   : > { %v3202_v46 = vpop.permute.xlu1 %3201  ;;  %v3216_v47 = vpop.permute.xlu2 %3215  ;;  %8023 = vmatpush.bf16.msra.mxu2 %v7904_v20  ;;  %8024 = vmatpush.bf16.msra.mxu3 %v7904_v20 }
 0x3bb   : > { %3306 = vst.msk [vmem:[#allocation4 + $0x40] sm:$0xf] %vm3289_vm6, %v3202_v46  ;;  %v3200_v49 = vpop.permute.xlu0 %3199  ;;  %v3540_v40 = vsel %vm8662_vm12, %v3538_v37, %v3539_v39  ;;  %v3553_v46 = vrot.slane %v3374_v44, 6 }
 0x3bc   : > { %3305 = vst.msk [vmem:[#allocation4 + $0x3c] sm:$0xf] %vm3289_vm6, %v3200_v49 }
 0x3bd   : > { %3313 = vst.msk [vmem:[#allocation4 + $0x5c] sm:$0xf] %vm3289_vm6, %v3216_v47  ;;  %3985 = vmatpush.bf16.msra.mxu0 %v7903_v36  ;;  %v3552_v47 = vrot.slane %v3550_v45, 4 }
 0x3be   : > { %8025 = vmatpush.bf16.msra.mxu2 %v7903_v36  ;;  %8026 = vmatpush.bf16.msra.mxu3 %v7903_v36 }
 0x3bf   : > { %v3554_v48 = vsel %vm8662_vm12, %v3552_v47, %v3553_v46 }
 0x3c0   : > { %3632 = vrot.lane.b32.xlu1 %v3526_v27, %s8105_s8  ;;  %3628 = vrot.lane.b32.xlu2 %v3519_v50, %s8105_s8 }
 0x3c1   : > { %3630 = vrot.lane.b32.xlu0 %v3523_v51, %s8105_s8  ;;  %3986 = vmatpush.bf16.msra.mxu0 %v7902_v38 }
 0x3c2   : > { %v3208_v55 = vpop.permute.xlu1 %3207  ;;  %v3222_v56 = vpop.permute.xlu2 %3221  ;;  %8027 = vmatpush.bf16.msra.mxu2 %v7902_v38  ;;  %8028 = vmatpush.bf16.msra.mxu3 %v7902_v38 }
 0x3c3   : > { %3309 = vst.msk [vmem:[#allocation4 + $0x4c] sm:$0xf] %vm3289_vm6, %v3208_v55  ;;  %v3206_v59 = vpop.permute.xlu0 %3205  ;;  %v3376_v55 = vld [vmem:[#allocation2 + $0xe8] sm:$0xf] }
 0x3c4   : > { %3308 = vst.msk [vmem:[#allocation4 + $0x48] sm:$0xf] %vm3289_vm6, %v3206_v59  ;;  %v3557_v57 = vrot.slane %v3376_v55, 6 }
 0x3c5   : > { %3316 = vst.msk [vmem:[#allocation4 + $0x68] sm:$0xf] %vm3289_vm6, %v3222_v56  ;;  %v7569_v56 = vrot.slane %v3375_v54, 10  ;;  %v3380_v54 = vld [vmem:[#allocation2 + $0xf8] sm:$0x3] }
 0x3c6   : > { %v3559_v53 = vrot.slane %v3557_v57, 4 }
 0x3c7   : > { %v3558_v58 = vsel %vm8662_vm12, %v7569_v56, %v3557_v57  ;;  %v3567_v57 = vrot.slane %v3380_v54, 6 }
 0x3c8   : > { %3638 = vrot.lane.b32.xlu1 %v3537_v9, %s8105_s8  ;;  %3634 = vrot.lane.b32.xlu2 %v3530_v17, %s8105_s8 }
 0x3c9   : > { %3636 = vrot.lane.b32.xlu0 %v3533_v63, %s8105_s8  ;;  %v3372_v63 = vld [vmem:[#allocation2 + $0xd8] sm:$0xc] }
 0x3ca   : > { %v3214_v8 = vpop.permute.xlu1 %3213  ;;  %v3228_v62 = vpop.permute.xlu2 %3227  ;;  %v7568_v1 = vrot.slane %v3372_v63, 10 }
 0x3cb   : > { %3312 = vst.msk [vmem:[#allocation4 + $0x58] sm:$0xf] %vm3289_vm6, %v3214_v8  ;;  %v3212_v2 = vpop.permute.xlu0 %3211 }
 0x3cc   : > { %3311 = vst.msk [vmem:[#allocation4 + $0x54] sm:$0xf] %vm3289_vm6, %v3212_v2  ;;  %v3551_v5 = vsel %vm8662_vm12, %v7568_v1, %v3550_v45 }
 0x3cd   : > { %3319 = vst.msk [vmem:[#allocation4 + $0x74] sm:$0xf] %vm3289_vm6, %v3228_v62 }
 0x3d0   : > { %3644 = vrot.lane.b32.xlu1 %v3547_v32, %s8105_s8  ;;  %3640 = vrot.lane.b32.xlu2 %v3540_v40, %s8105_s8 }
 0x3d1   : > { %3642 = vrot.lane.b32.xlu0 %v3544_v34, %s8105_s8 }
 0x3d2   : > { %v3220_v12 = vpop.permute.xlu1 %3219  ;;  %v3234_v13 = vpop.permute.xlu2 %3233 }
 0x3d3   : > { %3315 = vst.msk [vmem:[#allocation4 + $0x64] sm:$0xf] %vm3289_vm6, %v3220_v12  ;;  %v3218_v16 = vpop.permute.xlu0 %3217  ;;  %v3561_v12 = vsel %vm8662_vm12, %v3559_v53, %v3560_v11 }
 0x3d4   : > { %3314 = vst.msk [vmem:[#allocation4 + $0x60] sm:$0xf] %vm3289_vm6, %v3218_v16 }
 0x3d5   : > { %3322 = vst.msk [vmem:[#allocation4 + $0x80] sm:$0xf] %vm3289_vm6, %v3234_v13 }
 0x3d8   : > { %3650 = vrot.lane.b32.xlu1 %v3558_v58, %s8105_s8  ;;  %3646 = vrot.lane.b32.xlu2 %v3551_v5, %s8105_s8  ;;  %v9701_v58 = vld [vmem:[%s11042_s2] ss:$0 sm:$0xff] }
 0x3d9   : > { %3648 = vrot.lane.b32.xlu0 %v3554_v48, %s8105_s8 }
 0x3da   : > { %v3226_v31 = vpop.permute.xlu1 %3225  ;;  %v3240_v22 = vpop.permute.xlu2 %3239 }
 0x3db   : > { %3318 = vst.msk [vmem:[#allocation4 + $0x70] sm:$0xf] %vm3289_vm6, %v3226_v31  ;;  %v3224_v29 = vpop.permute.xlu0 %3223 }
 0x3dc   : > { %3317 = vst.msk [vmem:[#allocation4 + $0x6c] sm:$0xf] %vm3289_vm6, %v3224_v29 }
 0x3dd   : > { %3325 = vst.msk [vmem:[#allocation4 + $0x8c] sm:$0xf] %vm3289_vm6, %v3240_v22 }
 0x3e0   : > { %3652 = vrot.lane.b32.xlu2 %v3561_v12, %s8105_s8 }
 0x3e2   : > { %v3232_v18 = vpop.permute.xlu1 %3231  ;;  %v3246_v21 = vpop.permute.xlu2 %3245 }
 0x3e3   : > { %3321 = vst.msk [vmem:[#allocation4 + $0x7c] sm:$0xf] %vm3289_vm6, %v3232_v18  ;;  %v3230_v42 = vpop.permute.xlu0 %3229 }
 0x3e4   : > { %3320 = vst.msk [vmem:[#allocation4 + $0x78] sm:$0xf] %vm3289_vm6, %v3230_v42 }
 0x3e5   : > { %3328 = vst.msk [vmem:[#allocation4 + $0x98] sm:$0xf] %vm3289_vm6, %v3246_v21 }
 0x3ea   : > { %v3238_v49 = vpop.permute.xlu1 %3237  ;;  %v3593_v14 = vpop.permute.xlu2 %3592 }
 0x3eb   : > { %3324 = vst.msk [vmem:[#allocation4 + $0x88] sm:$0xf] %vm3289_vm6, %v3238_v49  ;;  %v3236_v27 = vpop.permute.xlu0 %3235 }
 0x3ec   : > { %3323 = vst.msk [vmem:[#allocation4 + $0x84] sm:$0xf] %vm3289_vm6, %v3236_v27  ;;  %v3378_v27 = vld [vmem:[#allocation2 + $0xf0] sm:$0xc] }
 0x3ed   : > { %3712 = vst.msk [vmem:[#allocation4 + $0x4] sm:$0xf] %vm3710_vm7, %v3593_v14 }
 0x3f2   : > { %v3244_v50 = vpop.permute.xlu1 %3243  ;;  %v3599_v51 = vpop.permute.xlu2 %3598 }
 0x3f3   : > { %3327 = vst.msk [vmem:[#allocation4 + $0x94] sm:$0xf] %vm3289_vm6, %v3244_v50  ;;  %v3242_v52 = vpop.permute.xlu0 %3241  ;;  %v3379_v50 = vld [vmem:[#allocation2 + $0xf4] sm:$0xf] }
 0x3f4   : > { %3326 = vst.msk [vmem:[#allocation4 + $0x90] sm:$0xf] %vm3289_vm6, %v3242_v52  ;;  %v3564_v52 = vrot.slane %v3379_v50, 6 }
 0x3f5   : > { %3715 = vst.msk [vmem:[#allocation4 + $0x10] sm:$0xf] %vm3710_vm7, %v3599_v51  ;;  %v7570_v51 = vrot.slane %v3378_v27, 10 }
 0x3f6   : > { %v3566_v56 = vrot.slane %v3564_v52, 4 }
 0x3f7   : > { %v3565_v55 = vsel %vm8662_vm12, %v7570_v51, %v3564_v52 }
 0x3f8   : > { %3654 = vrot.lane.b32.xlu0 %v3565_v55, %s8105_s8 }
 0x3fa   : > { %v3591_v59 = vpop.permute.xlu1 %3590  ;;  %v3605_v60 = vpop.permute.xlu2 %3604 }
 0x3fb   : > { %3711 = vst.msk [vmem:[#allocation4] sm:$0xf] %vm3710_vm7, %v3591_v59  ;;  %v3248_v61 = vpop.permute.xlu0 %3247  ;;  %v3568_v59 = vsel %vm8662_vm12, %v3566_v56, %v3567_v57 }
 0x3fc   : > { %3329 = vst.msk [vmem:[#allocation4 + $0x9c] sm:$0xf] %vm3289_vm6, %v3248_v61  ;;  %3656 = vrot.lane.b32.xlu1 %v3568_v59, %s8105_s8  ;;  %v3382_v61 = vld [vmem:[#allocation2 + $0x100] sm:$0xf] }
 0x3fd   : > { %3718 = vst.msk [vmem:[#allocation4 + $0x1c] sm:$0xf] %vm3710_vm7, %v3605_v60  ;;  %v3571_v1 = vrot.slane %v3382_v61, 6 }
 0x402   : > { %v7882_v6 = vld [vmem:[#allocation4] sm:$0xff]  ;;  %v3597_v7 = vpop.permute.xlu1 %3596  ;;  %v3611_v8 = vpop.permute.xlu2 %3610 }
 0x403   : > { %3714 = vst.msk [vmem:[#allocation4 + $0xc] sm:$0xf] %vm3710_vm7, %v3597_v7  ;;  %v3595_v62 = vpop.permute.xlu0 %3594  ;;  %3987 = vmatmul.bf16.vlgmr.msra.gmra.mxu0 %v7882_v6  ;;  %v3383_v7 = vld [vmem:[#allocation2 + $0x104] sm:$0x3] }
 0x404   : > { %3713 = vst.msk [vmem:[#allocation4 + $0x8] sm:$0xf] %vm3710_vm7, %v3595_v62  ;;  %v3574_v62 = vrot.slane %v3383_v7, 6 }
 0x405   : > { %3721 = vst.msk [vmem:[#allocation4 + $0x28] sm:$0xf] %vm3710_vm7, %v3611_v8  ;;  %v3573_v8 = vrot.slane %v3571_v1, 4 }
 0x407   : > { %v3575_v41 = vsel %vm8662_vm12, %v3573_v8, %v3574_v62 }
 0x408   : > { %3660 = vrot.lane.b32.xlu0 %v3575_v41, %s8105_s8 }
 0x40a   : > { %v3603_v2 = vpop.permute.xlu1 %3602  ;;  %v3617_v9 = vpop.permute.xlu2 %3616 }
 0x40b   : > { %3717 = vst.msk [vmem:[#allocation4 + $0x18] sm:$0xf] %vm3710_vm7, %v3603_v2  ;;  %v3601_v10 = vpop.permute.xlu0 %3600  ;;  %v7883_v13 = vld [vmem:[#allocation4 + $0x8] sm:$0xff] }
 0x40c   : > { %3716 = vst.msk [vmem:[#allocation4 + $0x14] sm:$0xf] %vm3710_vm7, %v3601_v10  ;;  %v3385_v10 = vld [vmem:[#allocation2 + $0x10c] sm:$0xf] }
 0x40d   : > { %3724 = vst.msk [vmem:[#allocation4 + $0x34] sm:$0xf] %vm3710_vm7, %v3617_v9  ;;  %v3384_v9 = vld [vmem:[#allocation2 + $0x108] sm:$0xc]  ;;  %v3578_v11 = vrot.slane %v3385_v10, 6 }
 0x40e   : > { %v7572_v53 = vrot.slane %v3384_v9, 10 }
 0x412   : > { %v3609_v16 = vpop.permute.xlu1 %3608  ;;  %v3623_v17 = vpop.permute.xlu2 %3622  ;;  %v7885_v22 = vld [vmem:[#allocation4 + $0x18] sm:$0xff] }
 0x413   : > { %3720 = vst.msk [vmem:[#allocation4 + $0x24] sm:$0xf] %vm3710_vm7, %v3609_v16  ;;  %v3607_v19 = vpop.permute.xlu0 %3606  ;;  %3992 = vmatmul.bf16.gmra.mxu0 %v7883_v13  ;;  %v7884_v24 = vld [vmem:[#allocation4 + $0x10] sm:$0xff]  ;;  %v3579_v13 = vsel %vm8662_vm12, %v7572_v53, %v3578_v11 }
 0x414   : > { %3719 = vst.msk [vmem:[#allocation4 + $0x20] sm:$0xf] %vm3710_vm7, %v3607_v19  ;;  %3662 = vrot.lane.b32.xlu1 %v3579_v13, %s8105_s8 }
 0x415   : > { %3727 = vst.msk [vmem:[#allocation4 + $0x40] sm:$0xf] %vm3710_vm7, %v3623_v17 }
 0x41a   : > { %v3615_v20 = vpop.permute.xlu1 %3614  ;;  %v3629_v15 = vpop.permute.xlu2 %3628 }
 0x41b   : > { %3723 = vst.msk [vmem:[#allocation4 + $0x30] sm:$0xf] %vm3710_vm7, %v3615_v20  ;;  %v3613_v23 = vpop.permute.xlu0 %3612  ;;  %v7886_v39 = vld [vmem:[#allocation4 + $0x20] sm:$0xff] }
 0x41c   : > { %3722 = vst.msk [vmem:[#allocation4 + $0x2c] sm:$0xf] %vm3710_vm7, %v3613_v23  ;;  %v3387_v20 = vld [vmem:[#allocation2 + $0x114] sm:$0xc] }
 0x41d   : > { %3730 = vst.msk [vmem:[#allocation4 + $0x4c] sm:$0xf] %vm3710_vm7, %v3629_v15  ;;  %v3388_v15 = vld [vmem:[#allocation2 + $0x118] sm:$0xf]  ;;  %v7573_v23 = vrot.slane %v3387_v20, 10 }
 0x422   : > { %v3621_v25 = vpop.permute.xlu1 %3620  ;;  %v3635_v31 = vpop.permute.xlu2 %3634  ;;  %v7888_v46 = vld [vmem:[#allocation4 + $0x30] sm:$0xff] }
 0x423   : > { %3726 = vst.msk [vmem:[#allocation4 + $0x3c] sm:$0xf] %vm3710_vm7, %v3621_v25  ;;  %v3619_v26 = vpop.permute.xlu0 %3618  ;;  %3997 = vmatmul.bf16.gmra.mxu0 %v7884_v24  ;;  %v7887_v42 = vld [vmem:[#allocation4 + $0x28] sm:$0xff]  ;;  %v3585_v25 = vrot.slane %v3388_v15, 6 }
 0x424   : > { %3725 = vst.msk [vmem:[#allocation4 + $0x38] sm:$0xf] %vm3710_vm7, %v3619_v26  ;;  %v3381_v26 = vld [vmem:[#allocation2 + $0xfc] sm:$0xc] }
 0x425   : > { %3733 = vst.msk [vmem:[#allocation4 + $0x58] sm:$0xf] %vm3710_vm7, %v3635_v31 }
 0x42a   : > { %v3627_v28 = vpop.permute.xlu1 %3626  ;;  %v3641_v36 = vpop.permute.xlu2 %3640 }
 0x42b   : > { %3729 = vst.msk [vmem:[#allocation4 + $0x48] sm:$0xf] %vm3710_vm7, %v3627_v28  ;;  %v3625_v30 = vpop.permute.xlu0 %3624  ;;  %v7889_v14 = vld [vmem:[#allocation4 + $0x38] sm:$0xff]  ;;  %v3389_v28 = vld [vmem:[#allocation2 + $0x11c] sm:$0x3] }
 0x42c   : > { %3728 = vst.msk [vmem:[#allocation4 + $0x44] sm:$0xf] %vm3710_vm7, %v3625_v30  ;;  %v7571_v30 = vrot.slane %v3381_v26, 10  ;;  %v3588_v31 = vrot.slane %v3389_v28, 6 }
 0x42d   : > { %3736 = vst.msk [vmem:[#allocation4 + $0x64] sm:$0xf] %vm3710_vm7, %v3641_v36 }
 0x432   : > { %v7891_v29 = vld [vmem:[#allocation4 + $0x48] sm:$0xff]  ;;  %v3633_v32 = vpop.permute.xlu1 %3632  ;;  %v3647_v43 = vpop.permute.xlu2 %3646 }
 0x433   : > { %3732 = vst.msk [vmem:[#allocation4 + $0x54] sm:$0xf] %vm3710_vm7, %v3633_v32  ;;  %v3631_v34 = vpop.permute.xlu0 %3630  ;;  %4002 = vmatmul.bf16.gmra.mxu0 %v7885_v22  ;;  %4032 = vmatmul.bf16.vlgmr.msra.gmra.mxu2 %v7891_v29  ;;  %v7890_v6 = vld [vmem:[#allocation4 + $0x40] sm:$0xff]  ;;  %v3586_v29 = vsel %vm8662_vm12, %v7573_v23, %v3585_v25  ;;  %v3587_v32 = vrot.slane %v3585_v25, 4 }
 0x434   : > { %3731 = vst.msk [vmem:[#allocation4 + $0x50] sm:$0xf] %vm3710_vm7, %v3631_v34  ;;  %3666 = vrot.lane.b32.xlu0 %v3586_v29, %s8105_s8  ;;  %v3572_v34 = vsel %vm8662_vm12, %v7571_v30, %v3571_v1 }
 0x435   : > { %3739 = vst.msk [vmem:[#allocation4 + $0x70] sm:$0xf] %vm3710_vm7, %v3647_v43  ;;  %3658 = vrot.lane.b32.xlu2 %v3572_v34, %s8105_s8  ;;  %v3580_v43 = vrot.slane %v3578_v11, 4 }
 0x43a   : > { %v3639_v37 = vpop.permute.xlu1 %3638  ;;  %v3653_v48 = vpop.permute.xlu2 %3652 }
 0x43b   : > { %v3637_v35 = vpop.permute.xlu0 %3636  ;;  %3735 = vst.msk [vmem:[#allocation4 + $0x60] sm:$0xf] %vm3710_vm7, %v3639_v37  ;;  %v7892_v38 = vld [vmem:[#allocation4 + $0x50] sm:$0xff] }
 0x43c   : > { %3734 = vst.msk [vmem:[#allocation4 + $0x5c] sm:$0xf] %vm3710_vm7, %v3637_v35 }
 0x43d   : > { %3742 = vst.msk [vmem:[#allocation4 + $0x7c] sm:$0xf] %vm3710_vm7, %v3653_v48 }
 0x442   : > { %v3645_v40 = vpop.permute.xlu1 %3644  ;;  %v7894_v45 = vld [vmem:[#allocation4 + $0x60] sm:$0xff] }
 0x443   : > { %4007 = vmatmul.bf16.gmra.mxu0 %v7886_v39  ;;  %4037 = vmatmul.bf16.gmra.mxu2 %v7892_v38  ;;  %v3643_v18 = vpop.permute.xlu0 %3642  ;;  %3738 = vst.msk [vmem:[#allocation4 + $0x6c] sm:$0xf] %vm3710_vm7, %v3645_v40  ;;  %v7893_v21 = vld [vmem:[#allocation4 + $0x58] sm:$0xff]  ;;  %v3589_v38 = vsel %vm8662_vm12, %v3587_v32, %v3588_v31 }
 0x444   : > { %3737 = vst.msk [vmem:[#allocation4 + $0x68] sm:$0xf] %vm3710_vm7, %v3643_v18  ;;  %3668 = vrot.lane.b32.xlu1 %v3589_v38, %s8105_s8 }
 0x44a   : > { %v3651_v47 = vpop.permute.xlu1 %3650 }
 0x44b   : > { %v3649_v44 = vpop.permute.xlu0 %3648  ;;  %3741 = vst.msk [vmem:[#allocation4 + $0x78] sm:$0xf] %vm3710_vm7, %v3651_v47  ;;  %v7895_v49 = vld [vmem:[#allocation4 + $0x68] sm:$0xff] }
 0x44c   : > { %3740 = vst.msk [vmem:[#allocation4 + $0x74] sm:$0xf] %vm3710_vm7, %v3649_v44 }
 0x452   : > { %v7897_v37 = vld [vmem:[#allocation4 + $0x78] sm:$0xff] }
 0x453   : > { %4012 = vmatmul.bf16.gmra.mxu0 %v7887_v42  ;;  %4042 = vmatmul.bf16.gmra.mxu2 %v7893_v21  ;;  %v7896_v60 = vld [vmem:[#allocation4 + $0x70] sm:$0xff]  ;;  %v3386_v42 = vld [vmem:[#allocation2 + $0x110] sm:$0x3] }
 0x454   : > { %v3581_v44 = vrot.slane %v3386_v42, 6 }
 0x463   : > { %4017 = vmatmul.bf16.gmra.mxu0 %v7888_v46  ;;  %4047 = vmatmul.bf16.gmra.mxu2 %v7894_v45  ;;  %v3582_v46 = vsel %vm8662_vm12, %v3580_v43, %v3581_v44 }
 0x464   : > { %3664 = vrot.lane.b32.xlu2 %v3582_v46, %s8105_s8 }
 0x473   : > { %4022 = vmatmul.bf16.gmra.mxu0 %v7889_v14  ;;  %4052 = vmatmul.bf16.gmra.mxu2 %v7895_v49 }
 0x480   : > { %v3988_v63 = vpop.f32.mrf.mxu0 }
 0x481   : > { %v3989_v5 = vadd.f32 %v9701_v58, %v3988_v63 }
 0x483   : > { %v4088_v2 = vmax.f32 %v3989_v5, 0.0  ;;  %4027 = vmatmul.bf16.gmra.mxu0 %v7890_v6  ;;  %4057 = vmatmul.bf16.gmra.mxu2 %v7896_v60 }
 0x485   : > { %v4128_v12 = vpack.c.bf16 %v4088_v2, %v4088_v2 }
 0x487   : > { %v4208_v16 = vrot.slane %v4128_v12, 7 }
 0x488   : > { %v3990_v17 = vpop.f32.mrf.mxu0 }
 0x489   : > { %4368 = vst.msk [vmem:[#allocation3] sm:$0xe] %vm384_vm0, %v4208_v16  ;;  %v3991_v19 = vadd.f32 %v9701_v58, %v3990_v17  ;;  %v4209_v36 = vrot.slane %v4208_v16, 4 }
 0x48a   : > { %4428 = vst.msk [vmem:[#allocation3] sm:$0xe] %vm384_vm0, %v8097_v0 }
 0x48b   : > { %v4089_v24 = vmax.f32 %v3991_v19, 0.0 }
 0x48d   : > { %v4129_v22 = vpack.c.bf16 %v4089_v24, %v4089_v24 }
 0x48f   : > { %v4210_v35 = vrot.slane %v4129_v22, 7 }
 0x490   : > { %v3993_v39 = vpop.f32.mrf.mxu0 }
 0x491   : > { %v4211_v40 = vsel %vm8378_vm8, %v4209_v36, %v4210_v35  ;;  %v4212_v18 = vrot.slane %v4210_v35, 4  ;;  %v3994_v21 = vadd.f32 %v9701_v58, %v3993_v39  ;;  %v4505_v27 = vld [vmem:[#allocation3] sm:$0xe] }
 0x492   : > { %4369 = vst.msk [vmem:[#allocation3 + $0x4] sm:$0xf] %vm386_vm1, %v4211_v40  ;;  %v7686_v50 = vrot.slane %v4505_v27, 9 }
 0x493   : > { %4370 = vst.msk [vmem:[#allocation3 + $0x8] sm:$0x1] %vm388_vm5, %v4212_v18  ;;  %v4090_v45 = vmax.f32 %v3994_v21, 0.0  ;;  %4062 = vmatmul.bf16.gmra.mxu2 %v7897_v37 }
 0x494   : > { %4429 = vst.msk [vmem:[#allocation3 + $0x4] sm:$0xf] %vm386_vm1, %v8097_v0 }
 0x495   : > { %4430 = vst.msk [vmem:[#allocation3 + $0x8] sm:$0x1] %vm388_vm5, %v8097_v0  ;;  %v4130_v47 = vpack.c.bf16 %v4090_v45, %v4090_v45 }
 0x497   : > { %v4213_v48 = vrot.slane %v4130_v47, 7 }
 0x498   : > { %v3995_v49 = vpop.f32.mrf.mxu0 }
 0x499   : > { %4371 = vst.msk [vmem:[#allocation3 + $0xc] sm:$0xe] %vm384_vm0, %v4213_v48  ;;  %v3996_v14 = vadd.f32 %v9701_v58, %v3995_v49  ;;  %v4214_v61 = vrot.slane %v4213_v48, 4 }
 0x49a   : > { %4431 = vst.msk [vmem:[#allocation3 + $0xc] sm:$0xe] %vm384_vm0, %v8097_v0 }
 0x49b   : > { %v4091_v51 = vmax.f32 %v3996_v14, 0.0  ;;  %v4506_v52 = vld [vmem:[#allocation3 + $0x4] sm:$0xf] }
 0x49c   : > { %v4507_v54 = vld [vmem:[#allocation3 + $0x8] sm:$0x1]  ;;  %v4603_v55 = vrot.slane %v4506_v52, 5 }
 0x49d   : > { %v4131_v56 = vpack.c.bf16 %v4091_v51, %v4091_v51  ;;  %v4606_v57 = vrot.slane %v4507_v54, 5 }
 0x49e   : > { %v4605_v59 = vrot.slane %v4603_v55, 4  ;;  %v4604_v60 = vsel %vm8168_vm4, %v7686_v50, %v4603_v55 }
 0x49f   : > { %v4215_v63 = vrot.slane %v4131_v56, 7  ;;  %4713 = vrot.lane.b32.xlu2 %v4604_v60, %s8098_s22 }
 0x4a0   : > { %v3998_v1 = vpop.f32.mrf.mxu0  ;;  %v4607_v5 = vsel %vm8168_vm4, %v4605_v59, %v4606_v57 }
 0x4a1   : > { %v4216_v6 = vsel %vm8378_vm8, %v4214_v61, %v4215_v63  ;;  %v4217_v7 = vrot.slane %v4215_v63, 4  ;;  %v3999_v8 = vadd.f32 %v9701_v58, %v3998_v1  ;;  %4715 = vrot.lane.b32.xlu0 %v4607_v5, %s8098_s22  ;;  %v4508_v10 = vld [vmem:[#allocation3 + $0xc] sm:$0xe] }
 0x4a2   : > { %4372 = vst.msk [vmem:[#allocation3 + $0x10] sm:$0xf] %vm386_vm1, %v4216_v6  ;;  %v7687_v11 = vrot.slane %v4508_v10, 9 }
 0x4a3   : > { %4373 = vst.msk [vmem:[#allocation3 + $0x14] sm:$0x1] %vm388_vm5, %v4217_v7  ;;  %v4092_v62 = vmax.f32 %v3999_v8, 0.0 }
 0x4a4   : > { %4432 = vst.msk [vmem:[#allocation3 + $0x10] sm:$0xf] %vm386_vm1, %v8097_v0 }
 0x4a5   : > { %4433 = vst.msk [vmem:[#allocation3 + $0x14] sm:$0x1] %vm388_vm5, %v8097_v0  ;;  %v4132_v2 = vpack.c.bf16 %v4092_v62, %v4092_v62 }
 0x4a7   : > { %v4218_v9 = vrot.slane %v4132_v2, 7 }
 0x4a8   : > { %v4000_v41 = vpop.f32.mrf.mxu0 }
 0x4a9   : > { %4374 = vst.msk [vmem:[#allocation3 + $0x18] sm:$0xe] %vm384_vm0, %v4218_v9  ;;  %v4001_v53 = vadd.f32 %v9701_v58, %v4000_v41  ;;  %v4219_v24 = vrot.slane %v4218_v9, 4 }
 0x4ab   : > { %v4093_v12 = vmax.f32 %v4001_v53, 0.0  ;;  %v4509_v13 = vld [vmem:[#allocation3 + $0x10] sm:$0xf] }
 0x4ac   : > { %v4610_v16 = vrot.slane %v4509_v13, 5  ;;  %v4510_v17 = vld [vmem:[#allocation3 + $0x14] sm:$0x1] }
 0x4ad   : > { %v4133_v19 = vpack.c.bf16 %v4093_v12, %v4093_v12  ;;  %v4613_v20 = vrot.slane %v4510_v17, 5 }
 0x4ae   : > { %v4611_v15 = vsel %vm8168_vm4, %v7687_v11, %v4610_v16  ;;  %v4612_v23 = vrot.slane %v4610_v16, 4 }
 0x4af   : > { %v4220_v25 = vrot.slane %v4133_v19, 7  ;;  %4717 = vrot.lane.b32.xlu1 %v4611_v15, %s8098_s22 }
 0x4b0   : > { %v4003_v26 = vpop.f32.mrf.mxu0  ;;  %v4614_v28 = vsel %vm8168_vm4, %v4612_v23, %v4613_v20  ;;  %v4445_v30 = vld [vmem:[#allocation3 + $0x18] sm:$0xf] }
 0x4b1   : > { %v4221_v31 = vsel %vm8378_vm8, %v4219_v24, %v4220_v25  ;;  %v4222_v22 = vrot.slane %v4220_v25, 4  ;;  %v4004_v29 = vadd.f32 %v9701_v58, %v4003_v26  ;;  %4719 = vrot.lane.b32.xlu2 %v4614_v28, %s8098_s22  ;;  %4477 = vst.msk [vmem:[#allocation4 + $0x10] sm:$0xf] %vm386_vm1, %v4445_v30  ;;  %v4511_v38 = vld [vmem:[#allocation3 + $0x18] sm:$0xe] }
 0x4b2   : > { %4375 = vst.msk [vmem:[#allocation3 + $0x1c] sm:$0xf] %vm386_vm1, %v4221_v31  ;;  %v7688_v42 = vrot.slane %v4511_v38, 9 }
 0x4b3   : > { %4376 = vst.msk [vmem:[#allocation3 + $0x20] sm:$0x1] %vm388_vm5, %v4222_v22  ;;  %v4094_v32 = vmax.f32 %v4004_v29, 0.0 }
 0x4b5   : > { %v4134_v34 = vpack.c.bf16 %v4094_v32, %v4094_v32 }
 0x4b6   : > { %v4033_v36 = vpop.f32.mrf.mxu2 }
 0x4b7   : > { %v4223_v35 = vrot.slane %v4134_v34, 7  ;;  %v4034_v37 = vadd.f32 %v9701_v58, %v4033_v36 }
 0x4b8   : > { %v4005_v39 = vpop.f32.mrf.mxu0 }
 0x4b9   : > { %4377 = vst.msk [vmem:[#allocation3 + $0x24] sm:$0xe] %vm384_vm0, %v4223_v35  ;;  %v4006_v40 = vadd.f32 %v9701_v58, %v4005_v39  ;;  %v4106_v18 = vmax.f32 %v4034_v37, 0.0  ;;  %v4512_v21 = vld [vmem:[#allocation3 + $0x1c] sm:$0xf]  ;;  %v4224_v54 = vrot.slane %v4223_v35, 4 }
 0x4ba   : > { %v4617_v43 = vrot.slane %v4512_v21, 5  ;;  %v4513_v44 = vld [vmem:[#allocation3 + $0x20] sm:$0x1]  ;;  %v4446_v45 = vld [vmem:[#allocation3 + $0x1c] sm:$0xf] }
 0x4bb   : > { %v4095_v46 = vmax.f32 %v4006_v40, 0.0  ;;  %v4146_v47 = vpack.c.bf16 %v4106_v18, %v4106_v18  ;;  %v4620_v48 = vrot.slane %v4513_v44, 5  ;;  %4478 = vst.msk [vmem:[#allocation4 + $0x14] sm:$0xf] %vm386_vm1, %v4446_v45 }
 0x4bc   : > { %v4618_v49 = vsel %vm8168_vm4, %v7688_v42, %v4617_v43  ;;  %v4619_v14 = vrot.slane %v4617_v43, 4 }
 0x4bd   : > { %v4135_v27 = vpack.c.bf16 %v4095_v46, %v4095_v46  ;;  %v4253_v50 = vrot.slane %v4146_v47, 7  ;;  %4721 = vrot.lane.b32.xlu0 %v4618_v49, %s8098_s22 }
 0x4be   : > { %v4621_v51 = vsel %vm8168_vm4, %v4619_v14, %v4620_v48  ;;  %v4035_v52 = vpop.f32.mrf.mxu2 }
 0x4bf   : > { %v4225_v55 = vrot.slane %v4135_v27, 7  ;;  %4395 = vst.msk [vmem:[#allocation3 + $0x6c] sm:$0xe] %vm384_vm0, %v4253_v50  ;;  %4723 = vrot.lane.b32.xlu1 %v4621_v51, %s8098_s22  ;;  %v4036_v56 = vadd.f32 %v9701_v58, %v4035_v52  ;;  %v4254_v5 = vrot.slane %v4253_v50, 4 }
 0x4c0   : > { %v4008_v57 = vpop.f32.mrf.mxu0  ;;  %v4447_v59 = vld [vmem:[#allocation3 + $0x24] sm:$0xf] }
 0x4c1   : > { %v4226_v60 = vsel %vm8378_vm8, %v4224_v54, %v4225_v55  ;;  %v4227_v61 = vrot.slane %v4225_v55, 4  ;;  %v4009_v63 = vadd.f32 %v9701_v58, %v4008_v57  ;;  %v4107_v1 = vmax.f32 %v4036_v56, 0.0  ;;  %4479 = vst.msk [vmem:[#allocation4 + $0x18] sm:$0xf] %vm386_vm1, %v4447_v59  ;;  %v4514_v12 = vld [vmem:[#allocation3 + $0x24] sm:$0xe] }
 0x4c2   : > { %4378 = vst.msk [vmem:[#allocation3 + $0x28] sm:$0xf] %vm386_vm1, %v4226_v60  ;;  %v7689_v20 = vrot.slane %v4514_v12, 9 }
 0x4c3   : > { %4379 = vst.msk [vmem:[#allocation3 + $0x2c] sm:$0x1] %vm388_vm5, %v4227_v61  ;;  %v4096_v6 = vmax.f32 %v4009_v63, 0.0  ;;  %v4147_v7 = vpack.c.bf16 %v4107_v1, %v4107_v1 }
 0x4c5   : > { %v4136_v8 = vpack.c.bf16 %v4096_v6, %v4096_v6  ;;  %v4255_v62 = vrot.slane %v4147_v7, 7 }
 0x4c6   : > { %v4038_v2 = vpop.f32.mrf.mxu2  ;;  %v4459_v9 = vld [vmem:[#allocation3 + $0x6c] sm:$0xf] }
 0x4c7   : > { %v4228_v10 = vrot.slane %v4136_v8, 7  ;;  %v4256_v41 = vsel %vm8378_vm8, %v4254_v5, %v4255_v62  ;;  %v4257_v53 = vrot.slane %v4255_v62, 4  ;;  %v4039_v11 = vadd.f32 %v9701_v58, %v4038_v2  ;;  %4491 = vst.msk [vmem:[#allocation4 + $0x48] sm:$0xf] %vm386_vm1, %v4459_v9 }
 0x4c8   : > { %4396 = vst.msk [vmem:[#allocation3 + $0x70] sm:$0xf] %vm386_vm1, %v4256_v41  ;;  %v4010_v13 = vpop.f32.mrf.mxu0 }
 0x4c9   : > { %4380 = vst.msk [vmem:[#allocation3 + $0x30] sm:$0xe] %vm384_vm0, %v4228_v10  ;;  %v4011_v16 = vadd.f32 %v9701_v58, %v4010_v13  ;;  %v4108_v17 = vmax.f32 %v4039_v11, 0.0  ;;  %v4515_v19 = vld [vmem:[#allocation3 + $0x28] sm:$0xf]  ;;  %v4229_v36 = vrot.slane %v4228_v10, 4 }
 0x4ca   : > { %4397 = vst.msk [vmem:[#allocation3 + $0x74] sm:$0x1] %vm388_vm5, %v4257_v53  ;;  %v4624_v15 = vrot.slane %v4515_v19, 5  ;;  %v4516_v23 = vld [vmem:[#allocation3 + $0x2c] sm:$0x1] }
 0x4cb   : > { %v4097_v24 = vmax.f32 %v4011_v16, 0.0  ;;  %v4148_v25 = vpack.c.bf16 %v4108_v17, %v4108_v17  ;;  %v4627_v26 = vrot.slane %v4516_v23, 5  ;;  %v4448_v28 = vld [vmem:[#allocation3 + $0x28] sm:$0xf] }
 0x4cc   : > { %v4625_v30 = vsel %vm8168_vm4, %v7689_v20, %v4624_v15  ;;  %v4626_v31 = vrot.slane %v4624_v15, 4  ;;  %4480 = vst.msk [vmem:[#allocation4 + $0x1c] sm:$0xf] %vm386_vm1, %v4448_v28 }
 0x4cd   : > { %v4137_v22 = vpack.c.bf16 %v4097_v24, %v4097_v24  ;;  %v4258_v29 = vrot.slane %v4148_v25, 7  ;;  %4725 = vrot.lane.b32.xlu2 %v4625_v30, %s8098_s22 }
 0x4ce   : > { %v4628_v32 = vsel %vm8168_vm4, %v4626_v31, %v4627_v26  ;;  %v4040_v34 = vpop.f32.mrf.mxu2 }
 0x4cf   : > { %v4230_v35 = vrot.slane %v4137_v22, 7  ;;  %4398 = vst.msk [vmem:[#allocation3 + $0x78] sm:$0xe] %vm384_vm0, %v4258_v29  ;;  %4727 = vrot.lane.b32.xlu0 %v4628_v32, %s8098_s22  ;;  %v4041_v37 = vadd.f32 %v9701_v58, %v4040_v34  ;;  %v4259_v43 = vrot.slane %v4258_v29, 4  ;;  %v4460_v48 = vld [vmem:[#allocation3 + $0x70] sm:$0xf] }
 0x4d0   : > { %v4013_v38 = vpop.f32.mrf.mxu0  ;;  %v4449_v39 = vld [vmem:[#allocation3 + $0x30] sm:$0xf]  ;;  %4492 = vst.msk [vmem:[#allocation4 + $0x4c] sm:$0xf] %vm386_vm1, %v4460_v48 }
 0x4d1   : > { %v4231_v40 = vsel %vm8378_vm8, %v4229_v36, %v4230_v35  ;;  %v4232_v18 = vrot.slane %v4230_v35, 4  ;;  %v4014_v21 = vadd.f32 %v9701_v58, %v4013_v38  ;;  %v4109_v42 = vmax.f32 %v4041_v37, 0.0  ;;  %4481 = vst.msk [vmem:[#allocation4 + $0x20] sm:$0xf] %vm386_vm1, %v4449_v39  ;;  %v4517_v52 = vld [vmem:[#allocation3 + $0x30] sm:$0xe] }
 0x4d2   : > { %4381 = vst.msk [vmem:[#allocation3 + $0x34] sm:$0xf] %vm386_vm1, %v4231_v40  ;;  %v7690_v60 = vrot.slane %v4517_v52, 9 }
 0x4d3   : > { %4382 = vst.msk [vmem:[#allocation3 + $0x38] sm:$0x1] %vm388_vm5, %v4232_v18  ;;  %v4098_v44 = vmax.f32 %v4014_v21, 0.0  ;;  %v4149_v45 = vpack.c.bf16 %v4109_v42, %v4109_v42  ;;  %v3659_v18 = vpop.permute.xlu2 %3658 }
 0x4d4   : > { %3745 = vst.msk [vmem:[#allocation4 + $0x88] sm:$0xf] %vm3710_vm7, %v3659_v18 }
 0x4d5   : > { %v4138_v46 = vpack.c.bf16 %v4098_v44, %v4098_v44  ;;  %v4260_v47 = vrot.slane %v4149_v45, 7 }
 0x4d6   : > { %v4043_v49 = vpop.f32.mrf.mxu2  ;;  %v4461_v55 = vld [vmem:[#allocation3 + $0x78] sm:$0xf] }
 0x4d7   : > { %v4233_v14 = vrot.slane %v4138_v46, 7  ;;  %v4261_v27 = vsel %vm8378_vm8, %v4259_v43, %v4260_v47  ;;  %v4262_v50 = vrot.slane %v4260_v47, 4  ;;  %v4044_v51 = vadd.f32 %v9701_v58, %v4043_v49  ;;  %4493 = vst.msk [vmem:[#allocation4 + $0x50] sm:$0xf] %vm386_vm1, %v4461_v55 }
 0x4d8   : > { %4399 = vst.msk [vmem:[#allocation3 + $0x7c] sm:$0xf] %vm386_vm1, %v4261_v27  ;;  %v4015_v54 = vpop.f32.mrf.mxu0 }
 0x4d9   : > { %4383 = vst.msk [vmem:[#allocation3 + $0x3c] sm:$0xe] %vm384_vm0, %v4233_v14  ;;  %v4016_v56 = vadd.f32 %v9701_v58, %v4015_v54  ;;  %v4110_v57 = vmax.f32 %v4044_v51, 0.0  ;;  %v4518_v59 = vld [vmem:[#allocation3 + $0x34] sm:$0xf]  ;;  %v4234_v53 = vrot.slane %v4233_v14, 4 }
 0x4da   : > { %4400 = vst.msk [vmem:[#allocation3 + $0x80] sm:$0x1] %vm388_vm5, %v4262_v50  ;;  %v4631_v61 = vrot.slane %v4518_v59, 5  ;;  %v4519_v63 = vld [vmem:[#allocation3 + $0x38] sm:$0x1] }
 0x4db   : > { %v4099_v1 = vmax.f32 %v4016_v56, 0.0  ;;  %v4150_v5 = vpack.c.bf16 %v4110_v57, %v4110_v57  ;;  %v4634_v6 = vrot.slane %v4519_v63, 5  ;;  %v4450_v7 = vld [vmem:[#allocation3 + $0x34] sm:$0xf]  ;;  %v3655_v57 = vpop.permute.xlu0 %3654 }
 0x4dc   : > { %v4632_v8 = vsel %vm8168_vm4, %v7690_v60, %v4631_v61  ;;  %v4633_v62 = vrot.slane %v4631_v61, 4  ;;  %4482 = vst.msk [vmem:[#allocation4 + $0x24] sm:$0xf] %vm386_vm1, %v4450_v7 }
 0x4dd   : > { %v4139_v2 = vpack.c.bf16 %v4099_v1, %v4099_v1  ;;  %v4263_v9 = vrot.slane %v4150_v5, 7  ;;  %4729 = vrot.lane.b32.xlu1 %v4632_v8, %s8098_s22  ;;  %3743 = vst.msk [vmem:[#allocation4 + $0x80] sm:$0xf] %vm3710_vm7, %v3655_v57  ;;  %v3665_v1 = vpop.permute.xlu2 %3664  ;;  %v3657_v5 = vpop.permute.xlu1 %3656 }
 0x4de   : > { %v4635_v10 = vsel %vm8168_vm4, %v4633_v62, %v4634_v6  ;;  %v4045_v41 = vpop.f32.mrf.mxu2  ;;  %3748 = vst.msk [vmem:[#allocation4 + $0x94] sm:$0xf] %vm3710_vm7, %v3665_v1 }
 0x4df   : > { %v4235_v11 = vrot.slane %v4139_v2, 7  ;;  %4401 = vst.msk [vmem:[#allocation3 + $0x84] sm:$0xe] %vm384_vm0, %v4263_v9  ;;  %4731 = vrot.lane.b32.xlu2 %v4635_v10, %s8098_s22  ;;  %v4046_v12 = vadd.f32 %v9701_v58, %v4045_v41  ;;  %v4264_v23 = vrot.slane %v4263_v9, 4  ;;  %v4462_v26 = vld [vmem:[#allocation3 + $0x7c] sm:$0xf] }
 0x4e0   : > { %v4018_v13 = vpop.f32.mrf.mxu0  ;;  %v4451_v15 = vld [vmem:[#allocation3 + $0x3c] sm:$0xf]  ;;  %4494 = vst.msk [vmem:[#allocation4 + $0x54] sm:$0xf] %vm386_vm1, %v4462_v26 }
 0x4e1   : > { %v4236_v16 = vsel %vm8378_vm8, %v4234_v53, %v4235_v11  ;;  %v4237_v17 = vrot.slane %v4235_v11, 4  ;;  %v4019_v19 = vadd.f32 %v9701_v58, %v4018_v13  ;;  %v4111_v20 = vmax.f32 %v4046_v12, 0.0  ;;  %4483 = vst.msk [vmem:[#allocation4 + $0x28] sm:$0xf] %vm386_vm1, %v4451_v15  ;;  %v4520_v35 = vld [vmem:[#allocation3 + $0x3c] sm:$0xe] }
 0x4e2   : > { %4384 = vst.msk [vmem:[#allocation3 + $0x40] sm:$0xf] %vm386_vm1, %v4236_v16  ;;  %v7691_v21 = vrot.slane %v4520_v35, 9 }
 0x4e3   : > { %4385 = vst.msk [vmem:[#allocation3 + $0x44] sm:$0x1] %vm388_vm5, %v4237_v17  ;;  %v4100_v24 = vmax.f32 %v4019_v19, 0.0  ;;  %v4151_v25 = vpack.c.bf16 %v4111_v20, %v4111_v20  ;;  %v3661_v19 = vpop.permute.xlu0 %3660 }
 0x4e4   : > { %3744 = vst.msk [vmem:[#allocation4 + $0x84] sm:$0xf] %vm3710_vm7, %v3657_v5 }
 0x4e5   : > { %v4140_v28 = vpack.c.bf16 %v4100_v24, %v4100_v24  ;;  %v4265_v30 = vrot.slane %v4151_v25, 7  ;;  %3746 = vst.msk [vmem:[#allocation4 + $0x8c] sm:$0xf] %vm3710_vm7, %v3661_v19 }
 0x4e6   : > { %v4048_v31 = vpop.f32.mrf.mxu2  ;;  %v4463_v22 = vld [vmem:[#allocation3 + $0x84] sm:$0xf] }
 0x4e7   : > { %v4238_v29 = vrot.slane %v4140_v28, 7  ;;  %v4266_v32 = vsel %vm8378_vm8, %v4264_v23, %v4265_v30  ;;  %v4267_v34 = vrot.slane %v4265_v30, 4  ;;  %v4049_v36 = vadd.f32 %v9701_v58, %v4048_v31  ;;  %4495 = vst.msk [vmem:[#allocation4 + $0x58] sm:$0xf] %vm386_vm1, %v4463_v22  ;;  %v3663_v28 = vpop.permute.xlu1 %3662 }
 0x4e8   : > { %4402 = vst.msk [vmem:[#allocation3 + $0x88] sm:$0xf] %vm386_vm1, %v4266_v32  ;;  %v4020_v37 = vpop.f32.mrf.mxu0 }
 0x4e9   : > { %4386 = vst.msk [vmem:[#allocation3 + $0x48] sm:$0xe] %vm384_vm0, %v4238_v29  ;;  %v4021_v38 = vadd.f32 %v9701_v58, %v4020_v37  ;;  %v4112_v39 = vmax.f32 %v4049_v36, 0.0  ;;  %v4521_v40 = vld [vmem:[#allocation3 + $0x40] sm:$0xf]  ;;  %v4239_v52 = vrot.slane %v4238_v29, 4 }
 0x4ea   : > { %4403 = vst.msk [vmem:[#allocation3 + $0x8c] sm:$0x1] %vm388_vm5, %v4267_v34  ;;  %v4638_v42 = vrot.slane %v4521_v40, 5  ;;  %v4522_v43 = vld [vmem:[#allocation3 + $0x44] sm:$0x1] }
 0x4eb   : > { %v4101_v44 = vmax.f32 %v4021_v38, 0.0  ;;  %v4152_v45 = vpack.c.bf16 %v4112_v39, %v4112_v39  ;;  %v4641_v46 = vrot.slane %v4522_v43, 5  ;;  %v4452_v49 = vld [vmem:[#allocation3 + $0x40] sm:$0xf]  ;;  %3747 = vst.msk [vmem:[#allocation4 + $0x90] sm:$0xf] %vm3710_vm7, %v3663_v28 }
 0x4ec   : > { %v4639_v47 = vsel %vm8168_vm4, %v7691_v21, %v4638_v42  ;;  %v4640_v48 = vrot.slane %v4638_v42, 4  ;;  %4484 = vst.msk [vmem:[#allocation4 + $0x2c] sm:$0xf] %vm386_vm1, %v4452_v49  ;;  %v4441_v29 = vld [vmem:[#allocation3] sm:$0xf] }
 0x4ed   : > { %v4141_v14 = vpack.c.bf16 %v4101_v44, %v4101_v44  ;;  %v4268_v27 = vrot.slane %v4152_v45, 7  ;;  %4733 = vrot.lane.b32.xlu0 %v4639_v47, %s8098_s22  ;;  %4473 = vst.msk [vmem:[#allocation4] sm:$0xf] %vm386_vm1, %v4441_v29  ;;  %v4444_v42 = vld [vmem:[#allocation3 + $0x10] sm:$0xf]  ;;  %v3667_v44 = vpop.permute.xlu0 %3666 }
 0x4ee   : > { %v4642_v50 = vsel %vm8168_vm4, %v4640_v48, %v4641_v46  ;;  %v4050_v51 = vpop.f32.mrf.mxu2  ;;  %4476 = vst.msk [vmem:[#allocation4 + $0xc] sm:$0xf] %vm386_vm1, %v4444_v42 }
 0x4ef   : > { %v4240_v54 = vrot.slane %v4141_v14, 7  ;;  %4404 = vst.msk [vmem:[#allocation3 + $0x90] sm:$0xe] %vm384_vm0, %v4268_v27  ;;  %4735 = vrot.lane.b32.xlu1 %v4642_v50, %s8098_s22  ;;  %v4051_v55 = vadd.f32 %v9701_v58, %v4050_v51  ;;  %v4269_v6 = vrot.slane %v4268_v27, 4  ;;  %v3669_v51 = vpop.permute.xlu1 %3668 }
 0x4f0   : > { %v4023_v56 = vpop.f32.mrf.mxu0  ;;  %v4453_v62 = vld [vmem:[#allocation3 + $0x48] sm:$0xf]  ;;  %3749 = vst.msk [vmem:[#allocation4 + $0x98] sm:$0xf] %vm3710_vm7, %v3667_v44 }
 0x4f1   : > { %v4241_v59 = vsel %vm8378_vm8, %v4239_v52, %v4240_v54  ;;  %v4242_v60 = vrot.slane %v4240_v54, 4  ;;  %v4024_v61 = vadd.f32 %v9701_v58, %v4023_v56  ;;  %v4113_v63 = vmax.f32 %v4051_v55, 0.0  ;;  %4485 = vst.msk [vmem:[#allocation4 + $0x30] sm:$0xf] %vm386_vm1, %v4453_v62  ;;  %v4523_v16 = vld [vmem:[#allocation3 + $0x48] sm:$0xe] }
 0x4f2   : > { %4387 = vst.msk [vmem:[#allocation3 + $0x4c] sm:$0xf] %vm386_vm1, %v4241_v59  ;;  %v7692_v24 = vrot.slane %v4523_v16, 9 }
 0x4f3   : > { %4388 = vst.msk [vmem:[#allocation3 + $0x50] sm:$0x1] %vm388_vm5, %v4242_v60  ;;  %v4102_v7 = vmax.f32 %v4024_v61, 0.0  ;;  %v4153_v8 = vpack.c.bf16 %v4113_v63, %v4113_v63 }
 0x4f4   : > { %3750 = vst.msk [vmem:[#allocation4 + $0x9c] sm:$0xf] %vm3710_vm7, %v3669_v51 }
 0x4f5   : > { %v4142_v2 = vpack.c.bf16 %v4102_v7, %v4102_v7  ;;  %v4270_v9 = vrot.slane %v4153_v8, 7 }
 0x4f6   : > { %v4053_v10 = vpop.f32.mrf.mxu2  ;;  %v4465_v41 = vld [vmem:[#allocation3 + $0x90] sm:$0xf] }
 0x4f7   : > { %v4243_v53 = vrot.slane %v4142_v2, 7  ;;  %v4271_v11 = vsel %vm8378_vm8, %v4269_v6, %v4270_v9  ;;  %v4272_v12 = vrot.slane %v4270_v9, 4  ;;  %v4054_v13 = vadd.f32 %v9701_v58, %v4053_v10  ;;  %4497 = vst.msk [vmem:[#allocation4 + $0x60] sm:$0xf] %vm386_vm1, %v4465_v41 }
 0x4f8   : > { %4405 = vst.msk [vmem:[#allocation3 + $0x94] sm:$0xf] %vm386_vm1, %v4271_v11  ;;  %v4025_v17 = vpop.f32.mrf.mxu0  ;;  %v4442_v11 = vld [vmem:[#allocation3 + $0x4] sm:$0xf] }
 0x4f9   : > { %4389 = vst.msk [vmem:[#allocation3 + $0x54] sm:$0xe] %vm384_vm0, %v4243_v53  ;;  %v4026_v20 = vadd.f32 %v9701_v58, %v4025_v17  ;;  %v4114_v15 = vmax.f32 %v4054_v13, 0.0  ;;  %v4524_v23 = vld [vmem:[#allocation3 + $0x4c] sm:$0xf]  ;;  %v4714_v36 = vpop.permute.xlu2 %4713  ;;  %v4244_v40 = vrot.slane %v4243_v53, 4 }
 0x4fa   : > { %4406 = vst.msk [vmem:[#allocation3 + $0x98] sm:$0x1] %vm388_vm5, %v4272_v12  ;;  %v4645_v25 = vrot.slane %v4524_v23, 5  ;;  %v4525_v26 = vld [vmem:[#allocation3 + $0x50] sm:$0x1] }
 0x4fb   : > { %v4103_v30 = vmax.f32 %v4026_v20, 0.0  ;;  %v4154_v31 = vpack.c.bf16 %v4114_v15, %v4114_v15  ;;  %v4648_v22 = vrot.slane %v4525_v26, 5  ;;  %4809 = vst.msk [vmem:[#allocation4] sm:$0xf] %vm1119_vm9, %v4714_v36  ;;  %v4454_v49 = vld [vmem:[#allocation3 + $0x4c] sm:$0xf] }
 0x4fc   : > { %v4646_v32 = vsel %vm8168_vm4, %v7692_v24, %v4645_v25  ;;  %v4647_v34 = vrot.slane %v4645_v25, 4  ;;  %4486 = vst.msk [vmem:[#allocation4 + $0x34] sm:$0xf] %vm386_vm1, %v4454_v49  ;;  %v4443_v12 = vld [vmem:[#allocation3 + $0xc] sm:$0xf]  ;;  %v7898_v49 = vld [vmem:[#allocation4 + $0x80] sm:$0xff] }
 0x4fd   : > { %v4143_v35 = vpack.c.bf16 %v4103_v30, %v4103_v30  ;;  %v4273_v37 = vrot.slane %v4154_v31, 7  ;;  %4737 = vrot.lane.b32.xlu2 %v4646_v32, %s8098_s22  ;;  %v4532_v20 = vld [vmem:[#allocation3 + $0x6c] sm:$0xe]  ;;  %4474 = vst.msk [vmem:[#allocation4 + $0x4] sm:$0xf] %vm386_vm1, %v4442_v11  ;;  %4067 = vmatmul.bf16.gmra.mxu2 %v7898_v49 }
 0x4fe   : > { %v4649_v38 = vsel %vm8168_vm4, %v4647_v34, %v4648_v22  ;;  %v4055_v39 = vpop.f32.mrf.mxu2  ;;  %v9909_v24 = vld [vmem:[#allocation3 + $0x70] sm:$0xf]  ;;  %4475 = vst.msk [vmem:[#allocation4 + $0x8] sm:$0xf] %vm386_vm1, %v4443_v12  ;;  %v7695_v30 = vrot.slane %v4532_v20, 9 }
 0x4ff   : > { %v4245_v18 = vrot.slane %v4143_v35, 7  ;;  %4407 = vst.msk [vmem:[#allocation3 + $0x9c] sm:$0xe] %vm384_vm0, %v4273_v37  ;;  %4739 = vrot.lane.b32.xlu0 %v4649_v38, %s8098_s22  ;;  %v4056_v21 = vadd.f32 %v9701_v58, %v4055_v39  ;;  %v4274_v14 = vrot.slane %v4273_v37, 4  ;;  %v4666_v32 = vrot.slane %v9909_v24, 5 }
 0x500   : > { %v4028_v43 = vpop.f32.mrf.mxu0  ;;  %v4455_v56 = vld [vmem:[#allocation3 + $0x54] sm:$0xf]  ;;  %v9919_v34 = vld [vmem:[#allocation3 + $0x7c] sm:$0xf]  ;;  %v4539_v20 = vld [vmem:[#allocation3 + $0x88] sm:$0xf] }
 0x501   : > { %v4246_v45 = vsel %vm8378_vm8, %v4244_v40, %v4245_v18  ;;  %v4247_v46 = vrot.slane %v4245_v18, 4  ;;  %v4029_v47 = vadd.f32 %v9701_v58, %v4028_v43  ;;  %v4115_v48 = vmax.f32 %v4056_v21, 0.0  ;;  %v4526_v63 = vld [vmem:[#allocation3 + $0x54] sm:$0xe]  ;;  %4487 = vst.msk [vmem:[#allocation4 + $0x38] sm:$0xf] %vm386_vm1, %v4455_v56 }
 0x502   : > { %4390 = vst.msk [vmem:[#allocation3 + $0x58] sm:$0xf] %vm386_vm1, %v4246_v45  ;;  %v7693_v8 = vrot.slane %v4526_v63, 9  ;;  %v4667_v21 = vsel %vm8168_vm4, %v7695_v30, %v4666_v32  ;;  %v4537_v43 = vld [vmem:[#allocation3 + $0x80] sm:$0x1]  ;;  %v4673_v44 = vrot.slane %v9919_v34, 5 }
 0x503   : > { %4391 = vst.msk [vmem:[#allocation3 + $0x5c] sm:$0x1] %vm388_vm5, %v4247_v46  ;;  %v4104_v27 = vmax.f32 %v4029_v47, 0.0  ;;  %v4155_v50 = vpack.c.bf16 %v4115_v48, %v4115_v48 }
 0x505   : > { %v4144_v52 = vpack.c.bf16 %v4104_v27, %v4104_v27  ;;  %v4275_v54 = vrot.slane %v4155_v50, 7 }
 0x506   : > { %v4058_v55 = vpop.f32.mrf.mxu2 }
 0x507   : > { %v4248_v57 = vrot.slane %v4144_v52, 7  ;;  %v4276_v59 = vsel %vm8378_vm8, %v4274_v14, %v4275_v54  ;;  %v4277_v60 = vrot.slane %v4275_v54, 4  ;;  %v4059_v61 = vadd.f32 %v9701_v58, %v4058_v55 }
 0x508   : > { %4408 = vst.msk [vmem:[#allocation3 + $0xa0] sm:$0xf] %vm386_vm1, %v4276_v59  ;;  %v4030_v1 = vpop.f32.mrf.mxu0  ;;  %v4675_v52 = vrot.slane %v4673_v44, 4  ;;  %v4676_v54 = vrot.slane %v4537_v43, 5  ;;  %v4467_v43 = vld [vmem:[#allocation3 + $0x9c] sm:$0xf] }
 0x509   : > { %4392 = vst.msk [vmem:[#allocation3 + $0x60] sm:$0xe] %vm384_vm0, %v4248_v57  ;;  %v4031_v5 = vadd.f32 %v9701_v58, %v4030_v1  ;;  %v4116_v6 = vmax.f32 %v4059_v61, 0.0  ;;  %v4527_v7 = vld [vmem:[#allocation3 + $0x58] sm:$0xf]  ;;  %v4249_v25 = vrot.slane %v4248_v57, 4 }
 0x50a   : > { %4409 = vst.msk [vmem:[#allocation3 + $0xa4] sm:$0x1] %vm388_vm5, %v4277_v60  ;;  %v4652_v62 = vrot.slane %v4527_v7, 5  ;;  %v4528_v2 = vld [vmem:[#allocation3 + $0x5c] sm:$0x1] }
 0x50b   : > { %v4105_v9 = vmax.f32 %v4031_v5, 0.0  ;;  %v4156_v10 = vpack.c.bf16 %v4116_v6, %v4116_v6  ;;  %v4655_v41 = vrot.slane %v4528_v2, 5  ;;  %v4720_v53 = vpop.permute.xlu2 %4719  ;;  %v4456_v36 = vld [vmem:[#allocation3 + $0x58] sm:$0xf]  ;;  %v4534_v1 = vld [vmem:[#allocation3 + $0x74] sm:$0x1]  ;;  %v4677_v5 = vsel %vm8168_vm4, %v4675_v52, %v4676_v54 }
 0x50c   : > { %v4653_v13 = vsel %vm8168_vm4, %v7693_v8, %v4652_v62  ;;  %v4654_v16 = vrot.slane %v4652_v62, 4  ;;  %4812 = vst.msk [vmem:[#allocation4 + $0xc] sm:$0xf] %vm1119_vm9, %v4720_v53  ;;  %v4535_v8 = vld [vmem:[#allocation3 + $0x78] sm:$0xe] }
 0x50d   : > { %v4145_v17 = vpack.c.bf16 %v4105_v9, %v4105_v9  ;;  %v4278_v19 = vrot.slane %v4156_v10, 7  ;;  %4741 = vrot.lane.b32.xlu1 %v4653_v13, %s8098_s22  ;;  %4488 = vst.msk [vmem:[#allocation4 + $0x3c] sm:$0xf] %vm386_vm1, %v4456_v36  ;;  %v4541_v2 = vld [vmem:[#allocation3 + $0x90] sm:$0xe]  ;;  %v4668_v10 = vrot.slane %v4666_v32, 4 }
 0x50e   : > { %v4656_v15 = vsel %vm8168_vm4, %v4654_v16, %v4655_v41  ;;  %v4060_v23 = vpop.f32.mrf.mxu2  ;;  %v4542_v9 = vld [vmem:[#allocation3 + $0x94] sm:$0xf]  ;;  %v4669_v41 = vrot.slane %v4534_v1, 5  ;;  %v4464_v53 = vld [vmem:[#allocation3 + $0x88] sm:$0xf]  ;;  %v7696_v12 = vrot.slane %v4535_v8, 9 }
 0x50f   : > { %v4250_v26 = vrot.slane %v4145_v17, 7  ;;  %4410 = vst.msk [vmem:[#allocation3 + $0xa8] sm:$0xe] %vm384_vm0, %v4278_v19  ;;  %4743 = vrot.lane.b32.xlu2 %v4656_v15, %s8098_s22  ;;  %v4061_v28 = vadd.f32 %v9701_v58, %v4060_v23  ;;  %v4279_v35 = vrot.slane %v4278_v19, 4  ;;  %v4468_v39 = vld [vmem:[#allocation3 + $0xa0] sm:$0xf] }
 0x510   : > { %v4457_v40 = vld [vmem:[#allocation3 + $0x60] sm:$0xf]  ;;  %4500 = vst.msk [vmem:[#allocation4 + $0x6c] sm:$0xf] %vm386_vm1, %v4468_v39  ;;  %v4466_v16 = vld [vmem:[#allocation3 + $0x94] sm:$0xf] }
 0x511   : > { %v4251_v31 = vsel %vm8378_vm8, %v4249_v25, %v4250_v26  ;;  %v4252_v22 = vrot.slane %v4250_v26, 4  ;;  %v4117_v29 = vmax.f32 %v4061_v28, 0.0  ;;  %v4529_v48 = vld [vmem:[#allocation3 + $0x60] sm:$0xe]  ;;  %4489 = vst.msk [vmem:[#allocation4 + $0x40] sm:$0xf] %vm386_vm1, %v4457_v40 }
 0x512   : > { %4393 = vst.msk [vmem:[#allocation3 + $0x64] sm:$0xf] %vm386_vm1, %v4251_v31  ;;  %v7694_v50 = vrot.slane %v4529_v48, 9  ;;  %v7698_v17 = vrot.slane %v4541_v2, 9  ;;  %v4687_v19 = vrot.slane %v4542_v9, 5  ;;  %v4680_v28 = vrot.slane %v4539_v20, 5 }
 0x513   : > { %4394 = vst.msk [vmem:[#allocation3 + $0x68] sm:$0x1] %vm388_vm5, %v4252_v22  ;;  %v4157_v37 = vpack.c.bf16 %v4117_v29, %v4117_v29  ;;  %v4716_v38 = vpop.permute.xlu0 %4715  ;;  %v9948_v24 = vld [vmem:[#allocation3 + $0xa0] sm:$0xf]  ;;  %v4538_v26 = vld [vmem:[#allocation3 + $0x84] sm:$0xe]  ;;  %v4674_v31 = vsel %vm8168_vm4, %v7696_v12, %v4673_v44 }
 0x514   : > { %4810 = vst.msk [vmem:[#allocation4 + $0x4] sm:$0xf] %vm1119_vm9, %v4716_v38  ;;  %v4688_v30 = vsel %vm8168_vm4, %v7698_v17, %v4687_v19  ;;  %v4694_v22 = vrot.slane %v9948_v24, 5  ;;  %v4540_v29 = vld [vmem:[#allocation3 + $0x8c] sm:$0x1]  ;;  %v7697_v38 = vrot.slane %v4538_v26, 9 }
 0x515   : > { %v4280_v18 = vrot.slane %v4157_v37, 7  ;;  %4496 = vst.msk [vmem:[#allocation4 + $0x5c] sm:$0xf] %vm386_vm1, %v4464_v53  ;;  %v7899_v37 = vld [vmem:[#allocation4 + $0x88] sm:$0xff]  ;;  %v4682_v40 = vrot.slane %v4680_v28, 4 }
 0x516   : > { %v4063_v42 = vpop.f32.mrf.mxu2  ;;  %4498 = vst.msk [vmem:[#allocation4 + $0x64] sm:$0xf] %vm386_vm1, %v4466_v16  ;;  %4072 = vmatmul.bf16.gmra.mxu2 %v7899_v37  ;;  %v4681_v44 = vsel %vm8168_vm4, %v7697_v38, %v4680_v28  ;;  %v4841_v17 = vld [vmem:[#allocation3] sm:$0xc]  ;;  %v4848_v20 = vld [vmem:[#allocation3 + $0x1c] sm:$0xf] }
 0x517   : > { %v4281_v45 = vsel %vm8378_vm8, %v4279_v35, %v4280_v18  ;;  %v4282_v46 = vrot.slane %v4280_v18, 4  ;;  %4749 = vrot.lane.b32.xlu2 %v4667_v21, %s8098_s22  ;;  %v4064_v47 = vadd.f32 %v9701_v58, %v4063_v42  ;;  %v4546_v35 = vld [vmem:[#allocation3 + $0xa4] sm:$0x1]  ;;  %v4683_v18 = vrot.slane %v4540_v29, 5  ;;  %4499 = vst.msk [vmem:[#allocation4 + $0x68] sm:$0xf] %vm386_vm1, %v4467_v43 }
 0x518   : > { %4411 = vst.msk [vmem:[#allocation3 + $0xac] sm:$0xf] %vm386_vm1, %v4281_v45  ;;  %v4696_v21 = vrot.slane %v4694_v22, 4  ;;  %v4697_v42 = vrot.slane %v4546_v35, 5  ;;  %v4543_v45 = vld [vmem:[#allocation3 + $0x98] sm:$0x1] }
 0x519   : > { %4412 = vst.msk [vmem:[#allocation3 + $0xb0] sm:$0x1] %vm388_vm5, %v4282_v46  ;;  %v4118_v14 = vmax.f32 %v4064_v47, 0.0  ;;  %v4530_v27 = vld [vmem:[#allocation3 + $0x64] sm:$0xf]  ;;  %v4684_v48 = vsel %vm8168_vm4, %v4682_v40, %v4683_v18  ;;  %v7702_v24 = vrot.slane %v4841_v17, 10 }
 0x51a   : > { %v4659_v51 = vrot.slane %v4530_v27, 5  ;;  %v4531_v55 = vld [vmem:[#allocation3 + $0x68] sm:$0x1]  ;;  %v4458_v61 = vld [vmem:[#allocation3 + $0x64] sm:$0xf]  ;;  %v4698_v47 = vsel %vm8168_vm4, %v4696_v21, %v4697_v42  ;;  %v4953_v28 = vrot.slane %v4848_v20, 6 }
 0x51b   : > { %v4158_v56 = vpack.c.bf16 %v4118_v14, %v4118_v14  ;;  %v4662_v57 = vrot.slane %v4531_v55, 5  ;;  %4490 = vst.msk [vmem:[#allocation4 + $0x44] sm:$0xf] %vm386_vm1, %v4458_v61  ;;  %v4690_v14 = vrot.slane %v4543_v45, 5  ;;  %v7900_v55 = vld [vmem:[#allocation4 + $0x90] sm:$0xff] }
 0x51c   : > { %v4660_v59 = vsel %vm8168_vm4, %v7694_v50, %v4659_v51  ;;  %v4661_v60 = vrot.slane %v4659_v51, 4  ;;  %v4544_v50 = vld [vmem:[#allocation3 + $0x9c] sm:$0xe]  ;;  %v4689_v51 = vrot.slane %v4687_v19, 4  ;;  %4077 = vmatmul.bf16.vlgmr.msra.gmra.mxu3 %v7900_v55  ;;  %v4845_v26 = vld [vmem:[#allocation3 + $0x10] sm:$0xf] }
 0x51d   : > { %v4283_v63 = vrot.slane %v4158_v56, 7  ;;  %4745 = vrot.lane.b32.xlu0 %v4660_v59, %s8098_s22  ;;  %v7699_v59 = vrot.slane %v4544_v50, 9  ;;  %v4846_v35 = vld [vmem:[#allocation3 + $0x14] sm:$0x3]  ;;  %v4852_v40 = vld [vmem:[#allocation3 + $0x2c] sm:$0x3] }
 0x51e   : > { %v4663_v6 = vsel %vm8168_vm4, %v4661_v60, %v4662_v57  ;;  %v4065_v7 = vpop.f32.mrf.mxu2  ;;  %v4842_v57 = vld [vmem:[#allocation3 + $0x4] sm:$0xf]  ;;  %v4691_v61 = vsel %vm8168_vm4, %v4689_v51, %v4690_v14  ;;  %v4949_v21 = vrot.slane %v4846_v35, 6  ;;  %v4469_v45 = vld [vmem:[#allocation3 + $0xa8] sm:$0xf]  ;;  %v4955_v50 = vrot.slane %v4953_v28, 4 }
 0x51f   : > { %4413 = vst.msk [vmem:[#allocation3 + $0xb4] sm:$0xe] %vm384_vm0, %v4283_v63  ;;  %4755 = vrot.lane.b32.xlu2 %v4677_v5, %s8098_s22  ;;  %4747 = vrot.lane.b32.xlu1 %v4663_v6, %s8098_s22  ;;  %v4066_v62 = vadd.f32 %v9701_v58, %v4065_v7  ;;  %v4284_v15 = vrot.slane %v4283_v63, 4  ;;  %v4670_v58 = vsel %vm8168_vm4, %v4668_v10, %v4669_v41  ;;  %v4548_v60 = vld [vmem:[#allocation3 + $0xac] sm:$0xf]  ;;  %v4939_v1 = vrot.slane %v4842_v57, 6 }
 0x520   : > { %v4547_v5 = vld [vmem:[#allocation3 + $0xa8] sm:$0xe]  ;;  %v4695_v7 = vsel %vm8168_vm4, %v7699_v59, %v4694_v22  ;;  %v4701_v8 = vrot.slane %v4548_v60, 5  ;;  %4501 = vst.msk [vmem:[#allocation4 + $0x70] sm:$0xf] %vm386_vm1, %v4469_v45 }
 0x521   : > { %v4119_v11 = vmax.f32 %v4066_v62, 0.0  ;;  %v4718_v13 = vpop.permute.xlu1 %4717  ;;  %v4843_v6 = vld [vmem:[#allocation3 + $0x8] sm:$0x3]  ;;  %v4549_v62 = vld [vmem:[#allocation3 + $0xb0] sm:$0x1]  ;;  %v7700_v2 = vrot.slane %v4547_v5, 9 }
 0x522   : > { %4811 = vst.msk [vmem:[#allocation4 + $0x8] sm:$0xf] %vm1119_vm9, %v4718_v13  ;;  %v4941_v9 = vrot.slane %v4939_v1, 4  ;;  %v4942_v10 = vrot.slane %v4843_v6, 6  ;;  %v4703_v53 = vrot.slane %v4701_v8, 4 }
 0x523   : > { %v4159_v23 = vpack.c.bf16 %v4119_v11, %v4119_v11  ;;  %v4704_v11 = vrot.slane %v4549_v62, 5  ;;  %v4702_v12 = vsel %vm8168_vm4, %v7700_v2, %v4701_v8  ;;  %v4851_v22 = vld [vmem:[#allocation3 + $0x28] sm:$0xf]  ;;  %v4860_v57 = vld [vmem:[#allocation3 + $0x4c] sm:$0xf] }
 0x524   : > { %v4943_v13 = vsel %vm8662_vm12, %v4941_v9, %v4942_v10  ;;  %v4853_v5 = vld [vmem:[#allocation3 + $0x30] sm:$0xc]  ;;  %v4861_v62 = vld [vmem:[#allocation3 + $0x50] sm:$0x3]  ;;  %v4855_v2 = vld [vmem:[#allocation3 + $0x38] sm:$0x3] }
 0x525   : > { %v4285_v25 = vrot.slane %v4159_v23, 7  ;;  %4751 = vrot.lane.b32.xlu0 %v4670_v58, %s8098_s22  ;;  %v4705_v19 = vsel %vm8168_vm4, %v4703_v53, %v4704_v11  ;;  %v7706_v9 = vrot.slane %v4853_v5, 10  ;;  %v4970_v11 = vrot.slane %v4855_v2, 6  ;;  %v4873_v2 = vld [vmem:[#allocation3 + $0x80] sm:$0x3] }
 0x526   : > { %v4471_v39 = vld [vmem:[#allocation3 + $0xb4] sm:$0xf]  ;;  %v5203_v33 = vld [vmem:[#allocation3 + $0xac] sm:$0xf] }
 0x527   : > { %v4286_v32 = vsel %vm8378_vm8, %v4284_v15, %v4285_v25  ;;  %v4287_v34 = vrot.slane %v4285_v25, 4  ;;  %v4726_v36 = vpop.permute.xlu2 %4725  ;;  %4761 = vrot.lane.b32.xlu2 %v4688_v30, %s8098_s22  ;;  %4753 = vrot.lane.b32.xlu1 %v4674_v31, %s8098_s22  ;;  %4503 = vst.msk [vmem:[#allocation4 + $0x78] sm:$0xf] %vm386_vm1, %v4471_v39  ;;  %v4550_v46 = vld [vmem:[#allocation3 + $0xb4] sm:$0xe]  ;;  %v7901_v30 = vld [vmem:[#allocation4 + $0x98] sm:$0xff] }
 0x528   : > { %4414 = vst.msk [vmem:[#allocation3 + $0xb8] sm:$0xf] %vm386_vm1, %v4286_v32  ;;  %v7701_v52 = vrot.slane %v4550_v46, 9  ;;  %v4847_v25 = vld [vmem:[#allocation3 + $0x18] sm:$0xc]  ;;  %v4960_v39 = vrot.slane %v4851_v22, 6 }
 0x529   : > { %4415 = vst.msk [vmem:[#allocation3 + $0xbc] sm:$0x1] %vm388_vm5, %v4287_v34  ;;  %v4844_v31 = vld [vmem:[#allocation3 + $0xc] sm:$0xc]  ;;  %v7704_v32 = vrot.slane %v4847_v25, 10  ;;  %v4940_v34 = vsel %vm8662_vm12, %v7702_v24, %v4939_v1 }
 0x52a   : > { %4815 = vst.msk [vmem:[#allocation4 + $0x18] sm:$0xf] %vm1119_vm9, %v4726_v36  ;;  %v4946_v36 = vrot.slane %v4845_v26, 6  ;;  %v7703_v38 = vrot.slane %v4844_v31, 10  ;;  %v4962_v43 = vrot.slane %v4960_v39, 4 }
 0x52b   : > { %v4954_v37 = vsel %vm8662_vm12, %v7704_v32, %v4953_v28  ;;  %v4470_v46 = vld [vmem:[#allocation3 + $0xac] sm:$0xf]  ;;  %v4865_v25 = vld [vmem:[#allocation3 + $0x60] sm:$0xc]  ;;  %v4859_v26 = vld [vmem:[#allocation3 + $0x48] sm:$0xc] }
 0x52c   : > { %4082 = vmatmul.bf16.gmra.mxu3 %v7901_v30  ;;  %v4948_v18 = vrot.slane %v4946_v36, 4  ;;  %v4947_v42 = vsel %vm8662_vm12, %v7703_v38, %v4946_v36  ;;  %4502 = vst.msk [vmem:[#allocation4 + $0x74] sm:$0xf] %vm386_vm1, %v4470_v46  ;;  %v4863_v30 = vld [vmem:[#allocation3 + $0x58] sm:$0xf]  ;;  %v7708_v32 = vrot.slane %v4859_v26, 10 }
 0x52d   : > { %4757 = vrot.lane.b32.xlu0 %v4681_v44, %s8098_s22  ;;  %v4963_v44 = vrot.slane %v4852_v40, 6  ;;  %v4869_v31 = vld [vmem:[#allocation3 + $0x70] sm:$0xf]  ;;  %v4988_v35 = vrot.slane %v4863_v30, 6  ;;  %v4864_v40 = vld [vmem:[#allocation3 + $0x5c] sm:$0x3] }
 0x52e   : > { %v5002_v38 = vrot.slane %v4869_v31, 6  ;;  %v4991_v45 = vrot.slane %v4864_v40, 6  ;;  %v4882_v40 = vld [vmem:[#allocation3 + $0xa4] sm:$0x3] }
 0x52f   : > { %v4722_v49 = vpop.permute.xlu0 %4721  ;;  %4767 = vrot.lane.b32.xlu2 %v4698_v47, %s8098_s22  ;;  %4759 = vrot.lane.b32.xlu1 %v4684_v48, %s8098_s22  ;;  %v4551_v27 = vld [vmem:[#allocation3 + $0xb8] sm:$0xf]  ;;  %v4950_v47 = vsel %vm8662_vm12, %v4948_v18, %v4949_v21  ;;  %v4849_v48 = vld [vmem:[#allocation3 + $0x20] sm:$0x3] }
 0x530   : > { %4813 = vst.msk [vmem:[#allocation4 + $0x10] sm:$0xf] %vm1119_vm9, %v4722_v49  ;;  %v4708_v54 = vrot.slane %v4551_v27, 5  ;;  %v4552_v16 = vld [vmem:[#allocation3 + $0xbc] sm:$0x1]  ;;  %v4964_v49 = vsel %vm8662_vm12, %v4962_v43, %v4963_v44  ;;  %v4956_v51 = vrot.slane %v4849_v48, 6 }
 0x531   : > { %v4724_v56 = vpop.permute.xlu1 %4723  ;;  %v4711_v23 = vrot.slane %v4552_v16, 5  ;;  %v4857_v27 = vld [vmem:[#allocation3 + $0x40] sm:$0xf]  ;;  %v4858_v16 = vld [vmem:[#allocation3 + $0x44] sm:$0x3]  ;;  %v5004_v43 = vrot.slane %v5002_v38, 4 }
 0x532   : > { %4814 = vst.msk [vmem:[#allocation4 + $0x14] sm:$0xf] %vm1119_vm9, %v4724_v56  ;;  %v4709_v63 = vsel %vm8168_vm4, %v7701_v52, %v4708_v54  ;;  %v4710_v15 = vrot.slane %v4708_v54, 4  ;;  %v4856_v52 = vld [vmem:[#allocation3 + $0x3c] sm:$0xc]  ;;  %v4974_v55 = vrot.slane %v4857_v27, 6  ;;  %v4957_v59 = vsel %vm8662_vm12, %v4955_v50, %v4956_v51 }
 0x533   : > { %v4850_v54 = vld [vmem:[#allocation3 + $0x24] sm:$0xc]  ;;  %v4854_v56 = vld [vmem:[#allocation3 + $0x34] sm:$0xf]  ;;  %v7707_v60 = vrot.slane %v4856_v52, 10  ;;  %v4977_v24 = vrot.slane %v4858_v16, 6 }
 0x534   : > { %v4712_v29 = vsel %vm8168_vm4, %v4710_v15, %v4711_v23  ;;  %v4967_v6 = vrot.slane %v4854_v56, 6  ;;  %v4866_v15 = vld [vmem:[#allocation3 + $0x64] sm:$0xf]  ;;  %v4976_v23 = vrot.slane %v4974_v55, 4  ;;  %v4990_v44 = vrot.slane %v4988_v35, 4 }
 0x535   : > { %4763 = vrot.lane.b32.xlu0 %v4691_v61, %s8098_s22  ;;  %v7705_v61 = vrot.slane %v4850_v54, 10  ;;  %v4995_v28 = vrot.slane %v4866_v15, 6  ;;  %v4875_v27 = vld [vmem:[#allocation3 + $0x88] sm:$0xf]  ;;  %v4868_v50 = vld [vmem:[#allocation3 + $0x6c] sm:$0xc] }
 0x536   : > { %v4969_v53 = vrot.slane %v4967_v6, 4  ;;  %v4978_v22 = vsel %vm8662_vm12, %v4976_v23, %v4977_v24  ;;  %v4876_v16 = vld [vmem:[#allocation3 + $0x8c] sm:$0x3]  ;;  %v4883_v15 = vld [vmem:[#allocation3 + $0xa8] sm:$0xc] }
 0x537   : > { %4773 = vrot.lane.b32.xlu2 %v4709_v63, %s8098_s22  ;;  %4765 = vrot.lane.b32.xlu1 %v4695_v7, %s8098_s22  ;;  %v4975_v63 = vsel %vm8662_vm12, %v7707_v60, %v4974_v55  ;;  %v4961_v1 = vsel %vm8662_vm12, %v7705_v61, %v4960_v39  ;;  %v4981_v7 = vrot.slane %v4860_v57, 6  ;;  %v4862_v39 = vld [vmem:[#allocation3 + $0x54] sm:$0xc]  ;;  %v4997_v51 = vrot.slane %v4995_v28, 4  ;;  %v4872_v60 = vld [vmem:[#allocation3 + $0x7c] sm:$0xf] }
 0x538   : > { %v5016_v57 = vrot.slane %v4875_v27, 6  ;;  %v4878_v61 = vld [vmem:[#allocation3 + $0x94] sm:$0xf]  ;;  %v4884_v23 = vld [vmem:[#allocation3 + $0xac] sm:$0xf] }
 0x539   : > { %v4732_v41 = vpop.permute.xlu2 %4731  ;;  %v4983_v10 = vrot.slane %v4981_v7, 4  ;;  %v4982_v36 = vsel %vm8662_vm12, %v7708_v32, %v4981_v7  ;;  %v5009_v7 = vrot.slane %v4872_v60, 6  ;;  %v4877_v24 = vld [vmem:[#allocation3 + $0x90] sm:$0xc]  ;;  %v5037_v30 = vrot.slane %v4884_v23, 6 }
 0x53a   : > { %4818 = vst.msk [vmem:[#allocation4 + $0x24] sm:$0xf] %vm1119_vm9, %v4732_v41  ;;  %v4984_v41 = vrot.slane %v4861_v62, 6  ;;  %v4879_v62 = vld [vmem:[#allocation3 + $0x98] sm:$0x3]  ;;  %v7714_v31 = vrot.slane %v4877_v24, 10 }
 0x53b   : > { %v4886_v27 = vld [vmem:[#allocation3 + $0xb4] sm:$0xc] }
 0x53c   : > { %v4985_v17 = vsel %vm8662_vm12, %v4983_v10, %v4984_v41 }
 0x53d   : > { %4769 = vrot.lane.b32.xlu0 %v4702_v12, %s8098_s22  ;;  %v4472_v12 = vld [vmem:[#allocation3 + $0xb8] sm:$0xf] }
 0x53e   : > { %4504 = vst.msk [vmem:[#allocation4 + $0x7c] sm:$0xf] %vm386_vm1, %v4472_v12  ;;  %v5012_v12 = vrot.slane %v4873_v2, 6 }
 0x53f   : > { %5051 = vrot.lane.b32.xlu2 %v4943_v13, %s8099_s27  ;;  %4771 = vrot.lane.b32.xlu1 %v4705_v19, %s8098_s22  ;;  %v4968_v13 = vsel %vm8662_vm12, %v7706_v9, %v4967_v6  ;;  %v4971_v19 = vsel %vm8662_vm12, %v4969_v53, %v4970_v11  ;;  %v5026_v53 = vrot.slane %v4879_v62, 6  ;;  %v5011_v11 = vrot.slane %v5009_v7, 4  ;;  %v5179_v62 = vld [vmem:[#allocation3 + $0x1c] sm:$0xf] }
 0x541   : > { %v4728_v58 = vpop.permute.xlu0 %4727 }
 0x542   : > { %4816 = vst.msk [vmem:[#allocation4 + $0x1c] sm:$0xf] %vm1119_vm9, %v4728_v58 }
 0x545   : > { %4775 = vrot.lane.b32.xlu0 %v4712_v29, %s8098_s22  ;;  %v7710_v29 = vrot.slane %v4865_v25, 10  ;;  %v5019_v25 = vrot.slane %v4876_v16, 6 }
 0x547   : > { %5057 = vrot.lane.b32.xlu2 %v4954_v37, %s8099_s27  ;;  %5049 = vrot.lane.b32.xlu1 %v4940_v34, %s8099_s27  ;;  %v4996_v34 = vsel %vm8662_vm12, %v7710_v29, %v4995_v28  ;;  %v4870_v37 = vld [vmem:[#allocation3 + $0x74] sm:$0x3]  ;;  %v7716_v28 = vrot.slane %v4883_v15, 10  ;;  %v4887_v29 = vld [vmem:[#allocation3 + $0xb8] sm:$0xf] }
 0x548   : > { %v5005_v21 = vrot.slane %v4870_v37, 6 }
 0x54a   : > { %v5006_v48 = vsel %vm8662_vm12, %v5004_v43, %v5005_v21 }
 0x54d   : > { %5053 = vrot.lane.b32.xlu0 %v4947_v42, %s8099_s27  ;;  %v7709_v42 = vrot.slane %v4862_v39, 10  ;;  %v4888_v39 = vld [vmem:[#allocation3 + $0xbc] sm:$0x3] }
 0x54e   : > { %v5047_v43 = vrot.slane %v4888_v39, 6 }
 0x54f   : > { %5063 = vrot.lane.b32.xlu2 %v4964_v49, %s8099_s27  ;;  %5055 = vrot.lane.b32.xlu1 %v4950_v47, %s8099_s27  ;;  %v4730_v14 = vpop.permute.xlu1 %4729  ;;  %v4989_v46 = vsel %vm8662_vm12, %v7709_v42, %v4988_v35  ;;  %v4867_v47 = vld [vmem:[#allocation3 + $0x68] sm:$0x3]  ;;  %v4992_v49 = vsel %vm8662_vm12, %v4990_v44, %v4991_v45  ;;  %v5033_v45 = vrot.slane %v4882_v40, 6 }
 0x550   : > { %4817 = vst.msk [vmem:[#allocation4 + $0x20] sm:$0xf] %vm1119_vm9, %v4730_v14  ;;  %v4874_v14 = vld [vmem:[#allocation3 + $0x84] sm:$0xc]  ;;  %v4998_v52 = vrot.slane %v4867_v47, 6 }
 0x551   : > { %v7713_v56 = vrot.slane %v4874_v14, 10  ;;  %v4885_v47 = vld [vmem:[#allocation3 + $0xb0] sm:$0x3] }
 0x553   : > { %v5017_v5 = vsel %vm8662_vm12, %v7713_v56, %v5016_v57 }
 0x555   : > { %5059 = vrot.lane.b32.xlu0 %v4957_v59, %s8099_s27  ;;  %v7711_v59 = vrot.slane %v4868_v50, 10  ;;  %v5039_v50 = vrot.slane %v5037_v30, 4 }
 0x557   : > { %5069 = vrot.lane.b32.xlu2 %v4975_v63, %s8099_s27  ;;  %v4738_v8 = vpop.permute.xlu2 %4737  ;;  %5061 = vrot.lane.b32.xlu1 %v4961_v1, %s8099_s27  ;;  %v4999_v63 = vsel %vm8662_vm12, %v4997_v51, %v4998_v52  ;;  %v4871_v1 = vld [vmem:[#allocation3 + $0x78] sm:$0xc]  ;;  %v5003_v6 = vsel %vm8662_vm12, %v7711_v59, %v5002_v38  ;;  %v5044_v38 = vrot.slane %v4887_v29, 6  ;;  %v5040_v51 = vrot.slane %v4885_v47, 6 }
 0x558   : > { %4821 = vst.msk [vmem:[#allocation4 + $0x30] sm:$0xf] %vm1119_vm9, %v4738_v8  ;;  %v5023_v8 = vrot.slane %v4878_v61, 6  ;;  %v7712_v9 = vrot.slane %v4871_v1, 10  ;;  %v5178_v1 = vld [vmem:[#allocation3 + $0x18] sm:$0xf] }
 0x559   : > { %v5046_v42 = vrot.slane %v5044_v38, 4  ;;  %v5041_v56 = vsel %vm8662_vm12, %v5039_v50, %v5040_v51 }
 0x55a   : > { %v5025_v41 = vrot.slane %v5023_v8, 4  ;;  %v5024_v35 = vsel %vm8662_vm12, %v7714_v31, %v5023_v8  ;;  %v5183_v8 = vld [vmem:[#allocation3 + $0x34] sm:$0xf] }
 0x55d   : > { %5065 = vrot.lane.b32.xlu0 %v4968_v13, %s8099_s27  ;;  %v5010_v13 = vsel %vm8662_vm12, %v7712_v9, %v5009_v7 }
 0x55f   : > { %v4734_v20 = vpop.permute.xlu0 %4733  ;;  %5075 = vrot.lane.b32.xlu2 %v4985_v17, %s8099_s27  ;;  %5067 = vrot.lane.b32.xlu1 %v4971_v19, %s8099_s27  ;;  %v5027_v17 = vsel %vm8662_vm12, %v5025_v41, %v5026_v53  ;;  %v5013_v19 = vsel %vm8662_vm12, %v5011_v11, %v5012_v12  ;;  %v5181_v12 = vld [vmem:[#allocation3 + $0x28] sm:$0xf] }
 0x560   : > { %4819 = vst.msk [vmem:[#allocation4 + $0x28] sm:$0xf] %vm1119_vm9, %v4734_v20 }
 0x561   : > { %v4736_v58 = vpop.permute.xlu1 %4735 }
 0x562   : > { %4820 = vst.msk [vmem:[#allocation4 + $0x2c] sm:$0xf] %vm1119_vm9, %v4736_v58  ;;  %v5018_v58 = vrot.slane %v5016_v57, 4  ;;  %v5180_v57 = vld [vmem:[#allocation3 + $0x24] sm:$0xf] }
 0x564   : > { %v5020_v32 = vsel %vm8662_vm12, %v5018_v58, %v5019_v25 }
 0x565   : > { %5071 = vrot.lane.b32.xlu0 %v4978_v22, %s8099_s27  ;;  %v4881_v22 = vld [vmem:[#allocation3 + $0xa0] sm:$0xf] }
 0x566   : > { %v5030_v37 = vrot.slane %v4881_v22, 6 }
 0x567   : > { %5081 = vrot.lane.b32.xlu2 %v4996_v34, %s8099_s27  ;;  %5073 = vrot.lane.b32.xlu1 %v4982_v36, %s8099_s27  ;;  %v4880_v34 = vld [vmem:[#allocation3 + $0x9c] sm:$0xc]  ;;  %v5038_v36 = vsel %vm8662_vm12, %v7716_v28, %v5037_v30 }
 0x568   : > { %v5032_v44 = vrot.slane %v5030_v37, 4  ;;  %v5184_v28 = vld [vmem:[#allocation3 + $0x3c] sm:$0xf] }
 0x569   : > { %v4744_v18 = vpop.permute.xlu2 %4743 }
 0x56a   : > { %4824 = vst.msk [vmem:[#allocation4 + $0x3c] sm:$0xf] %vm1119_vm9, %v4744_v18  ;;  %v7715_v18 = vrot.slane %v4880_v34, 10  ;;  %v5185_v34 = vld [vmem:[#allocation3 + $0x40] sm:$0xf] }
 0x56d   : > { %5077 = vrot.lane.b32.xlu0 %v4989_v46, %s8099_s27  ;;  %v5031_v46 = vsel %vm8662_vm12, %v7715_v18, %v5030_v37  ;;  %v5187_v18 = vld [vmem:[#allocation3 + $0x4c] sm:$0xf] }
 0x56f   : > { %5087 = vrot.lane.b32.xlu2 %v5006_v48, %s8099_s27  ;;  %5079 = vrot.lane.b32.xlu1 %v4992_v49, %s8099_s27  ;;  %v5048_v48 = vsel %vm8662_vm12, %v5046_v42, %v5047_v43  ;;  %v5034_v49 = vsel %vm8662_vm12, %v5032_v44, %v5033_v45  ;;  %v5192_v44 = vld [vmem:[#allocation3 + $0x6c] sm:$0xf]  ;;  %v5188_v45 = vld [vmem:[#allocation3 + $0x54] sm:$0xf] }
 0x571   : > { %v4740_v54 = vpop.permute.xlu0 %4739  ;;  %v4750_v55 = vpop.permute.xlu2 %4749 }
 0x572   : > { %4822 = vst.msk [vmem:[#allocation4 + $0x34] sm:$0xf] %vm1119_vm9, %v4740_v54 }
 0x573   : > { %4827 = vst.msk [vmem:[#allocation4 + $0x48] sm:$0xf] %vm1119_vm9, %v4750_v55  ;;  %v7717_v55 = vrot.slane %v4886_v27, 10 }
 0x575   : > { %5083 = vrot.lane.b32.xlu0 %v4999_v63, %s8099_s27  ;;  %v5045_v59 = vsel %vm8662_vm12, %v7717_v55, %v5044_v38  ;;  %v5190_v55 = vld [vmem:[#allocation3 + $0x60] sm:$0xf] }
 0x577   : > { %5093 = vrot.lane.b32.xlu2 %v5017_v5, %s8099_s27  ;;  %5085 = vrot.lane.b32.xlu1 %v5003_v6, %s8099_s27  ;;  %v10121_v6 = vld [vmem:[%s11042_s2] ss:$0 sm:$0xff] }
 0x579   : > { %v4756_v10 = vpop.permute.xlu2 %4755 }
 0x57a   : > { %4830 = vst.msk [vmem:[#allocation4 + $0x54] sm:$0xf] %vm1119_vm9, %v4756_v10 }
 0x57d   : > { %5089 = vrot.lane.b32.xlu0 %v5010_v13, %s8099_s27 }
 0x57f   : > { %5099 = vrot.lane.b32.xlu2 %v5027_v17, %s8099_s27  ;;  %5091 = vrot.lane.b32.xlu1 %v5013_v19, %s8099_s27  ;;  %v4742_v20 = vpop.permute.xlu1 %4741  ;;  %v5186_v17 = vld [vmem:[#allocation3 + $0x48] sm:$0xf]  ;;  %v5182_v19 = vld [vmem:[#allocation3 + $0x30] sm:$0xf] }
 0x580   : > { %4823 = vst.msk [vmem:[#allocation4 + $0x38] sm:$0xf] %vm1119_vm9, %v4742_v20  ;;  %v4068_v5 = vpop.f32.mrf.mxu2 }
 0x581   : > { %v4762_v26 = vpop.permute.xlu2 %4761  ;;  %v4069_v7 = vadd.f32 %v10121_v6, %v4068_v5 }
 0x582   : > { %4833 = vst.msk [vmem:[#allocation4 + $0x60] sm:$0xf] %vm1119_vm9, %v4762_v26 }
 0x583   : > { %v4120_v9 = vmax.f32 %v4069_v7, 0.0 }
 0x585   : > { %5095 = vrot.lane.b32.xlu0 %v5020_v32, %s8099_s27  ;;  %v4160_v53 = vpack.c.bf16 %v4120_v9, %v4120_v9  ;;  %v5189_v32 = vld [vmem:[#allocation3 + $0x58] sm:$0xf] }
 0x587   : > { %5105 = vrot.lane.b32.xlu2 %v5038_v36, %s8099_s27  ;;  %5097 = vrot.lane.b32.xlu1 %v5024_v35, %s8099_s27  ;;  %v4288_v11 = vrot.slane %v4160_v53, 7  ;;  %v5198_v53 = vld [vmem:[#allocation3 + $0x90] sm:$0xf] }
 0x588   : > { %v4070_v13 = vpop.f32.mrf.mxu2 }
 0x589   : > { %v4768_v21 = vpop.permute.xlu2 %4767  ;;  %4416 = vst.msk [vmem:[#allocation3 + $0xc0] sm:$0xe] %vm384_vm0, %v4288_v11  ;;  %v4071_v16 = vadd.f32 %v10121_v6, %v4070_v13  ;;  %v4289_v58 = vrot.slane %v4288_v11, 4  ;;  %v5194_v11 = vld [vmem:[#allocation3 + $0x78] sm:$0xf] }
 0x58a   : > { %4836 = vst.msk [vmem:[#allocation4 + $0x6c] sm:$0xf] %vm1119_vm9, %v4768_v21 }
 0x58b   : > { %v4121_v15 = vmax.f32 %v4071_v16, 0.0 }
 0x58d   : > { %5101 = vrot.lane.b32.xlu0 %v5031_v46, %s8099_s27  ;;  %v4161_v25 = vpack.c.bf16 %v4121_v15, %v4121_v15 }
 0x58f   : > { %v4746_v14 = vpop.permute.xlu0 %4745  ;;  %5111 = vrot.lane.b32.xlu2 %v5048_v48, %s8099_s27  ;;  %5103 = vrot.lane.b32.xlu1 %v5034_v49, %s8099_s27  ;;  %v4290_v26 = vrot.slane %v4161_v25, 7  ;;  %v5201_v25 = vld [vmem:[#allocation3 + $0xa0] sm:$0xf] }
 0x590   : > { %4825 = vst.msk [vmem:[#allocation4 + $0x40] sm:$0xf] %vm1119_vm9, %v4746_v14 }
 0x591   : > { %v4774_v52 = vpop.permute.xlu2 %4773  ;;  %v4748_v54 = vpop.permute.xlu1 %4747  ;;  %v4291_v31 = vsel %vm8378_vm8, %v4289_v58, %v4290_v26  ;;  %v4292_v22 = vrot.slane %v4290_v26, 4  ;;  %v5197_v26 = vld [vmem:[#allocation3 + $0x88] sm:$0xf] }
 0x592   : > { %4839 = vst.msk [vmem:[#allocation4 + $0x78] sm:$0xf] %vm1119_vm9, %v4774_v52 }
 0x593   : > { %4826 = vst.msk [vmem:[#allocation4 + $0x44] sm:$0xf] %vm1119_vm9, %v4748_v54 }
 0x594   : > { %4417 = vst.msk [vmem:[#allocation3 + $0xc4] sm:$0xf] %vm386_vm1, %v4291_v31 }
 0x595   : > { %5107 = vrot.lane.b32.xlu0 %v5041_v56, %s8099_s27  ;;  %4418 = vst.msk [vmem:[#allocation3 + $0xc8] sm:$0x1] %vm388_vm5, %v4292_v22  ;;  %v5195_v56 = vld [vmem:[#allocation3 + $0x7c] sm:$0xf] }
 0x597   : > { %v4752_v60 = vpop.permute.xlu0 %4751  ;;  %5246 = vrot.lane.b32.xlu2 %v5180_v57, %s8100_s28  ;;  %5109 = vrot.lane.b32.xlu1 %v5045_v59, %s8099_s27 }
 0x598   : > { %4828 = vst.msk [vmem:[#allocation4 + $0x4c] sm:$0xf] %vm1119_vm9, %v4752_v60 }
 0x599   : > { %v5052_v61 = vpop.permute.xlu2 %5051  ;;  %v4754_v63 = vpop.permute.xlu1 %4753 }
 0x59a   : > { %5146 = vst.msk [vmem:[#allocation4 + $0x4] sm:$0xf] %vm1543_vm13, %v5052_v61  ;;  %v4073_v30 = vpop.f32.mrf.mxu2  ;;  %v5191_v61 = vld [vmem:[#allocation3 + $0x64] sm:$0xf] }
 0x59b   : > { %4829 = vst.msk [vmem:[#allocation4 + $0x50] sm:$0xf] %vm1119_vm9, %v4754_v63  ;;  %v4074_v29 = vadd.f32 %v10121_v6, %v4073_v30 }
 0x59d   : > { %5242 = vrot.lane.b32.xlu0 %v5178_v1, %s8100_s28  ;;  %v4122_v35 = vmax.f32 %v4074_v29, 0.0 }
 0x59f   : > { %v4758_v2 = vpop.permute.xlu0 %4757  ;;  %5252 = vrot.lane.b32.xlu2 %v5183_v8, %s8100_s28  ;;  %5244 = vrot.lane.b32.xlu1 %v5179_v62, %s8100_s28  ;;  %v4162_v39 = vpack.c.bf16 %v4122_v35, %v4122_v35  ;;  %v4078_v43 = vpop.f32.mrf.mxu3 }
 0x5a0   : > { %4831 = vst.msk [vmem:[#allocation4 + $0x58] sm:$0xf] %vm1119_vm9, %v4758_v2  ;;  %v4079_v46 = vadd.f32 %v10121_v6, %v4078_v43 }
 0x5a1   : > { %v5058_v10 = vpop.permute.xlu2 %5057  ;;  %v4760_v41 = vpop.permute.xlu1 %4759  ;;  %v4293_v40 = vrot.slane %v4162_v39, 7  ;;  %v5200_v39 = vld [vmem:[#allocation3 + $0x9c] sm:$0xf] }
 0x5a2   : > { %5149 = vst.msk [vmem:[#allocation4 + $0x10] sm:$0xf] %vm1543_vm13, %v5058_v10  ;;  %v4075_v21 = vpop.f32.mrf.mxu2  ;;  %v4124_v49 = vmax.f32 %v4079_v46, 0.0  ;;  %v5193_v10 = vld [vmem:[#allocation3 + $0x70] sm:$0xf] }
 0x5a3   : > { %4832 = vst.msk [vmem:[#allocation4 + $0x5c] sm:$0xf] %vm1119_vm9, %v4760_v41  ;;  %v4076_v42 = vadd.f32 %v10121_v6, %v4075_v21  ;;  %v4294_v50 = vrot.slane %v4293_v40, 4 }
 0x5a4   : > { %4419 = vst.msk [vmem:[#allocation3 + $0xcc] sm:$0xe] %vm384_vm0, %v4293_v40  ;;  %v4164_v52 = vpack.c.bf16 %v4124_v49, %v4124_v49 }
 0x5a5   : > { %5248 = vrot.lane.b32.xlu0 %v5181_v12, %s8100_s28  ;;  %v4123_v48 = vmax.f32 %v4076_v42, 0.0 }
 0x5a6   : > { %v4298_v63 = vrot.slane %v4164_v52, 7 }
 0x5a7   : > { %v4764_v20 = vpop.permute.xlu0 %4763  ;;  %5258 = vrot.lane.b32.xlu2 %v5186_v17, %s8100_s28  ;;  %5250 = vrot.lane.b32.xlu1 %v5182_v19, %s8100_s28  ;;  %v4163_v51 = vpack.c.bf16 %v4123_v48, %v4123_v48  ;;  %v4080_v60 = vpop.f32.mrf.mxu3 }
 0x5a8   : > { %4834 = vst.msk [vmem:[#allocation4 + $0x64] sm:$0xf] %vm1119_vm9, %v4764_v20  ;;  %v4081_v1 = vadd.f32 %v10121_v6, %v4080_v60  ;;  %v4299_v2 = vrot.slane %v4298_v63, 4 }
 0x5a9   : > { %v5064_v23 = vpop.permute.xlu2 %5063  ;;  %v4766_v24 = vpop.permute.xlu1 %4765  ;;  %v4295_v54 = vrot.slane %v4163_v51, 7  ;;  %4422 = vst.msk [vmem:[#allocation3 + $0xd8] sm:$0xe] %vm384_vm0, %v4298_v63  ;;  %v5205_v51 = vld [vmem:[#allocation3 + $0xb8] sm:$0xf] }
 0x5aa   : > { %5152 = vst.msk [vmem:[#allocation4 + $0x1c] sm:$0xf] %vm1543_vm13, %v5064_v23  ;;  %v4125_v7 = vmax.f32 %v4081_v1, 0.0 }
 0x5ab   : > { %4835 = vst.msk [vmem:[#allocation4 + $0x68] sm:$0xf] %vm1119_vm9, %v4766_v24  ;;  %v4296_v57 = vsel %vm8378_vm8, %v4294_v50, %v4295_v54  ;;  %v4297_v59 = vrot.slane %v4295_v54, 4  ;;  %v5196_v24 = vld [vmem:[#allocation3 + $0x84] sm:$0xf] }
 0x5ac   : > { %4420 = vst.msk [vmem:[#allocation3 + $0xd0] sm:$0xf] %vm386_vm1, %v4296_v57  ;;  %v4165_v9 = vpack.c.bf16 %v4125_v7, %v4125_v7  ;;  %v5374_v50 = vld [vmem:[#allocation3 + $0x28] sm:$0xf]  ;;  %v5206_v54 = vld [vmem:[#allocation3 + $0xc0] sm:$0xf] }
 0x5ad   : > { %5254 = vrot.lane.b32.xlu0 %v5184_v28, %s8100_s28  ;;  %4421 = vst.msk [vmem:[#allocation3 + $0xd4] sm:$0x1] %vm388_vm5, %v4297_v59  ;;  %v5375_v57 = vld [vmem:[#allocation3 + $0x2c] sm:$0x1] }
 0x5ae   : > { %4435 = vst.msk [vmem:[#allocation3 + $0xd8] sm:$0xe] %vm384_vm0, %v8097_v0  ;;  %v4300_v41 = vrot.slane %v4165_v9, 7  ;;  %v5478_v63 = vrot.slane %v5375_v57, 5  ;;  %v5208_v1 = vld [vmem:[#allocation3 + $0xcc] sm:$0xf] }
 0x5af   : > { %v4770_v36 = vpop.permute.xlu0 %4769  ;;  %5264 = vrot.lane.b32.xlu2 %v5189_v32, %s8100_s28  ;;  %5256 = vrot.lane.b32.xlu1 %v5185_v34, %s8100_s28  ;;  %v4083_v17 = vpop.f32.mrf.mxu3  ;;  %v5385_v57 = vld [vmem:[#allocation3 + $0x54] sm:$0xe] }
 0x5b0   : > { %4837 = vst.msk [vmem:[#allocation4 + $0x70] sm:$0xf] %vm1119_vm9, %v4770_v36  ;;  %v4301_v12 = vsel %vm8378_vm8, %v4299_v2, %v4300_v41  ;;  %v4302_v13 = vrot.slane %v4300_v41, 4  ;;  %v4084_v19 = vadd.f32 %v10121_v6, %v4083_v17  ;;  %v5199_v36 = vld [vmem:[#allocation3 + $0x94] sm:$0xf] }
 0x5b1   : > { %v5070_v37 = vpop.permute.xlu2 %5069  ;;  %v4772_v38 = vpop.permute.xlu1 %4771  ;;  %4423 = vst.msk [vmem:[#allocation3 + $0xdc] sm:$0xf] %vm386_vm1, %v4301_v12  ;;  %v5380_v2 = vld [vmem:[#allocation3 + $0x40] sm:$0xf]  ;;  %v5373_v12 = vld [vmem:[#allocation3 + $0x24] sm:$0xe] }
 0x5b2   : > { %5155 = vst.msk [vmem:[#allocation4 + $0x28] sm:$0xf] %vm1543_vm13, %v5070_v37  ;;  %v4126_v23 = vmax.f32 %v4084_v19, 0.0  ;;  %v5383_v17 = vld [vmem:[#allocation3 + $0x4c] sm:$0xf] }
 0x5b3   : > { %4838 = vst.msk [vmem:[#allocation4 + $0x74] sm:$0xf] %vm1119_vm9, %v4772_v38  ;;  %v5204_v38 = vld [vmem:[#allocation3 + $0xb4] sm:$0xf] }
 0x5b4   : > { %4424 = vst.msk [vmem:[#allocation3 + $0xe0] sm:$0x1] %vm388_vm5, %v4302_v13  ;;  %v4166_v58 = vpack.c.bf16 %v4126_v23, %v4126_v23  ;;  %v5489_v13 = vrot.slane %v5380_v2, 5  ;;  %v5390_v2 = vld [vmem:[#allocation3 + $0x68] sm:$0x1] }
 0x5b5   : > { %5260 = vrot.lane.b32.xlu0 %v5187_v18, %s8100_s28  ;;  %4436 = vst.msk [vmem:[#allocation3 + $0xdc] sm:$0xf] %vm386_vm1, %v8097_v0 }
 0x5b6   : > { %4437 = vst.msk [vmem:[#allocation3 + $0xe0] sm:$0x1] %vm388_vm5, %v8097_v0  ;;  %v4303_v30 = vrot.slane %v4166_v58, 7  ;;  %v5376_v58 = vld [vmem:[#allocation3 + $0x30] sm:$0xe] }
 0x5b7   : > { %v4776_v47 = vpop.permute.xlu0 %4775  ;;  %5270 = vrot.lane.b32.xlu2 %v5192_v44, %s8100_s28  ;;  %5262 = vrot.lane.b32.xlu1 %v5188_v45, %s8100_s28  ;;  %v4085_v31 = vpop.f32.mrf.mxu3  ;;  %v5202_v44 = vld [vmem:[#allocation3 + $0xa8] sm:$0xf]  ;;  %v5207_v45 = vld [vmem:[#allocation3 + $0xc4] sm:$0xf] }
 0x5b8   : > { %4840 = vst.msk [vmem:[#allocation4 + $0x7c] sm:$0xf] %vm1119_vm9, %v4776_v47  ;;  %v4086_v22 = vadd.f32 %v10121_v6, %v4085_v31  ;;  %v4304_v35 = vrot.slane %v4303_v30, 4  ;;  %v5371_v47 = vld [vmem:[#allocation3 + $0x1c] sm:$0xf] }
 0x5b9   : > { %v5076_v14 = vpop.permute.xlu2 %5075  ;;  %v5050_v27 = vpop.permute.xlu1 %5049  ;;  %4425 = vst.msk [vmem:[#allocation3 + $0xe4] sm:$0xe] %vm384_vm0, %v4303_v30  ;;  %v5384_v30 = vld [vmem:[#allocation3 + $0x50] sm:$0x1]  ;;  %v5378_v31 = vld [vmem:[#allocation3 + $0x38] sm:$0x1] }
 0x5ba   : > { %5158 = vst.msk [vmem:[#allocation4 + $0x34] sm:$0xf] %vm1543_vm13, %v5076_v14  ;;  %v4127_v34 = vmax.f32 %v4086_v22, 0.0  ;;  %v5370_v14 = vld [vmem:[#allocation3 + $0x18] sm:$0xe] }
 0x5bb   : > { %5145 = vst.msk [vmem:[#allocation4] sm:$0xf] %vm1543_vm13, %v5050_v27  ;;  %v5468_v27 = vrot.slane %v5371_v47, 5  ;;  %v7718_v52 = vrot.slane %v5370_v14, 9 }
 0x5bc   : > { %4438 = vst.msk [vmem:[#allocation3 + $0xe4] sm:$0xe] %vm384_vm0, %v8097_v0  ;;  %v4167_v37 = vpack.c.bf16 %v4127_v34, %v4127_v34  ;;  %vm7323_vm0 = vcmask 31744  }
 0x5bd   : > { %5266 = vrot.lane.b32.xlu0 %v5190_v55, %s8100_s28  ;;  %v5475_v55 = vrot.slane %v5374_v50, 5  ;;  %v5470_v9 = vrot.slane %v5468_v27, 4 }
 0x5be   : > { %v4305_v6 = vrot.slane %v4167_v37, 7  ;;  %v5485_v37 = vrot.slane %v5378_v31, 5 }
 0x5bf   : > { %v5054_v5 = vpop.permute.xlu0 %5053  ;;  %5276 = vrot.lane.b32.xlu2 %v5195_v56, %s8100_s28  ;;  %5268 = vrot.lane.b32.xlu1 %v5191_v61, %s8100_s28  ;;  %v5477_v61 = vrot.slane %v5475_v55, 4 }
 0x5c0   : > { %5147 = vst.msk [vmem:[#allocation4 + $0x8] sm:$0xf] %vm1543_vm13, %v5054_v5  ;;  %v4306_v18 = vsel %vm8378_vm8, %v4304_v35, %v4305_v6  ;;  %v4307_v21 = vrot.slane %v4305_v6, 4  ;;  %v5372_v5 = vld [vmem:[#allocation3 + $0x20] sm:$0x1] }
 0x5c1   : > { %v5082_v8 = vpop.permute.xlu2 %5081  ;;  %v5056_v62 = vpop.permute.xlu1 %5055  ;;  %4426 = vst.msk [vmem:[#allocation3 + $0xe8] sm:$0xf] %vm386_vm1, %v4306_v18  ;;  %v5479_v7 = vsel %vm8168_vm4, %v5477_v61, %v5478_v63 }
 0x5c2   : > { %5161 = vst.msk [vmem:[#allocation4 + $0x40] sm:$0xf] %vm1543_vm13, %v5082_v8  ;;  %v5209_v8 = vld [vmem:[#allocation3 + $0xd0] sm:$0xf] }
 0x5c3   : > { %5148 = vst.msk [vmem:[#allocation4 + $0xc] sm:$0xf] %vm1543_vm13, %v5056_v62 }
 0x5c4   : > { %4427 = vst.msk [vmem:[#allocation3 + $0xec] sm:$0x1] %vm388_vm5, %v4307_v21  ;;  %v5389_v21 = vld [vmem:[#allocation3 + $0x64] sm:$0xf] }
 0x5c5   : > { %5272 = vrot.lane.b32.xlu0 %v5193_v10, %s8100_s28  ;;  %4439 = vst.msk [vmem:[#allocation3 + $0xe8] sm:$0xf] %vm386_vm1, %v8097_v0  ;;  %v5471_v10 = vrot.slane %v5372_v5, 5  ;;  %v5510_v47 = vrot.slane %v5389_v21, 5  ;;  %v5399_v21 = vld [vmem:[#allocation3 + $0x8c] sm:$0x1] }
 0x5c6   : > { %4440 = vst.msk [vmem:[#allocation3 + $0xec] sm:$0x1] %vm388_vm5, %v8097_v0  ;;  %v5469_v0 = vsel %vm8168_vm4, %v7718_v52, %v5468_v27 }
 0x5c7   : > { %v5060_v16 = vpop.permute.xlu0 %5059  ;;  %5282 = vrot.lane.b32.xlu2 %v5198_v53, %s8100_s28  ;;  %5274 = vrot.lane.b32.xlu1 %v5194_v11, %s8100_s28  ;;  %v5379_v11 = vld [vmem:[#allocation3 + $0x3c] sm:$0xe]  ;;  %v5472_v19 = vsel %vm8168_vm4, %v5470_v9, %v5471_v10 }
 0x5c8   : > { %5150 = vst.msk [vmem:[#allocation4 + $0x14] sm:$0xf] %vm1543_vm13, %v5060_v16  ;;  %v5377_v16 = vld [vmem:[#allocation3 + $0x34] sm:$0xf] }
 0x5c9   : > { %v5088_v20 = vpop.permute.xlu2 %5087  ;;  %v5062_v15 = vpop.permute.xlu1 %5061 }
 0x5ca   : > { %5164 = vst.msk [vmem:[#allocation4 + $0x4c] sm:$0xf] %vm1543_vm13, %v5088_v20  ;;  %v7721_v20 = vrot.slane %v5379_v11, 9  ;;  %v5398_v11 = vld [vmem:[#allocation3 + $0x88] sm:$0xf] }
 0x5cb   : > { %5151 = vst.msk [vmem:[#allocation4 + $0x18] sm:$0xf] %vm1543_vm13, %v5062_v15  ;;  %v7719_v15 = vrot.slane %v5373_v12, 9  ;;  %v5391_v12 = vld [vmem:[#allocation3 + $0x6c] sm:$0xe] }
 0x5cc   : > { %v5490_v23 = vsel %vm8168_vm4, %v7721_v20, %v5489_v13 }
 0x5cd   : > { %5278 = vrot.lane.b32.xlu0 %v5196_v24, %s8100_s28  ;;  %v5476_v24 = vsel %vm8168_vm4, %v7719_v15, %v5475_v55  ;;  %v5531_v15 = vrot.slane %v5398_v11, 5 }
 0x5cf   : > { %v5066_v28 = vpop.permute.xlu0 %5065  ;;  %5288 = vrot.lane.b32.xlu2 %v5201_v25, %s8100_s28  ;;  %5280 = vrot.lane.b32.xlu1 %v5197_v26, %s8100_s28  ;;  %v5482_v25 = vrot.slane %v5377_v16, 5  ;;  %v5496_v26 = vrot.slane %v5383_v17, 5  ;;  %v5513_v16 = vrot.slane %v5390_v2, 5 }
 0x5d0   : > { %5153 = vst.msk [vmem:[#allocation4 + $0x20] sm:$0xf] %vm1543_vm13, %v5066_v28 }
 0x5d1   : > { %v5094_v29 = vpop.permute.xlu2 %5093  ;;  %v5068_v32 = vpop.permute.xlu1 %5067  ;;  %v5498_v34 = vrot.slane %v5496_v26, 4  ;;  %v5484_v35 = vrot.slane %v5482_v25, 4 }
 0x5d2   : > { %5167 = vst.msk [vmem:[#allocation4 + $0x58] sm:$0xf] %vm1543_vm13, %v5094_v29 }
 0x5d3   : > { %5154 = vst.msk [vmem:[#allocation4 + $0x24] sm:$0xf] %vm1543_vm13, %v5068_v32  ;;  %v7720_v32 = vrot.slane %v5376_v58, 9  ;;  %v5401_v58 = vld [vmem:[#allocation3 + $0x94] sm:$0xf] }
 0x5d5   : > { %5284 = vrot.lane.b32.xlu0 %v5199_v36, %s8100_s28  ;;  %v5499_v36 = vrot.slane %v5384_v30, 5 }
 0x5d7   : > { %v5072_v40 = vpop.permute.xlu0 %5071  ;;  %5294 = vrot.lane.b32.xlu2 %v5204_v38, %s8100_s28  ;;  %5286 = vrot.lane.b32.xlu1 %v5200_v39, %s8100_s28  ;;  %v5483_v38 = vsel %vm8168_vm4, %v7720_v32, %v5482_v25  ;;  %v5381_v39 = vld [vmem:[#allocation3 + $0x44] sm:$0x1]  ;;  %v5500_v6 = vsel %vm8168_vm4, %v5498_v34, %v5499_v36  ;;  %v5402_v32 = vld [vmem:[#allocation3 + $0x98] sm:$0x1]  ;;  %v5396_v34 = vld [vmem:[#allocation3 + $0x80] sm:$0x1] }
 0x5d8   : > { %5156 = vst.msk [vmem:[#allocation4 + $0x2c] sm:$0xf] %vm1543_vm13, %v5072_v40  ;;  %v5486_v40 = vsel %vm8168_vm4, %v5484_v35, %v5485_v37 }
 0x5d9   : > { %v5100_v42 = vpop.permute.xlu2 %5099  ;;  %v5074_v43 = vpop.permute.xlu1 %5073 }
 0x5da   : > { %5170 = vst.msk [vmem:[#allocation4 + $0x64] sm:$0xf] %vm1543_vm13, %v5100_v42  ;;  %v5491_v42 = vrot.slane %v5489_v13, 4  ;;  %v5512_v13 = vrot.slane %v5510_v47, 4 }
 0x5db   : > { %5157 = vst.msk [vmem:[#allocation4 + $0x30] sm:$0xf] %vm1543_vm13, %v5074_v43  ;;  %v5492_v43 = vrot.slane %v5381_v39, 5  ;;  %v5541_v39 = vrot.slane %v5402_v32, 5 }
 0x5dc   : > { %v5514_v25 = vsel %vm8168_vm4, %v5512_v13, %v5513_v16  ;;  %v5415_v16 = vld [vmem:[#allocation3 + $0xcc] sm:$0xe] }
 0x5dd   : > { %5290 = vrot.lane.b32.xlu0 %v5202_v44, %s8100_s28  ;;  %v5493_v14 = vsel %vm8168_vm4, %v5491_v42, %v5492_v43 }
 0x5df   : > { %v5078_v46 = vpop.permute.xlu0 %5077  ;;  %5300 = vrot.lane.b32.xlu2 %v5207_v45, %s8100_s28  ;;  %5292 = vrot.lane.b32.xlu1 %v5203_v33, %s8100_s28  ;;  %v5388_v33 = vld [vmem:[#allocation3 + $0x60] sm:$0xe] }
 0x5e0   : > { %5159 = vst.msk [vmem:[#allocation4 + $0x38] sm:$0xf] %vm1543_vm13, %v5078_v46  ;;  %v5382_v46 = vld [vmem:[#allocation3 + $0x48] sm:$0xe]  ;;  %v7724_v27 = vrot.slane %v5388_v33, 9 }
 0x5e1   : > { %v5106_v48 = vpop.permute.xlu2 %5105  ;;  %v5080_v49 = vpop.permute.xlu1 %5079  ;;  %v7722_v50 = vrot.slane %v5382_v46, 9  ;;  %v5407_v33 = vld [vmem:[#allocation3 + $0xac] sm:$0xf]  ;;  %v5400_v46 = vld [vmem:[#allocation3 + $0x90] sm:$0xe] }
 0x5e2   : > { %5173 = vst.msk [vmem:[#allocation4 + $0x70] sm:$0xf] %vm1543_vm13, %v5106_v48  ;;  %v5386_v48 = vld [vmem:[#allocation3 + $0x58] sm:$0xf] }
 0x5e3   : > { %5160 = vst.msk [vmem:[#allocation4 + $0x3c] sm:$0xf] %vm1543_vm13, %v5080_v49  ;;  %v5392_v49 = vld [vmem:[#allocation3 + $0x70] sm:$0xf]  ;;  %v5497_v52 = vsel %vm8168_vm4, %v7722_v50, %v5496_v26  ;;  %v5394_v26 = vld [vmem:[#allocation3 + $0x78] sm:$0xe] }
 0x5e4   : > { %v5517_v55 = vrot.slane %v5392_v49, 5  ;;  %v7726_v36 = vrot.slane %v5394_v26, 9  ;;  %v5552_v50 = vrot.slane %v5407_v33, 5 }
 0x5e5   : > { %5296 = vrot.lane.b32.xlu0 %v5205_v51, %s8100_s28  ;;  %v5511_v51 = vsel %vm8168_vm4, %v7724_v27, %v5510_v47  ;;  %v5533_v47 = vrot.slane %v5531_v15, 4 }
 0x5e6   : > { %v5519_v5 = vrot.slane %v5517_v55, 4 }
 0x5e7   : > { %v5084_v56 = vpop.permute.xlu0 %5083  ;;  %5578 = vrot.lane.b32.xlu2 %v5469_v0, %s8101_s29  ;;  %5298 = vrot.lane.b32.xlu1 %v5206_v54, %s8100_s28  ;;  %v5503_v0 = vrot.slane %v5386_v48, 5  ;;  %v5393_v54 = vld [vmem:[#allocation3 + $0x74] sm:$0x1]  ;;  %v5534_v48 = vrot.slane %v5399_v21, 5 }
 0x5e8   : > { %5162 = vst.msk [vmem:[#allocation4 + $0x44] sm:$0xf] %vm1543_vm13, %v5084_v56  ;;  %v5520_v63 = vrot.slane %v5393_v54, 5 }
 0x5e9   : > { %v5112_v59 = vpop.permute.xlu2 %5111  ;;  %v5086_v60 = vpop.permute.xlu1 %5085  ;;  %v5535_v54 = vsel %vm8168_vm4, %v5533_v47, %v5534_v48  ;;  %v5713_v48 = vld [vmem:[#allocation3 + $0x34] sm:$0xf] }
 0x5ea   : > { %5176 = vst.msk [vmem:[#allocation4 + $0x7c] sm:$0xf] %vm1543_vm13, %v5112_v59  ;;  %v5387_v59 = vld [vmem:[#allocation3 + $0x5c] sm:$0x1]  ;;  %v5521_v9 = vsel %vm8168_vm4, %v5519_v5, %v5520_v63 }
 0x5eb   : > { %5163 = vst.msk [vmem:[#allocation4 + $0x48] sm:$0xf] %vm1543_vm13, %v5086_v60  ;;  %v5411_v63 = vld [vmem:[#allocation3 + $0xbc] sm:$0x1] }
 0x5ec   : > { %v5562_v2 = vrot.slane %v5411_v63, 5  ;;  %v5709_v63 = vld [vmem:[#allocation3 + $0x24] sm:$0xc] }
 0x5ed   : > { %5302 = vrot.lane.b32.xlu0 %v5208_v1, %s8100_s28  ;;  %v7723_v1 = vrot.slane %v5385_v57, 9 }
 0x5ef   : > { %v5090_v62 = vpop.permute.xlu0 %5089  ;;  %5584 = vrot.lane.b32.xlu2 %v5479_v7, %s8101_s29  ;;  %5304 = vrot.lane.b32.xlu1 %v5209_v8, %s8100_s28  ;;  %v5505_v7 = vrot.slane %v5503_v0, 4  ;;  %v5506_v8 = vrot.slane %v5387_v59, 5  ;;  %s7881_s28 = sshll.u32 %s11057_s18, 8 }
 0x5f0   : > { %5165 = vst.msk [vmem:[#allocation4 + $0x50] sm:$0xf] %vm1543_vm13, %v5090_v62  ;;  %v5504_v62 = vsel %vm8168_vm4, %v7723_v1, %v5503_v0  ;;  %v5410_v0 = vld [vmem:[#allocation3 + $0xb8] sm:$0xf]  ;;  %v5405_v1 = vld [vmem:[#allocation3 + $0xa4] sm:$0x1]  ;;  %s10856_s17 = scalar_lea.vmem %s11045_s5, %s7881_s28 }
 0x5f1   : > { %v5247_v41 = vpop.permute.xlu2 %5246  ;;  %v5092_v53 = vpop.permute.xlu1 %5091  ;;  %v5507_v10 = vsel %vm8168_vm4, %v5505_v7, %v5506_v8 }
 0x5f2   : > { %5340 = vst.msk [vmem:[#allocation4 + $0x8] sm:$0xf] %vm1785_vm14, %v5247_v41 }
 0x5f3   : > { %5166 = vst.msk [vmem:[#allocation4 + $0x54] sm:$0xf] %vm1543_vm13, %v5092_v53  ;;  %v5397_v53 = vld [vmem:[#allocation3 + $0x84] sm:$0xe] }
 0x5f4   : > { %v7727_v20 = vrot.slane %v5397_v53, 9  ;;  %v5408_v53 = vld [vmem:[#allocation3 + $0xb0] sm:$0x1] }
 0x5f5   : > { %5580 = vrot.lane.b32.xlu0 %v5472_v19, %s8101_s29 }
 0x5f7   : > { %v5096_v28 = vpop.permute.xlu0 %5095  ;;  %5590 = vrot.lane.b32.xlu2 %v5490_v23, %s8101_s29  ;;  %5582 = vrot.lane.b32.xlu1 %v5476_v24, %s8101_s29  ;;  %v7725_v23 = vrot.slane %v5391_v12, 9  ;;  %v5395_v24 = vld [vmem:[#allocation3 + $0x7c] sm:$0xf] }
 0x5f8   : > { %5168 = vst.msk [vmem:[#allocation4 + $0x5c] sm:$0xf] %vm1543_vm13, %v5096_v28  ;;  %v5532_v28 = vsel %vm8168_vm4, %v7727_v20, %v5531_v15  ;;  %v5524_v31 = vrot.slane %v5395_v24, 5  ;;  %v5554_v20 = vrot.slane %v5552_v50, 4  ;;  %v5555_v15 = vrot.slane %v5408_v53, 5 }
 0x5f9   : > { %v5253_v22 = vpop.permute.xlu2 %5252  ;;  %v5098_v29 = vpop.permute.xlu1 %5097  ;;  %v5518_v30 = vsel %vm8168_vm4, %v7725_v23, %v5517_v55  ;;  %v5403_v55 = vld [vmem:[#allocation3 + $0x9c] sm:$0xe] }
 0x5fa   : > { %5343 = vst.msk [vmem:[#allocation4 + $0x14] sm:$0xf] %vm1785_vm14, %v5253_v22  ;;  %v5538_v22 = vrot.slane %v5401_v58, 5  ;;  %v7729_v5 = vrot.slane %v5403_v55, 9  ;;  %v7733_v58 = vrot.slane %v5415_v16, 9 }
 0x5fb   : > { %5169 = vst.msk [vmem:[#allocation4 + $0x60] sm:$0xf] %vm1543_vm13, %v5098_v29  ;;  %v5716_v55 = vld [vmem:[#allocation3 + $0x40] sm:$0xf]  ;;  %v5714_v16 = vld [vmem:[#allocation3 + $0x38] sm:$0x3] }
 0x5fd   : > { %5586 = vrot.lane.b32.xlu0 %v5483_v38, %s8101_s29  ;;  %v5540_v38 = vrot.slane %v5538_v22, 4 }
 0x5ff   : > { %v5102_v18 = vpop.permute.xlu0 %5101  ;;  %5596 = vrot.lane.b32.xlu2 %v5500_v6, %s8101_s29  ;;  %5588 = vrot.lane.b32.xlu1 %v5486_v40, %s8101_s29  ;;  %v5526_v6 = vrot.slane %v5524_v31, 4  ;;  %v5527_v40 = vrot.slane %v5396_v34, 5  ;;  %v5542_v42 = vsel %vm8168_vm4, %v5540_v38, %v5541_v39  ;;  %v5414_v38 = vld [vmem:[#allocation3 + $0xc8] sm:$0x1] }
 0x600   : > { %5171 = vst.msk [vmem:[#allocation4 + $0x68] sm:$0xf] %vm1543_vm13, %v5102_v18  ;;  %v5525_v18 = vsel %vm8168_vm4, %v7726_v36, %v5524_v31  ;;  %v5556_v31 = vsel %vm8168_vm4, %v5554_v20, %v5555_v15  ;;  %v5722_v15 = vld [vmem:[#allocation3 + $0x58] sm:$0xf] }
 0x601   : > { %v5259_v44 = vpop.permute.xlu2 %5258  ;;  %v5104_v45 = vpop.permute.xlu1 %5103  ;;  %v5528_v43 = vsel %vm8168_vm4, %v5526_v6, %v5527_v40 }
 0x602   : > { %5346 = vst.msk [vmem:[#allocation4 + $0x20] sm:$0xf] %vm1785_vm14, %v5259_v44 }
 0x603   : > { %5172 = vst.msk [vmem:[#allocation4 + $0x6c] sm:$0xf] %vm1543_vm13, %v5104_v45  ;;  %v5406_v45 = vld [vmem:[#allocation3 + $0xa8] sm:$0xe] }
 0x604   : > { %v7730_v27 = vrot.slane %v5406_v45, 9  ;;  %v5417_v45 = vld [vmem:[#allocation3 + $0xd4] sm:$0x1] }
 0x605   : > { %5592 = vrot.lane.b32.xlu0 %v5493_v14, %s8101_s29 }
 0x607   : > { %v5108_v56 = vpop.permute.xlu0 %5107  ;;  %5602 = vrot.lane.b32.xlu2 %v5511_v51, %s8101_s29  ;;  %5594 = vrot.lane.b32.xlu1 %v5497_v52, %s8101_s29  ;;  %v7728_v51 = vrot.slane %v5400_v46, 9  ;;  %v5404_v52 = vld [vmem:[#allocation3 + $0xa0] sm:$0xf] }
 0x608   : > { %5174 = vst.msk [vmem:[#allocation4 + $0x74] sm:$0xf] %vm1543_vm13, %v5108_v56  ;;  %v5553_v56 = vsel %vm8168_vm4, %v7730_v27, %v5552_v50  ;;  %v5545_v59 = vrot.slane %v5404_v52, 5  ;;  %v5706_v52 = vld [vmem:[#allocation3 + $0x18] sm:$0xc] }
 0x609   : > { %v5265_v60 = vpop.permute.xlu2 %5264  ;;  %v5110_v61 = vpop.permute.xlu1 %5109  ;;  %v5539_v57 = vsel %vm8168_vm4, %v7728_v51, %v5538_v22  ;;  %v5412_v22 = vld [vmem:[#allocation3 + $0xc0] sm:$0xe]  ;;  %v5712_v51 = vld [vmem:[#allocation3 + $0x30] sm:$0xc] }
 0x60a   : > { %5349 = vst.msk [vmem:[#allocation4 + $0x2c] sm:$0xf] %vm1785_vm14, %v5265_v60  ;;  %v5559_v60 = vrot.slane %v5410_v0, 5  ;;  %v7732_v39 = vrot.slane %v5412_v22, 9  ;;  %v5818_v0 = vrot.slane %v5713_v48, 6 }
 0x60b   : > { %5175 = vst.msk [vmem:[#allocation4 + $0x78] sm:$0xf] %vm1543_vm13, %v5110_v61  ;;  %v5725_v22 = vld [vmem:[#allocation3 + $0x64] sm:$0xf]  ;;  %v5723_v48 = vld [vmem:[#allocation3 + $0x5c] sm:$0x3] }
 0x60d   : > { %5598 = vrot.lane.b32.xlu0 %v5504_v62, %s8101_s29  ;;  %v5561_v62 = vrot.slane %v5559_v60, 4 }
 0x60f   : > { %v5243_v41 = vpop.permute.xlu0 %5242  ;;  %5608 = vrot.lane.b32.xlu2 %v5521_v9, %s8101_s29  ;;  %5600 = vrot.lane.b32.xlu1 %v5507_v10, %s8101_s29  ;;  %v5547_v9 = vrot.slane %v5545_v59, 4  ;;  %v5548_v10 = vrot.slane %v5405_v1, 5  ;;  %v5563_v11 = vsel %vm8168_vm4, %v5561_v62, %v5562_v2  ;;  %v5711_v62 = vld [vmem:[#allocation3 + $0x2c] sm:$0x3] }
 0x610   : > { %5338 = vst.msk [vmem:[#allocation4] sm:$0xf] %vm1785_vm14, %v5243_v41  ;;  %v5546_v41 = vsel %vm8168_vm4, %v7729_v5, %v5545_v59  ;;  %v7734_v59 = vrot.slane %v5706_v52, 10  ;;  %v5825_v5 = vrot.slane %v5716_v55, 6 }
 0x611   : > { %v5271_v17 = vpop.permute.xlu2 %5270  ;;  %v5245_v19 = vpop.permute.xlu1 %5244  ;;  %v5549_v12 = vsel %vm8168_vm4, %v5547_v9, %v5548_v10  ;;  %v7735_v10 = vrot.slane %v5709_v63, 10 }
 0x612   : > { %5352 = vst.msk [vmem:[#allocation4 + $0x38] sm:$0xf] %vm1785_vm14, %v5271_v17  ;;  %v5416_v17 = vld [vmem:[#allocation3 + $0xd0] sm:$0xf] }
 0x613   : > { %5339 = vst.msk [vmem:[#allocation4 + $0x4] sm:$0xf] %vm1785_vm14, %v5245_v19  ;;  %v5409_v19 = vld [vmem:[#allocation3 + $0xb4] sm:$0xe] }
 0x614   : > { %v7731_v26 = vrot.slane %v5409_v19, 9 }
 0x615   : > { %5604 = vrot.lane.b32.xlu0 %v5514_v25, %s8101_s29  ;;  %v5573_v25 = vrot.slane %v5416_v17, 5 }
 0x616   : > { %v5560_v32 = vsel %vm8168_vm4, %v7731_v26, %v5559_v60  ;;  %v5721_v26 = vld [vmem:[#allocation3 + $0x54] sm:$0xc] }
 0x617   : > { %v5249_v29 = vpop.permute.xlu0 %5248  ;;  %5614 = vrot.lane.b32.xlu2 %v5532_v28, %s8101_s29  ;;  %5606 = vrot.lane.b32.xlu1 %v5518_v30, %s8101_s29  ;;  %v5413_v28 = vld [vmem:[#allocation3 + $0xc4] sm:$0xf]  ;;  %v5707_v30 = vld [vmem:[#allocation3 + $0x1c] sm:$0xf] }
 0x618   : > { %5341 = vst.msk [vmem:[#allocation4 + $0xc] sm:$0xf] %vm1785_vm14, %v5249_v29  ;;  %v5574_v29 = vsel %vm8168_vm4, %v7733_v58, %v5573_v25  ;;  %v5566_v34 = vrot.slane %v5413_v28, 5  ;;  %v5804_v36 = vrot.slane %v5707_v30, 6  ;;  %v5715_v28 = vld [vmem:[#allocation3 + $0x3c] sm:$0xc] }
 0x619   : > { %v5277_v35 = vpop.permute.xlu2 %5276  ;;  %v5251_v37 = vpop.permute.xlu1 %5250  ;;  %v5839_v30 = vrot.slane %v5722_v15, 6  ;;  %v5732_v15 = vld [vmem:[#allocation3 + $0x80] sm:$0x3] }
 0x61a   : > { %5355 = vst.msk [vmem:[#allocation4 + $0x44] sm:$0xf] %vm1785_vm14, %v5277_v35 }
 0x61b   : > { %5342 = vst.msk [vmem:[#allocation4 + $0x10] sm:$0xf] %vm1785_vm14, %v5251_v37  ;;  %v5708_v37 = vld [vmem:[#allocation3 + $0x20] sm:$0x3]  ;;  %v5841_v52 = vrot.slane %v5839_v30, 4 }
 0x61c   : > { %v5807_v21 = vrot.slane %v5708_v37, 6  ;;  %v5718_v37 = vld [vmem:[#allocation3 + $0x48] sm:$0xc] }
 0x61d   : > { %5610 = vrot.lane.b32.xlu0 %v5525_v18, %s8101_s29  ;;  %v5806_v18 = vrot.slane %v5804_v36, 4 }
 0x61f   : > { %v5255_v44 = vpop.permute.xlu0 %5254  ;;  %5620 = vrot.lane.b32.xlu2 %v5542_v42, %s8101_s29  ;;  %5612 = vrot.lane.b32.xlu1 %v5528_v43, %s8101_s29  ;;  %v5568_v42 = vrot.slane %v5566_v34, 4  ;;  %v5569_v43 = vrot.slane %v5414_v38, 5  ;;  %v5808_v33 = vsel %vm8662_vm12, %v5806_v18, %v5807_v21  ;;  %v5720_v18 = vld [vmem:[#allocation3 + $0x50] sm:$0x3] }
 0x620   : > { %5344 = vst.msk [vmem:[#allocation4 + $0x18] sm:$0xf] %vm1785_vm14, %v5255_v44  ;;  %v5567_v44 = vsel %vm8168_vm4, %v7732_v39, %v5566_v34  ;;  %v7737_v34 = vrot.slane %v5715_v28, 10  ;;  %v5846_v39 = vrot.slane %v5725_v22, 6  ;;  %v5863_v28 = vrot.slane %v5732_v15, 6 }
 0x621   : > { %v5283_v49 = vpop.permute.xlu2 %5282  ;;  %v5257_v14 = vpop.permute.xlu1 %5256  ;;  %v5570_v46 = vsel %vm8168_vm4, %v5568_v42, %v5569_v43  ;;  %v7738_v43 = vrot.slane %v5718_v37, 10  ;;  %v6263_v15 = vld [vmem:[#allocation3 + $0xa0] sm:$0xf] }
 0x622   : > { %5358 = vst.msk [vmem:[#allocation4 + $0x50] sm:$0xf] %vm1785_vm14, %v5283_v49  ;;  %v5575_v49 = vrot.slane %v5573_v25, 4 }
 0x623   : > { %5345 = vst.msk [vmem:[#allocation4 + $0x1c] sm:$0xf] %vm1785_vm14, %v5257_v14  ;;  %v5576_v14 = vrot.slane %v5417_v45, 5 }
 0x625   : > { %5616 = vrot.lane.b32.xlu0 %v5535_v54, %s8101_s29  ;;  %v5710_v54 = vld [vmem:[#allocation3 + $0x28] sm:$0xf] }
 0x626   : > { %v5811_v1 = vrot.slane %v5710_v54, 6 }
 0x627   : > { %v5261_v61 = vpop.permute.xlu0 %5260  ;;  %5626 = vrot.lane.b32.xlu2 %v5553_v56, %s8101_s29  ;;  %5618 = vrot.lane.b32.xlu1 %v5539_v57, %s8101_s29  ;;  %v5577_v56 = vsel %vm8168_vm4, %v5575_v49, %v5576_v14  ;;  %v7736_v57 = vrot.slane %v5712_v51, 10  ;;  %v5731_v51 = vld [vmem:[#allocation3 + $0x7c] sm:$0xf] }
 0x628   : > { %5347 = vst.msk [vmem:[#allocation4 + $0x24] sm:$0xf] %vm1785_vm14, %v5261_v61  ;;  %v5805_v61 = vsel %vm8662_vm12, %v7734_v59, %v5804_v36  ;;  %v5860_v59 = vrot.slane %v5731_v51, 6  ;;  %v6235_v51 = vld [vmem:[#allocation3 + $0x30] sm:$0xe] }
 0x629   : > { %v5289_v7 = vpop.permute.xlu2 %5288  ;;  %v5263_v8 = vpop.permute.xlu1 %5262  ;;  %v5819_v60 = vsel %vm8662_vm12, %v7736_v57, %v5818_v0 }
 0x62a   : > { %5361 = vst.msk [vmem:[#allocation4 + $0x5c] sm:$0xf] %vm1785_vm14, %v5289_v7 }
 0x62b   : > { %5348 = vst.msk [vmem:[#allocation4 + $0x28] sm:$0xf] %vm1785_vm14, %v5263_v8  ;;  %v5717_v8 = vld [vmem:[#allocation3 + $0x44] sm:$0x3] }
 0x62c   : > { %v5828_v53 = vrot.slane %v5717_v8, 6 }
 0x62d   : > { %5622 = vrot.lane.b32.xlu0 %v5546_v41, %s8101_s29  ;;  %v5827_v41 = vrot.slane %v5825_v5, 4 }
 0x62f   : > { %v5267_v13 = vpop.permute.xlu0 %5266  ;;  %5632 = vrot.lane.b32.xlu2 %v5563_v11, %s8101_s29  ;;  %5624 = vrot.lane.b32.xlu1 %v5549_v12, %s8101_s29  ;;  %v5813_v11 = vrot.slane %v5811_v1, 4  ;;  %v5814_v12 = vrot.slane %v5711_v62, 6  ;;  %v5829_v17 = vsel %vm8662_vm12, %v5827_v41, %v5828_v53  ;;  %v5729_v41 = vld [vmem:[#allocation3 + $0x74] sm:$0x3] }
 0x630   : > { %5350 = vst.msk [vmem:[#allocation4 + $0x30] sm:$0xf] %vm1785_vm14, %v5267_v13  ;;  %v5812_v13 = vsel %vm8662_vm12, %v7735_v10, %v5811_v1  ;;  %v5735_v10 = vld [vmem:[#allocation3 + $0x8c] sm:$0x3] }
 0x631   : > { %v5295_v23 = vpop.permute.xlu2 %5294  ;;  %v5269_v24 = vpop.permute.xlu1 %5268  ;;  %v5815_v19 = vsel %vm8662_vm12, %v5813_v11, %v5814_v12 }
 0x632   : > { %5364 = vst.msk [vmem:[#allocation4 + $0x68] sm:$0xf] %vm1785_vm14, %v5295_v23  ;;  %v5820_v23 = vrot.slane %v5818_v0, 4  ;;  %v5842_v0 = vrot.slane %v5723_v48, 6 }
 0x633   : > { %5351 = vst.msk [vmem:[#allocation4 + $0x34] sm:$0xf] %vm1785_vm14, %v5269_v24  ;;  %v5821_v24 = vrot.slane %v5714_v16, 6  ;;  %v5870_v16 = vrot.slane %v5735_v10, 6 }
 0x634   : > { %v5843_v63 = vsel %vm8662_vm12, %v5841_v52, %v5842_v0  ;;  %v6572_v52 = vld [vmem:[#allocation3 + $0x34] sm:$0xf]  ;;  %v6239_v0 = vld [vmem:[#allocation3 + $0x40] sm:$0xf] }
 0x635   : > { %5628 = vrot.lane.b32.xlu0 %v5556_v31, %s8101_s29  ;;  %v5719_v31 = vld [vmem:[#allocation3 + $0x4c] sm:$0xf] }
 0x636   : > { %v5832_v38 = vrot.slane %v5719_v31, 6 }
 0x637   : > { %v5273_v35 = vpop.permute.xlu0 %5272  ;;  %5638 = vrot.lane.b32.xlu2 %v5574_v29, %s8101_s29  ;;  %5630 = vrot.lane.b32.xlu1 %v5560_v32, %s8101_s29  ;;  %v5822_v29 = vsel %vm8662_vm12, %v5820_v23, %v5821_v24  ;;  %v7739_v32 = vrot.slane %v5721_v26, 10  ;;  %v5862_v26 = vrot.slane %v5860_v59, 4 }
 0x638   : > { %5353 = vst.msk [vmem:[#allocation4 + $0x3c] sm:$0xf] %vm1785_vm14, %v5273_v35  ;;  %v5826_v35 = vsel %vm8662_vm12, %v7737_v34, %v5825_v5  ;;  %v5727_v5 = vld [vmem:[#allocation3 + $0x6c] sm:$0xc] }
 0x639   : > { %v5301_v6 = vpop.permute.xlu2 %5300  ;;  %v5275_v40 = vpop.permute.xlu1 %5274  ;;  %v5840_v36 = vsel %vm8662_vm12, %v7739_v32, %v5839_v30  ;;  %v7741_v53 = vrot.slane %v5727_v5, 10  ;;  %v6236_v32 = vld [vmem:[#allocation3 + $0x34] sm:$0xf]  ;;  %v5864_v34 = vsel %vm8662_vm12, %v5862_v26, %v5863_v28  ;;  %v6573_v5 = vld [vmem:[#allocation3 + $0x38] sm:$0x3] }
 0x63a   : > { %5367 = vst.msk [vmem:[#allocation4 + $0x74] sm:$0xf] %vm1785_vm14, %v5301_v6  ;;  %v6574_v26 = vld [vmem:[#allocation3 + $0x3c] sm:$0xc] }
 0x63b   : > { %5354 = vst.msk [vmem:[#allocation4 + $0x40] sm:$0xf] %vm1785_vm14, %v5275_v40  ;;  %v5726_v40 = vld [vmem:[#allocation3 + $0x68] sm:$0x3] }
 0x63c   : > { %v5849_v45 = vrot.slane %v5726_v40, 6  ;;  %v6237_v40 = vld [vmem:[#allocation3 + $0x38] sm:$0x1] }
 0x63d   : > { %5634 = vrot.lane.b32.xlu0 %v5567_v44, %s8101_s29  ;;  %v5848_v44 = vrot.slane %v5846_v39, 4 }
 0x63f   : > { %v5279_v47 = vpop.permute.xlu0 %5278  ;;  %5916 = vrot.lane.b32.xlu2 %v5808_v33, %s8102_s30  ;;  %5636 = vrot.lane.b32.xlu1 %v5570_v46, %s8101_s29  ;;  %v5834_v33 = vrot.slane %v5832_v38, 4  ;;  %v5835_v46 = vrot.slane %v5720_v18, 6  ;;  %v5850_v49 = vsel %vm8662_vm12, %v5848_v44, %v5849_v45  ;;  %v5738_v18 = vld [vmem:[#allocation3 + $0x98] sm:$0x3]  ;;  %v6336_v45 = vrot.slane %v6237_v40, 5 }
 0x640   : > { %5356 = vst.msk [vmem:[#allocation4 + $0x48] sm:$0xf] %vm1785_vm14, %v5279_v47  ;;  %v5833_v47 = vsel %vm8662_vm12, %v7738_v43, %v5832_v38 }
 0x641   : > { %v5579_v27 = vpop.permute.xlu2 %5578  ;;  %v5281_v50 = vpop.permute.xlu1 %5280  ;;  %v5836_v14 = vsel %vm8662_vm12, %v5834_v33, %v5835_v46  ;;  %v5877_v46 = vrot.slane %v5738_v18, 6 }
 0x642   : > { %5674 = vst.msk [vmem:[#allocation4] sm:$0xf] %vm2206_vm15, %v5579_v27 }
 0x643   : > { %5357 = vst.msk [vmem:[#allocation4 + $0x4c] sm:$0xf] %vm1785_vm14, %v5281_v50  ;;  %v5730_v50 = vld [vmem:[#allocation3 + $0x78] sm:$0xc] }
 0x644   : > { %v7742_v57 = vrot.slane %v5730_v50, 10 }
 0x645   : > { %5640 = vrot.lane.b32.xlu0 %v5577_v56, %s8101_s29  ;;  %v5724_v56 = vld [vmem:[#allocation3 + $0x60] sm:$0xc] }
 0x646   : > { %v7740_v1 = vrot.slane %v5724_v56, 10  ;;  %v6045_v56 = vld [vmem:[#allocation3 + $0x3c] sm:$0xf] }
 0x647   : > { %v5285_v7 = vpop.permute.xlu0 %5284  ;;  %5922 = vrot.lane.b32.xlu2 %v5819_v60, %s8102_s30  ;;  %5914 = vrot.lane.b32.xlu1 %v5805_v61, %s8102_s30  ;;  %v5728_v60 = vld [vmem:[#allocation3 + $0x70] sm:$0xf]  ;;  %v5734_v61 = vld [vmem:[#allocation3 + $0x88] sm:$0xf] }
 0x648   : > { %5359 = vst.msk [vmem:[#allocation4 + $0x54] sm:$0xf] %vm1785_vm14, %v5285_v7  ;;  %v5861_v7 = vsel %vm8662_vm12, %v7742_v57, %v5860_v59  ;;  %v5847_v8 = vsel %vm8662_vm12, %v7740_v1, %v5846_v39  ;;  %v5853_v62 = vrot.slane %v5728_v60, 6  ;;  %v6333_v39 = vrot.slane %v6236_v32, 5  ;;  %v6571_v59 = vld [vmem:[#allocation3 + $0x30] sm:$0xc] }
 0x649   : > { %v5585_v2 = vpop.permute.xlu2 %5584  ;;  %v5287_v9 = vpop.permute.xlu1 %5286  ;;  %v6669_v60 = vrot.slane %v6572_v52, 6  ;;  %v6240_v1 = vld [vmem:[#allocation3 + $0x44] sm:$0x1]  ;;  %v6243_v52 = vld [vmem:[#allocation3 + $0x50] sm:$0x1] }
 0x64a   : > { %5677 = vst.msk [vmem:[#allocation4 + $0xc] sm:$0xf] %vm2206_vm15, %v5585_v2  ;;  %v5867_v2 = vrot.slane %v5734_v61, 6  ;;  %v6335_v44 = vrot.slane %v6333_v39, 4  ;;  %v6340_v61 = vrot.slane %v6239_v0, 5 }
 0x64b   : > { %5360 = vst.msk [vmem:[#allocation4 + $0x58] sm:$0xf] %vm1785_vm14, %v5287_v9  ;;  %v6671_v10 = vrot.slane %v6669_v60, 4  ;;  %v6600_v0 = vld [vmem:[#allocation3 + $0xa4] sm:$0x3] }
 0x64c   : > { %v6337_v48 = vsel %vm8168_vm4, %v6335_v44, %v6336_v45 }
 0x64d   : > { %5918 = vrot.lane.b32.xlu0 %v5812_v13, %s8102_s30  ;;  %v5869_v13 = vrot.slane %v5867_v2, 4 }
 0x64f   : > { %v5291_v20 = vpop.permute.xlu0 %5290  ;;  %5928 = vrot.lane.b32.xlu2 %v5829_v17, %s8102_s30  ;;  %5920 = vrot.lane.b32.xlu1 %v5815_v19, %s8102_s30  ;;  %v5855_v17 = vrot.slane %v5853_v62, 4  ;;  %v5856_v19 = vrot.slane %v5729_v41, 6  ;;  %v5871_v23 = vsel %vm8662_vm12, %v5869_v13, %v5870_v16  ;;  %v6672_v41 = vrot.slane %v6573_v5, 6 }
 0x650   : > { %5362 = vst.msk [vmem:[#allocation4 + $0x60] sm:$0xf] %vm1785_vm14, %v5291_v20  ;;  %v5854_v20 = vsel %vm8662_vm12, %v7741_v53, %v5853_v62  ;;  %v7766_v62 = vrot.slane %v6571_v59, 10  ;;  %v6350_v59 = vrot.slane %v6243_v52, 5 }
 0x651   : > { %v5591_v58 = vpop.permute.xlu2 %5590  ;;  %v5293_v25 = vpop.permute.xlu1 %5292  ;;  %v5857_v24 = vsel %vm8662_vm12, %v5855_v17, %v5856_v19  ;;  %v6238_v19 = vld [vmem:[#allocation3 + $0x3c] sm:$0xe] }
 0x652   : > { %5680 = vst.msk [vmem:[#allocation4 + $0x18] sm:$0xf] %vm2206_vm15, %v5591_v58  ;;  %v6670_v53 = vsel %vm8662_vm12, %v7766_v62, %v6669_v60 }
 0x653   : > { %5363 = vst.msk [vmem:[#allocation4 + $0x64] sm:$0xf] %vm1785_vm14, %v5293_v25  ;;  %v5733_v25 = vld [vmem:[#allocation3 + $0x84] sm:$0xc] }
 0x654   : > { %v7743_v22 = vrot.slane %v5733_v25, 10 }
 0x655   : > { %5924 = vrot.lane.b32.xlu0 %v5822_v29, %s8102_s30  ;;  %v5737_v29 = vld [vmem:[#allocation3 + $0x94] sm:$0xf] }
 0x656   : > { %v5868_v37 = vsel %vm8662_vm12, %v7743_v22, %v5867_v2  ;;  %v5874_v38 = vrot.slane %v5737_v29, 6  ;;  %v6342_v2 = vrot.slane %v6340_v61, 4  ;;  %v6264_v22 = vld [vmem:[#allocation3 + $0xa4] sm:$0x1] }
 0x657   : > { %v5297_v6 = vpop.permute.xlu0 %5296  ;;  %5934 = vrot.lane.b32.xlu2 %v5840_v36, %s8102_s30  ;;  %5926 = vrot.lane.b32.xlu1 %v5826_v35, %s8102_s30  ;;  %v5736_v36 = vld [vmem:[#allocation3 + $0x90] sm:$0xc]  ;;  %v6576_v29 = vld [vmem:[#allocation3 + $0x44] sm:$0x3] }
 0x658   : > { %5365 = vst.msk [vmem:[#allocation4 + $0x6c] sm:$0xf] %vm1785_vm14, %v5297_v6  ;;  %v6043_v35 = vld [vmem:[#allocation3 + $0x30] sm:$0xf]  ;;  %v5876_v33 = vrot.slane %v5874_v38, 4 }
 0x659   : > { %v5597_v21 = vpop.permute.xlu2 %5596  ;;  %v5299_v42 = vpop.permute.xlu1 %5298 }
 0x65a   : > { %5683 = vst.msk [vmem:[#allocation4 + $0x24] sm:$0xf] %vm2206_vm15, %v5597_v21  ;;  %v7744_v21 = vrot.slane %v5736_v36, 10  ;;  %v7767_v36 = vrot.slane %v6574_v26, 10 }
 0x65b   : > { %5366 = vst.msk [vmem:[#allocation4 + $0x70] sm:$0xf] %vm1785_vm14, %v5299_v42 }
 0x65d   : > { %5930 = vrot.lane.b32.xlu0 %v5833_v47, %s8102_s30  ;;  %v5875_v47 = vsel %vm8662_vm12, %v7744_v21, %v5874_v38 }
 0x65f   : > { %v5303_v27 = vpop.permute.xlu0 %5302  ;;  %5940 = vrot.lane.b32.xlu2 %v5850_v49, %s8102_s30  ;;  %5932 = vrot.lane.b32.xlu1 %v5836_v14, %s8102_s30  ;;  %v5878_v49 = vsel %vm8662_vm12, %v5876_v33, %v5877_v46  ;;  %v6599_v33 = vld [vmem:[#allocation3 + $0xa0] sm:$0xf]  ;;  %v6242_v46 = vld [vmem:[#allocation3 + $0x4c] sm:$0xf] }
 0x660   : > { %5368 = vst.msk [vmem:[#allocation4 + $0x78] sm:$0xf] %vm1785_vm14, %v5303_v27 }
 0x661   : > { %v5603_v54 = vpop.permute.xlu2 %5602  ;;  %v5305_v55 = vpop.permute.xlu1 %5304 }
 0x662   : > { %5686 = vst.msk [vmem:[#allocation4 + $0x30] sm:$0xf] %vm2206_vm15, %v5603_v54  ;;  %v6044_v54 = vld [vmem:[#allocation3 + $0x34] sm:$0xf] }
 0x663   : > { %5369 = vst.msk [vmem:[#allocation4 + $0x7c] sm:$0xf] %vm1785_vm14, %v5305_v55  ;;  %v7750_v55 = vrot.slane %v6235_v51, 9 }
 0x665   : > { %5936 = vrot.lane.b32.xlu0 %v5843_v63, %s8102_s30  ;;  %v6334_v57 = vsel %vm8168_vm4, %v7750_v55, %v6333_v39  ;;  %v6679_v39 = vrot.slane %v6576_v29, 6 }
 0x667   : > { %v5581_v9 = vpop.permute.xlu0 %5580  ;;  %5946 = vrot.lane.b32.xlu2 %v5861_v7, %s8102_s30  ;;  %5938 = vrot.lane.b32.xlu1 %v5847_v8, %s8102_s30 }
 0x668   : > { %5675 = vst.msk [vmem:[#allocation4 + $0x4] sm:$0xf] %vm2206_vm15, %v5581_v9  ;;  %v6343_v9 = vrot.slane %v6240_v1, 5 }
 0x669   : > { %v5609_v11 = vpop.permute.xlu2 %5608  ;;  %v5583_v12 = vpop.permute.xlu1 %5582 }
 0x66a   : > { %5689 = vst.msk [vmem:[#allocation4 + $0x3c] sm:$0xf] %vm2206_vm15, %v5609_v11  ;;  %v6344_v11 = vsel %vm8168_vm4, %v6342_v2, %v6343_v9  ;;  %v6241_v2 = vld [vmem:[#allocation3 + $0x48] sm:$0xe]  ;;  %v6578_v9 = vld [vmem:[#allocation3 + $0x4c] sm:$0xf] }
 0x66b   : > { %5676 = vst.msk [vmem:[#allocation4 + $0x8] sm:$0xf] %vm2206_vm15, %v5583_v12  ;;  %v6673_v12 = vsel %vm8662_vm12, %v6671_v10, %v6672_v41  ;;  %v6266_v10 = vld [vmem:[#allocation3 + $0xac] sm:$0xf] }
 0x66c   : > { %v6048_v41 = vld [vmem:[#allocation3 + $0x4c] sm:$0xf] }
 0x66d   : > { %5942 = vrot.lane.b32.xlu0 %v5854_v20, %s8102_s30  ;;  %v6575_v20 = vld [vmem:[#allocation3 + $0x40] sm:$0xf] }
 0x66e   : > { %v6676_v28 = vrot.slane %v6575_v20, 6  ;;  %v6267_v20 = vld [vmem:[#allocation3 + $0xb0] sm:$0x1] }
 0x66f   : > { %v5587_v58 = vpop.permute.xlu0 %5586  ;;  %5952 = vrot.lane.b32.xlu2 %v5871_v23, %s8102_s30  ;;  %5944 = vrot.lane.b32.xlu1 %v5857_v24, %s8102_s30  ;;  %v6046_v23 = vld [vmem:[#allocation3 + $0x40] sm:$0xf]  ;;  %v7751_v24 = vrot.slane %v6238_v19, 9  ;;  %v6406_v26 = vrot.slane %v6267_v20, 5 }
 0x670   : > { %5678 = vst.msk [vmem:[#allocation4 + $0x10] sm:$0xf] %vm2206_vm15, %v5587_v58  ;;  %v6061_v58 = vld [vmem:[#allocation3 + $0x9c] sm:$0xf]  ;;  %v6678_v38 = vrot.slane %v6676_v28, 4 }
 0x671   : > { %v5615_v30 = vpop.permute.xlu2 %5614  ;;  %v5589_v31 = vpop.permute.xlu1 %5588  ;;  %v6341_v25 = vsel %vm8168_vm4, %v7751_v24, %v6340_v61  ;;  %v6735_v61 = vrot.slane %v6600_v0, 6 }
 0x672   : > { %5692 = vst.msk [vmem:[#allocation4 + $0x48] sm:$0xf] %vm2206_vm15, %v5615_v30  ;;  %v6396_v30 = vrot.slane %v6263_v15, 5  ;;  %v6680_v18 = vsel %vm8662_vm12, %v6678_v38, %v6679_v39  ;;  %v6579_v15 = vld [vmem:[#allocation3 + $0x50] sm:$0x3] }
 0x673   : > { %5679 = vst.msk [vmem:[#allocation4 + $0x14] sm:$0xf] %vm2206_vm15, %v5589_v31  ;;  %v6602_v38 = vld [vmem:[#allocation3 + $0xac] sm:$0xf]  ;;  %v6245_v39 = vld [vmem:[#allocation3 + $0x58] sm:$0xf] }
 0x675   : > { %5948 = vrot.lane.b32.xlu0 %v5864_v34, %s8102_s30 }
 0x677   : > { %v5593_v6 = vpop.permute.xlu0 %5592  ;;  %6107 = vrot.lane.b32.xlu2 %v6043_v35, %s8103_s6  ;;  %5950 = vrot.lane.b32.xlu1 %v5868_v37, %s8102_s30  ;;  %v6398_v35 = vrot.slane %v6396_v30, 4  ;;  %v6399_v37 = vrot.slane %v6264_v22, 5 }
 0x678   : > { %5681 = vst.msk [vmem:[#allocation4 + $0x1c] sm:$0xf] %vm2206_vm15, %v5593_v6  ;;  %v6677_v6 = vsel %vm8662_vm12, %v7767_v36, %v6676_v28 }
 0x679   : > { %v5621_v42 = vpop.permute.xlu2 %5620  ;;  %v5595_v43 = vpop.permute.xlu1 %5594  ;;  %v6400_v40 = vsel %vm8168_vm4, %v6398_v35, %v6399_v37 }
 0x67a   : > { %5695 = vst.msk [vmem:[#allocation4 + $0x54] sm:$0xf] %vm2206_vm15, %v5621_v42  ;;  %v6262_v42 = vld [vmem:[#allocation3 + $0x9c] sm:$0xe] }
 0x67b   : > { %5682 = vst.msk [vmem:[#allocation4 + $0x20] sm:$0xf] %vm2206_vm15, %v5595_v43  ;;  %v7759_v45 = vrot.slane %v6262_v42, 9  ;;  %v6739_v42 = vrot.slane %v6602_v38, 6  ;;  %v6269_v38 = vld [vmem:[#allocation3 + $0xb8] sm:$0xf] }
 0x67d   : > { %5954 = vrot.lane.b32.xlu0 %v5875_v47, %s8102_s30  ;;  %v6062_v47 = vld [vmem:[#allocation3 + $0xa0] sm:$0xf] }
 0x67f   : > { %v5599_v14 = vpop.permute.xlu0 %5598  ;;  %6445 = vrot.lane.b32.xlu2 %v6337_v48, %s8104_s7  ;;  %5956 = vrot.lane.b32.xlu1 %v5878_v49, %s8102_s30  ;;  %v6598_v48 = vld [vmem:[#allocation3 + $0x9c] sm:$0xc]  ;;  %v6047_v49 = vld [vmem:[#allocation3 + $0x48] sm:$0xf] }
 0x680   : > { %5684 = vst.msk [vmem:[#allocation4 + $0x28] sm:$0xf] %vm2206_vm15, %v5599_v14  ;;  %v6397_v14 = vsel %vm8168_vm4, %v7759_v45, %v6396_v30  ;;  %v6686_v30 = vrot.slane %v6579_v15, 6 }
 0x681   : > { %v5627_v27 = vpop.permute.xlu2 %5626  ;;  %v5601_v50 = vpop.permute.xlu1 %5600 }
 0x682   : > { %5698 = vst.msk [vmem:[#allocation4 + $0x60] sm:$0xf] %vm2206_vm15, %v5627_v27  ;;  %v6732_v27 = vrot.slane %v6599_v33, 6  ;;  %v6603_v33 = vld [vmem:[#allocation3 + $0xb0] sm:$0x3] }
 0x683   : > { %5685 = vst.msk [vmem:[#allocation4 + $0x2c] sm:$0xf] %vm2206_vm15, %v5601_v50  ;;  %v6347_v50 = vrot.slane %v6242_v46, 5 }
 0x684   : > { %v6734_v60 = vrot.slane %v6732_v27, 4 }
 0x685   : > { %6109 = vrot.lane.b32.xlu0 %v6044_v54, %s8103_s6  ;;  %v7775_v54 = vrot.slane %v6598_v48, 10 }
 0x686   : > { %v6736_v5 = vsel %vm8662_vm12, %v6734_v60, %v6735_v61 }
 0x687   : > { %v5605_v63 = vpop.permute.xlu0 %5604  ;;  %6111 = vrot.lane.b32.xlu2 %v6045_v56, %s8103_s6  ;;  %6443 = vrot.lane.b32.xlu1 %v6334_v57, %s8104_s7  ;;  %v6349_v57 = vrot.slane %v6347_v50, 4 }
 0x688   : > { %5687 = vst.msk [vmem:[#allocation4 + $0x34] sm:$0xf] %vm2206_vm15, %v5605_v63  ;;  %v6733_v63 = vsel %vm8662_vm12, %v7775_v54, %v6732_v27  ;;  %v6741_v27 = vrot.slane %v6739_v42, 4 }
 0x689   : > { %v5633_v7 = vpop.permute.xlu2 %5632  ;;  %v5607_v8 = vpop.permute.xlu1 %5606  ;;  %v6351_v1 = vsel %vm8168_vm4, %v6349_v57, %v6350_v59  ;;  %v5740_v57 = vld [vmem:[#allocation3 + $0xa0] sm:$0xf]  ;;  %v7932_v59 = vld [vmem:[%s11043_s3 + $0x30] sm:$0xff] }
 0x68a   : > { %5701 = vst.msk [vmem:[#allocation4 + $0x6c] sm:$0xf] %vm2206_vm15, %v5633_v7 }
 0x68b   : > { %5688 = vst.msk [vmem:[#allocation4 + $0x38] sm:$0xf] %vm2206_vm15, %v5607_v8 }
 0x68d   : > { %6779 = vrot.lane.b32.xlu0 %v6670_v53, %s8105_s8  ;;  %v7752_v53 = vrot.slane %v6241_v2, 9 }
 0x68f   : > { %v5611_v13 = vpop.permute.xlu0 %5610  ;;  %6449 = vrot.lane.b32.xlu2 %v6344_v11, %s8104_s7  ;;  %6781 = vrot.lane.b32.xlu1 %v6673_v12, %s8105_s8  ;;  %v6063_v11 = vld [vmem:[#allocation3 + $0xa8] sm:$0xf]  ;;  %v6348_v12 = vsel %vm8168_vm4, %v7752_v53, %v6347_v50  ;;  %v6742_v50 = vrot.slane %v6603_v33, 6 }
 0x690   : > { %5690 = vst.msk [vmem:[#allocation4 + $0x40] sm:$0xf] %vm2206_vm15, %v5611_v13  ;;  %v6577_v13 = vld [vmem:[#allocation3 + $0x48] sm:$0xc] }
 0x691   : > { %v5639_v16 = vpop.permute.xlu2 %5638  ;;  %v5613_v17 = vpop.permute.xlu1 %5612  ;;  %v6743_v54 = vsel %vm8662_vm12, %v6741_v27, %v6742_v50  ;;  %v6606_v27 = vld [vmem:[#allocation3 + $0xbc] sm:$0x3]  ;;  %v6052_v50 = vld [vmem:[#allocation3 + $0x64] sm:$0xf] }
 0x692   : > { %5704 = vst.msk [vmem:[#allocation4 + $0x78] sm:$0xf] %vm2206_vm15, %v5639_v16  ;;  %v6683_v16 = vrot.slane %v6578_v9, 6 }
 0x693   : > { %5691 = vst.msk [vmem:[#allocation4 + $0x44] sm:$0xf] %vm2206_vm15, %v5613_v17  ;;  %v6403_v17 = vrot.slane %v6266_v10, 5 }
 0x694   : > { %v6685_v28 = vrot.slane %v6683_v16, 4 }
 0x695   : > { %6113 = vrot.lane.b32.xlu0 %v6046_v23, %s8103_s6 }
 0x696   : > { %v6687_v29 = vsel %vm8662_vm12, %v6685_v28, %v6686_v30  ;;  %v6604_v30 = vld [vmem:[#allocation3 + $0xb4] sm:$0xc] }
 0x697   : > { %v5617_v31 = vpop.permute.xlu0 %5616  ;;  %6143 = vrot.lane.b32.xlu2 %v6061_v58, %s8103_s6  ;;  %6447 = vrot.lane.b32.xlu1 %v6341_v25, %s8104_s7  ;;  %v7768_v58 = vrot.slane %v6577_v13, 10  ;;  %v6405_v25 = vrot.slane %v6403_v17, 4 }
 0x698   : > { %5693 = vst.msk [vmem:[#allocation4 + $0x4c] sm:$0xf] %vm2206_vm15, %v5617_v31 }
 0x699   : > { %v5917_v32 = vpop.permute.xlu2 %5916  ;;  %v5619_v34 = vpop.permute.xlu1 %5618  ;;  %v6684_v31 = vsel %vm8662_vm12, %v7768_v58, %v6683_v16  ;;  %v6407_v22 = vsel %vm8168_vm4, %v6405_v25, %v6406_v26  ;;  %v5741_v58 = vld [vmem:[#allocation3 + $0xa4] sm:$0x3]  ;;  %v6066_v25 = vld [vmem:[#allocation3 + $0xb8] sm:$0xf] }
 0x69a   : > { %6011 = vst.msk [vmem:[#allocation4 + $0x4] sm:$0xf] %vm2627_vm2, %v5917_v32 }
 0x69b   : > { %5694 = vst.msk [vmem:[#allocation4 + $0x50] sm:$0xf] %vm2206_vm15, %v5619_v34  ;;  %v6265_v34 = vld [vmem:[#allocation3 + $0xa8] sm:$0xe] }
 0x69c   : > { %v7760_v37 = vrot.slane %v6265_v34, 9 }
 0x69d   : > { %6783 = vrot.lane.b32.xlu0 %v6677_v6, %s8105_s8  ;;  %v6064_v6 = vld [vmem:[#allocation3 + $0xac] sm:$0xf] }
 0x69f   : > { %v5623_v21 = vpop.permute.xlu0 %5622  ;;  %6481 = vrot.lane.b32.xlu2 %v6400_v40, %s8104_s7  ;;  %6785 = vrot.lane.b32.xlu1 %v6680_v18, %s8105_s8  ;;  %v6601_v40 = vld [vmem:[#allocation3 + $0xa8] sm:$0xc]  ;;  %v6049_v18 = vld [vmem:[#allocation3 + $0x54] sm:$0xf] }
 0x6a0   : > { %5696 = vst.msk [vmem:[#allocation4 + $0x58] sm:$0xf] %vm2206_vm15, %v5623_v21  ;;  %v6404_v21 = vsel %vm8168_vm4, %v7760_v37, %v6403_v17  ;;  %v7776_v46 = vrot.slane %v6601_v40, 10  ;;  %v7930_v17 = vld [vmem:[%s11043_s3 + $0x20] sm:$0xff]  ;;  %v6268_v40 = vld [vmem:[#allocation3 + $0xb4] sm:$0xe] }
 0x6a1   : > { %v5923_v43 = vpop.permute.xlu2 %5922  ;;  %v5625_v44 = vpop.permute.xlu1 %5624 }
 0x6a2   : > { %6014 = vst.msk [vmem:[#allocation4 + $0x10] sm:$0xf] %vm2627_vm2, %v5923_v43  ;;  %v6246_v43 = vld [vmem:[#allocation3 + $0x5c] sm:$0x1]  ;;  %v6740_v52 = vsel %vm8662_vm12, %v7776_v46, %v6739_v42  ;;  %v6410_v42 = vrot.slane %v6269_v38, 5 }
 0x6a3   : > { %5697 = vst.msk [vmem:[#allocation4 + $0x5c] sm:$0xf] %vm2206_vm15, %v5625_v44  ;;  %v6354_v44 = vrot.slane %v6245_v39, 5 }
 0x6a5   : > { %6145 = vrot.lane.b32.xlu0 %v6062_v47, %s8103_s6 }
 0x6a7   : > { %v5629_v51 = vpop.permute.xlu0 %5628  ;;  %6115 = vrot.lane.b32.xlu2 %v6047_v49, %s8103_s6  ;;  %6479 = vrot.lane.b32.xlu1 %v6397_v14, %s8104_s7  ;;  %v6357_v49 = vrot.slane %v6246_v43, 5  ;;  %v6356_v14 = vrot.slane %v6354_v44, 4 }
 0x6a8   : > { %5699 = vst.msk [vmem:[#allocation4 + $0x64] sm:$0xf] %vm2206_vm15, %v5629_v51  ;;  %v7933_v51 = vld [vmem:[%s11043_s3 + $0x38] sm:$0xff] }
 0x6a9   : > { %v5929_v55 = vpop.permute.xlu2 %5928  ;;  %v5631_v56 = vpop.permute.xlu1 %5630  ;;  %7103 = vmatpush.bf16.msra.mxu1 %v7933_v51  ;;  %8029 = vmatpush.bf16.msrb.mxu3 %v7933_v51  ;;  %v6358_v0 = vsel %vm8168_vm4, %v6356_v14, %v6357_v49 }
 0x6aa   : > { %6017 = vst.msk [vmem:[#allocation4 + $0x1c] sm:$0xf] %vm2627_vm2, %v5929_v55 }
 0x6ab   : > { %5700 = vst.msk [vmem:[#allocation4 + $0x68] sm:$0xf] %vm2206_vm15, %v5631_v56  ;;  %v5739_v56 = vld [vmem:[#allocation3 + $0x9c] sm:$0xc] }
 0x6ad   : > { %6815 = vrot.lane.b32.xlu0 %v6733_v63, %s8105_s8  ;;  %v6244_v63 = vld [vmem:[#allocation3 + $0x54] sm:$0xe]  ;;  %7104 = vmatpush.bf16.msra.mxu1 %v7932_v59 }
 0x6ae   : > { %8030 = vmatpush.bf16.msrb.mxu3 %v7932_v59  ;;  %v7753_v2 = vrot.slane %v6244_v63, 9  ;;  %v6583_v59 = vld [vmem:[#allocation3 + $0x60] sm:$0xc]  ;;  %v5743_v63 = vld [vmem:[#allocation3 + $0xac] sm:$0xf] }
 0x6af   : > { %v5635_v7 = vpop.permute.xlu0 %5634  ;;  %6453 = vrot.lane.b32.xlu2 %v6351_v1, %s8104_s7  ;;  %6817 = vrot.lane.b32.xlu1 %v6736_v5, %s8105_s8  ;;  %v7745_v1 = vrot.slane %v5739_v56, 10  ;;  %v5881_v5 = vrot.slane %v5740_v57, 6 }
 0x6b0   : > { %5702 = vst.msk [vmem:[#allocation4 + $0x70] sm:$0xf] %vm2206_vm15, %v5635_v7  ;;  %v6581_v7 = vld [vmem:[#allocation3 + $0x58] sm:$0xf]  ;;  %v6355_v10 = vsel %vm8168_vm4, %v7753_v2, %v6354_v44  ;;  %v6270_v44 = vld [vmem:[#allocation3 + $0xbc] sm:$0x1] }
 0x6b1   : > { %v5935_v8 = vpop.permute.xlu2 %5934  ;;  %v5637_v62 = vpop.permute.xlu1 %5636  ;;  %v5882_v9 = vsel %vm8662_vm12, %v7745_v1, %v5881_v5  ;;  %v6413_v49 = vrot.slane %v6270_v44, 5 }
 0x6b2   : > { %6020 = vst.msk [vmem:[#allocation4 + $0x28] sm:$0xf] %vm2627_vm2, %v5935_v8  ;;  %v7931_v8 = vld [vmem:[%s11043_s3 + $0x28] sm:$0xff] }
 0x6b3   : > { %5703 = vst.msk [vmem:[#allocation4 + $0x74] sm:$0xf] %vm2206_vm15, %v5637_v62  ;;  %v6050_v62 = vld [vmem:[#allocation3 + $0x58] sm:$0xf]  ;;  %7105 = vmatpush.bf16.msra.mxu1 %v7931_v8  ;;  %8031 = vmatpush.bf16.msrb.mxu3 %v7931_v8  ;;  %v6051_v8 = vld [vmem:[#allocation3 + $0x60] sm:$0xf] }
 0x6b5   : > { %6117 = vrot.lane.b32.xlu0 %v6048_v41, %s8103_s6  ;;  %v6690_v41 = vrot.slane %v6581_v7, 6 }
 0x6b7   : > { %v5641_v19 = vpop.permute.xlu0 %5640  ;;  %6147 = vrot.lane.b32.xlu2 %v6063_v11, %s8103_s6  ;;  %6451 = vrot.lane.b32.xlu1 %v6348_v12, %s8104_s7  ;;  %v6580_v11 = vld [vmem:[#allocation3 + $0x54] sm:$0xc]  ;;  %v6582_v12 = vld [vmem:[#allocation3 + $0x5c] sm:$0x3]  ;;  %v6692_v20 = vrot.slane %v6690_v41, 4 }
 0x6b8   : > { %5705 = vst.msk [vmem:[#allocation4 + $0x7c] sm:$0xf] %vm2206_vm15, %v5641_v19  ;;  %v7769_v19 = vrot.slane %v6580_v11, 10  ;;  %v6693_v15 = vrot.slane %v6582_v12, 6  ;;  %7106 = vmatpush.bf16.msra.mxu1 %v7930_v17  ;;  %8032 = vmatpush.bf16.msrb.mxu3 %v7930_v17 }
 0x6b9   : > { %v5941_v23 = vpop.permute.xlu2 %5940  ;;  %v5915_v24 = vpop.permute.xlu1 %5914 }
 0x6ba   : > { %6023 = vst.msk [vmem:[#allocation4 + $0x34] sm:$0xf] %vm2627_vm2, %v5941_v23  ;;  %v6691_v23 = vsel %vm8662_vm12, %v7769_v19, %v6690_v41  ;;  %v6694_v26 = vsel %vm8662_vm12, %v6692_v20, %v6693_v15  ;;  %v5744_v41 = vld [vmem:[#allocation3 + $0xb0] sm:$0x3] }
 0x6bb   : > { %6010 = vst.msk [vmem:[#allocation4] sm:$0xf] %vm2627_vm2, %v5915_v24  ;;  %v7929_v24 = vld [vmem:[%s11043_s3 + $0x18] sm:$0xff]  ;;  %v5891_v19 = vrot.slane %v5744_v41, 6 }
 0x6bc   : > { %7107 = vmatpush.bf16.msra.mxu1 %v7929_v24  ;;  %8033 = vmatpush.bf16.msrb.mxu3 %v7929_v24  ;;  %v6585_v24 = vld [vmem:[#allocation3 + $0x68] sm:$0x3] }
 0x6bd   : > { %6787 = vrot.lane.b32.xlu0 %v6684_v31, %s8105_s8  ;;  %v6605_v31 = vld [vmem:[#allocation3 + $0xb8] sm:$0xf] }
 0x6be   : > { %v6746_v37 = vrot.slane %v6605_v31, 6 }
 0x6bf   : > { %v5919_v32 = vpop.permute.xlu0 %5918  ;;  %6485 = vrot.lane.b32.xlu2 %v6407_v22, %s8104_s7  ;;  %6789 = vrot.lane.b32.xlu1 %v6687_v29, %s8105_s8  ;;  %v5883_v22 = vrot.slane %v5881_v5, 4  ;;  %v5884_v29 = vrot.slane %v5741_v58, 6  ;;  %v7770_v5 = vrot.slane %v6583_v59, 10 }
 0x6c0   : > { %6012 = vst.msk [vmem:[#allocation4 + $0x8] sm:$0xf] %vm2627_vm2, %v5919_v32  ;;  %v7928_v32 = vld [vmem:[%s11043_s3 + $0x10] sm:$0xff] }
 0x6c1   : > { %v5947_v36 = vpop.permute.xlu2 %5946  ;;  %v5921_v35 = vpop.permute.xlu1 %5920  ;;  %v5885_v39 = vsel %vm8662_vm12, %v5883_v22, %v5884_v29  ;;  %7108 = vmatpush.bf16.msra.mxu1 %v7928_v32  ;;  %8034 = vmatpush.bf16.msrb.mxu3 %v7928_v32  ;;  %v6700_v22 = vrot.slane %v6585_v24, 6 }
 0x6c2   : > { %6026 = vst.msk [vmem:[#allocation4 + $0x40] sm:$0xf] %vm2627_vm2, %v5947_v36 }
 0x6c3   : > { %6013 = vst.msk [vmem:[#allocation4 + $0xc] sm:$0xf] %vm2627_vm2, %v5921_v35  ;;  %v7777_v35 = vrot.slane %v6604_v30, 10  ;;  %v5742_v30 = vld [vmem:[#allocation3 + $0xa8] sm:$0xc] }
 0x6c5   : > { %6149 = vrot.lane.b32.xlu0 %v6064_v6, %s8103_s6  ;;  %v7927_v6 = vld [vmem:[%s11043_s3 + $0x8] sm:$0xff] }
 0x6c6   : > { %7109 = vmatpush.bf16.msra.mxu1 %v7927_v6  ;;  %8035 = vmatpush.bf16.msrb.mxu3 %v7927_v6 }
 0x6c7   : > { %v5925_v45 = vpop.permute.xlu0 %5924  ;;  %6119 = vrot.lane.b32.xlu2 %v6049_v18, %s8103_s6  ;;  %6483 = vrot.lane.b32.xlu1 %v6404_v21, %s8104_s7  ;;  %v6747_v18 = vsel %vm8662_vm12, %v7777_v35, %v6746_v37  ;;  %v6065_v21 = vld [vmem:[#allocation3 + $0xb4] sm:$0xf]  ;;  %v7746_v35 = vrot.slane %v5742_v30, 10  ;;  %v6069_v30 = vld [vmem:[#allocation3 + $0xcc] sm:$0xf] }
 0x6c8   : > { %6015 = vst.msk [vmem:[#allocation4 + $0x14] sm:$0xf] %vm2627_vm2, %v5925_v45  ;;  %v7761_v45 = vrot.slane %v6268_v40, 9 }
 0x6c9   : > { %v5953_v47 = vpop.permute.xlu2 %5952  ;;  %v5927_v48 = vpop.permute.xlu1 %5926 }
 0x6ca   : > { %6029 = vst.msk [vmem:[#allocation4 + $0x4c] sm:$0xf] %vm2627_vm2, %v5953_v47  ;;  %v7926_v47 = vld [vmem:[%s11043_s3] sm:$0xff]  ;;  %v6411_v14 = vsel %vm8168_vm4, %v7761_v45, %v6410_v42 }
 0x6cb   : > { %6016 = vst.msk [vmem:[#allocation4 + $0x18] sm:$0xf] %vm2627_vm2, %v5927_v48  ;;  %v6412_v48 = vrot.slane %v6410_v42, 4  ;;  %7110 = vmatpush.bf16.msra.mxu1 %v7926_v47  ;;  %8036 = vmatpush.bf16.msrb.mxu3 %v7926_v47  ;;  %v6067_v47 = vld [vmem:[#allocation3 + $0xc0] sm:$0xf] }
 0x6cd   : > { %6819 = vrot.lane.b32.xlu0 %v6740_v52, %s8105_s8  ;;  %v6414_v51 = vsel %vm8168_vm4, %v6412_v48, %v6413_v49  ;;  %v6273_v48 = vld [vmem:[#allocation3 + $0xc8] sm:$0x1] }
 0x6cf   : > { %v5931_v55 = vpop.permute.xlu0 %5930  ;;  %6457 = vrot.lane.b32.xlu2 %v6358_v0, %s8104_s7  ;;  %6821 = vrot.lane.b32.xlu1 %v6743_v54, %s8105_s8  ;;  %v6584_v0 = vld [vmem:[#allocation3 + $0x64] sm:$0xf]  ;;  %v6748_v54 = vrot.slane %v6746_v37, 4 }
 0x6d0   : > { %6018 = vst.msk [vmem:[#allocation4 + $0x20] sm:$0xf] %vm2627_vm2, %v5931_v55  ;;  %v6749_v55 = vrot.slane %v6606_v27, 6  ;;  %v6608_v37 = vld [vmem:[#allocation3 + $0xc4] sm:$0xf] }
 0x6d1   : > { %v6108_v60 = vpop.permute.xlu2 %6107  ;;  %v5933_v61 = vpop.permute.xlu1 %5932  ;;  %v6753_v40 = vrot.slane %v6608_v37, 6 }
 0x6d2   : > { %6203 = vst.msk [vmem:[#allocation4] sm:$0xf] %vm2868_vm3, %v6108_v60  ;;  %v6697_v60 = vrot.slane %v6584_v0, 6  ;;  %v6750_v1 = vsel %vm8662_vm12, %v6748_v54, %v6749_v55  ;;  %v6420_v0 = vrot.slane %v6273_v48, 5 }
 0x6d3   : > { %6019 = vst.msk [vmem:[#allocation4 + $0x24] sm:$0xf] %vm2627_vm2, %v5933_v61  ;;  %v6248_v61 = vld [vmem:[#allocation3 + $0x64] sm:$0xf]  ;;  %v6755_v45 = vrot.slane %v6753_v40, 4 }
 0x6d4   : > { %v6698_v7 = vsel %vm8662_vm12, %v7770_v5, %v6697_v60  ;;  %v6361_v2 = vrot.slane %v6248_v61, 5  ;;  %v6699_v31 = vrot.slane %v6697_v60, 4  ;;  %v6587_v60 = vld [vmem:[#allocation3 + $0x70] sm:$0xf] }
 0x6d5   : > { %6121 = vrot.lane.b32.xlu0 %v6050_v62, %s8103_s6  ;;  %v6247_v62 = vld [vmem:[#allocation3 + $0x60] sm:$0xe]  ;;  %v6704_v5 = vrot.slane %v6587_v60, 6 }
 0x6d6   : > { %v6363_v20 = vrot.slane %v6361_v2, 4  ;;  %v6701_v38 = vsel %vm8662_vm12, %v6699_v31, %v6700_v22 }
 0x6d7   : > { %v5937_v53 = vpop.permute.xlu0 %5936  ;;  %5958 = vrot.lane.b32.xlu2 %v5882_v9, %s8102_s30  ;;  %6455 = vrot.lane.b32.xlu1 %v6355_v10, %s8104_s7  ;;  %v5888_v9 = vrot.slane %v5743_v63, 6 }
 0x6d8   : > { %6021 = vst.msk [vmem:[#allocation4 + $0x2c] sm:$0xf] %vm2627_vm2, %v5937_v53  ;;  %v6249_v53 = vld [vmem:[#allocation3 + $0x68] sm:$0x1] }
 0x6d9   : > { %v10563_v13 = vpop.permute.xlu2 %6445  ;;  %v5939_v16 = vpop.permute.xlu1 %5938  ;;  %v5890_v17 = vrot.slane %v5888_v9, 4  ;;  %v6364_v15 = vrot.slane %v6249_v53, 5  ;;  %v5889_v6 = vsel %vm8662_vm12, %v7746_v35, %v5888_v9  ;;  %v6053_v53 = vld [vmem:[#allocation3 + $0x6c] sm:$0xf] }
 0x6da   : > { %6022 = vst.msk [vmem:[#allocation4 + $0x30] sm:$0xf] %vm2627_vm2, %v5939_v16  ;;  %v7754_v16 = vrot.slane %v6247_v62, 9 }
 0x6db   : > { %v5892_v58 = vsel %vm8662_vm12, %v5890_v17, %v5891_v19  ;;  %v6054_v17 = vld [vmem:[#allocation3 + $0x70] sm:$0xf] }
 0x6dd   : > { %6791 = vrot.lane.b32.xlu0 %v6691_v23, %s8105_s8  ;;  %v6362_v23 = vsel %vm8168_vm4, %v7754_v16, %v6361_v2 }
 0x6df   : > { %v5943_v28 = vpop.permute.xlu0 %5942  ;;  %6153 = vrot.lane.b32.xlu2 %v6066_v25, %s8103_s6  ;;  %6793 = vrot.lane.b32.xlu1 %v6694_v26, %s8105_s8  ;;  %v6271_v26 = vld [vmem:[#allocation3 + $0xc0] sm:$0xe] }
 0x6e0   : > { %6024 = vst.msk [vmem:[#allocation4 + $0x38] sm:$0xf] %vm2627_vm2, %v5943_v28  ;;  %v6272_v28 = vld [vmem:[#allocation3 + $0xc4] sm:$0xf] }
 0x6e1   : > { %v6112_v34 = vpop.permute.xlu2 %6111  ;;  %v5945_v36 = vpop.permute.xlu1 %5944 }
 0x6e2   : > { %6205 = vst.msk [vmem:[#allocation4 + $0x8] sm:$0xf] %vm2868_vm3, %v6112_v34  ;;  %v7762_v34 = vrot.slane %v6271_v26, 9 }
 0x6e3   : > { %6025 = vst.msk [vmem:[#allocation4 + $0x3c] sm:$0xf] %vm2627_vm2, %v5945_v36  ;;  %v6417_v36 = vrot.slane %v6272_v28, 5  ;;  %v5745_v28 = vld [vmem:[#allocation3 + $0xb4] sm:$0xc] }
 0x6e4   : > { %v7747_v35 = vrot.slane %v5745_v28, 10  ;;  %v6591_v28 = vld [vmem:[#allocation3 + $0x80] sm:$0x3] }
 0x6e5   : > { %5960 = vrot.lane.b32.xlu0 %v5885_v39, %s8102_s30  ;;  %v6418_v39 = vsel %vm8168_vm4, %v7762_v34, %v6417_v36 }
 0x6e7   : > { %v5949_v43 = vpop.permute.xlu0 %5948  ;;  %6823 = vrot.lane.b32.xlu2 %v6747_v18, %s8105_s8  ;;  %6151 = vrot.lane.b32.xlu1 %v6065_v21, %s8103_s6  ;;  %v6609_v21 = vld [vmem:[#allocation3 + $0xc8] sm:$0x3] }
 0x6e8   : > { %6027 = vst.msk [vmem:[#allocation4 + $0x44] sm:$0xf] %vm2627_vm2, %v5949_v43 }
 0x6e9   : > { %v10596_v33 = vpop.permute.xlu2 %6449  ;;  %v5951_v46 = vpop.permute.xlu1 %5950 }
 0x6ea   : > { %6028 = vst.msk [vmem:[#allocation4 + $0x48] sm:$0xf] %vm2627_vm2, %v5951_v46  ;;  %v6756_v46 = vrot.slane %v6609_v21, 6 }
 0x6ec   : > { %v6757_v49 = vsel %vm8662_vm12, %v6755_v45, %v6756_v46  ;;  %v6274_v46 = vld [vmem:[#allocation3 + $0xcc] sm:$0xe] }
 0x6ed   : > { %6487 = vrot.lane.b32.xlu0 %v6411_v14, %s8104_s7  ;;  %v6068_v14 = vld [vmem:[#allocation3 + $0xc4] sm:$0xf] }
 0x6ef   : > { %v5955_v52 = vpop.permute.xlu0 %5954  ;;  %6125 = vrot.lane.b32.xlu2 %v6052_v50, %s8103_s6  ;;  %6489 = vrot.lane.b32.xlu1 %v6414_v51, %s8104_s7  ;;  %v6251_v50 = vld [vmem:[#allocation3 + $0x70] sm:$0xf]  ;;  %v6607_v51 = vld [vmem:[#allocation3 + $0xc0] sm:$0xc] }
 0x6f0   : > { %6030 = vst.msk [vmem:[#allocation4 + $0x50] sm:$0xf] %vm2627_vm2, %v5955_v52  ;;  %v6419_v52 = vrot.slane %v6417_v36, 4  ;;  %v7778_v59 = vrot.slane %v6607_v51, 10  ;;  %v6276_v36 = vld [vmem:[#allocation3 + $0xd4] sm:$0x1] }
 0x6f1   : > { %v6144_v56 = vpop.permute.xlu2 %6143  ;;  %v5957_v57 = vpop.permute.xlu1 %5956  ;;  %v6055_v51 = vld [vmem:[#allocation3 + $0x78] sm:$0xf] }
 0x6f2   : > { %6221 = vst.msk [vmem:[#allocation4 + $0x48] sm:$0xf] %vm2868_vm3, %v6144_v56  ;;  %v6421_v61 = vsel %vm8168_vm4, %v6419_v52, %v6420_v0 }
 0x6f3   : > { %6031 = vst.msk [vmem:[#allocation4 + $0x54] sm:$0xf] %vm2627_vm2, %v5957_v57  ;;  %v6368_v57 = vrot.slane %v6251_v50, 5  ;;  %v6610_v50 = vld [vmem:[#allocation3 + $0xcc] sm:$0xc] }
 0x6f5   : > { %6825 = vrot.lane.b32.xlu0 %v6750_v1, %s8105_s8  ;;  %v6754_v1 = vsel %vm8662_vm12, %v7778_v59, %v6753_v40  ;;  %v7779_v59 = vrot.slane %v6610_v50, 10 }
 0x6f7   : > { %v6110_v10 = vpop.permute.xlu0 %6109  ;;  %6795 = vrot.lane.b32.xlu2 %v6698_v7, %s8105_s8  ;;  %6123 = vrot.lane.b32.xlu1 %v6051_v8, %s8103_s6  ;;  %v6588_v8 = vld [vmem:[#allocation3 + $0x74] sm:$0x3] }
 0x6f8   : > { %6204 = vst.msk [vmem:[#allocation4 + $0x4] sm:$0xf] %vm2868_vm3, %v6110_v10  ;;  %v6706_v10 = vrot.slane %v6704_v5, 4  ;;  %v6707_v41 = vrot.slane %v6588_v8, 6 }
 0x6f9   : > { %6540 = vst.msk [vmem:[#allocation4 + $0x4] sm:$0xf] %vm3289_vm6, %v10563_v13  ;;  %v10622_v11 = vpop.permute.xlu2 %6481  ;;  %v6444_v12 = vpop.permute.xlu1 %6443  ;;  %v6365_v13 = vsel %vm8168_vm4, %v6363_v20, %v6364_v15  ;;  %v6370_v20 = vrot.slane %v6368_v57, 4 }
 0x6fa   : > { %6539 = vst.msk [vmem:[#allocation4] sm:$0xf] %vm3289_vm6, %v6444_v12  ;;  %v6252_v12 = vld [vmem:[#allocation3 + $0x74] sm:$0x1]  ;;  %v6708_v16 = vsel %vm8662_vm12, %v6706_v10, %v6707_v41  ;;  %v5748_v41 = vld [vmem:[#allocation3 + $0xc0] sm:$0xc] }
 0x6fb   : > { %v6371_v15 = vrot.slane %v6252_v12, 5  ;;  %v6253_v12 = vld [vmem:[#allocation3 + $0x78] sm:$0xe] }
 0x6fd   : > { %6459 = vrot.lane.b32.xlu0 %v6362_v23, %s8104_s7  ;;  %v6372_v26 = vsel %vm8168_vm4, %v6370_v20, %v6371_v15  ;;  %v7756_v20 = vrot.slane %v6253_v12, 9  ;;  %v6590_v15 = vld [vmem:[#allocation3 + $0x7c] sm:$0xf]  ;;  %v5752_v12 = vld [vmem:[#allocation3 + $0xd0] sm:$0xf] }
 0x6ff   : > { %v6780_v25 = vpop.permute.xlu0 %6779  ;;  %5964 = vrot.lane.b32.xlu2 %v5892_v58, %s8102_s30  ;;  %6461 = vrot.lane.b32.xlu1 %v6365_v13, %s8104_s7  ;;  %v5746_v13 = vld [vmem:[#allocation3 + $0xb8] sm:$0xf] }
 0x700   : > { %6875 = vst.msk [vmem:[#allocation4] sm:$0xf] %vm3710_vm7, %v6780_v25  ;;  %v6275_v25 = vld [vmem:[#allocation3 + $0xd0] sm:$0xf]  ;;  %v5895_v22 = vrot.slane %v5746_v13, 6 }
 0x701   : > { %v6116_v29 = vpop.permute.xlu2 %6115  ;;  %v6782_v32 = vpop.permute.xlu1 %6781 }
 0x702   : > { %6207 = vst.msk [vmem:[#allocation4 + $0x10] sm:$0xf] %vm2868_vm3, %v6116_v29  ;;  %v6424_v29 = vrot.slane %v6275_v25, 5  ;;  %v5897_v21 = vrot.slane %v5895_v22, 4  ;;  %v6711_v25 = vrot.slane %v6590_v15, 6 }
 0x703   : > { %6876 = vst.msk [vmem:[#allocation4 + $0x4] sm:$0xf] %vm3710_vm7, %v6782_v32  ;;  %v5747_v32 = vld [vmem:[#allocation3 + $0xbc] sm:$0x3] }
 0x704   : > { %v6426_v40 = vrot.slane %v6424_v29, 4 }
 0x705   : > { %6797 = vrot.lane.b32.xlu0 %v6701_v38, %s8105_s8 }
 0x707   : > { %v6114_v18 = vpop.permute.xlu0 %6113  ;;  %6491 = vrot.lane.b32.xlu2 %v6418_v39, %s8104_s7  ;;  %5962 = vrot.lane.b32.xlu1 %v5889_v6, %s8102_s30  ;;  %v5898_v39 = vrot.slane %v5747_v32, 6  ;;  %v6713_v32 = vrot.slane %v6711_v25, 4 }
 0x708   : > { %6206 = vst.msk [vmem:[#allocation4 + $0xc] sm:$0xf] %vm2868_vm3, %v6114_v18  ;;  %v6427_v18 = vrot.slane %v6276_v36, 5 }
 0x709   : > { %6542 = vst.msk [vmem:[#allocation4 + $0xc] sm:$0xf] %vm3289_vm6, %v10596_v33  ;;  %v10649_v42 = vpop.permute.xlu2 %6453  ;;  %v6448_v43 = vpop.permute.xlu1 %6447  ;;  %v6250_v33 = vld [vmem:[#allocation3 + $0x6c] sm:$0xe] }
 0x70a   : > { %6541 = vst.msk [vmem:[#allocation4 + $0x8] sm:$0xf] %vm3289_vm6, %v6448_v43  ;;  %v7910_v44 = vld [vmem:[#allocation4] sm:$0xff]  ;;  %v7755_v56 = vrot.slane %v6250_v33, 9  ;;  %v5896_v43 = vsel %vm8662_vm12, %v7747_v35, %v5895_v22  ;;  %v6072_v35 = vld [vmem:[#allocation3 + $0xdc] sm:$0xf] }
 0x70b   : > { %7111 = vmatmul.bf16.vlgmr.msra.gmra.mxu1 %v7910_v44  ;;  %v6428_v44 = vsel %vm8168_vm4, %v6426_v40, %v6427_v18  ;;  %v6070_v33 = vld [vmem:[#allocation3 + $0xd0] sm:$0xf] }
 0x70c   : > { %v6369_v63 = vsel %vm8168_vm4, %v7755_v56, %v6368_v57  ;;  %v6612_v57 = vld [vmem:[#allocation3 + $0xd4] sm:$0x3] }
 0x70d   : > { %6155 = vrot.lane.b32.xlu0 %v6067_v47, %s8103_s6  ;;  %v6763_v8 = vrot.slane %v6612_v57, 6 }
 0x70f   : > { %v6784_v27 = vpop.permute.xlu0 %6783  ;;  %6829 = vrot.lane.b32.xlu2 %v6757_v49, %s8105_s8  ;;  %6157 = vrot.lane.b32.xlu1 %v6068_v14, %s8103_s6  ;;  %v7763_v49 = vrot.slane %v6274_v46, 9  ;;  %v6611_v14 = vld [vmem:[#allocation3 + $0xd0] sm:$0xf]  ;;  %v6278_v46 = vld [vmem:[#allocation3 + $0xdc] sm:$0xf] }
 0x710   : > { %6877 = vst.msk [vmem:[#allocation4 + $0x8] sm:$0xf] %vm3710_vm7, %v6784_v27  ;;  %v6254_v27 = vld [vmem:[#allocation3 + $0x7c] sm:$0xf]  ;;  %v6760_v0 = vrot.slane %v6611_v14, 6 }
 0x711   : > { %v6148_v54 = vpop.permute.xlu2 %6147  ;;  %v6786_v55 = vpop.permute.xlu1 %6785  ;;  %v6425_v52 = vsel %vm8168_vm4, %v7763_v49, %v6424_v29  ;;  %v6071_v14 = vld [vmem:[#allocation3 + $0xd8] sm:$0xf] }
 0x712   : > { %6223 = vst.msk [vmem:[#allocation4 + $0x50] sm:$0xf] %vm2868_vm3, %v6148_v54  ;;  %v6255_v54 = vld [vmem:[#allocation3 + $0x80] sm:$0x1] }
 0x713   : > { %6878 = vst.msk [vmem:[#allocation4 + $0xc] sm:$0xf] %vm3710_vm7, %v6786_v55  ;;  %v6375_v55 = vrot.slane %v6254_v27, 5  ;;  %v6431_v27 = vrot.slane %v6278_v46, 5 }
 0x715   : > { %6493 = vrot.lane.b32.xlu0 %v6421_v61, %s8104_s7  ;;  %v6376_v13 = vsel %vm8168_vm4, %v7756_v20, %v6375_v55  ;;  %v5909_v20 = vrot.slane %v5752_v12, 6 }
 0x717   : > { %v6146_v7 = vpop.permute.xlu0 %6145  ;;  %6463 = vrot.lane.b32.xlu2 %v6369_v63, %s8104_s7  ;;  %6827 = vrot.lane.b32.xlu1 %v6754_v1, %s8105_s8  ;;  %v6378_v63 = vrot.slane %v6255_v54, 5 }
 0x718   : > { %6222 = vst.msk [vmem:[#allocation4 + $0x4c] sm:$0xf] %vm2868_vm3, %v6146_v7  ;;  %v6762_v7 = vrot.slane %v6760_v0, 4 }
 0x719   : > { %6558 = vst.msk [vmem:[#allocation4 + $0x4c] sm:$0xf] %vm3289_vm6, %v10622_v11  ;;  %v10672_v62 = vpop.permute.xlu2 %6485  ;;  %v6480_v2 = vpop.permute.xlu1 %6479  ;;  %v6586_v11 = vld [vmem:[#allocation3 + $0x6c] sm:$0xc] }
 0x71a   : > { %6557 = vst.msk [vmem:[#allocation4 + $0x48] sm:$0xf] %vm3289_vm6, %v6480_v2  ;;  %v7911_v9 = vld [vmem:[#allocation4 + $0x8] sm:$0xff]  ;;  %v7771_v58 = vrot.slane %v6586_v11, 10  ;;  %v6761_v2 = vsel %vm8662_vm12, %v7779_v59, %v6760_v0  ;;  %v6615_v59 = vld [vmem:[#allocation3 + $0xe0] sm:$0x3] }
 0x71b   : > { %7116 = vmatmul.bf16.gmra.mxu1 %v7911_v9 }
 0x71c   : > { %v6705_v31 = vsel %vm8662_vm12, %v7771_v58, %v6704_v5  ;;  %v6377_v5 = vrot.slane %v6375_v55, 4 }
 0x71d   : > { %6127 = vrot.lane.b32.xlu0 %v6053_v53, %s8103_s6  ;;  %v5749_v53 = vld [vmem:[#allocation3 + $0xc4] sm:$0xf] }
 0x71e   : > { %v6379_v9 = vsel %vm8168_vm4, %v6377_v5, %v6378_v63  ;;  %v5902_v11 = vrot.slane %v5749_v53, 6  ;;  %v6058_v63 = vld [vmem:[#allocation3 + $0x88] sm:$0xf] }
 0x71f   : > { %v6816_v19 = vpop.permute.xlu0 %6815  ;;  %6801 = vrot.lane.b32.xlu2 %v6708_v16, %s8105_s8  ;;  %6129 = vrot.lane.b32.xlu1 %v6054_v17, %s8103_s6  ;;  %v6257_v53 = vld [vmem:[#allocation3 + $0x88] sm:$0xf] }
 0x720   : > { %6893 = vst.msk [vmem:[#allocation4 + $0x48] sm:$0xf] %vm3710_vm7, %v6816_v19  ;;  %v7748_v19 = vrot.slane %v5748_v41, 10  ;;  %v5904_v18 = vrot.slane %v5902_v11, 4 }
 0x721   : > { %v6120_v23 = vpop.permute.xlu2 %6119  ;;  %v6818_v24 = vpop.permute.xlu1 %6817 }
 0x722   : > { %6209 = vst.msk [vmem:[#allocation4 + $0x18] sm:$0xf] %vm2868_vm3, %v6120_v23  ;;  %v6056_v23 = vld [vmem:[#allocation3 + $0x7c] sm:$0xf]  ;;  %v5903_v58 = vsel %vm8662_vm12, %v7748_v19, %v5902_v11  ;;  %v6057_v11 = vld [vmem:[#allocation3 + $0x84] sm:$0xf] }
 0x723   : > { %6894 = vst.msk [vmem:[#allocation4 + $0x4c] sm:$0xf] %vm3710_vm7, %v6818_v24  ;;  %v6589_v24 = vld [vmem:[#allocation3 + $0x78] sm:$0xc] }
 0x725   : > { %6465 = vrot.lane.b32.xlu0 %v6372_v26, %s8104_s7 }
 0x727   : > { %v6118_v34 = vpop.permute.xlu0 %6117  ;;  %6159 = vrot.lane.b32.xlu2 %v6069_v30, %s8103_s6  ;;  %6799 = vrot.lane.b32.xlu1 %v6705_v31, %s8105_s8  ;;  %v7772_v30 = vrot.slane %v6589_v24, 10  ;;  %v6258_v24 = vld [vmem:[#allocation3 + $0x8c] sm:$0x1] }
 0x728   : > { %6208 = vst.msk [vmem:[#allocation4 + $0x14] sm:$0xf] %vm2868_vm3, %v6118_v34  ;;  %v6714_v34 = vrot.slane %v6591_v28, 6 }
 0x729   : > { %6544 = vst.msk [vmem:[#allocation4 + $0x14] sm:$0xf] %vm3289_vm6, %v10649_v42  ;;  %v10693_v37 = vpop.permute.xlu2 %6457  ;;  %v6452_v38 = vpop.permute.xlu1 %6451  ;;  %v5899_v42 = vsel %vm8662_vm12, %v5897_v21, %v5898_v39  ;;  %v6712_v36 = vsel %vm8662_vm12, %v7772_v30, %v6711_v25  ;;  %v6613_v39 = vld [vmem:[#allocation3 + $0xd8] sm:$0xc] }
 0x72a   : > { %6543 = vst.msk [vmem:[#allocation4 + $0x10] sm:$0xf] %vm3289_vm6, %v6452_v38  ;;  %v7919_v6 = vld [vmem:[#allocation4 + $0x48] sm:$0xff]  ;;  %v5750_v38 = vld [vmem:[#allocation3 + $0xc8] sm:$0x3] }
 0x72b   : > { %7156 = vmatmul.bf16.vlgmr.msrb.gmra.mxu3 %v7919_v6  ;;  %v6614_v6 = vld [vmem:[#allocation3 + $0xdc] sm:$0xf]  ;;  %v5905_v21 = vrot.slane %v5750_v38, 6 }
 0x72d   : > { %5966 = vrot.lane.b32.xlu0 %v5896_v43, %s8102_s30  ;;  %v7780_v43 = vrot.slane %v6613_v39, 10 }
 0x72f   : > { %v6788_v45 = vpop.permute.xlu0 %6787  ;;  %6497 = vrot.lane.b32.xlu2 %v6428_v44, %s8104_s7  ;;  %5968 = vrot.lane.b32.xlu1 %v5899_v42, %s8102_s30  ;;  %v6767_v44 = vrot.slane %v6614_v6, 6  ;;  %v5751_v6 = vld [vmem:[#allocation3 + $0xcc] sm:$0xc] }
 0x730   : > { %6879 = vst.msk [vmem:[#allocation4 + $0x10] sm:$0xf] %vm3710_vm7, %v6788_v45  ;;  %v7749_v46 = vrot.slane %v5751_v6, 10 }
 0x731   : > { %v5959_v47 = vpop.permute.xlu2 %5958  ;;  %v6790_v48 = vpop.permute.xlu1 %6789  ;;  %v6768_v49 = vsel %vm8662_vm12, %v7780_v43, %v6767_v44 }
 0x732   : > { %6032 = vst.msk [vmem:[#allocation4 + $0x58] sm:$0xf] %vm2627_vm2, %v5959_v47  ;;  %v6277_v47 = vld [vmem:[#allocation3 + $0xd8] sm:$0xe] }
 0x733   : > { %6880 = vst.msk [vmem:[#allocation4 + $0x14] sm:$0xf] %vm3710_vm7, %v6790_v48  ;;  %v5906_v48 = vsel %vm8662_vm12, %v5904_v18, %v5905_v21  ;;  %v7764_v50 = vrot.slane %v6277_v47, 9 }
 0x735   : > { %6161 = vrot.lane.b32.xlu0 %v6070_v33, %s8103_s6  ;;  %v6279_v33 = vld [vmem:[#allocation3 + $0xe0] sm:$0x1]  ;;  %v6432_v57 = vsel %vm8168_vm4, %v7764_v50, %v6431_v27 }
 0x736   : > { %v6434_v0 = vrot.slane %v6279_v33, 5 }
 0x737   : > { %v6150_v56 = vpop.permute.xlu0 %6149  ;;  %6131 = vrot.lane.b32.xlu2 %v6055_v51, %s8103_s6  ;;  %6495 = vrot.lane.b32.xlu1 %v6425_v52, %s8104_s7  ;;  %v6433_v52 = vrot.slane %v6431_v27, 4 }
 0x738   : > { %6224 = vst.msk [vmem:[#allocation4 + $0x54] sm:$0xf] %vm2868_vm3, %v6150_v56 }
 0x739   : > { %6560 = vst.msk [vmem:[#allocation4 + $0x54] sm:$0xf] %vm3289_vm6, %v10672_v62  ;;  %v10716_v60 = vpop.permute.xlu2 %6153  ;;  %v6484_v61 = vpop.permute.xlu1 %6483  ;;  %v6764_v62 = vsel %vm8662_vm12, %v6762_v7, %v6763_v8  ;;  %v6592_v7 = vld [vmem:[#allocation3 + $0x84] sm:$0xc]  ;;  %v6593_v8 = vld [vmem:[#allocation3 + $0x88] sm:$0xf] }
 0x73a   : > { %6559 = vst.msk [vmem:[#allocation4 + $0x50] sm:$0xf] %vm3289_vm6, %v6484_v61  ;;  %v7912_v1 = vld [vmem:[#allocation4 + $0x10] sm:$0xff]  ;;  %v6435_v61 = vsel %vm8168_vm4, %v6433_v52, %v6434_v0  ;;  %v6718_v41 = vrot.slane %v6593_v8, 6 }
 0x73b   : > { %7121 = vmatmul.bf16.gmra.mxu1 %v7912_v1  ;;  %v6769_v1 = vrot.slane %v6767_v44, 4  ;;  %v6073_v0 = vld [vmem:[#allocation3 + $0xe4] sm:$0xf] }
 0x73d   : > { %6831 = vrot.lane.b32.xlu0 %v6761_v2, %s8105_s8 }
 0x73f   : > { %v6820_v10 = vpop.permute.xlu0 %6819  ;;  %6469 = vrot.lane.b32.xlu2 %v6379_v9, %s8104_s7  ;;  %6833 = vrot.lane.b32.xlu1 %v6764_v62, %s8105_s8 }
 0x740   : > { %6895 = vst.msk [vmem:[#allocation4 + $0x50] sm:$0xf] %vm3710_vm7, %v6820_v10  ;;  %v7773_v10 = vrot.slane %v6592_v7, 10 }
 0x741   : > { %v10729_v16 = vpop.permute.xlu2 %6823  ;;  %v6822_v17 = vpop.permute.xlu1 %6821 }
 0x742   : > { %6896 = vst.msk [vmem:[#allocation4 + $0x54] sm:$0xf] %vm3710_vm7, %v6822_v17  ;;  %v6256_v17 = vld [vmem:[#allocation3 + $0x84] sm:$0xe]  ;;  %v6719_v19 = vsel %vm8662_vm12, %v7773_v10, %v6718_v41 }
 0x745   : > { %6133 = vrot.lane.b32.xlu0 %v6056_v23, %s8103_s6  ;;  %v5753_v23 = vld [vmem:[#allocation3 + $0xd4] sm:$0x3] }
 0x746   : > { %v5912_v28 = vrot.slane %v5753_v23, 6 }
 0x747   : > { %v6122_v26 = vpop.permute.xlu0 %6121  ;;  %5970 = vrot.lane.b32.xlu2 %v5903_v58, %s8102_s30  ;;  %6467 = vrot.lane.b32.xlu1 %v6376_v13, %s8104_s7  ;;  %v7757_v58 = vrot.slane %v6256_v17, 9  ;;  %v7935_v17 = vld [vmem:[%s8318_s26] sm:$0xff]  }
 0x748   : > { %6210 = vst.msk [vmem:[#allocation4 + $0x1c] sm:$0xf] %vm2868_vm3, %v6122_v26  ;;  %v5911_v26 = vrot.slane %v5909_v20, 4 }
 0x749   : > { %6546 = vst.msk [vmem:[#allocation4 + $0x1c] sm:$0xf] %vm3289_vm6, %v10693_v37  ;;  %v6126_v31 = vpop.permute.xlu2 %6125  ;;  %v6456_v22 = vpop.permute.xlu1 %6455  ;;  %v7920_v29 = vld [vmem:[#allocation4 + $0x50] sm:$0xff]  ;;  %v6715_v37 = vsel %vm8662_vm12, %v6713_v32, %v6714_v34  ;;  %v6281_v34 = vld [vmem:[#allocation3 + $0xe8] sm:$0xf] }
 0x74a   : > { %6212 = vst.msk [vmem:[#allocation4 + $0x24] sm:$0xf] %vm2868_vm3, %v6126_v31  ;;  %7161 = vmatmul.bf16.gmra.mxu3 %v7920_v29  ;;  %v6385_v31 = vrot.slane %v6258_v24, 5  ;;  %v6594_v29 = vld [vmem:[#allocation3 + $0x8c] sm:$0x3]  ;;  %v6438_v21 = vrot.slane %v6281_v34, 5 }
 0x74b   : > { %6545 = vst.msk [vmem:[#allocation4 + $0x18] sm:$0xf] %vm3289_vm6, %v6456_v22  ;;  %v6280_v32 = vld [vmem:[#allocation3 + $0xe4] sm:$0xe] }
 0x74c   : > { %v7765_v18 = vrot.slane %v6280_v32, 9  ;;  %v6060_v32 = vld [vmem:[#allocation3 + $0x94] sm:$0xf] }
 0x74d   : > { %6803 = vrot.lane.b32.xlu0 %v6712_v36, %s8105_s8  ;;  %v5913_v36 = vsel %vm8662_vm12, %v5911_v26, %v5912_v28 }
 0x74f   : > { %v6792_v40 = vpop.permute.xlu0 %6791  ;;  %6165 = vrot.lane.b32.xlu2 %v6072_v35, %s8103_s6  ;;  %6805 = vrot.lane.b32.xlu1 %v6715_v37, %s8105_s8  ;;  %v6720_v37 = vrot.slane %v6718_v41, 4 }
 0x750   : > { %6881 = vst.msk [vmem:[#allocation4 + $0x18] sm:$0xf] %vm3710_vm7, %v6792_v40  ;;  %v6721_v40 = vrot.slane %v6594_v29, 6 }
 0x751   : > { %v10752_v42 = vpop.permute.xlu2 %6795  ;;  %v6794_v45 = vpop.permute.xlu1 %6793 }
 0x752   : > { %6882 = vst.msk [vmem:[#allocation4 + $0x1c] sm:$0xf] %vm3710_vm7, %v6794_v45  ;;  %v6617_v45 = vld [vmem:[#allocation3 + $0xe8] sm:$0xf]  ;;  %v6722_v47 = vsel %vm8662_vm12, %v6720_v37, %v6721_v40 }
 0x755   : > { %5972 = vrot.lane.b32.xlu0 %v5906_v48, %s8102_s30  ;;  %v6439_v48 = vsel %vm8168_vm4, %v7765_v18, %v6438_v21 }
 0x757   : > { %v5961_v51 = vpop.permute.xlu0 %5960  ;;  %6835 = vrot.lane.b32.xlu2 %v6768_v49, %s8105_s8  ;;  %6163 = vrot.lane.b32.xlu1 %v6071_v14, %s8103_s6  ;;  %v6774_v49 = vrot.slane %v6617_v45, 6  ;;  %v6618_v14 = vld [vmem:[#allocation3 + $0xec] sm:$0x3] }
 0x758   : > { %6033 = vst.msk [vmem:[#allocation4 + $0x5c] sm:$0xf] %vm2627_vm2, %v5961_v51  ;;  %v6777_v50 = vrot.slane %v6618_v14, 6 }
 0x759   : > { %6226 = vst.msk [vmem:[#allocation4 + $0x5c] sm:$0xf] %vm2868_vm3, %v10716_v60  ;;  %v5965_v54 = vpop.permute.xlu2 %5964  ;;  %v6152_v55 = vpop.permute.xlu1 %6151  ;;  %v7913_v56 = vld [vmem:[#allocation4 + $0x18] sm:$0xff]  ;;  %v6770_v60 = vrot.slane %v6615_v59, 6  ;;  %v6776_v33 = vrot.slane %v6774_v49, 4  ;;  %v6440_v59 = vrot.slane %v6438_v21, 4 }
 0x75a   : > { %6035 = vst.msk [vmem:[#allocation4 + $0x64] sm:$0xf] %vm2627_vm2, %v5965_v54  ;;  %7126 = vmatmul.bf16.gmra.mxu1 %v7913_v56  ;;  %v6282_v54 = vld [vmem:[#allocation3 + $0xec] sm:$0x1]  ;;  %v6074_v56 = vld [vmem:[#allocation3 + $0xe8] sm:$0xf] }
 0x75b   : > { %6225 = vst.msk [vmem:[#allocation4 + $0x58] sm:$0xf] %vm2868_vm3, %v6152_v55  ;;  %v6771_v62 = vsel %vm8662_vm12, %v6769_v1, %v6770_v60  ;;  %v6778_v55 = vsel %vm8662_vm12, %v6776_v33, %v6777_v50  ;;  %v6259_v60 = vld [vmem:[#allocation3 + $0x90] sm:$0xe] }
 0x75c   : > { %v7758_v10 = vrot.slane %v6259_v60, 9 }
 0x75d   : > { %6499 = vrot.lane.b32.xlu0 %v6432_v57, %s8104_s7  ;;  %v6616_v57 = vld [vmem:[#allocation3 + $0xe4] sm:$0xc] }
 0x75e   : > { %v7781_v7 = vrot.slane %v6616_v57, 10 }
 0x75f   : > { %v6488_v5 = vpop.permute.xlu0 %6487  ;;  %6137 = vrot.lane.b32.xlu2 %v6058_v63, %s8103_s6  ;;  %6501 = vrot.lane.b32.xlu1 %v6435_v61, %s8104_s7  ;;  %v6441_v61 = vrot.slane %v6282_v54, 5 }
 0x760   : > { %6561 = vst.msk [vmem:[#allocation4 + $0x58] sm:$0xf] %vm3289_vm6, %v6488_v5  ;;  %v6260_v5 = vld [vmem:[#allocation3 + $0x94] sm:$0xf]  ;;  %v6775_v12 = vsel %vm8662_vm12, %v7781_v7, %v6774_v49 }
 0x761   : > { %6897 = vst.msk [vmem:[#allocation4 + $0x58] sm:$0xf] %vm3710_vm7, %v10729_v16  ;;  %v10777_v2 = vpop.permute.xlu2 %6491  ;;  %v6490_v9 = vpop.permute.xlu1 %6489  ;;  %v6382_v16 = vrot.slane %v6257_v53, 5  ;;  %v6389_v41 = vrot.slane %v6260_v5, 5  ;;  %v6596_v53 = vld [vmem:[#allocation3 + $0x94] sm:$0xf] }
 0x762   : > { %6562 = vst.msk [vmem:[#allocation4 + $0x5c] sm:$0xf] %vm3289_vm6, %v6490_v9  ;;  %v8006_v5 = vld [vmem:[%s8318_s26 + $0x48] sm:$0xff]  }
 0x763   : > { %v6384_v30 = vrot.slane %v6382_v16, 4  ;;  %v6383_v22 = vsel %vm8168_vm4, %v7757_v58, %v6382_v16  ;;  %v7972_v7 = vunpack.c.l.bf16 %v8006_v5 }
 0x765   : > { %6837 = vrot.lane.b32.xlu0 %v6771_v62, %s8105_s8  ;;  %v6386_v35 = vsel %vm8168_vm4, %v6384_v30, %v6385_v31  ;;  %v6442_v62 = vsel %vm8168_vm4, %v6440_v59, %v6441_v61  ;;  %v6059_v31 = vld [vmem:[#allocation3 + $0x90] sm:$0xf] }
 0x767   : > { %v6826_v15 = vpop.permute.xlu0 %6825  ;;  %6807 = vrot.lane.b32.xlu2 %v6719_v19, %s8105_s8  ;;  %6135 = vrot.lane.b32.xlu1 %v6057_v11, %s8103_s6  ;;  %v10841_v19 = vld [vmem:[%s11044_s4] ss:$0 sm:$0xff]  ;;  %v6725_v11 = vrot.slane %v6596_v53, 6 }
 0x768   : > { %6898 = vst.msk [vmem:[#allocation4 + $0x5c] sm:$0xf] %vm3710_vm7, %v6826_v15  ;;  %v7936_v15 = vunpack.c.l.bf16 %v7935_v17 }
 0x769   : > { %v10788_v13 = vpop.permute.xlu2 %6829  ;;  %v6124_v25 = vpop.permute.xlu1 %6123  ;;  %v6727_v26 = vrot.slane %v6725_v11, 4 }
 0x76a   : > { %6211 = vst.msk [vmem:[#allocation4 + $0x20] sm:$0xf] %vm2868_vm3, %v6124_v25 }
 0x76d   : > { %6471 = vrot.lane.b32.xlu0 %v6383_v22, %s8104_s7 }
 0x76f   : > { %v6460_v38 = vpop.permute.xlu0 %6459  ;;  %5976 = vrot.lane.b32.xlu2 %v5913_v36, %s8102_s30  ;;  %6473 = vrot.lane.b32.xlu1 %v6386_v35, %s8104_s7  ;;  %v7921_v39 = vld [vmem:[#allocation4 + $0x58] sm:$0xff]  ;;  %v6595_v36 = vld [vmem:[#allocation3 + $0x90] sm:$0xc]  ;;  %v7937_v35 = vunpack.c.h.bf16 %v7935_v17 }
 0x770   : > { %6547 = vst.msk [vmem:[#allocation4 + $0x20] sm:$0xf] %vm3289_vm6, %v6460_v38  ;;  %7166 = vmatmul.bf16.gmra.mxu3 %v7921_v39  ;;  %v6391_v38 = vrot.slane %v6389_v41, 4  ;;  %v7999_v17 = vld [vmem:[%s8318_s26 + $0x10] sm:$0xff]  }
 0x771   : > { %6883 = vst.msk [vmem:[#allocation4 + $0x20] sm:$0xf] %vm3710_vm7, %v10752_v42  ;;  %v10803_v43 = vpop.permute.xlu2 %6463  ;;  %v6462_v44 = vpop.permute.xlu1 %6461  ;;  %v5910_v42 = vsel %vm8662_vm12, %v7749_v46, %v5909_v20  ;;  %v6597_v20 = vld [vmem:[#allocation3 + $0x98] sm:$0x3] }
 0x772   : > { %6548 = vst.msk [vmem:[#allocation4 + $0x24] sm:$0xf] %vm3289_vm6, %v6462_v44  ;;  %v6728_v28 = vrot.slane %v6597_v20, 6  ;;  %v7774_v44 = vrot.slane %v6595_v36, 10 }
 0x774   : > { %v6729_v29 = vsel %vm8662_vm12, %v6727_v26, %v6728_v28 }
 0x775   : > { %6809 = vrot.lane.b32.xlu0 %v6722_v47, %s8105_s8  ;;  %v7998_v47 = vld [vmem:[%s8318_s26 + $0x8] sm:$0xff]  }
 0x776   : > { %v7940_v14 = vunpack.c.l.bf16 %v7998_v47 }
 0x777   : > { %v6798_v27 = vpop.permute.xlu0 %6797  ;;  %6503 = vrot.lane.b32.xlu2 %v6439_v48, %s8104_s7  ;;  %5974 = vrot.lane.b32.xlu1 %v5910_v42, %s8102_s30 }
 0x778   : > { %6884 = vst.msk [vmem:[#allocation4 + $0x24] sm:$0xf] %vm3710_vm7, %v6798_v27 }
 0x779   : > { %v10816_v51 = vpop.permute.xlu2 %6801  ;;  %v5963_v52 = vpop.permute.xlu1 %5962 }
 0x77a   : > { %6034 = vst.msk [vmem:[#allocation4 + $0x60] sm:$0xf] %vm2627_vm2, %v5963_v52 }
 0x77d   : > { %6167 = vrot.lane.b32.xlu0 %v6073_v0, %s8103_s6  ;;  %v7941_v0 = vunpack.c.h.bf16 %v7998_v47 }
 0x77f   : > { %v6156_v63 = vpop.permute.xlu0 %6155  ;;  %6841 = vrot.lane.b32.xlu2 %v6778_v55, %s8105_s8  ;;  %6169 = vrot.lane.b32.xlu1 %v6074_v56, %s8103_s6  ;;  %v7914_v1 = vld [vmem:[#allocation4 + $0x20] sm:$0xff] }
 0x780   : > { %6227 = vst.msk [vmem:[#allocation4 + $0x60] sm:$0xf] %vm2868_vm3, %v6156_v63  ;;  %7131 = vmatmul.bf16.gmra.mxu1 %v7914_v1 }
 0x781   : > { %6563 = vst.msk [vmem:[#allocation4 + $0x60] sm:$0xf] %vm3289_vm6, %v10777_v2  ;;  %v10827_v8 = vpop.permute.xlu2 %6159  ;;  %v6158_v9 = vpop.permute.xlu1 %6157  ;;  %v6390_v2 = vsel %vm8168_vm4, %v7758_v10, %v6389_v41 }
 0x782   : > { %6228 = vst.msk [vmem:[#allocation4 + $0x64] sm:$0xf] %vm2868_vm3, %v6158_v9 }
 0x785   : > { %6505 = vrot.lane.b32.xlu0 %v6442_v62, %s8104_s7 }
 0x787   : > { %v6494_v16 = vpop.permute.xlu0 %6493  ;;  %6475 = vrot.lane.b32.xlu2 %v6390_v2, %s8104_s7  ;;  %6839 = vrot.lane.b32.xlu1 %v6775_v12, %s8105_s8  ;;  %v7973_v2 = vunpack.c.h.bf16 %v8006_v5 }
 0x788   : > { %6564 = vst.msk [vmem:[#allocation4 + $0x64] sm:$0xf] %vm3289_vm6, %v6494_v16  ;;  %v7112_v24 = vpop.f32.mrf.mxu1 }
 0x789   : > { %6900 = vst.msk [vmem:[#allocation4 + $0x64] sm:$0xf] %vm3710_vm7, %v10788_v13  ;;  %v10848_v23 = vpop.permute.xlu2 %6497  ;;  %v7113_v58 = vadd.f32 %v10841_v19, %v7112_v24  ;;  %v6828_v25 = vpop.permute.xlu1 %6827  ;;  %v6261_v13 = vld [vmem:[#allocation3 + $0x98] sm:$0x1] }
 0x78a   : > { %6899 = vst.msk [vmem:[#allocation4 + $0x60] sm:$0xf] %vm3710_vm7, %v6828_v25  ;;  %v6392_v39 = vrot.slane %v6261_v13, 5 }
 0x78b   : > { %v7259_v30 = vadd.f32 %v7936_v15, %v7113_v58  ;;  %v7944_v15 = vunpack.c.l.bf16 %v7999_v17 }
 0x78c   : > { %v6393_v46 = vsel %vm8168_vm4, %v6391_v38, %v6392_v39 }
 0x78d   : > { %6139 = vrot.lane.b32.xlu0 %v6059_v31, %s8103_s6  ;;  %v7291_v22 = vmax.f32 %v7259_v30, 0.0 }
 0x78f   : > { %v6128_v34 = vpop.permute.xlu0 %6127  ;;  %6813 = vrot.lane.b32.xlu2 %v6729_v29, %s8105_s8  ;;  %6141 = vrot.lane.b32.xlu1 %v6060_v32, %s8103_s6  ;;  %7324 = vst.msk [vmem:[%s10856_s17] sm:$0xff] %vm7323_vm0, %v7291_v22  ;;  %v7945_v29 = vunpack.c.h.bf16 %v7999_v17 }
 0x790   : > { %6213 = vst.msk [vmem:[#allocation4 + $0x28] sm:$0xf] %vm2868_vm3, %v6128_v34  ;;  %v7114_v37 = vpop.f32.mrf.mxu1 }
 0x791   : > { %v6132_v6 = vpop.permute.xlu2 %6131  ;;  %6549 = vst.msk [vmem:[#allocation4 + $0x28] sm:$0xf] %vm3289_vm6, %v10803_v43  ;;  %v7115_v40 = vadd.f32 %v10841_v19, %v7114_v37  ;;  %v6130_v18 = vpop.permute.xlu1 %6129  ;;  %v7922_v21 = vld [vmem:[#allocation4 + $0x60] sm:$0xff]  ;;  %v6726_v43 = vsel %vm8662_vm12, %v7774_v44, %v6725_v11 }
 0x792   : > { %6215 = vst.msk [vmem:[#allocation4 + $0x30] sm:$0xf] %vm2868_vm3, %v6132_v6  ;;  %7171 = vmatmul.bf16.gmra.mxu3 %v7922_v21  ;;  %v8007_v21 = vld [vmem:[%s8318_s26 + $0x50] sm:$0xff]  }
 0x793   : > { %v7260_v45 = vadd.f32 %v7937_v35, %v7115_v40  ;;  %6214 = vst.msk [vmem:[#allocation4 + $0x2c] sm:$0xf] %vm2868_vm3, %v6130_v18  ;;  %v7976_v44 = vunpack.c.l.bf16 %v8007_v21 }
 0x795   : > { %6477 = vrot.lane.b32.xlu0 %v6393_v46, %s8104_s7  ;;  %v7292_v48 = vmax.f32 %v7260_v45, 0.0 }
 0x797   : > { %v6466_v49 = vpop.permute.xlu0 %6465  ;;  %6811 = vrot.lane.b32.xlu1 %v6726_v43, %s8105_s8  ;;  %7325 = vst.msk [vmem:[%s10856_s17 + $0x8] sm:$0xff] %vm7323_vm0, %v7292_v48 }
 0x798   : > { %6550 = vst.msk [vmem:[#allocation4 + $0x2c] sm:$0xf] %vm3289_vm6, %v6466_v49  ;;  %v7117_v27 = vpop.f32.mrf.mxu1 }
 0x799   : > { %v6470_v42 = vpop.permute.xlu2 %6469  ;;  %6886 = vst.msk [vmem:[#allocation4 + $0x2c] sm:$0xf] %vm3710_vm7, %v10816_v51  ;;  %v7118_v3 = vadd.f32 %v10841_v19, %v7117_v27  ;;  %v6800_v33 = vpop.permute.xlu1 %6799 }
 0x79a   : > { %6885 = vst.msk [vmem:[#allocation4 + $0x28] sm:$0xf] %vm3710_vm7, %v6800_v33 }
 0x79b   : > { %v7261_v4 = vadd.f32 %v7940_v14, %v7118_v3  ;;  %v8000_v14 = vld [vmem:[%s8318_s26 + $0x18] sm:$0xff]  }
 0x79d   : > { %v7293_v50 = vmax.f32 %v7261_v4, 0.0  ;;  %v7948_v4 = vunpack.c.l.bf16 %v8000_v14 }
 0x79f   : > { %v5967_v52 = vpop.permute.xlu0 %5966  ;;  %7326 = vst.msk [vmem:[%s10856_s17 + $0x10] sm:$0xff] %vm7323_vm0, %v7293_v50 }
 0x7a0   : > { %6036 = vst.msk [vmem:[#allocation4 + $0x68] sm:$0xf] %vm2627_vm2, %v5967_v52  ;;  %v7119_v55 = vpop.f32.mrf.mxu1 }
 0x7a1   : > { %v5971_v54 = vpop.permute.xlu2 %5970  ;;  %6229 = vst.msk [vmem:[#allocation4 + $0x68] sm:$0xf] %vm2868_vm3, %v10827_v8  ;;  %v7120_v51 = vadd.f32 %v10841_v19, %v7119_v55  ;;  %v5969_v56 = vpop.permute.xlu1 %5968  ;;  %v7915_v57 = vld [vmem:[#allocation4 + $0x28] sm:$0xff] }
 0x7a2   : > { %6038 = vst.msk [vmem:[#allocation4 + $0x70] sm:$0xf] %vm2627_vm2, %v5971_v54  ;;  %7136 = vmatmul.bf16.gmra.mxu1 %v7915_v57 }
 0x7a3   : > { %v7262_v59 = vadd.f32 %v7941_v0, %v7120_v51  ;;  %6037 = vst.msk [vmem:[#allocation4 + $0x6c] sm:$0xf] %vm2627_vm2, %v5969_v56 }
 0x7a5   : > { %v7294_v61 = vmax.f32 %v7262_v59, 0.0  ;;  %v7949_v59 = vunpack.c.h.bf16 %v8000_v14 }
 0x7a7   : > { %v6162_v63 = vpop.permute.xlu0 %6161  ;;  %7327 = vst.msk [vmem:[%s10856_s17 + $0x18] sm:$0xff] %vm7323_vm0, %v7294_v61 }
 0x7a8   : > { %6230 = vst.msk [vmem:[#allocation4 + $0x6c] sm:$0xf] %vm2868_vm3, %v6162_v63 }
 0x7a9   : > { %v6166_v1 = vpop.permute.xlu2 %6165  ;;  %6566 = vst.msk [vmem:[#allocation4 + $0x6c] sm:$0xf] %vm3289_vm6, %v10848_v23  ;;  %v6496_v60 = vpop.permute.xlu1 %6495 }
 0x7aa   : > { %6565 = vst.msk [vmem:[#allocation4 + $0x68] sm:$0xf] %vm3289_vm6, %v6496_v60 }
 0x7ae   : > { %v7157_v9 = vpop.f32.mrf.mxu3 }
 0x7af   : > { %v6832_v8 = vpop.permute.xlu0 %6831  ;;  %v7158_v62 = vadd.f32 %v10841_v19, %v7157_v9 }
 0x7b0   : > { %6901 = vst.msk [vmem:[#allocation4 + $0x68] sm:$0xf] %vm3710_vm7, %v6832_v8 }
 0x7b1   : > { %v6836_v10 = vpop.permute.xlu2 %6835  ;;  %v7277_v41 = vadd.f32 %v7972_v7, %v7158_v62  ;;  %v6834_v53 = vpop.permute.xlu1 %6833 }
 0x7b2   : > { %6902 = vst.msk [vmem:[#allocation4 + $0x6c] sm:$0xf] %vm3710_vm7, %v6834_v53  ;;  %v8008_v53 = vld [vmem:[%s8318_s26 + $0x58] sm:$0xff]  }
 0x7b3   : > { %v7309_v12 = vmax.f32 %v7277_v41, 0.0  ;;  %v7980_v17 = vunpack.c.l.bf16 %v8008_v53 }
 0x7b5   : > { %7342 = vst.msk [vmem:[%s10856_s17 + $0x90] sm:$0xff] %vm7323_vm0, %v7309_v12 }
 0x7b6   : > { %v7159_v16 = vpop.f32.mrf.mxu3 }
 0x7b7   : > { %v6134_v11 = vpop.permute.xlu0 %6133  ;;  %v7160_v20 = vadd.f32 %v10841_v19, %v7159_v16 }
 0x7b8   : > { %6216 = vst.msk [vmem:[#allocation4 + $0x34] sm:$0xf] %vm2868_vm3, %v6134_v11  ;;  %v7122_v24 = vpop.f32.mrf.mxu1 }
 0x7b9   : > { %6552 = vst.msk [vmem:[#allocation4 + $0x34] sm:$0xf] %vm3289_vm6, %v6470_v42  ;;  %v6138_v23 = vpop.permute.xlu2 %6137  ;;  %v7278_v58 = vadd.f32 %v7973_v2, %v7160_v20  ;;  %v7123_v25 = vadd.f32 %v10841_v19, %v7122_v24  ;;  %v6468_v26 = vpop.permute.xlu1 %6467  ;;  %v7923_v28 = vld [vmem:[#allocation4 + $0x68] sm:$0xff]  ;;  %v7977_v42 = vunpack.c.h.bf16 %v8007_v21 }
 0x7ba   : > { %6218 = vst.msk [vmem:[#allocation4 + $0x3c] sm:$0xf] %vm2868_vm3, %v6138_v23  ;;  %7176 = vmatmul.bf16.gmra.mxu3 %v7923_v28 }
 0x7bb   : > { %6551 = vst.msk [vmem:[#allocation4 + $0x30] sm:$0xf] %vm3289_vm6, %v6468_v26  ;;  %v7310_v30 = vmax.f32 %v7278_v58, 0.0  ;;  %v7263_v31 = vadd.f32 %v7944_v15, %v7123_v25  ;;  %v8001_v58 = vld [vmem:[%s8318_s26 + $0x20] sm:$0xff]   ;;  %v7981_v25 = vunpack.c.h.bf16 %v8008_v53 }
 0x7bd   : > { %7343 = vst.msk [vmem:[%s10856_s17 + $0x98] sm:$0xff] %vm7323_vm0, %v7310_v30  ;;  %v7295_v13 = vmax.f32 %v7263_v31, 0.0  ;;  %v7952_v30 = vunpack.c.l.bf16 %v8001_v58 }
 0x7bf   : > { %v6804_v22 = vpop.permute.xlu0 %6803  ;;  %7328 = vst.msk [vmem:[%s10856_s17 + $0x20] sm:$0xff] %vm7323_vm0, %v7295_v13 }
 0x7c0   : > { %6887 = vst.msk [vmem:[#allocation4 + $0x30] sm:$0xf] %vm3710_vm7, %v6804_v22  ;;  %v7124_v34 = vpop.f32.mrf.mxu1 }
 0x7c1   : > { %v6808_v32 = vpop.permute.xlu2 %6807  ;;  %v7125_v36 = vadd.f32 %v10841_v19, %v7124_v34  ;;  %v6806_v35 = vpop.permute.xlu1 %6805 }
 0x7c2   : > { %6888 = vst.msk [vmem:[#allocation4 + $0x34] sm:$0xf] %vm3710_vm7, %v6806_v35 }
 0x7c3   : > { %v7264_v38 = vadd.f32 %v7945_v29, %v7125_v36 }
 0x7c5   : > { %v7296_v39 = vmax.f32 %v7264_v38, 0.0 }
 0x7c7   : > { %v5973_v6 = vpop.permute.xlu0 %5972  ;;  %7329 = vst.msk [vmem:[%s10856_s17 + $0x28] sm:$0xff] %vm7323_vm0, %v7296_v39 }
 0x7c8   : > { %6039 = vst.msk [vmem:[#allocation4 + $0x74] sm:$0xf] %vm2627_vm2, %v5973_v6  ;;  %v7953_v6 = vunpack.c.h.bf16 %v8001_v58 }
 0x7c9   : > { %v5977_v37 = vpop.permute.xlu2 %5976  ;;  %6232 = vst.msk [vmem:[#allocation4 + $0x74] sm:$0xf] %vm2868_vm3, %v6166_v1  ;;  %v6164_v40 = vpop.permute.xlu1 %6163  ;;  %v7916_v18 = vld [vmem:[#allocation4 + $0x30] sm:$0xff] }
 0x7ca   : > { %6041 = vst.msk [vmem:[#allocation4 + $0x7c] sm:$0xf] %vm2627_vm2, %v5977_v37  ;;  %7141 = vmatmul.bf16.gmra.mxu1 %v7916_v18 }
 0x7cb   : > { %6231 = vst.msk [vmem:[#allocation4 + $0x70] sm:$0xf] %vm2868_vm3, %v6164_v40 }
 0x7cd   : > { %v7162_v45 = vpop.f32.mrf.mxu3 }
 0x7ce   : > { %v7163_v47 = vadd.f32 %v10841_v19, %v7162_v45 }
 0x7cf   : > { %v6500_v46 = vpop.permute.xlu0 %6499 }
 0x7d0   : > { %6567 = vst.msk [vmem:[#allocation4 + $0x70] sm:$0xf] %vm3289_vm6, %v6500_v46  ;;  %v7279_v48 = vadd.f32 %v7976_v44, %v7163_v47 }
 0x7d1   : > { %6903 = vst.msk [vmem:[#allocation4 + $0x70] sm:$0xf] %vm3710_vm7, %v6836_v10  ;;  %v6502_v43 = vpop.permute.xlu1 %6501  ;;  %v6504_v9 = vpop.permute.xlu2 %6503 }
 0x7d2   : > { %v7311_v49 = vmax.f32 %v7279_v48, 0.0  ;;  %6568 = vst.msk [vmem:[#allocation4 + $0x74] sm:$0xf] %vm3289_vm6, %v6502_v43  ;;  %v8009_v48 = vld [vmem:[%s8318_s26 + $0x60] sm:$0xff]  }
 0x7d3   : > { %v7984_v43 = vunpack.c.l.bf16 %v8009_v48 }
 0x7d4   : > { %7344 = vst.msk [vmem:[%s10856_s17 + $0xa0] sm:$0xff] %vm7323_vm0, %v7311_v49 }
 0x7d5   : > { %v7164_v27 = vpop.f32.mrf.mxu3 }
 0x7d6   : > { %v7165_v33 = vadd.f32 %v10841_v19, %v7164_v27 }
 0x7d7   : > { %v6838_v3 = vpop.permute.xlu0 %6837  ;;  %v7127_v50 = vpop.f32.mrf.mxu1 }
 0x7d8   : > { %6904 = vst.msk [vmem:[#allocation4 + $0x74] sm:$0xf] %vm3710_vm7, %v6838_v3  ;;  %v7280_v52 = vadd.f32 %v7977_v42, %v7165_v33  ;;  %v7128_v0 = vadd.f32 %v10841_v19, %v7127_v50  ;;  %v8002_v3 = vld [vmem:[%s8318_s26 + $0x28] sm:$0xff]   ;;  %v7985_v33 = vunpack.c.h.bf16 %v8009_v48 }
 0x7d9   : > { %v6136_v54 = vpop.permute.xlu1 %6135  ;;  %v6842_v2 = vpop.permute.xlu2 %6841 }
 0x7da   : > { %v7312_v55 = vmax.f32 %v7280_v52, 0.0  ;;  %v7265_v51 = vadd.f32 %v7948_v4, %v7128_v0  ;;  %6217 = vst.msk [vmem:[#allocation4 + $0x38] sm:$0xf] %vm2868_vm3, %v6136_v54  ;;  %v7956_v52 = vunpack.c.l.bf16 %v8002_v3 }
 0x7dc   : > { %7345 = vst.msk [vmem:[%s10856_s17 + $0xa8] sm:$0xff] %vm7323_vm0, %v7312_v55  ;;  %v7297_v56 = vmax.f32 %v7265_v51, 0.0 }
 0x7de   : > { %7330 = vst.msk [vmem:[%s10856_s17 + $0x30] sm:$0xff] %vm7323_vm0, %v7297_v56 }
 0x7df   : > { %v6472_v57 = vpop.permute.xlu0 %6471  ;;  %v7924_v61 = vld [vmem:[#allocation4 + $0x70] sm:$0xff]  ;;  %v7129_v63 = vpop.f32.mrf.mxu1 }
 0x7e0   : > { %6553 = vst.msk [vmem:[#allocation4 + $0x38] sm:$0xf] %vm3289_vm6, %v6472_v57  ;;  %v7130_v1 = vadd.f32 %v10841_v19, %v7129_v63  ;;  %7181 = vmatmul.bf16.gmra.mxu3 %v7924_v61 }
 0x7e1   : > { %6889 = vst.msk [vmem:[#allocation4 + $0x38] sm:$0xf] %vm3710_vm7, %v6808_v32  ;;  %v6474_v60 = vpop.permute.xlu1 %6473  ;;  %v6476_v31 = vpop.permute.xlu2 %6475 }
 0x7e2   : > { %v7266_v5 = vadd.f32 %v7949_v59, %v7130_v1  ;;  %6554 = vst.msk [vmem:[#allocation4 + $0x3c] sm:$0xf] %vm3289_vm6, %v6474_v60  ;;  %v7957_v59 = vunpack.c.h.bf16 %v8002_v3 }
 0x7e4   : > { %v7298_v7 = vmax.f32 %v7266_v5, 0.0  ;;  %v8010_v5 = vld [vmem:[%s8318_s26 + $0x68] sm:$0xff]  }
 0x7e5   : > { %v7989_v53 = vunpack.c.h.bf16 %v8010_v5 }
 0x7e6   : > { %7331 = vst.msk [vmem:[%s10856_s17 + $0x38] sm:$0xff] %vm7323_vm0, %v7298_v7  ;;  %v7988_v7 = vunpack.c.l.bf16 %v8010_v5 }
 0x7e7   : > { %v6810_v8 = vpop.permute.xlu0 %6809 }
 0x7e8   : > { %6890 = vst.msk [vmem:[#allocation4 + $0x3c] sm:$0xf] %vm3710_vm7, %v6810_v8 }
 0x7e9   : > { %v5975_v62 = vpop.permute.xlu1 %5974  ;;  %v6814_v21 = vpop.permute.xlu2 %6813 }
 0x7ea   : > { %6040 = vst.msk [vmem:[#allocation4 + $0x78] sm:$0xf] %vm2627_vm2, %v5975_v62 }
 0x7ef   : > { %v6168_v10 = vpop.permute.xlu0 %6167  ;;  %v7917_v41 = vld [vmem:[#allocation4 + $0x38] sm:$0xff] }
 0x7f0   : > { %6233 = vst.msk [vmem:[#allocation4 + $0x78] sm:$0xf] %vm2868_vm3, %v6168_v10  ;;  %7146 = vmatmul.bf16.gmra.mxu1 %v7917_v41  ;;  %v8003_v41 = vld [vmem:[%s8318_s26 + $0x30] sm:$0xff]  }
 0x7f1   : > { %6569 = vst.msk [vmem:[#allocation4 + $0x78] sm:$0xf] %vm3289_vm6, %v6504_v9  ;;  %v6170_v12 = vpop.permute.xlu1 %6169  ;;  %v7961_v58 = vunpack.c.h.bf16 %v8003_v41 }
 0x7f2   : > { %6234 = vst.msk [vmem:[#allocation4 + $0x7c] sm:$0xf] %vm2868_vm3, %v6170_v12 }
 0x7f3   : > { %v7167_v11 = vpop.f32.mrf.mxu3 }
 0x7f4   : > { %v7168_v16 = vadd.f32 %v10841_v19, %v7167_v11 }
 0x7f6   : > { %v7281_v20 = vadd.f32 %v7980_v17, %v7168_v16 }
 0x7f7   : > { %v6506_v15 = vpop.permute.xlu0 %6505 }
 0x7f8   : > { %6570 = vst.msk [vmem:[#allocation4 + $0x7c] sm:$0xf] %vm3289_vm6, %v6506_v15  ;;  %v7313_v23 = vmax.f32 %v7281_v20, 0.0 }
 0x7f9   : > { %6906 = vst.msk [vmem:[#allocation4 + $0x7c] sm:$0xf] %vm3710_vm7, %v6842_v2  ;;  %v6840_v24 = vpop.permute.xlu1 %6839  ;;  %v7960_v2 = vunpack.c.l.bf16 %v8003_v41 }
 0x7fa   : > { %7346 = vst.msk [vmem:[%s10856_s17 + $0xb0] sm:$0xff] %vm7323_vm0, %v7313_v23 }
 0x7fb   : > { %6905 = vst.msk [vmem:[#allocation4 + $0x78] sm:$0xf] %vm3710_vm7, %v6840_v24  ;;  %v7169_v26 = vpop.f32.mrf.mxu3 }
 0x7fc   : > { %v7170_v28 = vadd.f32 %v10841_v19, %v7169_v26 }
 0x7fd   : > { %v7132_v13 = vpop.f32.mrf.mxu1 }
 0x7fe   : > { %v7282_v22 = vadd.f32 %v7981_v25, %v7170_v28  ;;  %v7133_v32 = vadd.f32 %v10841_v19, %v7132_v13 }
 0x7ff   : > { %v6140_v29 = vpop.permute.xlu0 %6139 }
 0x800   : > { %6219 = vst.msk [vmem:[#allocation4 + $0x40] sm:$0xf] %vm2868_vm3, %v6140_v29  ;;  %v7314_v34 = vmax.f32 %v7282_v22, 0.0  ;;  %v7267_v36 = vadd.f32 %v7952_v30, %v7133_v32 }
 0x801   : > { %6555 = vst.msk [vmem:[#allocation4 + $0x40] sm:$0xf] %vm3289_vm6, %v6476_v31  ;;  %v6142_v35 = vpop.permute.xlu1 %6141  ;;  %v8011_v31 = vld [vmem:[%s8318_s26 + $0x70] sm:$0xff]  }
 0x802   : > { %7347 = vst.msk [vmem:[%s10856_s17 + $0xb8] sm:$0xff] %vm7323_vm0, %v7314_v34  ;;  %v7299_v38 = vmax.f32 %v7267_v36, 0.0  ;;  %v7925_v39 = vld [vmem:[#allocation4 + $0x78] sm:$0xff]  ;;  %v7992_v13 = vunpack.c.l.bf16 %v8011_v31  ;;  %v8004_v36 = vld [vmem:[%s8318_s26 + $0x38] sm:$0xff]  }
 0x803   : > { %6220 = vst.msk [vmem:[#allocation4 + $0x44] sm:$0xf] %vm2868_vm3, %v6142_v35  ;;  %7186 = vmatmul.bf16.gmra.mxu3 %v7925_v39  ;;  %v7993_v35 = vunpack.c.h.bf16 %v8011_v31 }
 0x804   : > { %7332 = vst.msk [vmem:[%s10856_s17 + $0x40] sm:$0xff] %vm7323_vm0, %v7299_v38 }
 0x805   : > { %v7134_v37 = vpop.f32.mrf.mxu1 }
 0x806   : > { %v7135_v18 = vadd.f32 %v10841_v19, %v7134_v37 }
 0x807   : > { %v6478_v40 = vpop.permute.xlu0 %6477 }
 0x808   : > { %6556 = vst.msk [vmem:[#allocation4 + $0x44] sm:$0xf] %vm3289_vm6, %v6478_v40  ;;  %v7268_v44 = vadd.f32 %v7953_v6, %v7135_v18  ;;  %v7964_v6 = vunpack.c.l.bf16 %v8004_v36 }
 0x809   : > { %6892 = vst.msk [vmem:[#allocation4 + $0x44] sm:$0xf] %vm3710_vm7, %v6814_v21  ;;  %v6812_v45 = vpop.permute.xlu1 %6811 }
 0x80a   : > { %v7300_v46 = vmax.f32 %v7268_v44, 0.0  ;;  %6891 = vst.msk [vmem:[#allocation4 + $0x40] sm:$0xf] %vm3710_vm7, %v6812_v45 }
 0x80c   : > { %7333 = vst.msk [vmem:[%s10856_s17 + $0x48] sm:$0xff] %vm7323_vm0, %v7300_v46  ;;  %v7965_v46 = vunpack.c.h.bf16 %v8004_v36 }
 0x811   : > { %v7918_v47 = vld [vmem:[#allocation4 + $0x40] sm:$0xff] }
 0x812   : > { %7151 = vmatmul.bf16.gmra.mxu1 %v7918_v47 }
 0x815   : > { %v7172_v49 = vpop.f32.mrf.mxu3 }
 0x816   : > { %v7173_v14 = vadd.f32 %v10841_v19, %v7172_v49 }
 0x818   : > { %v7283_v42 = vadd.f32 %v7984_v43, %v7173_v14  ;;  %v8012_v14 = vld [vmem:[%s8318_s26 + $0x78] sm:$0xff]  }
 0x81a   : > { %v7315_v27 = vmax.f32 %v7283_v42, 0.0  ;;  %v7996_v42 = vunpack.c.l.bf16 %v8012_v14 }
 0x81c   : > { %7348 = vst.msk [vmem:[%s10856_s17 + $0xc0] sm:$0xff] %vm7323_vm0, %v7315_v27 }
 0x81d   : > { %v7174_v4 = vpop.f32.mrf.mxu3 }
 0x81e   : > { %v7175_v50 = vadd.f32 %v10841_v19, %v7174_v4 }
 0x81f   : > { %v7137_v0 = vpop.f32.mrf.mxu1 }
 0x820   : > { %v7284_v54 = vadd.f32 %v7985_v33, %v7175_v50  ;;  %v7138_v55 = vadd.f32 %v10841_v19, %v7137_v0  ;;  %v8005_v50 = vld [vmem:[%s8318_s26 + $0x40] sm:$0xff]  }
 0x822   : > { %v7316_v51 = vmax.f32 %v7284_v54, 0.0  ;;  %v7269_v56 = vadd.f32 %v7956_v52, %v7138_v55  ;;  %v7997_v52 = vunpack.c.h.bf16 %v8012_v14  ;;  %v7968_v54 = vunpack.c.l.bf16 %v8005_v50 }
 0x824   : > { %7349 = vst.msk [vmem:[%s10856_s17 + $0xc8] sm:$0xff] %vm7323_vm0, %v7316_v51  ;;  %v7301_v57 = vmax.f32 %v7269_v56, 0.0 }
 0x826   : > { %7334 = vst.msk [vmem:[%s10856_s17 + $0x50] sm:$0xff] %vm7323_vm0, %v7301_v57 }
 0x827   : > { %v7139_v61 = vpop.f32.mrf.mxu1 }
 0x828   : > { %v7140_v63 = vadd.f32 %v10841_v19, %v7139_v61 }
 0x82a   : > { %v7270_v1 = vadd.f32 %v7957_v59, %v7140_v63 }
 0x82c   : > { %v7302_v60 = vmax.f32 %v7270_v1, 0.0  ;;  %v7969_v1 = vunpack.c.h.bf16 %v8005_v50 }
 0x82e   : > { %7335 = vst.msk [vmem:[%s10856_s17 + $0x58] sm:$0xff] %vm7323_vm0, %v7302_v60 }
 0x83d   : > { %v7177_v8 = vpop.f32.mrf.mxu3 }
 0x83e   : > { %v7178_v9 = vadd.f32 %v10841_v19, %v7177_v8 }
 0x840   : > { %v7285_v62 = vadd.f32 %v7988_v7, %v7178_v9 }
 0x842   : > { %v7317_v10 = vmax.f32 %v7285_v62, 0.0 }
 0x844   : > { %7350 = vst.msk [vmem:[%s10856_s17 + $0xd0] sm:$0xff] %vm7323_vm0, %v7317_v10 }
 0x845   : > { %v7179_v12 = vpop.f32.mrf.mxu3 }
 0x846   : > { %v7180_v17 = vadd.f32 %v10841_v19, %v7179_v12 }
 0x847   : > { %v7142_v11 = vpop.f32.mrf.mxu1 }
 0x848   : > { %v7286_v16 = vadd.f32 %v7989_v53, %v7180_v17  ;;  %v7143_v20 = vadd.f32 %v10841_v19, %v7142_v11 }
 0x84a   : > { %v7318_v15 = vmax.f32 %v7286_v16, 0.0  ;;  %v7271_v23 = vadd.f32 %v7960_v2, %v7143_v20 }
 0x84c   : > { %7351 = vst.msk [vmem:[%s10856_s17 + $0xd8] sm:$0xff] %vm7323_vm0, %v7318_v15  ;;  %v7303_v24 = vmax.f32 %v7271_v23, 0.0 }
 0x84e   : > { %7336 = vst.msk [vmem:[%s10856_s17 + $0x60] sm:$0xff] %vm7323_vm0, %v7303_v24 }
 0x84f   : > { %v7144_v25 = vpop.f32.mrf.mxu1 }
 0x850   : > { %v7145_v26 = vadd.f32 %v10841_v19, %v7144_v25 }
 0x852   : > { %v7272_v28 = vadd.f32 %v7961_v58, %v7145_v26 }
 0x854   : > { %v7304_v30 = vmax.f32 %v7272_v28, 0.0 }
 0x856   : > { %7337 = vst.msk [vmem:[%s10856_s17 + $0x68] sm:$0xff] %vm7323_vm0, %v7304_v30 }
 0x863   : > { %v7182_v22 = vpop.f32.mrf.mxu3 }
 0x864   : > { %v7183_v29 = vadd.f32 %v10841_v19, %v7182_v22 }
 0x866   : > { %v7287_v32 = vadd.f32 %v7992_v13, %v7183_v29 }
 0x868   : > { %v7319_v34 = vmax.f32 %v7287_v32, 0.0 }
 0x86a   : > { %7352 = vst.msk [vmem:[%s10856_s17 + $0xe0] sm:$0xff] %vm7323_vm0, %v7319_v34 }
 0x86b   : > { %v7184_v38 = vpop.f32.mrf.mxu3 }
 0x86c   : > { %v7185_v39 = vadd.f32 %v10841_v19, %v7184_v38 }
 0x86d   : > { %v7147_v37 = vpop.f32.mrf.mxu1 }
 0x86e   : > { %v7288_v40 = vadd.f32 %v7993_v35, %v7185_v39  ;;  %v7148_v18 = vadd.f32 %v10841_v19, %v7147_v37 }
 0x870   : > { %v7320_v21 = vmax.f32 %v7288_v40, 0.0  ;;  %v7273_v44 = vadd.f32 %v7964_v6, %v7148_v18 }
 0x872   : > { %7353 = vst.msk [vmem:[%s10856_s17 + $0xe8] sm:$0xff] %vm7323_vm0, %v7320_v21  ;;  %v7305_v45 = vmax.f32 %v7273_v44, 0.0 }
 0x874   : > { %7338 = vst.msk [vmem:[%s10856_s17 + $0x70] sm:$0xff] %vm7323_vm0, %v7305_v45 }
 0x875   : > { %v7149_v47 = vpop.f32.mrf.mxu1 }
 0x876   : > { %v7150_v48 = vadd.f32 %v10841_v19, %v7149_v47 }
 0x878   : > { %v7274_v43 = vadd.f32 %v7965_v46, %v7150_v48 }
 0x87a   : > { %v7306_v49 = vmax.f32 %v7274_v43, 0.0 }
 0x87c   : > { %7339 = vst.msk [vmem:[%s10856_s17 + $0x78] sm:$0xff] %vm7323_vm0, %v7306_v49 }
 0x886   : > { %v7187_v27 = vpop.f32.mrf.mxu3 }
 0x887   : > { %v7188_v3 = vadd.f32 %v10841_v19, %v7187_v27 }
 0x889   : > { %v7289_v33 = vadd.f32 %v7996_v42, %v7188_v3 }
 0x88b   : > { %v7321_v4 = vmax.f32 %v7289_v33, 0.0 }
 0x88d   : > { %7354 = vst.msk [vmem:[%s10856_s17 + $0xf0] sm:$0xff] %vm7323_vm0, %v7321_v4 }
 0x88e   : > { %v7189_v0 = vpop.f32.mrf.mxu3 }
 0x88f   : > { %v7190_v55 = vadd.f32 %v10841_v19, %v7189_v0  ;;  %v7152_v51 = vpop.f32.mrf.mxu1 }
 0x890   : > { %v7153_v56 = vadd.f32 %v10841_v19, %v7152_v51 }
 0x891   : > { %v7290_v57 = vadd.f32 %v7997_v52, %v7190_v55 }
 0x892   : > { %v7275_v59 = vadd.f32 %v7968_v54, %v7153_v56 }
 0x893   : > { %v7322_v61 = vmax.f32 %v7290_v57, 0.0 }
 0x894   : > { %v7307_v63 = vmax.f32 %v7275_v59, 0.0 }
 0x895   : > { %7355 = vst.msk [vmem:[%s10856_s17 + $0xf8] sm:$0xff] %vm7323_vm0, %v7322_v61 }
 0x896   : > { %7340 = vst.msk [vmem:[%s10856_s17 + $0x80] sm:$0xff] %vm7323_vm0, %v7307_v63 }
 0x897   : > { %v7154_v60 = vpop.f32.mrf.mxu1 }
 0x898   : > { %v7155_v5 = vadd.f32 %v10841_v19, %v7154_v60 }
 0x89a   : > { %v7276_v7 = vadd.f32 %v7969_v1, %v7155_v5 }
 0x89c   : > { %v7308_v8 = vmax.f32 %v7276_v7, 0.0 }
 0x89e   : > { %7341 = vst.msk [vmem:[%s10856_s17 + $0x88] sm:$0xff] %vm7323_vm0, %v7308_v8 }
 0x89f PF: > { %s15_s20 = sadd.s32 1, %s8095_s20   ;;  %s11052_s18 = smov %s8091_s19 }
 0x8a0   : > { %p12_p5 = scmp.ge.s32.totalorder %s15_s20, 4   ;;  %s11053_s19 = smov %s11055_s21 }
 0x8a2   :  { %14 = sbr.rel (!%p12_p5) target bundleno = 2 (0x2), region = 81 }

</bundles_post_ra>
